<compile_context>
chip_gen: v7x
topology: tpu7x:2x2x1
jax: 0.10.0
libtpu: 0.0.40
codegen_flags: <defaults>
</compile_context>

<pallas_src>
import functools

import jax
import jax.numpy as jnp
from jax.experimental import pallas as pl
from jax.experimental.pallas import tpu as pltpu

# pltpu.CompilerParams on current JAX; TPUCompilerParams on some older releases.
_CompilerParams = getattr(pltpu, "CompilerParams", None) or getattr(pltpu, "TPUCompilerParams")


def _cparams(dimension_semantics):
    return _CompilerParams(dimension_semantics=dimension_semantics)


# ---------------------------------------------------------------------------
# Small in-kernel helpers
# ---------------------------------------------------------------------------

def _matmul_bf16(x, w):
    """MXU matmul: bf16 operands, f32 accumulation."""
    return jnp.dot(x.astype(jnp.bfloat16), w.astype(jnp.bfloat16),
                   preferred_element_type=jnp.float32)


def _small_k_matmul(x, w):
    """VPU broadcast-sum matmul for tiny contraction dims (K <= 8)."""
    xf = x.astype(jnp.float32)
    wf = w.astype(jnp.float32)
    acc = jnp.zeros((xf.shape[0], wf.shape[1]), jnp.float32)
    for kk in range(xf.shape[1]):
        acc = acc + xf[:, kk:kk + 1] * wf[kk:kk + 1, :]
    return acc


def _pick_tile(n, target=512):
    """Largest point-axis tile <= target that divides N (multiple of 16 for bf16 tiles)."""
    if n <= target:
        return n
    for t in range(target, 15, -1):
        if n % t == 0 and t % 16 == 0:
            return t
    return n


# ---------------------------------------------------------------------------
# Pallas kernels
# ---------------------------------------------------------------------------

def _mlp3_maxpool_kernel(x_ref, w1_ref, s1_ref, w2_ref, s2_ref, w3_ref, s3_ref,
                         o_ref, acc_ref):
    """Fused 3-layer shared MLP (Conv1d k=1 + folded BN + ReLU) + global max over points."""
    n = pl.program_id(1)

    @pl.when(n == 0)
    def _():
        acc_ref[...] = jnp.full(acc_ref.shape, -jnp.inf, acc_ref.dtype)

    x = x_ref[...]                                           # (TN, Cin)
    if x.shape[1] <= 8:                                      # K=6 -> VPU path
        h = _small_k_matmul(x, w1_ref[...])
    else:                                                    # K=64 -> MXU path
        h = _matmul_bf16(x, w1_ref[...])
    h = jnp.maximum(h + s1_ref[...], 0.0)

    h = jnp.maximum(_matmul_bf16(h, w2_ref[...]) + s2_ref[...], 0.0)
    h = jnp.maximum(_matmul_bf16(h, w3_ref[...]) + s3_ref[...], 0.0)

    acc_ref[...] = jnp.maximum(acc_ref[...], jnp.max(h, axis=0, keepdims=True))

    @pl.when(n == pl.num_programs(1) - 1)
    def _():
        o_ref[...] = acc_ref[...]


def _transform_conv1_kernel(x_ref, t_ref, w1_ref, s1_ref, o_ref, *, d):
    """Fused 3x3 spatial transform (VPU), feature concat, and conv1 (D->64) + BN + ReLU."""
    x = x_ref[...].astype(jnp.float32)                       # (TN, D)
    trans = t_ref[...].astype(jnp.float32)                   # (3, 3)
    w1 = w1_ref[...].astype(jnp.float32)                     # (D, 64)

    # coords @ trans  (K=3 -> VPU broadcast-sum)
    ct = jnp.zeros((x.shape[0], 3), jnp.float32)
    for kk in range(3):
        ct = ct + x[:, kk:kk + 1] * trans[kk:kk + 1, :]

    # conv1: equivalent to concat([coords@trans, feats], -1) @ w1, without the concat.
    h = jnp.zeros((x.shape[0], w1.shape[1]), jnp.float32)
    for kk in range(3):
        h = h + ct[:, kk:kk + 1] * w1[kk:kk + 1, :]
    for kk in range(3, d):
        h = h + x[:, kk:kk + 1] * w1[kk:kk + 1, :]

    h = jnp.maximum(h + s1_ref[...], 0.0)
    o_ref[...] = h.astype(o_ref.dtype)


def _ft_mlp2_maxpool_kernel(h_ref, t_ref, w2_ref, s2_ref, w3_ref, s3_ref, o_ref, acc_ref):
    """Fused 64x64 feature transform (bmm) + conv2(+ReLU) + conv3 (BN only) + global max."""
    n = pl.program_id(1)

    @pl.when(n == 0)
    def _():
        acc_ref[...] = jnp.full(acc_ref.shape, -jnp.inf, acc_ref.dtype)

    h = h_ref[...]                                           # (TN, 64) bf16
    ht = _matmul_bf16(h, t_ref[...])                         # per-batch feature transform
    h2 = jnp.maximum(_matmul_bf16(ht, w2_ref[...]) + s2_ref[...], 0.0)
    h3 = _matmul_bf16(h2, w3_ref[...]) + s3_ref[...]         # conv3: BN, no ReLU (matches ref)

    acc_ref[...] = jnp.maximum(acc_ref[...], jnp.max(h3, axis=0, keepdims=True))

    @pl.when(n == pl.num_programs(1) - 1)
    def _():
        o_ref[...] = acc_ref[...]


def _fc_head_kernel(g_ref, w1_ref, s1_ref, w2_ref, s2_ref, w3_ref, s3_ref, o_ref,
                    *, log_softmax):
    """Fused FC head: (fc1+BN+ReLU) -> (fc2+BN+ReLU) -> fc3 [-> log_softmax]."""
    h = jnp.maximum(_matmul_bf16(g_ref[...], w1_ref[...]) + s1_ref[...], 0.0)
    h = jnp.maximum(_matmul_bf16(h, w2_ref[...]) + s2_ref[...], 0.0)
    h = _matmul_bf16(h, w3_ref[...]) + s3_ref[...]
    if log_softmax:
        m = jnp.max(h, axis=1, keepdims=True)
        sh = h - m
        lse = jnp.log(jnp.sum(jnp.exp(sh), axis=1, keepdims=True))
        h = sh - lse
    o_ref[...] = h


# ---------------------------------------------------------------------------
# pallas_call wrappers
# ---------------------------------------------------------------------------

def mlp3_maxpool(x, w1, s1, w2, s2, w3, s3, tn):
    B, N, Cin = x.shape
    C1, C2, C3 = w1.shape[1], w2.shape[1], w3.shape[1]
    const = lambda b, n: (0, 0)
    out = pl.pallas_call(
        _mlp3_maxpool_kernel,
        out_shape=jax.ShapeDtypeStruct((B, 1, C3), jnp.float32),
        grid=(B, N // tn),
        in_specs=[
            pl.BlockSpec((None, tn, Cin), lambda b, n: (b, n, 0)),
            pl.BlockSpec((Cin, C1), const),
            pl.BlockSpec((1, C1), const),
            pl.BlockSpec((C1, C2), const),
            pl.BlockSpec((1, C2), const),
            pl.BlockSpec((C2, C3), const),
            pl.BlockSpec((1, C3), const),
        ],
        out_specs=pl.BlockSpec((None, 1, C3), lambda b, n: (b, 0, 0)),
        scratch_shapes=[pltpu.VMEM((1, C3), jnp.float32)],
        compiler_params=_cparams(("parallel", "arbitrary")),
    )(x, w1, s1, w2, s2, w3, s3)
    return out.reshape(B, C3)


def transform_conv1(x, trans, w1, s1, tn):
    B, N, D = x.shape
    C1 = w1.shape[1]
    const = lambda b, n: (0, 0)
    return pl.pallas_call(
        functools.partial(_transform_conv1_kernel, d=D),
        out_shape=jax.ShapeDtypeStruct((B, N, C1), jnp.bfloat16),
        grid=(B, N // tn),
        in_specs=[
            pl.BlockSpec((None, tn, D), lambda b, n: (b, n, 0)),
            pl.BlockSpec((None, 3, 3), lambda b, n: (b, 0, 0)),
            pl.BlockSpec((D, C1), const),
            pl.BlockSpec((1, C1), const),
        ],
        out_specs=pl.BlockSpec((None, tn, C1), lambda b, n: (b, n, 0)),
        compiler_params=_cparams(("parallel", "parallel")),
    )(x, trans, w1, s1)


def ft_mlp2_maxpool(h, trans_feat, w2, s2, w3, s3, tn):
    B, N, C = h.shape
    C2, C3 = w2.shape[1], w3.shape[1]
    const = lambda b, n: (0, 0)
    out = pl.pallas_call(
        _ft_mlp2_maxpool_kernel,
        out_shape=jax.ShapeDtypeStruct((B, 1, C3), jnp.float32),
        grid=(B, N // tn),
        in_specs=[
            pl.BlockSpec((None, tn, C), lambda b, n: (b, n, 0)),
            pl.BlockSpec((None, C, C), lambda b, n: (b, 0, 0)),
            pl.BlockSpec((C, C2), const),
            pl.BlockSpec((1, C2), const),
            pl.BlockSpec((C2, C3), const),
            pl.BlockSpec((1, C3), const),
        ],
        out_specs=pl.BlockSpec((None, 1, C3), lambda b, n: (b, 0, 0)),
        scratch_shapes=[pltpu.VMEM((1, C3), jnp.float32)],
        compiler_params=_cparams(("parallel", "arbitrary")),
    )(h, trans_feat, w2, s2, w3, s3)
    return out.reshape(B, C3)


def fc_head(g, w1, s1, w2, s2, w3, s3, log_softmax=False):
    B, C = g.shape
    C1, C2, C3 = w1.shape[1], w2.shape[1], w3.shape[1]
    const = lambda i: (0, 0)
    return pl.pallas_call(
        functools.partial(_fc_head_kernel, log_softmax=log_softmax),
        out_shape=jax.ShapeDtypeStruct((B, C3), jnp.float32),
        grid=(1,),
        in_specs=[
            pl.BlockSpec((B, C), const),
            pl.BlockSpec((C, C1), const),
            pl.BlockSpec((1, C1), const),
            pl.BlockSpec((C1, C2), const),
            pl.BlockSpec((1, C2), const),
            pl.BlockSpec((C2, C3), const),
            pl.BlockSpec((1, C3), const),
        ],
        out_specs=pl.BlockSpec((B, C3), const),
        compiler_params=_cparams(("arbitrary",)),
    )(g, w1, s1, w2, s2, w3, s3)


# ---------------------------------------------------------------------------
# Deterministic parameter init (synthetic weights; eval-mode BN folded in)
# ---------------------------------------------------------------------------

def _init_linear_raw(key, cin, cout, w_scale=0.05):
    kw, kb = jax.random.split(key)
    w = jax.random.normal(kw, (cin, cout), jnp.float32) * w_scale
    b = jax.random.normal(kb, (cout,), jnp.float32) * 0.01
    return w, b


def _init_bn_raw(key, c):
    k1, k2, k3, k4 = jax.random.split(key, 4)
    gamma = 1.0 + 0.1 * jax.random.normal(k1, (c,), jnp.float32)
    beta = 0.1 * jax.random.normal(k2, (c,), jnp.float32)
    mean = 0.1 * jax.random.normal(k3, (c,), jnp.float32)
    var = 1.0 + 0.1 * jnp.abs(jax.random.normal(k4, (c,), jnp.float32))
    return gamma, beta, mean, var


def init_fused_layer(key, cin, cout, bn=True, extra_shift=None, eps=1e-5):
    """Linear / Conv1d(k=1) with eval-mode BatchNorm folded: returns (bf16 W_eff, f32 shift)."""
    kl, kb = jax.random.split(key)
    w, b = _init_linear_raw(kl, cin, cout)
    if bn:
        gamma, beta, mean, var = _init_bn_raw(kb, cout)
        s = gamma / jnp.sqrt(var + eps)
        w = w * s[None, :]
        shift = b * s + beta - mean * s
    else:
        shift = b
    if extra_shift is not None:
        shift = shift + extra_shift
    return w.astype(jnp.bfloat16), shift.reshape(1, cout).astype(jnp.float32)


def init_stn_params(key, cin, kout):
    ks = jax.random.split(key, 6)
    iden = jnp.eye(kout, dtype=jnp.float32).reshape(-1)   # "x + identity" is a constant shift
    p = {}
    p['c1w'], p['c1s'] = init_fused_layer(ks[0], cin, 64, bn=True)
    p['c2w'], p['c2s'] = init_fused_layer(ks[1], 64, 128, bn=True)
    p['c3w'], p['c3s'] = init_fused_layer(ks[2], 128, 1024, bn=True)
    p['f1w'], p['f1s'] = init_fused_layer(ks[3], 1024, 512, bn=True)
    p['f2w'], p['f2s'] = init_fused_layer(ks[4], 512, 256, bn=True)
    p['f3w'], p['f3s'] = init_fused_layer(ks[5], 256, kout * kout, bn=False, extra_shift=iden)
    return p


def init_encoder_params(key, channel):
    ks = jax.random.split(key, 5)
    p = {'stn': init_stn_params(ks[0], channel, 3),       # STN3d
         'fstn': init_stn_params(ks[1], 64, 64)}          # STNkd(k=64)
    p['c1w'], p['c1s'] = init_fused_layer(ks[2], channel, 64, bn=True)
    p['c2w'], p['c2s'] = init_fused_layer(ks[3], 64, 128, bn=True)
    p['c3w'], p['c3s'] = init_fused_layer(ks[4], 128, 1024, bn=True)
    return p


def init_model_params(key, k=40, channel=6):
    ks = jax.random.split(key, 4)
    p = {'feat': init_encoder_params(ks[0], channel)}
    p['f1w'], p['f1s'] = init_fused_layer(ks[1], 1024, 512, bn=True)
    p['f2w'], p['f2s'] = init_fused_layer(ks[2], 512, 256, bn=True)
    p['f3w'], p['f3s'] = init_fused_layer(ks[3], 256, k, bn=False)
    return p


# ---------------------------------------------------------------------------
# Forward pass (mirrors PointNetEncoder(global_feat=True, feature_transform=True) + head)
# ---------------------------------------------------------------------------

def model_forward(x, p):
    """PointNet classifier forward.  x: (B, D, N) in PyTorch NCW layout."""
    B, D, N = x.shape
    x_bnc = jnp.transpose(x, (0, 2, 1))                    # (B, N, D) channels-last
    tn = _pick_tile(N)
    feat = p['feat']
    stn, fstn = feat['stn'], feat['fstn']

    # --- input (spatial) transform: STN3d -------------------------------------------------
    g = mlp3_maxpool(x_bnc, stn['c1w'], stn['c1s'], stn['c2w'], stn['c2s'],
                     stn['c3w'], stn['c3s'], tn)                               # (B, 1024)
    t9 = fc_head(g, stn['f1w'], stn['f1s'], stn['f2w'], stn['f2s'],
                 stn['f3w'], stn['f3s'])                                       # (B, 9)
    trans = t9.reshape(B, 3, 3)

    # --- apply 3x3 transform to coords + concat feats + conv1 (D->64), fused --------------
    h = transform_conv1(x_bnc, trans, feat['c1w'], feat['c1s'], tn)            # (B, N, 64) bf16

    # --- feature transform: STNkd(k=64) ----------------------------------------------------
    gf = mlp3_maxpool(h, fstn['c1w'], fstn['c1s'], fstn['c2w'], fstn['c2s'],
                      fstn['c3w'], fstn['c3s'], tn)                            # (B, 1024)
    t64 = fc_head(gf, fstn['f1w'], fstn['f1s'], fstn['f2w'], fstn['f2s'],
                  fstn['f3w'], fstn['f3s'])                                    # (B, 4096)
    trans_feat = t64.reshape(B, 64, 64)

    # --- bmm(h, trans_feat) + conv2 + conv3 + global max pool, fused -----------------------
    g = ft_mlp2_maxpool(h, trans_feat, feat['c2w'], feat['c2s'],
                        feat['c3w'], feat['c3s'], tn)                          # (B, 1024)

    # --- classifier head: fc1+BN+ReLU, fc2+BN+ReLU, fc3, log_softmax (fused) ---------------
    # TODO(synk): nn.Dropout(p=0.4) between fc2 and bn2 is the identity in eval mode.
    logits = fc_head(g, p['f1w'], p['f1s'], p['f2w'], p['f2s'],
                     p['f3w'], p['f3s'], log_softmax=True)                     # (B, k)
    return logits, trans_feat


# ---------------------------------------------------------------------------

if __name__ == "__main__":
    key = jax.random.PRNGKey(0)
    kp, kx = jax.random.split(key)

    B, C, N, K = 2, 6, 16, 40        # batch=2, channel=6 (normal_channel=True), 16 points
    params = init_model_params(kp, k=K, channel=C)
    x = jax.random.normal(kx, (B, C, N), jnp.float32)

    fwd = jax.jit(model_forward)
    logits, trans_feat = fwd(x, params)
    jax.block_until_ready((logits, trans_feat))

    assert logits.shape == (B, K)
    assert trans_feat.shape == (B, 64, 64)
    assert bool(jnp.all(jnp.isfinite(logits)))
    assert bool(jnp.all(jnp.isfinite(trans_feat)))
    print("KERNEL_OK")
</pallas_src>

<mosaic_0001>
module attributes {stable_mosaic.version = 11 : i64} {
  func.func @_mlp3_maxpool_kernel(%arg0: i32, %arg1: i32, %arg2: memref<1x16x6xf32, #tpu.memory_space<vmem>>, %arg3: memref<6x64xbf16, #tpu.memory_space<vmem>>, %arg4: memref<1x64xf32, #tpu.memory_space<vmem>>, %arg5: memref<64x128xbf16, #tpu.memory_space<vmem>>, %arg6: memref<1x128xf32, #tpu.memory_space<vmem>>, %arg7: memref<128x1024xbf16, #tpu.memory_space<vmem>>, %arg8: memref<1x1024xf32, #tpu.memory_space<vmem>>, %arg9: memref<1x1x1024xf32, #tpu.memory_space<vmem>>, %arg10: memref<1x1024xf32, #tpu.memory_space<vmem>>) attributes {dimension_semantics = [#tpu.dimension_semantics<parallel>, #tpu.dimension_semantics<arbitrary>], iteration_bounds = array<i64: 2, 1>, scalar_prefetch = 0 : i64, scratch_operands = 1 : i64, tpu.core_type = #tpu.core_type<tc>, window_params = [{transform_indices = @transform_0, window_bounds = array<i64: 1, 16, 6>}, {pipeline_mode = #tpu.pipeline_mode<synchronous>, transform_indices = @transform_1, window_bounds = array<i64: 6, 64>}, {pipeline_mode = #tpu.pipeline_mode<synchronous>, transform_indices = @transform_2, window_bounds = array<i64: 1, 64>}, {pipeline_mode = #tpu.pipeline_mode<synchronous>, transform_indices = @transform_3, window_bounds = array<i64: 64, 128>}, {pipeline_mode = #tpu.pipeline_mode<synchronous>, transform_indices = @transform_4, window_bounds = array<i64: 1, 128>}, {pipeline_mode = #tpu.pipeline_mode<synchronous>, transform_indices = @transform_5, window_bounds = array<i64: 128, 1024>}, {pipeline_mode = #tpu.pipeline_mode<synchronous>, transform_indices = @transform_6, window_bounds = array<i64: 1, 1024>}, {transform_indices = @transform_7, window_bounds = array<i64: 1, 1, 1024>}]} {
    %c0_i32 = arith.constant 0 : i32
    %0 = arith.cmpi eq, %arg1, %c0_i32 : i32
    %1 = arith.extui %0 : i1 to i32
    %c0_i32_0 = arith.constant 0 : i32
    %2 = arith.cmpi ne, %1, %c0_i32_0 : i32
    scf.if %2 {
      %cst_27 = arith.constant 0xFF800000 : f32
      %73 = vector.broadcast %cst_27 : f32 to vector<1x1024xf32>
      %c0_28 = arith.constant 0 : index
      %c0_29 = arith.constant 0 : index
      %74 = vector.load %arg10[%c0_28, %c0_29] : memref<1x1024xf32, #tpu.memory_space<vmem>>, vector<1x1024xf32>
      tpu.vector_store %arg10[%c0_28, %c0_29], %73 {strides = array<i32>} : memref<1x1024xf32, #tpu.memory_space<vmem>>, vector<1x1024xf32>,
    } else {
    }
    %c0 = arith.constant 0 : index
    %c0_1 = arith.constant 0 : index
    %c0_2 = arith.constant 0 : index
    %3 = vector.load %arg2[%c0, %c0_1, %c0_2] : memref<1x16x6xf32, #tpu.memory_space<vmem>>, vector<1x16x6xf32>
    %4 = vector.shape_cast %3 : vector<1x16x6xf32> to vector<16x6xf32>
    %c0_3 = arith.constant 0 : index
    %c0_4 = arith.constant 0 : index
    %5 = vector.load %arg3[%c0_3, %c0_4] : memref<6x64xbf16, #tpu.memory_space<vmem>>, vector<6x64xbf16>
    %6 = arith.extf %5 : vector<6x64xbf16> to vector<6x64xf32>
    %cst = arith.constant 0.000000e+00 : f32
    %7 = vector.broadcast %cst : f32 to vector<16x64xf32>
    %8 = vector.extract_strided_slice %4 {offsets = [0, 0], sizes = [16, 1], strides = [1, 1]} : vector<16x6xf32> to vector<16x1xf32>
    %9 = vector.extract_strided_slice %6 {offsets = [0, 0], sizes = [1, 64], strides = [1, 1]} : vector<6x64xf32> to vector<1x64xf32>
    %10 = vector.broadcast %8 : vector<16x1xf32> to vector<16x64xf32>
    %11 = vector.broadcast %9 : vector<1x64xf32> to vector<16x64xf32>
    %12 = arith.mulf %10, %11 : vector<16x64xf32>
    %13 = arith.addf %7, %12 : vector<16x64xf32>
    %14 = vector.extract_strided_slice %4 {offsets = [0, 1], sizes = [16, 1], strides = [1, 1]} : vector<16x6xf32> to vector<16x1xf32>
    %15 = vector.extract_strided_slice %6 {offsets = [1, 0], sizes = [1, 64], strides = [1, 1]} : vector<6x64xf32> to vector<1x64xf32>
    %16 = vector.broadcast %14 : vector<16x1xf32> to vector<16x64xf32>
    %17 = vector.broadcast %15 : vector<1x64xf32> to vector<16x64xf32>
    %18 = arith.mulf %16, %17 : vector<16x64xf32>
    %19 = arith.addf %13, %18 : vector<16x64xf32>
    %20 = vector.extract_strided_slice %4 {offsets = [0, 2], sizes = [16, 1], strides = [1, 1]} : vector<16x6xf32> to vector<16x1xf32>
    %21 = vector.extract_strided_slice %6 {offsets = [2, 0], sizes = [1, 64], strides = [1, 1]} : vector<6x64xf32> to vector<1x64xf32>
    %22 = vector.broadcast %20 : vector<16x1xf32> to vector<16x64xf32>
    %23 = vector.broadcast %21 : vector<1x64xf32> to vector<16x64xf32>
    %24 = arith.mulf %22, %23 : vector<16x64xf32>
    %25 = arith.addf %19, %24 : vector<16x64xf32>
    %26 = vector.extract_strided_slice %4 {offsets = [0, 3], sizes = [16, 1], strides = [1, 1]} : vector<16x6xf32> to vector<16x1xf32>
    %27 = vector.extract_strided_slice %6 {offsets = [3, 0], sizes = [1, 64], strides = [1, 1]} : vector<6x64xf32> to vector<1x64xf32>
    %28 = vector.broadcast %26 : vector<16x1xf32> to vector<16x64xf32>
    %29 = vector.broadcast %27 : vector<1x64xf32> to vector<16x64xf32>
    %30 = arith.mulf %28, %29 : vector<16x64xf32>
    %31 = arith.addf %25, %30 : vector<16x64xf32>
    %32 = vector.extract_strided_slice %4 {offsets = [0, 4], sizes = [16, 1], strides = [1, 1]} : vector<16x6xf32> to vector<16x1xf32>
    %33 = vector.extract_strided_slice %6 {offsets = [4, 0], sizes = [1, 64], strides = [1, 1]} : vector<6x64xf32> to vector<1x64xf32>
    %34 = vector.broadcast %32 : vector<16x1xf32> to vector<16x64xf32>
    %35 = vector.broadcast %33 : vector<1x64xf32> to vector<16x64xf32>
    %36 = arith.mulf %34, %35 : vector<16x64xf32>
    %37 = arith.addf %31, %36 : vector<16x64xf32>
    %38 = vector.extract_strided_slice %4 {offsets = [0, 5], sizes = [16, 1], strides = [1, 1]} : vector<16x6xf32> to vector<16x1xf32>
    %39 = vector.extract_strided_slice %6 {offsets = [5, 0], sizes = [1, 64], strides = [1, 1]} : vector<6x64xf32> to vector<1x64xf32>
    %40 = vector.broadcast %38 : vector<16x1xf32> to vector<16x64xf32>
    %41 = vector.broadcast %39 : vector<1x64xf32> to vector<16x64xf32>
    %42 = arith.mulf %40, %41 : vector<16x64xf32>
    %43 = arith.addf %37, %42 : vector<16x64xf32>
    %c0_5 = arith.constant 0 : index
    %c0_6 = arith.constant 0 : index
    %44 = vector.load %arg4[%c0_5, %c0_6] : memref<1x64xf32, #tpu.memory_space<vmem>>, vector<1x64xf32>
    %45 = vector.broadcast %44 : vector<1x64xf32> to vector<16x64xf32>
    %46 = arith.addf %43, %45 : vector<16x64xf32>
    %cst_7 = arith.constant 0.000000e+00 : f32
    %47 = vector.broadcast %cst_7 : f32 to vector<16x64xf32>
    %48 = arith.maximumf %46, %47 : vector<16x64xf32>
    %c0_8 = arith.constant 0 : index
    %c0_9 = arith.constant 0 : index
    %49 = vector.load %arg5[%c0_8, %c0_9] : memref<64x128xbf16, #tpu.memory_space<vmem>>, vector<64x128xbf16>
    %50 = arith.truncf %48 : vector<16x64xf32> to vector<16x64xbf16>
    %cst_10 = arith.constant dense<0.000000e+00> : vector<16x128xf32>
    %51 = tpu.matmul %50, %49, %cst_10 {dimension_numbers = #tpu.dot_dimension_numbers<[1], [0], [0], [1], [0, 0, 1, 1], [], []>} : vector<16x64xbf16>, vector<64x128xbf16>, vector<16x128xf32> -> vector<16x128xf32>
    %c0_11 = arith.constant 0 : index
    %c0_12 = arith.constant 0 : index
    %52 = vector.load %arg6[%c0_11, %c0_12] : memref<1x128xf32, #tpu.memory_space<vmem>>, vector<1x128xf32>
    %53 = vector.broadcast %52 : vector<1x128xf32> to vector<16x128xf32>
    %54 = arith.addf %51, %53 : vector<16x128xf32>
    %cst_13 = arith.constant 0.000000e+00 : f32
    %55 = vector.broadcast %cst_13 : f32 to vector<16x128xf32>
    %56 = arith.maximumf %54, %55 : vector<16x128xf32>
    %c0_14 = arith.constant 0 : index
    %c0_15 = arith.constant 0 : index
    %57 = vector.load %arg7[%c0_14, %c0_15] : memref<128x1024xbf16, #tpu.memory_space<vmem>>, vector<128x1024xbf16>
    %58 = arith.truncf %56 : vector<16x128xf32> to vector<16x128xbf16>
    %cst_16 = arith.constant dense<0.000000e+00> : vector<16x1024xf32>
    %59 = tpu.matmul %58, %57, %cst_16 {dimension_numbers = #tpu.dot_dimension_numbers<[1], [0], [0], [1], [0, 0, 1, 1], [], []>} : vector<16x128xbf16>, vector<128x1024xbf16>, vector<16x1024xf32> -> vector<16x1024xf32>
    %c0_17 = arith.constant 0 : index
    %c0_18 = arith.constant 0 : index
    %60 = vector.load %arg8[%c0_17, %c0_18] : memref<1x1024xf32, #tpu.memory_space<vmem>>, vector<1x1024xf32>
    %61 = vector.broadcast %60 : vector<1x1024xf32> to vector<16x1024xf32>
    %62 = arith.addf %59, %61 : vector<16x1024xf32>
    %cst_19 = arith.constant 0.000000e+00 : f32
    %63 = vector.broadcast %cst_19 : f32 to vector<16x1024xf32>
    %64 = arith.maximumf %62, %63 : vector<16x1024xf32>
    %c0_20 = arith.constant 0 : index
    %c0_21 = arith.constant 0 : index
    %65 = vector.load %arg10[%c0_20, %c0_21] : memref<1x1024xf32, #tpu.memory_space<vmem>>, vector<1x1024xf32>
    %cst_22 = arith.constant dense<0xFF800000> : vector<1024xf32>
    %66 = vector.multi_reduction <maximumf>, %64, %cst_22 [0] : vector<16x1024xf32> to vector<1024xf32>
    %67 = vector.shape_cast %66 : vector<1024xf32> to vector<1x1024xf32>
    %68 = arith.maximumf %65, %67 : vector<1x1024xf32>
    %c0_23 = arith.constant 0 : index
    %c0_24 = arith.constant 0 : index
    %69 = vector.load %arg10[%c0_23, %c0_24] : memref<1x1024xf32, #tpu.memory_space<vmem>>, vector<1x1024xf32>
    tpu.vector_store %arg10[%c0_23, %c0_24], %68 {strides = array<i32>} : memref<1x1024xf32, #tpu.memory_space<vmem>>, vector<1x1024xf32>,
    %c0_i32_25 = arith.constant 0 : i32
    %70 = arith.cmpi eq, %arg1, %c0_i32_25 : i32
    %71 = arith.extui %70 : i1 to i32
    %c0_i32_26 = arith.constant 0 : i32
    %72 = arith.cmpi ne, %71, %c0_i32_26 : i32
    scf.if %72 {
      %c0_27 = arith.constant 0 : index
      %c0_28 = arith.constant 0 : index
      %73 = vector.load %arg10[%c0_27, %c0_28] : memref<1x1024xf32, #tpu.memory_space<vmem>>, vector<1x1024xf32>
      %c0_29 = arith.constant 0 : index
      %c0_30 = arith.constant 0 : index
      %c0_31 = arith.constant 0 : index
      %74 = vector.load %arg9[%c0_29, %c0_30, %c0_31] : memref<1x1x1024xf32, #tpu.memory_space<vmem>>, vector<1x1x1024xf32>
      %75 = vector.shape_cast %74 : vector<1x1x1024xf32> to vector<1x1024xf32>
      %76 = vector.shape_cast %73 : vector<1x1024xf32> to vector<1x1x1024xf32>
      tpu.vector_store %arg9[%c0_29, %c0_30, %c0_31], %76 {strides = array<i32>} : memref<1x1x1024xf32, #tpu.memory_space<vmem>>, vector<1x1x1024xf32>,
    } else {
    }
    return
  }
  func.func @transform_0(%arg0: i32, %arg1: i32) -> (i32, i32, i32) {
    %c0_i32 = arith.constant 0 : i32
    %c0_i32_0 = arith.constant 0 : i32
    return %arg0, %arg1, %c0_i32 : i32, i32, i32
  }
  func.func @transform_1(%arg0: i32, %arg1: i32) -> (i32, i32) {
    %c0_i32 = arith.constant 0 : i32
    %c0_i32_0 = arith.constant 0 : i32
    %c0_i32_1 = arith.constant 0 : i32
    return %c0_i32, %c0_i32_0 : i32, i32
  }
  func.func @transform_2(%arg0: i32, %arg1: i32) -> (i32, i32) {
    %c0_i32 = arith.constant 0 : i32
    %c0_i32_0 = arith.constant 0 : i32
    %c0_i32_1 = arith.constant 0 : i32
    return %c0_i32, %c0_i32_0 : i32, i32
  }
  func.func @transform_3(%arg0: i32, %arg1: i32) -> (i32, i32) {
    %c0_i32 = arith.constant 0 : i32
    %c0_i32_0 = arith.constant 0 : i32
    %c0_i32_1 = arith.constant 0 : i32
    return %c0_i32, %c0_i32_0 : i32, i32
  }
  func.func @transform_4(%arg0: i32, %arg1: i32) -> (i32, i32) {
    %c0_i32 = arith.constant 0 : i32
    %c0_i32_0 = arith.constant 0 : i32
    %c0_i32_1 = arith.constant 0 : i32
    return %c0_i32, %c0_i32_0 : i32, i32
  }
  func.func @transform_5(%arg0: i32, %arg1: i32) -> (i32, i32) {
    %c0_i32 = arith.constant 0 : i32
    %c0_i32_0 = arith.constant 0 : i32
    %c0_i32_1 = arith.constant 0 : i32
    return %c0_i32, %c0_i32_0 : i32, i32
  }
  func.func @transform_6(%arg0: i32, %arg1: i32) -> (i32, i32) {
    %c0_i32 = arith.constant 0 : i32
    %c0_i32_0 = arith.constant 0 : i32
    %c0_i32_1 = arith.constant 0 : i32
    return %c0_i32, %c0_i32_0 : i32, i32
  }
  func.func @transform_7(%arg0: i32, %arg1: i32) -> (i32, i32, i32) {
    %c0_i32 = arith.constant 0 : i32
    %c0_i32_0 = arith.constant 0 : i32
    %c0_i32_1 = arith.constant 0 : i32
    return %arg0, %c0_i32, %c0_i32_0 : i32, i32, i32
  }
}

module attributes {stable_mosaic.version = 11 : i64} {
  func.func @_mlp3_maxpool_kernel(%arg0: i32, %arg1: i32, %arg2: memref<1x16x64xbf16, #tpu.memory_space<vmem>>, %arg3: memref<64x64xbf16, #tpu.memory_space<vmem>>, %arg4: memref<1x64xf32, #tpu.memory_space<vmem>>, %arg5: memref<64x128xbf16, #tpu.memory_space<vmem>>, %arg6: memref<1x128xf32, #tpu.memory_space<vmem>>, %arg7: memref<128x1024xbf16, #tpu.memory_space<vmem>>, %arg8: memref<1x1024xf32, #tpu.memory_space<vmem>>, %arg9: memref<1x1x1024xf32, #tpu.memory_space<vmem>>, %arg10: memref<1x1024xf32, #tpu.memory_space<vmem>>) attributes {dimension_semantics = [#tpu.dimension_semantics<parallel>, #tpu.dimension_semantics<arbitrary>], iteration_bounds = array<i64: 2, 1>, scalar_prefetch = 0 : i64, scratch_operands = 1 : i64, tpu.core_type = #tpu.core_type<tc>, window_params = [{transform_indices = @transform_0, window_bounds = array<i64: 1, 16, 64>}, {pipeline_mode = #tpu.pipeline_mode<synchronous>, transform_indices = @transform_1, window_bounds = array<i64: 64, 64>}, {pipeline_mode = #tpu.pipeline_mode<synchronous>, transform_indices = @transform_2, window_bounds = array<i64: 1, 64>}, {pipeline_mode = #tpu.pipeline_mode<synchronous>, transform_indices = @transform_3, window_bounds = array<i64: 64, 128>}, {pipeline_mode = #tpu.pipeline_mode<synchronous>, transform_indices = @transform_4, window_bounds = array<i64: 1, 128>}, {pipeline_mode = #tpu.pipeline_mode<synchronous>, transform_indices = @transform_5, window_bounds = array<i64: 128, 1024>}, {pipeline_mode = #tpu.pipeline_mode<synchronous>, transform_indices = @transform_6, window_bounds = array<i64: 1, 1024>}, {transform_indices = @transform_7, window_bounds = array<i64: 1, 1, 1024>}]} {
    %c0_i32 = arith.constant 0 : i32
    %0 = arith.cmpi eq, %arg1, %c0_i32 : i32
    %1 = arith.extui %0 : i1 to i32
    %c0_i32_0 = arith.constant 0 : i32
    %2 = arith.cmpi ne, %1, %c0_i32_0 : i32
    scf.if %2 {
      %cst_27 = arith.constant 0xFF800000 : f32
      %36 = vector.broadcast %cst_27 : f32 to vector<1x1024xf32>
      %c0_28 = arith.constant 0 : index
      %c0_29 = arith.constant 0 : index
      %37 = vector.load %arg10[%c0_28, %c0_29] : memref<1x1024xf32, #tpu.memory_space<vmem>>, vector<1x1024xf32>
      tpu.vector_store %arg10[%c0_28, %c0_29], %36 {strides = array<i32>} : memref<1x1024xf32, #tpu.memory_space<vmem>>, vector<1x1024xf32>,
    } else {
    }
    %c0 = arith.constant 0 : index
    %c0_1 = arith.constant 0 : index
    %c0_2 = arith.constant 0 : index
    %3 = vector.load %arg2[%c0, %c0_1, %c0_2] : memref<1x16x64xbf16, #tpu.memory_space<vmem>>, vector<1x16x64xbf16>
    %4 = vector.shape_cast %3 : vector<1x16x64xbf16> to vector<16x64xbf16>
    %c0_3 = arith.constant 0 : index
    %c0_4 = arith.constant 0 : index
    %5 = vector.load %arg3[%c0_3, %c0_4] : memref<64x64xbf16, #tpu.memory_space<vmem>>, vector<64x64xbf16>
    %cst = arith.constant dense<0.000000e+00> : vector<16x64xf32>
    %6 = tpu.matmul %4, %5, %cst {dimension_numbers = #tpu.dot_dimension_numbers<[1], [0], [0], [1], [0, 0, 1, 1], [], []>} : vector<16x64xbf16>, vector<64x64xbf16>, vector<16x64xf32> -> vector<16x64xf32>
    %c0_5 = arith.constant 0 : index
    %c0_6 = arith.constant 0 : index
    %7 = vector.load %arg4[%c0_5, %c0_6] : memref<1x64xf32, #tpu.memory_space<vmem>>, vector<1x64xf32>
    %8 = vector.broadcast %7 : vector<1x64xf32> to vector<16x64xf32>
    %9 = arith.addf %6, %8 : vector<16x64xf32>
    %cst_7 = arith.constant 0.000000e+00 : f32
    %10 = vector.broadcast %cst_7 : f32 to vector<16x64xf32>
    %11 = arith.maximumf %9, %10 : vector<16x64xf32>
    %c0_8 = arith.constant 0 : index
    %c0_9 = arith.constant 0 : index
    %12 = vector.load %arg5[%c0_8, %c0_9] : memref<64x128xbf16, #tpu.memory_space<vmem>>, vector<64x128xbf16>
    %13 = arith.truncf %11 : vector<16x64xf32> to vector<16x64xbf16>
    %cst_10 = arith.constant dense<0.000000e+00> : vector<16x128xf32>
    %14 = tpu.matmul %13, %12, %cst_10 {dimension_numbers = #tpu.dot_dimension_numbers<[1], [0], [0], [1], [0, 0, 1, 1], [], []>} : vector<16x64xbf16>, vector<64x128xbf16>, vector<16x128xf32> -> vector<16x128xf32>
    %c0_11 = arith.constant 0 : index
    %c0_12 = arith.constant 0 : index
    %15 = vector.load %arg6[%c0_11, %c0_12] : memref<1x128xf32, #tpu.memory_space<vmem>>, vector<1x128xf32>
    %16 = vector.broadcast %15 : vector<1x128xf32> to vector<16x128xf32>
    %17 = arith.addf %14, %16 : vector<16x128xf32>
    %cst_13 = arith.constant 0.000000e+00 : f32
    %18 = vector.broadcast %cst_13 : f32 to vector<16x128xf32>
    %19 = arith.maximumf %17, %18 : vector<16x128xf32>
    %c0_14 = arith.constant 0 : index
    %c0_15 = arith.constant 0 : index
    %20 = vector.load %arg7[%c0_14, %c0_15] : memref<128x1024xbf16, #tpu.memory_space<vmem>>, vector<128x1024xbf16>
    %21 = arith.truncf %19 : vector<16x128xf32> to vector<16x128xbf16>
    %cst_16 = arith.constant dense<0.000000e+00> : vector<16x1024xf32>
    %22 = tpu.matmul %21, %20, %cst_16 {dimension_numbers = #tpu.dot_dimension_numbers<[1], [0], [0], [1], [0, 0, 1, 1], [], []>} : vector<16x128xbf16>, vector<128x1024xbf16>, vector<16x1024xf32> -> vector<16x1024xf32>
    %c0_17 = arith.constant 0 : index
    %c0_18 = arith.constant 0 : index
    %23 = vector.load %arg8[%c0_17, %c0_18] : memref<1x1024xf32, #tpu.memory_space<vmem>>, vector<1x1024xf32>
    %24 = vector.broadcast %23 : vector<1x1024xf32> to vector<16x1024xf32>
    %25 = arith.addf %22, %24 : vector<16x1024xf32>
    %cst_19 = arith.constant 0.000000e+00 : f32
    %26 = vector.broadcast %cst_19 : f32 to vector<16x1024xf32>
    %27 = arith.maximumf %25, %26 : vector<16x1024xf32>
    %c0_20 = arith.constant 0 : index
    %c0_21 = arith.constant 0 : index
    %28 = vector.load %arg10[%c0_20, %c0_21] : memref<1x1024xf32, #tpu.memory_space<vmem>>, vector<1x1024xf32>
    %cst_22 = arith.constant dense<0xFF800000> : vector<1024xf32>
    %29 = vector.multi_reduction <maximumf>, %27, %cst_22 [0] : vector<16x1024xf32> to vector<1024xf32>
    %30 = vector.shape_cast %29 : vector<1024xf32> to vector<1x1024xf32>
    %31 = arith.maximumf %28, %30 : vector<1x1024xf32>
    %c0_23 = arith.constant 0 : index
    %c0_24 = arith.constant 0 : index
    %32 = vector.load %arg10[%c0_23, %c0_24] : memref<1x1024xf32, #tpu.memory_space<vmem>>, vector<1x1024xf32>
    tpu.vector_store %arg10[%c0_23, %c0_24], %31 {strides = array<i32>} : memref<1x1024xf32, #tpu.memory_space<vmem>>, vector<1x1024xf32>,
    %c0_i32_25 = arith.constant 0 : i32
    %33 = arith.cmpi eq, %arg1, %c0_i32_25 : i32
    %34 = arith.extui %33 : i1 to i32
    %c0_i32_26 = arith.constant 0 : i32
    %35 = arith.cmpi ne, %34, %c0_i32_26 : i32
    scf.if %35 {
      %c0_27 = arith.constant 0 : index
      %c0_28 = arith.constant 0 : index
      %36 = vector.load %arg10[%c0_27, %c0_28] : memref<1x1024xf32, #tpu.memory_space<vmem>>, vector<1x1024xf32>
      %c0_29 = arith.constant 0 : index
      %c0_30 = arith.constant 0 : index
      %c0_31 = arith.constant 0 : index
      %37 = vector.load %arg9[%c0_29, %c0_30, %c0_31] : memref<1x1x1024xf32, #tpu.memory_space<vmem>>, vector<1x1x1024xf32>
      %38 = vector.shape_cast %37 : vector<1x1x1024xf32> to vector<1x1024xf32>
      %39 = vector.shape_cast %36 : vector<1x1024xf32> to vector<1x1x1024xf32>
      tpu.vector_store %arg9[%c0_29, %c0_30, %c0_31], %39 {strides = array<i32>} : memref<1x1x1024xf32, #tpu.memory_space<vmem>>, vector<1x1x1024xf32>,
    } else {
    }
    return
  }
  func.func @transform_0(%arg0: i32, %arg1: i32) -> (i32, i32, i32) {
    %c0_i32 = arith.constant 0 : i32
    %c0_i32_0 = arith.constant 0 : i32
    return %arg0, %arg1, %c0_i32 : i32, i32, i32
  }
  func.func @transform_1(%arg0: i32, %arg1: i32) -> (i32, i32) {
    %c0_i32 = arith.constant 0 : i32
    %c0_i32_0 = arith.constant 0 : i32
    %c0_i32_1 = arith.constant 0 : i32
    return %c0_i32, %c0_i32_0 : i32, i32
  }
  func.func @transform_2(%arg0: i32, %arg1: i32) -> (i32, i32) {
    %c0_i32 = arith.constant 0 : i32
    %c0_i32_0 = arith.constant 0 : i32
    %c0_i32_1 = arith.constant 0 : i32
    return %c0_i32, %c0_i32_0 : i32, i32
  }
  func.func @transform_3(%arg0: i32, %arg1: i32) -> (i32, i32) {
    %c0_i32 = arith.constant 0 : i32
    %c0_i32_0 = arith.constant 0 : i32
    %c0_i32_1 = arith.constant 0 : i32
    return %c0_i32, %c0_i32_0 : i32, i32
  }
  func.func @transform_4(%arg0: i32, %arg1: i32) -> (i32, i32) {
    %c0_i32 = arith.constant 0 : i32
    %c0_i32_0 = arith.constant 0 : i32
    %c0_i32_1 = arith.constant 0 : i32
    return %c0_i32, %c0_i32_0 : i32, i32
  }
  func.func @transform_5(%arg0: i32, %arg1: i32) -> (i32, i32) {
    %c0_i32 = arith.constant 0 : i32
    %c0_i32_0 = arith.constant 0 : i32
    %c0_i32_1 = arith.constant 0 : i32
    return %c0_i32, %c0_i32_0 : i32, i32
  }
  func.func @transform_6(%arg0: i32, %arg1: i32) -> (i32, i32) {
    %c0_i32 = arith.constant 0 : i32
    %c0_i32_0 = arith.constant 0 : i32
    %c0_i32_1 = arith.constant 0 : i32
    return %c0_i32, %c0_i32_0 : i32, i32
  }
  func.func @transform_7(%arg0: i32, %arg1: i32) -> (i32, i32, i32) {
    %c0_i32 = arith.constant 0 : i32
    %c0_i32_0 = arith.constant 0 : i32
    %c0_i32_1 = arith.constant 0 : i32
    return %arg0, %c0_i32, %c0_i32_0 : i32, i32, i32
  }
}

module attributes {stable_mosaic.version = 11 : i64} {
  func.func @_transform_conv1_kernel(%arg0: i32, %arg1: i32, %arg2: memref<1x16x6xf32, #tpu.memory_space<vmem>>, %arg3: memref<1x3x3xf32, #tpu.memory_space<vmem>>, %arg4: memref<6x64xbf16, #tpu.memory_space<vmem>>, %arg5: memref<1x64xf32, #tpu.memory_space<vmem>>, %arg6: memref<1x16x64xbf16, #tpu.memory_space<vmem>>) attributes {dimension_semantics = [#tpu.dimension_semantics<parallel>, #tpu.dimension_semantics<parallel>], iteration_bounds = array<i64: 2, 1>, scalar_prefetch = 0 : i64, scratch_operands = 0 : i64, tpu.core_type = #tpu.core_type<tc>, window_params = [{transform_indices = @transform_0, window_bounds = array<i64: 1, 16, 6>}, {transform_indices = @transform_1, window_bounds = array<i64: 1, 3, 3>}, {pipeline_mode = #tpu.pipeline_mode<synchronous>, transform_indices = @transform_2, window_bounds = array<i64: 6, 64>}, {pipeline_mode = #tpu.pipeline_mode<synchronous>, transform_indices = @transform_3, window_bounds = array<i64: 1, 64>}, {transform_indices = @transform_4, window_bounds = array<i64: 1, 16, 64>}]} {
    %c0 = arith.constant 0 : index
    %c0_0 = arith.constant 0 : index
    %c0_1 = arith.constant 0 : index
    %0 = vector.load %arg2[%c0, %c0_0, %c0_1] : memref<1x16x6xf32, #tpu.memory_space<vmem>>, vector<1x16x6xf32>
    %1 = vector.shape_cast %0 : vector<1x16x6xf32> to vector<16x6xf32>
    %c0_2 = arith.constant 0 : index
    %c0_3 = arith.constant 0 : index
    %c0_4 = arith.constant 0 : index
    %2 = vector.load %arg3[%c0_2, %c0_3, %c0_4] : memref<1x3x3xf32, #tpu.memory_space<vmem>>, vector<1x3x3xf32>
    %3 = vector.shape_cast %2 : vector<1x3x3xf32> to vector<3x3xf32>
    %c0_5 = arith.constant 0 : index
    %c0_6 = arith.constant 0 : index
    %4 = vector.load %arg4[%c0_5, %c0_6] : memref<6x64xbf16, #tpu.memory_space<vmem>>, vector<6x64xbf16>
    %5 = arith.extf %4 : vector<6x64xbf16> to vector<6x64xf32>
    %cst = arith.constant 0.000000e+00 : f32
    %6 = vector.broadcast %cst : f32 to vector<16x3xf32>
    %7 = vector.extract_strided_slice %1 {offsets = [0, 0], sizes = [16, 1], strides = [1, 1]} : vector<16x6xf32> to vector<16x1xf32>
    %8 = vector.extract_strided_slice %3 {offsets = [0, 0], sizes = [1, 3], strides = [1, 1]} : vector<3x3xf32> to vector<1x3xf32>
    %9 = vector.broadcast %7 : vector<16x1xf32> to vector<16x3xf32>
    %10 = vector.broadcast %8 : vector<1x3xf32> to vector<16x3xf32>
    %11 = arith.mulf %9, %10 : vector<16x3xf32>
    %12 = arith.addf %6, %11 : vector<16x3xf32>
    %13 = vector.extract_strided_slice %1 {offsets = [0, 1], sizes = [16, 1], strides = [1, 1]} : vector<16x6xf32> to vector<16x1xf32>
    %14 = vector.extract_strided_slice %3 {offsets = [1, 0], sizes = [1, 3], strides = [1, 1]} : vector<3x3xf32> to vector<1x3xf32>
    %15 = vector.broadcast %13 : vector<16x1xf32> to vector<16x3xf32>
    %16 = vector.broadcast %14 : vector<1x3xf32> to vector<16x3xf32>
    %17 = arith.mulf %15, %16 : vector<16x3xf32>
    %18 = arith.addf %12, %17 : vector<16x3xf32>
    %19 = vector.extract_strided_slice %1 {offsets = [0, 2], sizes = [16, 1], strides = [1, 1]} : vector<16x6xf32> to vector<16x1xf32>
    %20 = vector.extract_strided_slice %3 {offsets = [2, 0], sizes = [1, 3], strides = [1, 1]} : vector<3x3xf32> to vector<1x3xf32>
    %21 = vector.broadcast %19 : vector<16x1xf32> to vector<16x3xf32>
    %22 = vector.broadcast %20 : vector<1x3xf32> to vector<16x3xf32>
    %23 = arith.mulf %21, %22 : vector<16x3xf32>
    %24 = arith.addf %18, %23 : vector<16x3xf32>
    %cst_7 = arith.constant 0.000000e+00 : f32
    %25 = vector.broadcast %cst_7 : f32 to vector<16x64xf32>
    %26 = vector.extract_strided_slice %24 {offsets = [0, 0], sizes = [16, 1], strides = [1, 1]} : vector<16x3xf32> to vector<16x1xf32>
    %27 = vector.extract_strided_slice %5 {offsets = [0, 0], sizes = [1, 64], strides = [1, 1]} : vector<6x64xf32> to vector<1x64xf32>
    %28 = vector.broadcast %26 : vector<16x1xf32> to vector<16x64xf32>
    %29 = vector.broadcast %27 : vector<1x64xf32> to vector<16x64xf32>
    %30 = arith.mulf %28, %29 : vector<16x64xf32>
    %31 = arith.addf %25, %30 : vector<16x64xf32>
    %32 = vector.extract_strided_slice %24 {offsets = [0, 1], sizes = [16, 1], strides = [1, 1]} : vector<16x3xf32> to vector<16x1xf32>
    %33 = vector.extract_strided_slice %5 {offsets = [1, 0], sizes = [1, 64], strides = [1, 1]} : vector<6x64xf32> to vector<1x64xf32>
    %34 = vector.broadcast %32 : vector<16x1xf32> to vector<16x64xf32>
    %35 = vector.broadcast %33 : vector<1x64xf32> to vector<16x64xf32>
    %36 = arith.mulf %34, %35 : vector<16x64xf32>
    %37 = arith.addf %31, %36 : vector<16x64xf32>
    %38 = vector.extract_strided_slice %24 {offsets = [0, 2], sizes = [16, 1], strides = [1, 1]} : vector<16x3xf32> to vector<16x1xf32>
    %39 = vector.extract_strided_slice %5 {offsets = [2, 0], sizes = [1, 64], strides = [1, 1]} : vector<6x64xf32> to vector<1x64xf32>
    %40 = vector.broadcast %38 : vector<16x1xf32> to vector<16x64xf32>
    %41 = vector.broadcast %39 : vector<1x64xf32> to vector<16x64xf32>
    %42 = arith.mulf %40, %41 : vector<16x64xf32>
    %43 = arith.addf %37, %42 : vector<16x64xf32>
    %44 = vector.extract_strided_slice %1 {offsets = [0, 3], sizes = [16, 1], strides = [1, 1]} : vector<16x6xf32> to vector<16x1xf32>
    %45 = vector.extract_strided_slice %5 {offsets = [3, 0], sizes = [1, 64], strides = [1, 1]} : vector<6x64xf32> to vector<1x64xf32>
    %46 = vector.broadcast %44 : vector<16x1xf32> to vector<16x64xf32>
    %47 = vector.broadcast %45 : vector<1x64xf32> to vector<16x64xf32>
    %48 = arith.mulf %46, %47 : vector<16x64xf32>
    %49 = arith.addf %43, %48 : vector<16x64xf32>
    %50 = vector.extract_strided_slice %1 {offsets = [0, 4], sizes = [16, 1], strides = [1, 1]} : vector<16x6xf32> to vector<16x1xf32>
    %51 = vector.extract_strided_slice %5 {offsets = [4, 0], sizes = [1, 64], strides = [1, 1]} : vector<6x64xf32> to vector<1x64xf32>
    %52 = vector.broadcast %50 : vector<16x1xf32> to vector<16x64xf32>
    %53 = vector.broadcast %51 : vector<1x64xf32> to vector<16x64xf32>
    %54 = arith.mulf %52, %53 : vector<16x64xf32>
    %55 = arith.addf %49, %54 : vector<16x64xf32>
    %56 = vector.extract_strided_slice %1 {offsets = [0, 5], sizes = [16, 1], strides = [1, 1]} : vector<16x6xf32> to vector<16x1xf32>
    %57 = vector.extract_strided_slice %5 {offsets = [5, 0], sizes = [1, 64], strides = [1, 1]} : vector<6x64xf32> to vector<1x64xf32>
    %58 = vector.broadcast %56 : vector<16x1xf32> to vector<16x64xf32>
    %59 = vector.broadcast %57 : vector<1x64xf32> to vector<16x64xf32>
    %60 = arith.mulf %58, %59 : vector<16x64xf32>
    %61 = arith.addf %55, %60 : vector<16x64xf32>
    %c0_8 = arith.constant 0 : index
    %c0_9 = arith.constant 0 : index
    %62 = vector.load %arg5[%c0_8, %c0_9] : memref<1x64xf32, #tpu.memory_space<vmem>>, vector<1x64xf32>
    %63 = vector.broadcast %62 : vector<1x64xf32> to vector<16x64xf32>
    %64 = arith.addf %61, %63 : vector<16x64xf32>
    %cst_10 = arith.constant 0.000000e+00 : f32
    %65 = vector.broadcast %cst_10 : f32 to vector<16x64xf32>
    %66 = arith.maximumf %64, %65 : vector<16x64xf32>
    %67 = arith.truncf %66 : vector<16x64xf32> to vector<16x64xbf16>
    %c0_11 = arith.constant 0 : index
    %c0_12 = arith.constant 0 : index
    %c0_13 = arith.constant 0 : index
    %68 = vector.load %arg6[%c0_11, %c0_12, %c0_13] : memref<1x16x64xbf16, #tpu.memory_space<vmem>>, vector<1x16x64xbf16>
    %69 = vector.shape_cast %68 : vector<1x16x64xbf16> to vector<16x64xbf16>
    %70 = vector.shape_cast %67 : vector<16x64xbf16> to vector<1x16x64xbf16>
    tpu.vector_store %arg6[%c0_11, %c0_12, %c0_13], %70 {strides = array<i32>} : memref<1x16x64xbf16, #tpu.memory_space<vmem>>, vector<1x16x64xbf16>,
    return
  }
  func.func @transform_0(%arg0: i32, %arg1: i32) -> (i32, i32, i32) {
    %c0_i32 = arith.constant 0 : i32
    %c0_i32_0 = arith.constant 0 : i32
    return %arg0, %arg1, %c0_i32 : i32, i32, i32
  }
  func.func @transform_1(%arg0: i32, %arg1: i32) -> (i32, i32, i32) {
    %c0_i32 = arith.constant 0 : i32
    %c0_i32_0 = arith.constant 0 : i32
    %c0_i32_1 = arith.constant 0 : i32
    return %arg0, %c0_i32, %c0_i32_0 : i32, i32, i32
  }
  func.func @transform_2(%arg0: i32, %arg1: i32) -> (i32, i32) {
    %c0_i32 = arith.constant 0 : i32
    %c0_i32_0 = arith.constant 0 : i32
    %c0_i32_1 = arith.constant 0 : i32
    return %c0_i32, %c0_i32_0 : i32, i32
  }
  func.func @transform_3(%arg0: i32, %arg1: i32) -> (i32, i32) {
    %c0_i32 = arith.constant 0 : i32
    %c0_i32_0 = arith.constant 0 : i32
    %c0_i32_1 = arith.constant 0 : i32
    return %c0_i32, %c0_i32_0 : i32, i32
  }
  func.func @transform_4(%arg0: i32, %arg1: i32) -> (i32, i32, i32) {
    %c0_i32 = arith.constant 0 : i32
    %c0_i32_0 = arith.constant 0 : i32
    return %arg0, %arg1, %c0_i32 : i32, i32, i32
  }
}

module attributes {stable_mosaic.version = 11 : i64} {
  func.func @_fc_head_kernel(%arg0: i32, %arg1: memref<2x1024xf32, #tpu.memory_space<vmem>>, %arg2: memref<1024x512xbf16, #tpu.memory_space<vmem>>, %arg3: memref<1x512xf32, #tpu.memory_space<vmem>>, %arg4: memref<512x256xbf16, #tpu.memory_space<vmem>>, %arg5: memref<1x256xf32, #tpu.memory_space<vmem>>, %arg6: memref<256x9xbf16, #tpu.memory_space<vmem>>, %arg7: memref<1x9xf32, #tpu.memory_space<vmem>>, %arg8: memref<2x9xf32, #tpu.memory_space<vmem>>) attributes {dimension_semantics = [#tpu.dimension_semantics<arbitrary>], iteration_bounds = array<i64: 1>, scalar_prefetch = 0 : i64, scratch_operands = 0 : i64, tpu.core_type = #tpu.core_type<tc>, window_params = [{pipeline_mode = #tpu.pipeline_mode<synchronous>, transform_indices = @transform_0, window_bounds = array<i64: 2, 1024>}, {pipeline_mode = #tpu.pipeline_mode<synchronous>, transform_indices = @transform_1, window_bounds = array<i64: 1024, 512>}, {pipeline_mode = #tpu.pipeline_mode<synchronous>, transform_indices = @transform_2, window_bounds = array<i64: 1, 512>}, {pipeline_mode = #tpu.pipeline_mode<synchronous>, transform_indices = @transform_3, window_bounds = array<i64: 512, 256>}, {pipeline_mode = #tpu.pipeline_mode<synchronous>, transform_indices = @transform_4, window_bounds = array<i64: 1, 256>}, {pipeline_mode = #tpu.pipeline_mode<synchronous>, transform_indices = @transform_5, window_bounds = array<i64: 256, 9>}, {pipeline_mode = #tpu.pipeline_mode<synchronous>, transform_indices = @transform_6, window_bounds = array<i64: 1, 9>}, {pipeline_mode = #tpu.pipeline_mode<synchronous>, transform_indices = @transform_7, window_bounds = array<i64: 2, 9>}]} {
    %c0 = arith.constant 0 : index
    %c0_0 = arith.constant 0 : index
    %0 = vector.load %arg1[%c0, %c0_0] : memref<2x1024xf32, #tpu.memory_space<vmem>>, vector<2x1024xf32>
    %c0_1 = arith.constant 0 : index
    %c0_2 = arith.constant 0 : index
    %1 = vector.load %arg2[%c0_1, %c0_2] : memref<1024x512xbf16, #tpu.memory_space<vmem>>, vector<1024x512xbf16>
    %2 = arith.truncf %0 : vector<2x1024xf32> to vector<2x1024xbf16>
    %cst = arith.constant dense<0.000000e+00> : vector<2x512xf32>
    %3 = tpu.matmul %2, %1, %cst {dimension_numbers = #tpu.dot_dimension_numbers<[1], [0], [0], [1], [0, 0, 1, 1], [], []>} : vector<2x1024xbf16>, vector<1024x512xbf16>, vector<2x512xf32> -> vector<2x512xf32>
    %c0_3 = arith.constant 0 : index
    %c0_4 = arith.constant 0 : index
    %4 = vector.load %arg3[%c0_3, %c0_4] : memref<1x512xf32, #tpu.memory_space<vmem>>, vector<1x512xf32>
    %5 = vector.broadcast %4 : vector<1x512xf32> to vector<2x512xf32>
    %6 = arith.addf %3, %5 : vector<2x512xf32>
    %cst_5 = arith.constant 0.000000e+00 : f32
    %7 = vector.broadcast %cst_5 : f32 to vector<2x512xf32>
    %8 = arith.maximumf %6, %7 : vector<2x512xf32>
    %c0_6 = arith.constant 0 : index
    %c0_7 = arith.constant 0 : index
    %9 = vector.load %arg4[%c0_6, %c0_7] : memref<512x256xbf16, #tpu.memory_space<vmem>>, vector<512x256xbf16>
    %10 = arith.truncf %8 : vector<2x512xf32> to vector<2x512xbf16>
    %cst_8 = arith.constant dense<0.000000e+00> : vector<2x256xf32>
    %11 = tpu.matmul %10, %9, %cst_8 {dimension_numbers = #tpu.dot_dimension_numbers<[1], [0], [0], [1], [0, 0, 1, 1], [], []>} : vector<2x512xbf16>, vector<512x256xbf16>, vector<2x256xf32> -> vector<2x256xf32>
    %c0_9 = arith.constant 0 : index
    %c0_10 = arith.constant 0 : index
    %12 = vector.load %arg5[%c0_9, %c0_10] : memref<1x256xf32, #tpu.memory_space<vmem>>, vector<1x256xf32>
    %13 = vector.broadcast %12 : vector<1x256xf32> to vector<2x256xf32>
    %14 = arith.addf %11, %13 : vector<2x256xf32>
    %cst_11 = arith.constant 0.000000e+00 : f32
    %15 = vector.broadcast %cst_11 : f32 to vector<2x256xf32>
    %16 = arith.maximumf %14, %15 : vector<2x256xf32>
    %c0_12 = arith.constant 0 : index
    %c0_13 = arith.constant 0 : index
    %17 = vector.load %arg6[%c0_12, %c0_13] : memref<256x9xbf16, #tpu.memory_space<vmem>>, vector<256x9xbf16>
    %18 = arith.truncf %16 : vector<2x256xf32> to vector<2x256xbf16>
    %cst_14 = arith.constant dense<0.000000e+00> : vector<2x9xf32>
    %19 = tpu.matmul %18, %17, %cst_14 {dimension_numbers = #tpu.dot_dimension_numbers<[1], [0], [0], [1], [0, 0, 1, 1], [], []>} : vector<2x256xbf16>, vector<256x9xbf16>, vector<2x9xf32> -> vector<2x9xf32>
    %c0_15 = arith.constant 0 : index
    %c0_16 = arith.constant 0 : index
    %20 = vector.load %arg7[%c0_15, %c0_16] : memref<1x9xf32, #tpu.memory_space<vmem>>, vector<1x9xf32>
    %21 = vector.broadcast %20 : vector<1x9xf32> to vector<2x9xf32>
    %22 = arith.addf %19, %21 : vector<2x9xf32>
    %c0_17 = arith.constant 0 : index
    %c0_18 = arith.constant 0 : index
    %23 = vector.load %arg8[%c0_17, %c0_18] : memref<2x9xf32, #tpu.memory_space<vmem>>, vector<2x9xf32>
    tpu.vector_store %arg8[%c0_17, %c0_18], %22 {strides = array<i32>} : memref<2x9xf32, #tpu.memory_space<vmem>>, vector<2x9xf32>,
    return
  }
  func.func @transform_0(%arg0: i32) -> (i32, i32) {
    %c0_i32 = arith.constant 0 : i32
    %c0_i32_0 = arith.constant 0 : i32
    %c0_i32_1 = arith.constant 0 : i32
    return %c0_i32, %c0_i32_0 : i32, i32
  }
  func.func @transform_1(%arg0: i32) -> (i32, i32) {
    %c0_i32 = arith.constant 0 : i32
    %c0_i32_0 = arith.constant 0 : i32
    %c0_i32_1 = arith.constant 0 : i32
    return %c0_i32, %c0_i32_0 : i32, i32
  }
  func.func @transform_2(%arg0: i32) -> (i32, i32) {
    %c0_i32 = arith.constant 0 : i32
    %c0_i32_0 = arith.constant 0 : i32
    %c0_i32_1 = arith.constant 0 : i32
    return %c0_i32, %c0_i32_0 : i32, i32
  }
  func.func @transform_3(%arg0: i32) -> (i32, i32) {
    %c0_i32 = arith.constant 0 : i32
    %c0_i32_0 = arith.constant 0 : i32
    %c0_i32_1 = arith.constant 0 : i32
    return %c0_i32, %c0_i32_0 : i32, i32
  }
  func.func @transform_4(%arg0: i32) -> (i32, i32) {
    %c0_i32 = arith.constant 0 : i32
    %c0_i32_0 = arith.constant 0 : i32
    %c0_i32_1 = arith.constant 0 : i32
    return %c0_i32, %c0_i32_0 : i32, i32
  }
  func.func @transform_5(%arg0: i32) -> (i32, i32) {
    %c0_i32 = arith.constant 0 : i32
    %c0_i32_0 = arith.constant 0 : i32
    %c0_i32_1 = arith.constant 0 : i32
    return %c0_i32, %c0_i32_0 : i32, i32
  }
  func.func @transform_6(%arg0: i32) -> (i32, i32) {
    %c0_i32 = arith.constant 0 : i32
    %c0_i32_0 = arith.constant 0 : i32
    %c0_i32_1 = arith.constant 0 : i32
    return %c0_i32, %c0_i32_0 : i32, i32
  }
  func.func @transform_7(%arg0: i32) -> (i32, i32) {
    %c0_i32 = arith.constant 0 : i32
    %c0_i32_0 = arith.constant 0 : i32
    %c0_i32_1 = arith.constant 0 : i32
    return %c0_i32, %c0_i32_0 : i32, i32
  }
}

module attributes {stable_mosaic.version = 11 : i64} {
  func.func @_fc_head_kernel(%arg0: i32, %arg1: memref<2x1024xf32, #tpu.memory_space<vmem>>, %arg2: memref<1024x512xbf16, #tpu.memory_space<vmem>>, %arg3: memref<1x512xf32, #tpu.memory_space<vmem>>, %arg4: memref<512x256xbf16, #tpu.memory_space<vmem>>, %arg5: memref<1x256xf32, #tpu.memory_space<vmem>>, %arg6: memref<256x4096xbf16, #tpu.memory_space<vmem>>, %arg7: memref<1x4096xf32, #tpu.memory_space<vmem>>, %arg8: memref<2x4096xf32, #tpu.memory_space<vmem>>) attributes {dimension_semantics = [#tpu.dimension_semantics<arbitrary>], iteration_bounds = array<i64: 1>, scalar_prefetch = 0 : i64, scratch_operands = 0 : i64, tpu.core_type = #tpu.core_type<tc>, window_params = [{pipeline_mode = #tpu.pipeline_mode<synchronous>, transform_indices = @transform_0, window_bounds = array<i64: 2, 1024>}, {pipeline_mode = #tpu.pipeline_mode<synchronous>, transform_indices = @transform_1, window_bounds = array<i64: 1024, 512>}, {pipeline_mode = #tpu.pipeline_mode<synchronous>, transform_indices = @transform_2, window_bounds = array<i64: 1, 512>}, {pipeline_mode = #tpu.pipeline_mode<synchronous>, transform_indices = @transform_3, window_bounds = array<i64: 512, 256>}, {pipeline_mode = #tpu.pipeline_mode<synchronous>, transform_indices = @transform_4, window_bounds = array<i64: 1, 256>}, {pipeline_mode = #tpu.pipeline_mode<synchronous>, transform_indices = @transform_5, window_bounds = array<i64: 256, 4096>}, {pipeline_mode = #tpu.pipeline_mode<synchronous>, transform_indices = @transform_6, window_bounds = array<i64: 1, 4096>}, {pipeline_mode = #tpu.pipeline_mode<synchronous>, transform_indices = @transform_7, window_bounds = array<i64: 2, 4096>}]} {
    %c0 = arith.constant 0 : index
    %c0_0 = arith.constant 0 : index
    %0 = vector.load %arg1[%c0, %c0_0] : memref<2x1024xf32, #tpu.memory_space<vmem>>, vector<2x1024xf32>
    %c0_1 = arith.constant 0 : index
    %c0_2 = arith.constant 0 : index
    %1 = vector.load %arg2[%c0_1, %c0_2] : memref<1024x512xbf16, #tpu.memory_space<vmem>>, vector<1024x512xbf16>
    %2 = arith.truncf %0 : vector<2x1024xf32> to vector<2x1024xbf16>
    %cst = arith.constant dense<0.000000e+00> : vector<2x512xf32>
    %3 = tpu.matmul %2, %1, %cst {dimension_numbers = #tpu.dot_dimension_numbers<[1], [0], [0], [1], [0, 0, 1, 1], [], []>} : vector<2x1024xbf16>, vector<1024x512xbf16>, vector<2x512xf32> -> vector<2x512xf32>
    %c0_3 = arith.constant 0 : index
    %c0_4 = arith.constant 0 : index
    %4 = vector.load %arg3[%c0_3, %c0_4] : memref<1x512xf32, #tpu.memory_space<vmem>>, vector<1x512xf32>
    %5 = vector.broadcast %4 : vector<1x512xf32> to vector<2x512xf32>
    %6 = arith.addf %3, %5 : vector<2x512xf32>
    %cst_5 = arith.constant 0.000000e+00 : f32
    %7 = vector.broadcast %cst_5 : f32 to vector<2x512xf32>
    %8 = arith.maximumf %6, %7 : vector<2x512xf32>
    %c0_6 = arith.constant 0 : index
    %c0_7 = arith.constant 0 : index
    %9 = vector.load %arg4[%c0_6, %c0_7] : memref<512x256xbf16, #tpu.memory_space<vmem>>, vector<512x256xbf16>
    %10 = arith.truncf %8 : vector<2x512xf32> to vector<2x512xbf16>
    %cst_8 = arith.constant dense<0.000000e+00> : vector<2x256xf32>
    %11 = tpu.matmul %10, %9, %cst_8 {dimension_numbers = #tpu.dot_dimension_numbers<[1], [0], [0], [1], [0, 0, 1, 1], [], []>} : vector<2x512xbf16>, vector<512x256xbf16>, vector<2x256xf32> -> vector<2x256xf32>
    %c0_9 = arith.constant 0 : index
    %c0_10 = arith.constant 0 : index
    %12 = vector.load %arg5[%c0_9, %c0_10] : memref<1x256xf32, #tpu.memory_space<vmem>>, vector<1x256xf32>
    %13 = vector.broadcast %12 : vector<1x256xf32> to vector<2x256xf32>
    %14 = arith.addf %11, %13 : vector<2x256xf32>
    %cst_11 = arith.constant 0.000000e+00 : f32
    %15 = vector.broadcast %cst_11 : f32 to vector<2x256xf32>
    %16 = arith.maximumf %14, %15 : vector<2x256xf32>
    %c0_12 = arith.constant 0 : index
    %c0_13 = arith.constant 0 : index
    %17 = vector.load %arg6[%c0_12, %c0_13] : memref<256x4096xbf16, #tpu.memory_space<vmem>>, vector<256x4096xbf16>
    %18 = arith.truncf %16 : vector<2x256xf32> to vector<2x256xbf16>
    %cst_14 = arith.constant dense<0.000000e+00> : vector<2x4096xf32>
    %19 = tpu.matmul %18, %17, %cst_14 {dimension_numbers = #tpu.dot_dimension_numbers<[1], [0], [0], [1], [0, 0, 1, 1], [], []>} : vector<2x256xbf16>, vector<256x4096xbf16>, vector<2x4096xf32> -> vector<2x4096xf32>
    %c0_15 = arith.constant 0 : index
    %c0_16 = arith.constant 0 : index
    %20 = vector.load %arg7[%c0_15, %c0_16] : memref<1x4096xf32, #tpu.memory_space<vmem>>, vector<1x4096xf32>
    %21 = vector.broadcast %20 : vector<1x4096xf32> to vector<2x4096xf32>
    %22 = arith.addf %19, %21 : vector<2x4096xf32>
    %c0_17 = arith.constant 0 : index
    %c0_18 = arith.constant 0 : index
    %23 = vector.load %arg8[%c0_17, %c0_18] : memref<2x4096xf32, #tpu.memory_space<vmem>>, vector<2x4096xf32>
    tpu.vector_store %arg8[%c0_17, %c0_18], %22 {strides = array<i32>} : memref<2x4096xf32, #tpu.memory_space<vmem>>, vector<2x4096xf32>,
    return
  }
  func.func @transform_0(%arg0: i32) -> (i32, i32) {
    %c0_i32 = arith.constant 0 : i32
    %c0_i32_0 = arith.constant 0 : i32
    %c0_i32_1 = arith.constant 0 : i32
    return %c0_i32, %c0_i32_0 : i32, i32
  }
  func.func @transform_1(%arg0: i32) -> (i32, i32) {
    %c0_i32 = arith.constant 0 : i32
    %c0_i32_0 = arith.constant 0 : i32
    %c0_i32_1 = arith.constant 0 : i32
    return %c0_i32, %c0_i32_0 : i32, i32
  }
  func.func @transform_2(%arg0: i32) -> (i32, i32) {
    %c0_i32 = arith.constant 0 : i32
    %c0_i32_0 = arith.constant 0 : i32
    %c0_i32_1 = arith.constant 0 : i32
    return %c0_i32, %c0_i32_0 : i32, i32
  }
  func.func @transform_3(%arg0: i32) -> (i32, i32) {
    %c0_i32 = arith.constant 0 : i32
    %c0_i32_0 = arith.constant 0 : i32
    %c0_i32_1 = arith.constant 0 : i32
    return %c0_i32, %c0_i32_0 : i32, i32
  }
  func.func @transform_4(%arg0: i32) -> (i32, i32) {
    %c0_i32 = arith.constant 0 : i32
    %c0_i32_0 = arith.constant 0 : i32
    %c0_i32_1 = arith.constant 0 : i32
    return %c0_i32, %c0_i32_0 : i32, i32
  }
  func.func @transform_5(%arg0: i32) -> (i32, i32) {
    %c0_i32 = arith.constant 0 : i32
    %c0_i32_0 = arith.constant 0 : i32
    %c0_i32_1 = arith.constant 0 : i32
    return %c0_i32, %c0_i32_0 : i32, i32
  }
  func.func @transform_6(%arg0: i32) -> (i32, i32) {
    %c0_i32 = arith.constant 0 : i32
    %c0_i32_0 = arith.constant 0 : i32
    %c0_i32_1 = arith.constant 0 : i32
    return %c0_i32, %c0_i32_0 : i32, i32
  }
  func.func @transform_7(%arg0: i32) -> (i32, i32) {
    %c0_i32 = arith.constant 0 : i32
    %c0_i32_0 = arith.constant 0 : i32
    %c0_i32_1 = arith.constant 0 : i32
    return %c0_i32, %c0_i32_0 : i32, i32
  }
}

module attributes {stable_mosaic.version = 11 : i64} {
  func.func @_ft_mlp2_maxpool_kernel(%arg0: i32, %arg1: i32, %arg2: memref<1x16x64xbf16, #tpu.memory_space<vmem>>, %arg3: memref<1x64x64xf32, #tpu.memory_space<vmem>>, %arg4: memref<64x128xbf16, #tpu.memory_space<vmem>>, %arg5: memref<1x128xf32, #tpu.memory_space<vmem>>, %arg6: memref<128x1024xbf16, #tpu.memory_space<vmem>>, %arg7: memref<1x1024xf32, #tpu.memory_space<vmem>>, %arg8: memref<1x1x1024xf32, #tpu.memory_space<vmem>>, %arg9: memref<1x1024xf32, #tpu.memory_space<vmem>>) attributes {dimension_semantics = [#tpu.dimension_semantics<parallel>, #tpu.dimension_semantics<arbitrary>], iteration_bounds = array<i64: 2, 1>, scalar_prefetch = 0 : i64, scratch_operands = 1 : i64, tpu.core_type = #tpu.core_type<tc>, window_params = [{transform_indices = @transform_0, window_bounds = array<i64: 1, 16, 64>}, {transform_indices = @transform_1, window_bounds = array<i64: 1, 64, 64>}, {pipeline_mode = #tpu.pipeline_mode<synchronous>, transform_indices = @transform_2, window_bounds = array<i64: 64, 128>}, {pipeline_mode = #tpu.pipeline_mode<synchronous>, transform_indices = @transform_3, window_bounds = array<i64: 1, 128>}, {pipeline_mode = #tpu.pipeline_mode<synchronous>, transform_indices = @transform_4, window_bounds = array<i64: 128, 1024>}, {pipeline_mode = #tpu.pipeline_mode<synchronous>, transform_indices = @transform_5, window_bounds = array<i64: 1, 1024>}, {transform_indices = @transform_6, window_bounds = array<i64: 1, 1, 1024>}]} {
    %c0_i32 = arith.constant 0 : i32
    %0 = arith.cmpi eq, %arg1, %c0_i32 : i32
    %1 = arith.extui %0 : i1 to i32
    %c0_i32_0 = arith.constant 0 : i32
    %2 = arith.cmpi ne, %1, %c0_i32_0 : i32
    scf.if %2 {
      %cst_24 = arith.constant 0xFF800000 : f32
      %31 = vector.broadcast %cst_24 : f32 to vector<1x1024xf32>
      %c0_25 = arith.constant 0 : index
      %c0_26 = arith.constant 0 : index
      %32 = vector.load %arg9[%c0_25, %c0_26] : memref<1x1024xf32, #tpu.memory_space<vmem>>, vector<1x1024xf32>
      tpu.vector_store %arg9[%c0_25, %c0_26], %31 {strides = array<i32>} : memref<1x1024xf32, #tpu.memory_space<vmem>>, vector<1x1024xf32>,
    } else {
    }
    %c0 = arith.constant 0 : index
    %c0_1 = arith.constant 0 : index
    %c0_2 = arith.constant 0 : index
    %3 = vector.load %arg2[%c0, %c0_1, %c0_2] : memref<1x16x64xbf16, #tpu.memory_space<vmem>>, vector<1x16x64xbf16>
    %4 = vector.shape_cast %3 : vector<1x16x64xbf16> to vector<16x64xbf16>
    %c0_3 = arith.constant 0 : index
    %c0_4 = arith.constant 0 : index
    %c0_5 = arith.constant 0 : index
    %5 = vector.load %arg3[%c0_3, %c0_4, %c0_5] : memref<1x64x64xf32, #tpu.memory_space<vmem>>, vector<1x64x64xf32>
    %6 = vector.shape_cast %5 : vector<1x64x64xf32> to vector<64x64xf32>
    %7 = arith.truncf %6 : vector<64x64xf32> to vector<64x64xbf16>
    %cst = arith.constant dense<0.000000e+00> : vector<16x64xf32>
    %8 = tpu.matmul %4, %7, %cst {dimension_numbers = #tpu.dot_dimension_numbers<[1], [0], [0], [1], [0, 0, 1, 1], [], []>} : vector<16x64xbf16>, vector<64x64xbf16>, vector<16x64xf32> -> vector<16x64xf32>
    %c0_6 = arith.constant 0 : index
    %c0_7 = arith.constant 0 : index
    %9 = vector.load %arg4[%c0_6, %c0_7] : memref<64x128xbf16, #tpu.memory_space<vmem>>, vector<64x128xbf16>
    %10 = arith.truncf %8 : vector<16x64xf32> to vector<16x64xbf16>
    %cst_8 = arith.constant dense<0.000000e+00> : vector<16x128xf32>
    %11 = tpu.matmul %10, %9, %cst_8 {dimension_numbers = #tpu.dot_dimension_numbers<[1], [0], [0], [1], [0, 0, 1, 1], [], []>} : vector<16x64xbf16>, vector<64x128xbf16>, vector<16x128xf32> -> vector<16x128xf32>
    %c0_9 = arith.constant 0 : index
    %c0_10 = arith.constant 0 : index
    %12 = vector.load %arg5[%c0_9, %c0_10] : memref<1x128xf32, #tpu.memory_space<vmem>>, vector<1x128xf32>
    %13 = vector.broadcast %12 : vector<1x128xf32> to vector<16x128xf32>
    %14 = arith.addf %11, %13 : vector<16x128xf32>
    %cst_11 = arith.constant 0.000000e+00 : f32
    %15 = vector.broadcast %cst_11 : f32 to vector<16x128xf32>
    %16 = arith.maximumf %14, %15 : vector<16x128xf32>
    %c0_12 = arith.constant 0 : index
    %c0_13 = arith.constant 0 : index
    %17 = vector.load %arg6[%c0_12, %c0_13] : memref<128x1024xbf16, #tpu.memory_space<vmem>>, vector<128x1024xbf16>
    %18 = arith.truncf %16 : vector<16x128xf32> to vector<16x128xbf16>
    %cst_14 = arith.constant dense<0.000000e+00> : vector<16x1024xf32>
    %19 = tpu.matmul %18, %17, %cst_14 {dimension_numbers = #tpu.dot_dimension_numbers<[1], [0], [0], [1], [0, 0, 1, 1], [], []>} : vector<16x128xbf16>, vector<128x1024xbf16>, vector<16x1024xf32> -> vector<16x1024xf32>
    %c0_15 = arith.constant 0 : index
    %c0_16 = arith.constant 0 : index
    %20 = vector.load %arg7[%c0_15, %c0_16] : memref<1x1024xf32, #tpu.memory_space<vmem>>, vector<1x1024xf32>
    %21 = vector.broadcast %20 : vector<1x1024xf32> to vector<16x1024xf32>
    %22 = arith.addf %19, %21 : vector<16x1024xf32>
    %c0_17 = arith.constant 0 : index
    %c0_18 = arith.constant 0 : index
    %23 = vector.load %arg9[%c0_17, %c0_18] : memref<1x1024xf32, #tpu.memory_space<vmem>>, vector<1x1024xf32>
    %cst_19 = arith.constant dense<0xFF800000> : vector<1024xf32>
    %24 = vector.multi_reduction <maximumf>, %22, %cst_19 [0] : vector<16x1024xf32> to vector<1024xf32>
    %25 = vector.shape_cast %24 : vector<1024xf32> to vector<1x1024xf32>
    %26 = arith.maximumf %23, %25 : vector<1x1024xf32>
    %c0_20 = arith.constant 0 : index
    %c0_21 = arith.constant 0 : index
    %27 = vector.load %arg9[%c0_20, %c0_21] : memref<1x1024xf32, #tpu.memory_space<vmem>>, vector<1x1024xf32>
    tpu.vector_store %arg9[%c0_20, %c0_21], %26 {strides = array<i32>} : memref<1x1024xf32, #tpu.memory_space<vmem>>, vector<1x1024xf32>,
    %c0_i32_22 = arith.constant 0 : i32
    %28 = arith.cmpi eq, %arg1, %c0_i32_22 : i32
    %29 = arith.extui %28 : i1 to i32
    %c0_i32_23 = arith.constant 0 : i32
    %30 = arith.cmpi ne, %29, %c0_i32_23 : i32
    scf.if %30 {
      %c0_24 = arith.constant 0 : index
      %c0_25 = arith.constant 0 : index
      %31 = vector.load %arg9[%c0_24, %c0_25] : memref<1x1024xf32, #tpu.memory_space<vmem>>, vector<1x1024xf32>
      %c0_26 = arith.constant 0 : index
      %c0_27 = arith.constant 0 : index
      %c0_28 = arith.constant 0 : index
      %32 = vector.load %arg8[%c0_26, %c0_27, %c0_28] : memref<1x1x1024xf32, #tpu.memory_space<vmem>>, vector<1x1x1024xf32>
      %33 = vector.shape_cast %32 : vector<1x1x1024xf32> to vector<1x1024xf32>
      %34 = vector.shape_cast %31 : vector<1x1024xf32> to vector<1x1x1024xf32>
      tpu.vector_store %arg8[%c0_26, %c0_27, %c0_28], %34 {strides = array<i32>} : memref<1x1x1024xf32, #tpu.memory_space<vmem>>, vector<1x1x1024xf32>,
    } else {
    }
    return
  }
  func.func @transform_0(%arg0: i32, %arg1: i32) -> (i32, i32, i32) {
    %c0_i32 = arith.constant 0 : i32
    %c0_i32_0 = arith.constant 0 : i32
    return %arg0, %arg1, %c0_i32 : i32, i32, i32
  }
  func.func @transform_1(%arg0: i32, %arg1: i32) -> (i32, i32, i32) {
    %c0_i32 = arith.constant 0 : i32
    %c0_i32_0 = arith.constant 0 : i32
    %c0_i32_1 = arith.constant 0 : i32
    return %arg0, %c0_i32, %c0_i32_0 : i32, i32, i32
  }
  func.func @transform_2(%arg0: i32, %arg1: i32) -> (i32, i32) {
    %c0_i32 = arith.constant 0 : i32
    %c0_i32_0 = arith.constant 0 : i32
    %c0_i32_1 = arith.constant 0 : i32
    return %c0_i32, %c0_i32_0 : i32, i32
  }
  func.func @transform_3(%arg0: i32, %arg1: i32) -> (i32, i32) {
    %c0_i32 = arith.constant 0 : i32
    %c0_i32_0 = arith.constant 0 : i32
    %c0_i32_1 = arith.constant 0 : i32
    return %c0_i32, %c0_i32_0 : i32, i32
  }
  func.func @transform_4(%arg0: i32, %arg1: i32) -> (i32, i32) {
    %c0_i32 = arith.constant 0 : i32
    %c0_i32_0 = arith.constant 0 : i32
    %c0_i32_1 = arith.constant 0 : i32
    return %c0_i32, %c0_i32_0 : i32, i32
  }
  func.func @transform_5(%arg0: i32, %arg1: i32) -> (i32, i32) {
    %c0_i32 = arith.constant 0 : i32
    %c0_i32_0 = arith.constant 0 : i32
    %c0_i32_1 = arith.constant 0 : i32
    return %c0_i32, %c0_i32_0 : i32, i32
  }
  func.func @transform_6(%arg0: i32, %arg1: i32) -> (i32, i32, i32) {
    %c0_i32 = arith.constant 0 : i32
    %c0_i32_0 = arith.constant 0 : i32
    %c0_i32_1 = arith.constant 0 : i32
    return %arg0, %c0_i32, %c0_i32_0 : i32, i32, i32
  }
}

module attributes {stable_mosaic.version = 11 : i64} {
  func.func @_fc_head_kernel(%arg0: i32, %arg1: memref<2x1024xf32, #tpu.memory_space<vmem>>, %arg2: memref<1024x512xbf16, #tpu.memory_space<vmem>>, %arg3: memref<1x512xf32, #tpu.memory_space<vmem>>, %arg4: memref<512x256xbf16, #tpu.memory_space<vmem>>, %arg5: memref<1x256xf32, #tpu.memory_space<vmem>>, %arg6: memref<256x40xbf16, #tpu.memory_space<vmem>>, %arg7: memref<1x40xf32, #tpu.memory_space<vmem>>, %arg8: memref<2x40xf32, #tpu.memory_space<vmem>>) attributes {dimension_semantics = [#tpu.dimension_semantics<arbitrary>], iteration_bounds = array<i64: 1>, scalar_prefetch = 0 : i64, scratch_operands = 0 : i64, tpu.core_type = #tpu.core_type<tc>, window_params = [{pipeline_mode = #tpu.pipeline_mode<synchronous>, transform_indices = @transform_0, window_bounds = array<i64: 2, 1024>}, {pipeline_mode = #tpu.pipeline_mode<synchronous>, transform_indices = @transform_1, window_bounds = array<i64: 1024, 512>}, {pipeline_mode = #tpu.pipeline_mode<synchronous>, transform_indices = @transform_2, window_bounds = array<i64: 1, 512>}, {pipeline_mode = #tpu.pipeline_mode<synchronous>, transform_indices = @transform_3, window_bounds = array<i64: 512, 256>}, {pipeline_mode = #tpu.pipeline_mode<synchronous>, transform_indices = @transform_4, window_bounds = array<i64: 1, 256>}, {pipeline_mode = #tpu.pipeline_mode<synchronous>, transform_indices = @transform_5, window_bounds = array<i64: 256, 40>}, {pipeline_mode = #tpu.pipeline_mode<synchronous>, transform_indices = @transform_6, window_bounds = array<i64: 1, 40>}, {pipeline_mode = #tpu.pipeline_mode<synchronous>, transform_indices = @transform_7, window_bounds = array<i64: 2, 40>}]} {
    %c0 = arith.constant 0 : index
    %c0_0 = arith.constant 0 : index
    %0 = vector.load %arg1[%c0, %c0_0] : memref<2x1024xf32, #tpu.memory_space<vmem>>, vector<2x1024xf32>
    %c0_1 = arith.constant 0 : index
    %c0_2 = arith.constant 0 : index
    %1 = vector.load %arg2[%c0_1, %c0_2] : memref<1024x512xbf16, #tpu.memory_space<vmem>>, vector<1024x512xbf16>
    %2 = arith.truncf %0 : vector<2x1024xf32> to vector<2x1024xbf16>
    %cst = arith.constant dense<0.000000e+00> : vector<2x512xf32>
    %3 = tpu.matmul %2, %1, %cst {dimension_numbers = #tpu.dot_dimension_numbers<[1], [0], [0], [1], [0, 0, 1, 1], [], []>} : vector<2x1024xbf16>, vector<1024x512xbf16>, vector<2x512xf32> -> vector<2x512xf32>
    %c0_3 = arith.constant 0 : index
    %c0_4 = arith.constant 0 : index
    %4 = vector.load %arg3[%c0_3, %c0_4] : memref<1x512xf32, #tpu.memory_space<vmem>>, vector<1x512xf32>
    %5 = vector.broadcast %4 : vector<1x512xf32> to vector<2x512xf32>
    %6 = arith.addf %3, %5 : vector<2x512xf32>
    %cst_5 = arith.constant 0.000000e+00 : f32
    %7 = vector.broadcast %cst_5 : f32 to vector<2x512xf32>
    %8 = arith.maximumf %6, %7 : vector<2x512xf32>
    %c0_6 = arith.constant 0 : index
    %c0_7 = arith.constant 0 : index
    %9 = vector.load %arg4[%c0_6, %c0_7] : memref<512x256xbf16, #tpu.memory_space<vmem>>, vector<512x256xbf16>
    %10 = arith.truncf %8 : vector<2x512xf32> to vector<2x512xbf16>
    %cst_8 = arith.constant dense<0.000000e+00> : vector<2x256xf32>
    %11 = tpu.matmul %10, %9, %cst_8 {dimension_numbers = #tpu.dot_dimension_numbers<[1], [0], [0], [1], [0, 0, 1, 1], [], []>} : vector<2x512xbf16>, vector<512x256xbf16>, vector<2x256xf32> -> vector<2x256xf32>
    %c0_9 = arith.constant 0 : index
    %c0_10 = arith.constant 0 : index
    %12 = vector.load %arg5[%c0_9, %c0_10] : memref<1x256xf32, #tpu.memory_space<vmem>>, vector<1x256xf32>
    %13 = vector.broadcast %12 : vector<1x256xf32> to vector<2x256xf32>
    %14 = arith.addf %11, %13 : vector<2x256xf32>
    %cst_11 = arith.constant 0.000000e+00 : f32
    %15 = vector.broadcast %cst_11 : f32 to vector<2x256xf32>
    %16 = arith.maximumf %14, %15 : vector<2x256xf32>
    %c0_12 = arith.constant 0 : index
    %c0_13 = arith.constant 0 : index
    %17 = vector.load %arg6[%c0_12, %c0_13] : memref<256x40xbf16, #tpu.memory_space<vmem>>, vector<256x40xbf16>
    %18 = arith.truncf %16 : vector<2x256xf32> to vector<2x256xbf16>
    %cst_14 = arith.constant dense<0.000000e+00> : vector<2x40xf32>
    %19 = tpu.matmul %18, %17, %cst_14 {dimension_numbers = #tpu.dot_dimension_numbers<[1], [0], [0], [1], [0, 0, 1, 1], [], []>} : vector<2x256xbf16>, vector<256x40xbf16>, vector<2x40xf32> -> vector<2x40xf32>
    %c0_15 = arith.constant 0 : index
    %c0_16 = arith.constant 0 : index
    %20 = vector.load %arg7[%c0_15, %c0_16] : memref<1x40xf32, #tpu.memory_space<vmem>>, vector<1x40xf32>
    %21 = vector.broadcast %20 : vector<1x40xf32> to vector<2x40xf32>
    %22 = arith.addf %19, %21 : vector<2x40xf32>
    %cst_17 = arith.constant dense<0xFF800000> : vector<2xf32>
    %23 = vector.multi_reduction <maximumf>, %22, %cst_17 [1] : vector<2x40xf32> to vector<2xf32>
    %24 = vector.shape_cast %23 : vector<2xf32> to vector<2x1xf32>
    %25 = vector.broadcast %24 : vector<2x1xf32> to vector<2x40xf32>
    %26 = arith.subf %22, %25 : vector<2x40xf32>
    %27 = math.exp %26 : vector<2x40xf32>
    %cst_18 = arith.constant dense<0.000000e+00> : vector<2xf32>
    %28 = vector.multi_reduction <add>, %27, %cst_18 [1] : vector<2x40xf32> to vector<2xf32>
    %29 = vector.shape_cast %28 : vector<2xf32> to vector<2x1xf32>
    %30 = math.log %29 : vector<2x1xf32>
    %31 = vector.broadcast %30 : vector<2x1xf32> to vector<2x40xf32>
    %32 = arith.subf %26, %31 : vector<2x40xf32>
    %c0_19 = arith.constant 0 : index
    %c0_20 = arith.constant 0 : index
    %33 = vector.load %arg8[%c0_19, %c0_20] : memref<2x40xf32, #tpu.memory_space<vmem>>, vector<2x40xf32>
    tpu.vector_store %arg8[%c0_19, %c0_20], %32 {strides = array<i32>} : memref<2x40xf32, #tpu.memory_space<vmem>>, vector<2x40xf32>,
    return
  }
  func.func @transform_0(%arg0: i32) -> (i32, i32) {
    %c0_i32 = arith.constant 0 : i32
    %c0_i32_0 = arith.constant 0 : i32
    %c0_i32_1 = arith.constant 0 : i32
    return %c0_i32, %c0_i32_0 : i32, i32
  }
  func.func @transform_1(%arg0: i32) -> (i32, i32) {
    %c0_i32 = arith.constant 0 : i32
    %c0_i32_0 = arith.constant 0 : i32
    %c0_i32_1 = arith.constant 0 : i32
    return %c0_i32, %c0_i32_0 : i32, i32
  }
  func.func @transform_2(%arg0: i32) -> (i32, i32) {
    %c0_i32 = arith.constant 0 : i32
    %c0_i32_0 = arith.constant 0 : i32
    %c0_i32_1 = arith.constant 0 : i32
    return %c0_i32, %c0_i32_0 : i32, i32
  }
  func.func @transform_3(%arg0: i32) -> (i32, i32) {
    %c0_i32 = arith.constant 0 : i32
    %c0_i32_0 = arith.constant 0 : i32
    %c0_i32_1 = arith.constant 0 : i32
    return %c0_i32, %c0_i32_0 : i32, i32
  }
  func.func @transform_4(%arg0: i32) -> (i32, i32) {
    %c0_i32 = arith.constant 0 : i32
    %c0_i32_0 = arith.constant 0 : i32
    %c0_i32_1 = arith.constant 0 : i32
    return %c0_i32, %c0_i32_0 : i32, i32
  }
  func.func @transform_5(%arg0: i32) -> (i32, i32) {
    %c0_i32 = arith.constant 0 : i32
    %c0_i32_0 = arith.constant 0 : i32
    %c0_i32_1 = arith.constant 0 : i32
    return %c0_i32, %c0_i32_0 : i32, i32
  }
  func.func @transform_6(%arg0: i32) -> (i32, i32) {
    %c0_i32 = arith.constant 0 : i32
    %c0_i32_0 = arith.constant 0 : i32
    %c0_i32_1 = arith.constant 0 : i32
    return %c0_i32, %c0_i32_0 : i32, i32
  }
  func.func @transform_7(%arg0: i32) -> (i32, i32) {
    %c0_i32 = arith.constant 0 : i32
    %c0_i32_0 = arith.constant 0 : i32
    %c0_i32_1 = arith.constant 0 : i32
    return %c0_i32, %c0_i32_0 : i32, i32
  }
}

</mosaic_0001>

<bundles_post_ra>
// kernel: model_forward.9
= control target key start
LH: loop header
LB: loop body
LE: loop exit
PB: predicated region body
PF: predicated region fallthrough
CT: control target
= control target key end

     0   :  { %9 = vsyncpa [#allocation3], 0  ;;  %s916_s0 = inlined_call_operand.vmem [shape: f32[2,16,6], index: 0, kind: input, shape index: {}]   ;;  %s917_s1 = inlined_call_operand.vmem [shape: f32[2,3,3], index: 1, kind: input, shape index: {}]   ;;  %s918_s2 = inlined_call_operand.hbm [shape: bf16[6,64], index: 2, kind: input, shape index: {}]   ;;  %s919_s3 = inlined_call_operand.hbm [shape: f32[1,64], index: 3, kind: input, shape index: {}]   ;;  %s920_s4 = inlined_call_operand.vmem [shape: bf16[2,16,64], index: 4, kind: output, shape index: {}]  }
   0x1   :  { %10 = vsyncpa [#allocation5], 0  ;;  %s786_s15 = smov 0   ;;  %s788_s16 = smov 0  }
   0x2   :  { %s790_s17 = smov 0  }
   0x3 LB: > { %s576_s18 = sadd.s32 4294967295, %s751_s17   ;;  %s28_s19 = sadd.s32 1, %s747_s16  ;;  %s751_s17 = sphi %s790_s17, %s16_s17   ;;  %s747_s16 = sphi %s788_s16, %s930_s16   ;;  %s743_s15 = sphi %s786_s15, %s929_s15  }
   0x4   : > { %p30_p0 = scmp.ge.s32.totalorder %s28_s19, 2  ;;  %p578_p1 = scmp.ge.s32.totalorder %s751_s17, 1 }
   0x5   : > { %p157_p2 = scmp.lt.s32.totalorder %s751_s17, 3  ;;  %p811_p4 = scmp.eq.s32.totalorder %s576_s18, 0 }
   0x6   : > { %s932_s19 = smov (%p30_p0, %s28_s19), 0  ;;  %s753_s22 = smov [#allocation2]  }
   0x7   : > { %p807_p3 = pnand %p578_p1, %p157_p2  ;;  %s170_s23 = sshll.u32 %s753_s22, 4  ;;  %s171_s23 = int_to_ptr.vmem [resolvable:$true] %s170_s23 }
   0x8   : > { %s925_s21 = scalar_select %p811_p4, 1, 0 }
   0x9   : > { %s924_s20 = scalar_select %p807_p3, 1, 0 }
   0xa   : > { %p607_p5 = pneg %p807_p3  ;;  %s754_s24 = smov [#allocation4]  }
   0xb   : > { %s181_s25 = sshll.u32 %s754_s24, 4  ;;  %s665_s29 = scalar_lea.hbm %s918_s2, 64  ;;  %s823_s25 = int_to_ptr.vmem [resolvable:$true] %s181_s25 }
   0xc   : > { %p819_p6 = pnand %p811_p4, %p607_p5  ;;  %p666_p7 = scmp.ne.s32.totalorder %s918_s2, %s665_s29 }
   0xd   : > { %p672_p11 = scmp.lt.u32.totalorder %s665_s29, %s918_s2 }
   0xe   : > { %p667_p8 = pneg %p819_p6 }
  0x10   : > { %p668_p9 = pnand %p667_p8, %p666_p7 }
  0x12   : > { %p669_p10 = pneg %p668_p9 }
  0x14   : > { %p674_p12 = pnand %p672_p11, %p669_p10 }
  0x16   : > { %677 = shalt.err (!%p674_p12)
}
  0x17   : > { %s678_s8 = scalar_lea.vmem %s171_s23, 64  ;;  %p686_p2 = scmp.lt.s32.totalorder %s171_s23, %s171_s23 }
  0x18   : > { %p679_p13 = scmp.ne.s32.totalorder %s171_s23, %s678_s8  ;;  %p687_p5 = scmp.lt.s32.totalorder %s678_s8, %s678_s8 }
  0x1a   : > { %p681_p0 = pnand %p679_p13, %p667_p8  ;;  %p688_p4 = por %p687_p5, %p686_p2 }
  0x1c   : > { %p682_p1 = pneg %p681_p0 }
  0x1e   : > { %p689_p3 = pnand %p688_p4, %p682_p1 }
  0x20   : > { %692 = shalt.err (!%p689_p3)
}
  0x21   : > { %610 = dma.hbm_to_vmem [thread:$0]  (!%p819_p6), %s918_s2, 64, %s171_s23, [#allocation3]  }
  0x22   : > { %s693_s13 = scalar_lea.hbm %s919_s3, 16 }
  0x23   : > { %p694_p7 = scmp.ne.s32.totalorder %s919_s3, %s693_s13  ;;  %p700_p3 = scmp.lt.u32.totalorder %s693_s13, %s919_s3 }
  0x25   : > { %p696_p9 = pnand %p694_p7, %p667_p8 }
  0x27   : > { %p697_p4 = pneg %p696_p9 }
  0x29   : > { %p702_p10 = pnand %p700_p3, %p697_p4 }
  0x2b   : > { %705 = shalt.err (!%p702_p10)
}
  0x2c   : > { %s706_s23 = scalar_lea.vmem %s823_s25, 16  ;;  %s713_s27 = scalar_lea.vmem %s823_s25, 32 }
  0x2d   : > { %p707_p11 = scmp.ne.s32.totalorder %s823_s25, %s706_s23  ;;  %p714_p0 = scmp.lt.s32.totalorder %s823_s25, %s823_s25 }
  0x2e   : > { %p715_p1 = scmp.lt.s32.totalorder %s713_s27, %s706_s23 }
  0x2f   : > { %p709_p12 = pnand %p707_p11, %p667_p8 }
  0x30   : > { %p716_p2 = por %p715_p1, %p714_p0 }
  0x31   : > { %p710_p13 = pneg %p709_p12 }
  0x33   : > { %p717_p5 = pnand %p716_p2, %p710_p13 }
  0x35   : > { %720 = shalt.err (!%p717_p5)
}
  0x36   : > { %613 = dma.hbm_to_vmem [thread:$0]  (!%p819_p6), %s919_s3, 16, %s823_s25, [#allocation5]  }
  0x37   : > { %p927_p7 = scmp.ne.s32.totalorder %s924_s20, 0 }
  0x38   : > { %p928_p8 = scmp.ne.s32.totalorder (!%p927_p7), %s925_s21, 0 }
  0x39   : > { %214 = sbr.rel (%p927_p7) target bundleno = 377 (0x179), region = 36 }
  0x40   : > { %734 = dma.done.wait (%p928_p8), [#allocation3], 64  }
  0x41   : > { %736 = vsyncadd (%p928_p8), [#allocation3], 4294967232 }
  0x42   : > { %738 = dma.done.wait (%p928_p8), [#allocation5], 16  }
  0x43   : > { %740 = vsyncadd (%p928_p8), [#allocation5], 4294967280  ;;  %p257_p9 = scmp.lt.s32.totalorder %s743_s15, 1  ;;  %v755_v0 = vmov 1   ;;  %v756_v1 = vmov 0   ;;  %v757_v4 = vmov 2   ;;  %v295_v7 = vlaneseq }
  0x44   : > { %651 = vset.pattern.permute.xlu1 %v755_v0  ;;  %650 = vset.pattern.permute.xlu0 %v756_v1  ;;  %v758_v5 = vmov 3   ;;  %v759_v6 = vmov 4   ;;  %v760_v32 = vmov 5   ;;  %v283_v36 = vld [vmem:[#allocation2] sm:$0x7]  ;;  %vm452_vm0 = vcmask 519168  }
  0x45   : > { %s934_s15 = smov (!%p257_p9, %s743_s15), 1  ;;  %v892_v8 = vshrl.u32 %v295_v7, 7  ;;  %v284_v37 = vunpack.c.l.bf16 %v283_v36 }
  0x46   : > { %s595_s20 = sshll.u32 %s934_s15, 4  ;;  %s587_s21 = sshll.u32 %s934_s15, 2 }
  0x47   : > { %s264_s30 = scalar_lea.vmem %s916_s0, %s595_s20  ;;  %s269_s7 = scalar_lea.vmem %s917_s1, %s587_s21  ;;  %v313_v9 = vsub.s32 1, %v892_v8  ;;  %v297_v10 = vsub.s32 0, %v892_v8  ;;  %v329_v14 = vsub.s32 2, %v892_v8  ;;  %v395_v40 = vsub.s32 3, %v892_v8 }
  0x48   : > { %v280_v2 = vld [vmem:[%s264_s30] sm:$0xff]  ;;  %v281_v3 = vld [vmem:[%s264_s30 + $0x8] sm:$0xff]  ;;  %v411_v43 = vsub.s32 4, %v892_v8  ;;  %v427_v45 = vsub.s32 5, %v892_v8  ;;  %s596_s8 = sshll.u32 %s934_s15, 3 }
  0x49   : > { %304 = vperm.xlu1 %651, %v280_v2   ;;  %287 = vperm.xlu0 %650, %v280_v2   ;;  %v282_v11 = vld [vmem:[%s269_s7] sm:$0x7]  ;;  %v348_v41 = vrot.slane %v284_v37, %v297_v10  ;;  %v364_v42 = vrot.slane %v284_v37, %v313_v9  ;;  %v380_v44 = vrot.slane %v284_v37, %v329_v14  ;;  %s278_s11 = scalar_lea.vmem %s920_s4, %s596_s8 }
  0x4a   : > { %v314_v15 = vrot.slane %v282_v11, %v313_v9  ;;  %v298_v16 = vrot.slane %v282_v11, %v297_v10  ;;  %v330_v19 = vrot.slane %v282_v11, %v329_v14  ;;  %v396_v48 = vrot.slane %v284_v37, %v395_v40 }
  0x4b   : > { %v412_v51 = vrot.slane %v284_v37, %v411_v43  ;;  %v428_v54 = vrot.slane %v284_v37, %v427_v45 }
  0x4d   : > { %308 = vperm.xlu1 %651, %v281_v3   ;;  %292 = vperm.xlu0 %650, %v281_v3  }
  0x51   : > { %653 = vset.pattern.permute.xlu1 %v757_v4  ;;  %652 = vset.pattern.permute.xlu0 %v757_v4 }
  0x52   : > { %324 = vperm.xlu1 %653, %v281_v3   ;;  %320 = vperm.xlu0 %652, %v280_v2  }
  0x56   : > { %654 = vset.pattern.permute.xlu1 %v758_v5  ;;  %655 = vset.pattern.permute.xlu0 %v758_v5 }
  0x57   : > { %386 = vperm.xlu1 %654, %v280_v2   ;;  %390 = vperm.xlu0 %655, %v281_v3  }
  0x5b   : > { %656 = vset.pattern.permute.xlu1 %v759_v6  ;;  %658 = vset.pattern.permute.xlu0 %v756_v1 }
  0x5c   : > { %402 = vperm.xlu1 %656, %v280_v2  }
  0x60   : > { %657 = vset.pattern.permute.xlu1 %v756_v1 }
  0xc8   : > { %v305_v12 = vpop.permute.xlu1 %304  ;;  %v288_v13 = vpop.permute.xlu0 %287 }
  0xc9   : > { %v315_v20 = vmul.f32 %v314_v15, %v305_v12  ;;  %v299_v21 = vmul.f32 %v298_v16, %v288_v13 }
  0xcb   : > { %v317_v26 = vadd.f32 %v315_v20, %v299_v21 }
  0xcc   : > { %v309_v17 = vpop.permute.xlu1 %308  ;;  %v293_v18 = vpop.permute.xlu0 %292 }
  0xcd   : > { %v316_v22 = vmul.f32 %v314_v15, %v309_v17  ;;  %v300_v23 = vmul.f32 %v298_v16, %v293_v18 }
  0xcf   : > { %v318_v27 = vadd.f32 %v316_v22, %v300_v23 }
  0xd1   : > { %v325_v24 = vpop.permute.xlu1 %324  ;;  %v321_v25 = vpop.permute.xlu0 %320 }
  0xd2   : > { %v332_v28 = vmul.f32 %v330_v19, %v325_v24  ;;  %v331_v29 = vmul.f32 %v330_v19, %v321_v25 }
  0xd4   : > { %v334_v30 = vadd.f32 %v332_v28, %v318_v27  ;;  %v333_v31 = vadd.f32 %v331_v29, %v317_v26 }
  0xd6   : > { %342 = vperm.xlu0 %658, %v334_v30   ;;  %337 = vperm.xlu1 %657, %v333_v31   ;;  %v387_v33 = vpop.permute.xlu1 %386  ;;  %v391_v35 = vpop.permute.xlu0 %390 }
  0xd7   : > { %v397_v56 = vmul.f32 %v396_v48, %v387_v33  ;;  %v398_v8 = vmul.f32 %v396_v48, %v391_v35 }
  0xda   : > { %660 = vset.pattern.permute.xlu0 %v757_v4  ;;  %659 = vset.pattern.permute.xlu1 %v755_v0 }
  0xdb   : > { %370 = vperm.xlu0 %660, %v333_v31   ;;  %354 = vperm.xlu1 %659, %v333_v31   ;;  %v403_v34 = vpop.permute.xlu1 %402 }
  0xdc   : > { %v413_v60 = vmul.f32 %v412_v51, %v403_v34 }
  0xdf   : > { %358 = vperm.xlu1 %659, %v334_v30   ;;  %663 = vset.pattern.permute.xlu0 %v760_v32 }
  0xe0   : > { %418 = vperm.xlu0 %663, %v280_v2  }
  0xe3   : > { %661 = vset.pattern.permute.xlu1 %v757_v4 }
  0xe4   : > { %374 = vperm.xlu1 %661, %v334_v30  }
  0xe8   : > { %662 = vset.pattern.permute.xlu1 %v759_v6 }
  0xe9   : > { %406 = vperm.xlu1 %662, %v281_v3  }
  0xed   : > { %664 = vset.pattern.permute.xlu1 %v760_v32 }
  0xee   : > { %422 = vperm.xlu1 %664, %v281_v3   ;;  %v590_v3 = vld [vmem:[#allocation4] ss:$0 sm:$0xff] }
 0x155   : > { %v338_v38 = vpop.permute.xlu1 %337  ;;  %v343_v39 = vpop.permute.xlu0 %342 }
 0x156   : > { %v349_v49 = vmul.f32 %v348_v41, %v338_v38  ;;  %v350_v63 = vmul.f32 %v348_v41, %v343_v39 }
 0x15a   : > { %v355_v46 = vpop.permute.xlu1 %354  ;;  %v371_v47 = vpop.permute.xlu0 %370 }
 0x15b   : > { %v365_v50 = vmul.f32 %v364_v42, %v355_v46  ;;  %v381_v53 = vmul.f32 %v380_v44, %v371_v47 }
 0x15d   : > { %v367_v52 = vadd.f32 %v365_v50, %v349_v49 }
 0x15e   : > { %v359_v55 = vpop.permute.xlu1 %358 }
 0x15f   : > { %v383_v57 = vadd.f32 %v381_v53, %v367_v52  ;;  %v419_v58 = vpop.permute.xlu0 %418  ;;  %v366_v59 = vmul.f32 %v364_v42, %v359_v55 }
 0x160   : > { %v429_v62 = vmul.f32 %v428_v54, %v419_v58 }
 0x161   : > { %v399_v61 = vadd.f32 %v397_v56, %v383_v57  ;;  %v368_v2 = vadd.f32 %v366_v59, %v350_v63 }
 0x163   : > { %v415_v0 = vadd.f32 %v413_v60, %v399_v61  ;;  %v375_v1 = vpop.permute.xlu1 %374 }
 0x164   : > { %v382_v4 = vmul.f32 %v380_v44, %v375_v1 }
 0x165   : > { %v431_v5 = vadd.f32 %v429_v62, %v415_v0 }
 0x166   : > { %v384_v6 = vadd.f32 %v382_v4, %v368_v2 }
 0x167   : > { %v440_v7 = vadd.f32 %v590_v3, %v431_v5 }
 0x168   : > { %v407_v9 = vpop.permute.xlu1 %406  ;;  %v400_v11 = vadd.f32 %v398_v8, %v384_v6 }
 0x169   : > { %v442_v10 = vmax.f32 %v440_v7, 0.0  ;;  %v414_v12 = vmul.f32 %v412_v51, %v407_v9 }
 0x16b   : > { %v597_v13 = vpack.c.bf16 %v442_v10, %v442_v10  ;;  %v416_v15 = vadd.f32 %v414_v12, %v400_v11 }
 0x16d   : > { %453 = vst.msk [vmem:[%s278_s11] sm:$0xf] %vm452_vm0, %v597_v13  ;;  %v423_v14 = vpop.permute.xlu1 %422 }
 0x16e   : > { %v430_v16 = vmul.f32 %v428_v54, %v423_v14 }
 0x170   : > { %v432_v17 = vadd.f32 %v430_v16, %v416_v15 }
 0x172   : > { %v441_v18 = vadd.f32 %v590_v3, %v432_v17 }
 0x174   : > { %v443_v19 = vmax.f32 %v441_v18, 0.0 }
 0x176   : > { %v598_v20 = vpack.c.bf16 %v443_v19, %v443_v19 }
 0x178   : > { %454 = vst.msk [vmem:[%s278_s11 + $0x4] sm:$0xf] %vm452_vm0, %v598_v20 }
 0x179 PF: > { %s16_s17 = sadd.s32 1, %s751_s17   ;;  %s929_s15 = smov %s747_s16 }
 0x17a   : > { %p13_p6 = scmp.ge.s32.totalorder %s16_s17, 4   ;;  %s930_s16 = smov %s932_s19 }
 0x17c   :  { %15 = sbr.rel (!%p13_p6) target bundleno = 3 (0x3), region = 78 }
 0x183   :  { %485 = vsyncpa [#allocation3], 1 }
 0x184   :  { %487 = vsyncpa [#allocation3 + $0x1], 1 }
 0x185   :  { %488 = vsyncpa [#allocation5], 1 }

// kernel: model_forward.10
= control target key start
LH: loop header
LB: loop body
LE: loop exit
PB: predicated region body
PF: predicated region fallthrough
CT: control target
= control target key end

     0   :  { %12 = vsyncpa [#allocation4], 0  ;;  %s2199_s0 = inlined_call_operand.vmem [shape: bf16[2,16,64], index: 0, kind: input, shape index: {}]   ;;  %s2200_s1 = inlined_call_operand.hbm [shape: bf16[64,64], index: 1, kind: input, shape index: {}]   ;;  %s2201_s2 = inlined_call_operand.hbm [shape: f32[1,64], index: 2, kind: input, shape index: {}]   ;;  %s2202_s3 = inlined_call_operand.hbm [shape: bf16[64,128], index: 3, kind: input, shape index: {}]   ;;  %s2203_s4 = inlined_call_operand.hbm [shape: f32[1,128], index: 4, kind: input, shape index: {}]   ;;  %s2204_s5 = inlined_call_operand.hbm [shape: bf16[128,1024], index: 5, kind: input, shape index: {}]   ;;  %s2205_s6 = inlined_call_operand.hbm [shape: f32[1,1024], index: 6, kind: input, shape index: {}]   ;;  %s2206_s7 = inlined_call_operand.vmem [shape: f32[2,1,1024], index: 7, kind: output, shape index: {}]  }
   0x1   :  { %13 = vsyncpa [#allocation6], 0 }
   0x2   :  { %14 = vsyncpa [#allocation9], 0 }
   0x3   :  { %15 = vsyncpa [#allocation12], 0  ;;  %s1935_s24 = smov 0   ;;  %s1937_s25 = smov 0  }
   0x4   :  { %s1939_s26 = smov 0  }
   0x5 LB: > { %s1881_s27 = smov [#allocation5]   ;;  %s1437_s29 = sadd.s32 4294967295, %s1879_s26   ;;  %s1879_s26 = sphi %s1939_s26, %s21_s26   ;;  %s1875_s25 = sphi %s1937_s25, %s2219_s25   ;;  %s1871_s24 = sphi %s1935_s24, %s2218_s24  }
   0x6   : > { %s244_s28 = sshll.u32 %s1881_s27, 4  ;;  %p1439_p0 = scmp.ge.s32.totalorder %s1879_s26, 1  ;;  %s245_s28 = int_to_ptr.vmem [resolvable:$true] %s244_s28 }
   0x7   : > { %p218_p1 = scmp.lt.s32.totalorder %s1879_s26, 3  ;;  %p1953_p2 = scmp.eq.s32.totalorder %s1437_s29, 0 }
   0x8   : > { %s1882_s9 = smov [#allocation8]   ;;  %s33_s12 = sadd.s32 1, %s1875_s25 }
   0x9   : > { %s2210_s30 = scalar_select %p1953_p2, 1, 0 }
   0xa   : > { %p1957_p3 = pnand %p1439_p0, %p218_p1  ;;  %s268_s10 = sshll.u32 %s1882_s9, 4  ;;  %s1963_s10 = int_to_ptr.vmem [resolvable:$true] %s268_s10 }
   0xb   : > { %p1974_p6 = scmp.ge.s32.totalorder %s33_s12, 2  ;;  %s1673_s16 = scalar_lea.hbm %s2201_s2, 16 }
   0xc   : > { %s2211_s8 = scalar_select %p1957_p3, 1, 0 }
   0xd   : > { %p1595_p4 = pneg %p1957_p3  ;;  %p1674_p7 = scmp.ne.s32.totalorder %s2201_s2, %s1673_s16 }
   0xe   : > { %s2213_s13 = scalar_select %p1974_p6, 1, 0 }
   0xf   : > { %p1967_p5 = pnand %p1953_p2, %p1595_p4  ;;  %p1680_p11 = scmp.lt.u32.totalorder %s1673_s16, %s2201_s2 }
  0x11   : > { %p1986_p8 = pneg %p1967_p5 }
  0x13   : > { %p1676_p9 = pnand %p1986_p8, %p1674_p7 }
  0x15   : > { %p1677_p10 = pneg %p1676_p9 }
  0x17   : > { %p1682_p12 = pnand %p1680_p11, %p1677_p10 }
  0x19   : > { %1685 = shalt.err (!%p1682_p12)
}
  0x1a   : > { %s1686_s22 = scalar_lea.vmem %s245_s28, 16  ;;  %s1693_s23 = scalar_lea.vmem %s245_s28, 32 }
  0x1b   : > { %p1687_p13 = scmp.ne.s32.totalorder %s245_s28, %s1686_s22  ;;  %p1694_p4 = scmp.lt.s32.totalorder %s245_s28, %s245_s28 }
  0x1c   : > { %p1695_p2 = scmp.lt.s32.totalorder %s1693_s23, %s1686_s22 }
  0x1d   : > { %p1689_p0 = pnand %p1687_p13, %p1986_p8 }
  0x1e   : > { %p1696_p3 = por %p1695_p2, %p1694_p4 }
  0x1f   : > { %p1690_p1 = pneg %p1689_p0 }
  0x21   : > { %p1697_p6 = pnand %p1696_p3, %p1690_p1 }
  0x23   : > { %1700 = shalt.err (!%p1697_p6)
}
  0x24   : > { %1601 = dma.hbm_to_vmem [thread:$0]  (!%p1967_p5), %s2201_s2, 16, %s245_s28, [#allocation6]  }
  0x25   : > { %s1701_s15 = scalar_lea.hbm %s2203_s4, 16 }
  0x26   : > { %p1702_p7 = scmp.ne.s32.totalorder %s2203_s4, %s1701_s15  ;;  %p1708_p3 = scmp.lt.u32.totalorder %s1701_s15, %s2203_s4 }
  0x28   : > { %p1704_p9 = pnand %p1702_p7, %p1986_p8 }
  0x2a   : > { %p1705_p2 = pneg %p1704_p9 }
  0x2c   : > { %p1710_p6 = pnand %p1708_p3, %p1705_p2 }
  0x2e   : > { %1713 = shalt.err (!%p1710_p6)
}
  0x2f   : > { %s1714_s28 = scalar_lea.vmem %s1963_s10, 16  ;;  %s1721_s21 = scalar_lea.vmem %s1963_s10, 32 }
  0x30   : > { %p1715_p10 = scmp.ne.s32.totalorder %s1963_s10, %s1714_s28  ;;  %p1722_p13 = scmp.lt.s32.totalorder %s1963_s10, %s1963_s10 }
  0x31   : > { %p1723_p0 = scmp.lt.s32.totalorder %s1721_s21, %s1714_s28 }
  0x32   : > { %p1717_p11 = pnand %p1715_p10, %p1986_p8 }
  0x33   : > { %p1724_p1 = por %p1723_p0, %p1722_p13 }
  0x34   : > { %p1718_p12 = pneg %p1717_p11 }
  0x36   : > { %p1725_p4 = pnand %p1724_p1, %p1718_p12 }
  0x38   : > { %1728 = shalt.err (!%p1725_p4)
}
  0x39   : > { %1607 = dma.hbm_to_vmem [thread:$0]  (!%p1967_p5), %s2203_s4, 16, %s1963_s10, [#allocation9]  }
  0x3a   : > { %p2215_p7 = scmp.ne.s32.totalorder %s2213_s13, 0  ;;  %s1883_s27 = smov [#allocation3]  }
  0x3b   : > { %s230_s29 = sshll.u32 %s1883_s27, 4  ;;  %s1729_s15 = scalar_lea.hbm %s2200_s1, 512  ;;  %s231_s29 = int_to_ptr.vmem [resolvable:$true] %s230_s29 }
  0x3c   : > { %s2221_s12 = smov (%p2215_p7, %s33_s12), 0  ;;  %p1730_p9 = scmp.ne.s32.totalorder %s2200_s1, %s1729_s15 }
  0x3d   : > { %p1736_p6 = scmp.lt.u32.totalorder %s1729_s15, %s2200_s1 }
  0x3e   : > { %p1732_p2 = pnand %p1730_p9, %p1986_p8 }
  0x40   : > { %p1733_p3 = pneg %p1732_p2 }
  0x42   : > { %p1738_p10 = pnand %p1736_p6, %p1733_p3 }
  0x44   : > { %1741 = shalt.err (!%p1738_p10)
}
  0x45   : > { %s1742_s13 = scalar_lea.vmem %s231_s29, 512  ;;  %p1750_p0 = scmp.lt.s32.totalorder %s231_s29, %s231_s29 }
  0x46   : > { %p1743_p11 = scmp.ne.s32.totalorder %s231_s29, %s1742_s13  ;;  %p1751_p1 = scmp.lt.s32.totalorder %s1742_s13, %s1742_s13 }
  0x48   : > { %p1745_p12 = pnand %p1743_p11, %p1986_p8  ;;  %p1752_p4 = por %p1751_p1, %p1750_p0 }
  0x4a   : > { %p1746_p13 = pneg %p1745_p12 }
  0x4c   : > { %p1753_p7 = pnand %p1752_p4, %p1746_p13 }
  0x4e   : > { %1756 = shalt.err (!%p1753_p7)
}
  0x4f   : > { %s1884_s20 = smov 64   ;;  %s1885_s28 = smov 4  }
  0x50   : > { %1598 = dma.hbm_to_vmem [thread:$0]  (!%p1967_p5), %s2200_s1, 512, %s231_s29, [#allocation4], %s1884_s20, %s1884_s20, %s1885_s28  }
  0x51   : > { %s1886_s23 = smov [#allocation7]   ;;  %s1887_s9 = smov [#allocation10]  }
  0x52   : > { %s254_s27 = sshll.u32 %s1886_s23, 4  ;;  %s278_s14 = sshll.u32 %s1887_s9, 4  ;;  %s255_s27 = int_to_ptr.vmem [resolvable:$true] %s254_s27  ;;  %s2050_s14 = int_to_ptr.vmem [resolvable:$true] %s278_s14 }
  0x53   : > { %s1757_s17 = scalar_lea.hbm %s2202_s3, 512 }
  0x54   : > { %p1758_p9 = scmp.ne.s32.totalorder %s2202_s3, %s1757_s17  ;;  %p1764_p6 = scmp.lt.u32.totalorder %s1757_s17, %s2202_s3 }
  0x56   : > { %p1760_p2 = pnand %p1758_p9, %p1986_p8 }
  0x58   : > { %p1761_p3 = pneg %p1760_p2 }
  0x5a   : > { %p1766_p10 = pnand %p1764_p6, %p1761_p3 }
  0x5c   : > { %1769 = shalt.err (!%p1766_p10)
}
  0x5d   : > { %s1770_s21 = scalar_lea.vmem %s255_s27, 512  ;;  %p1778_p0 = scmp.lt.s32.totalorder %s255_s27, %s255_s27 }
  0x5e   : > { %p1771_p11 = scmp.ne.s32.totalorder %s255_s27, %s1770_s21  ;;  %p1779_p1 = scmp.lt.s32.totalorder %s1770_s21, %s1770_s21 }
  0x60   : > { %p1773_p12 = pnand %p1771_p11, %p1986_p8  ;;  %p1780_p4 = por %p1779_p1, %p1778_p0 }
  0x62   : > { %p1774_p13 = pneg %p1773_p12 }
  0x64   : > { %p1781_p7 = pnand %p1780_p4, %p1774_p13 }
  0x66   : > { %1784 = shalt.err (!%p1781_p7)
}
  0x67   : > { %1604 = dma.hbm_to_vmem [thread:$0]  (!%p1967_p5), %s2202_s3, 512, %s255_s27, [#allocation6], %s1884_s20, %s1884_s20, %s1885_s28  }
  0x68   : > { %s1785_s16 = scalar_lea.hbm %s2204_s5, 8192 }
  0x69   : > { %p1786_p9 = scmp.ne.s32.totalorder %s2204_s5, %s1785_s16  ;;  %p1792_p6 = scmp.lt.u32.totalorder %s1785_s16, %s2204_s5 }
  0x6b   : > { %p1788_p2 = pnand %p1786_p9, %p1986_p8 }
  0x6d   : > { %p1789_p3 = pneg %p1788_p2 }
  0x6f   : > { %p1794_p10 = pnand %p1792_p6, %p1789_p3 }
  0x71   : > { %1797 = shalt.err (!%p1794_p10)
}
  0x72   : > { %s1798_s20 = scalar_lea.vmem %s2050_s14, 8192  ;;  %p1806_p0 = scmp.lt.s32.totalorder %s2050_s14, %s2050_s14 }
  0x73   : > { %p1799_p11 = scmp.ne.s32.totalorder %s2050_s14, %s1798_s20  ;;  %p1807_p1 = scmp.lt.s32.totalorder %s1798_s20, %s1798_s20 }
  0x75   : > { %p1801_p12 = pnand %p1799_p11, %p1986_p8  ;;  %p1808_p4 = por %p1807_p1, %p1806_p0 }
  0x77   : > { %p1802_p13 = pneg %p1801_p12 }
  0x79   : > { %p1809_p7 = pnand %p1808_p4, %p1802_p13 }
  0x7b   : > { %1812 = shalt.err (!%p1809_p7)
}
  0x7c   : > { %s1888_s28 = smov 512   ;;  %s1889_s27 = smov 32  }
  0x7d   : > { %1610 = dma.hbm_to_vmem [thread:$0]  (!%p1967_p5), %s2204_s5, 8192, %s2050_s14, [#allocation9], %s1888_s28, %s1888_s28, %s1889_s27  }
  0x7e   : > { %s1890_s22 = smov [#allocation11]   ;;  %s1813_s16 = scalar_lea.hbm %s2205_s6, 128 }
  0x7f   : > { %s292_s23 = sshll.u32 %s1890_s22, 4  ;;  %p1814_p9 = scmp.ne.s32.totalorder %s2205_s6, %s1813_s16  ;;  %s293_s23 = int_to_ptr.vmem [resolvable:$true] %s292_s23 }
  0x80   : > { %p1820_p6 = scmp.lt.u32.totalorder %s1813_s16, %s2205_s6 }
  0x81   : > { %p1816_p2 = pnand %p1814_p9, %p1986_p8 }
  0x83   : > { %p1817_p3 = pneg %p1816_p2 }
  0x85   : > { %p1822_p10 = pnand %p1820_p6, %p1817_p3 }
  0x87   : > { %1825 = shalt.err (!%p1822_p10)
}
  0x88   : > { %s1826_s14 = scalar_lea.vmem %s293_s23, 128  ;;  %p1834_p0 = scmp.lt.s32.totalorder %s293_s23, %s293_s23 }
  0x89   : > { %p1827_p11 = scmp.ne.s32.totalorder %s293_s23, %s1826_s14  ;;  %p1835_p1 = scmp.lt.s32.totalorder %s1826_s14, %s1826_s14 }
  0x8b   : > { %p1829_p12 = pnand %p1827_p11, %p1986_p8  ;;  %p1836_p4 = por %p1835_p1, %p1834_p0 }
  0x8d   : > { %p1830_p13 = pneg %p1829_p12 }
  0x8f   : > { %p1837_p7 = pnand %p1836_p4, %p1830_p13 }
  0x91   : > { %1840 = shalt.err (!%p1837_p7)
}
  0x92   : > { %1613 = dma.hbm_to_vmem [thread:$0]  (!%p1967_p5), %s2205_s6, 128, %s293_s23, [#allocation12]  }
  0x93   : > { %p2216_p9 = scmp.ne.s32.totalorder %s2211_s8, 0 }
  0x94   : > { %p2217_p2 = scmp.ne.s32.totalorder (!%p2216_p9), %s2210_s30, 0 }
  0x95   : > { %318 = sbr.rel (%p2216_p9) target bundleno = 897 (0x381), region = 48 }
  0x9c   : > { %1854 = dma.done.wait (%p2217_p2), [#allocation4], 512  }
  0x9d   : > { %1856 = vsyncadd (%p2217_p2), [#allocation4], 4294966784 }
  0x9e   : > { %1858 = dma.done.wait (%p2217_p2), [#allocation6], 528  }
  0x9f   : > { %1860 = vsyncadd (%p2217_p2), [#allocation6], 4294966768 }
  0xa0   : > { %1862 = dma.done.wait (%p2217_p2), [#allocation9], 8208  }
  0xa1   : > { %1864 = vsyncadd (%p2217_p2), [#allocation9], 4294959088 }
  0xa2   : > { %1866 = dma.done.wait (%p2217_p2), [#allocation12], 128  }
  0xa3   : > { %1868 = vsyncadd (%p2217_p2), [#allocation12], 4294967168  ;;  %p374_p5 = scmp.lt.s32.totalorder %s1871_s24, 1  ;;  %v1891_v0 = vmov 0.0   ;;  %vm1892_vm0 = vmmov 0   ;;  %v1664_v1 = vld [vmem:[#allocation3] sm:$0xff]  }
  0xa4   : > { %1547 = vmatprep.subr.bf16.mxu0 %v1891_v0  ;;  %1555 = vmatprep.mubr.msk.bf16.mxu0 %vm1892_vm0, %v1891_v0  ;;  %v1665_v2 = vld [vmem:[#allocation3 + $0x8] sm:$0xff]   ;;  %v1666_v4 = vld [vmem:[#allocation3 + $0x10] sm:$0xff]   ;;  %v1667_v6 = vld [vmem:[#allocation3 + $0x18] sm:$0xff]   ;;  %vm439_vm1 = vcmask 523264  }
  0xa5   : > { %1559 = vmatprep.subr.bf16.mxu1 %v1891_v0  ;;  %1567 = vmatprep.mubr.msk.bf16.mxu1 %vm1892_vm0, %v1891_v0  ;;  %s2223_s24 = smov (!%p374_p5, %s1871_s24), 1  ;;  %v1669_v3 = vld [vmem:[#allocation7] sm:$0xff]   ;;  %v1670_v5 = vld [vmem:[#allocation7 + $0x8] sm:$0xff]   ;;  %v1671_v8 = vld [vmem:[#allocation7 + $0x10] sm:$0xff]  }
  0xa6   : > { %s1536_s8 = sshll.u32 %s2223_s24, 3  ;;  %1548 = vmatpush3.bf16.msra.mxu0 %v1664_v1  ;;  %1560 = vmatpush3.bf16.msra.mxu1 %v1669_v3  ;;  %v1672_v9 = vld [vmem:[#allocation7 + $0x18] sm:$0xff]   ;;  %v572_v10 = vld [vmem:[#allocation10] sm:$0xff]  ;;  %v573_v12 = vld [vmem:[#allocation10 + $0x8] sm:$0xff] }
  0xa7   : > { %1549 = vmatprep.subr.bf16.mxu0 %v1891_v0  ;;  %s381_s19 = scalar_lea.vmem %s2199_s0, %s1536_s8  ;;  %1561 = vmatprep.subr.bf16.mxu1 %v1891_v0  ;;  %v576_v11 = vld [vmem:[#allocation10 + $0x20] sm:$0xff]  ;;  %v577_v15 = vld [vmem:[#allocation10 + $0x28] sm:$0xff]  ;;  %v1457_v38 = vld [vmem:[#allocation5] ss:$0 sm:$0xff]  ;;  %s386_s21 = scalar_lea.vmem %s2206_s7, %s1536_s8 }
  0xa8   : > { %v1668_v7 = vld [vmem:[%s381_s19] sm:$0xff]   ;;  %v1470_v13 = vcombine.low %v572_v10, %v576_v11  ;;  %v1471_v14 = vcombine.high %v572_v10, %v576_v11  ;;  %v1472_v18 = vcombine.low %v573_v12, %v577_v15  ;;  %v1473_v19 = vcombine.high %v573_v12, %v577_v15  ;;  %v581_v45 = vld [vmem:[#allocation10 + $0x48] sm:$0xff] }
  0xa9   : > { %v580_v16 = vld [vmem:[#allocation10 + $0x40] sm:$0xff]  ;;  %v585_v46 = vld [vmem:[#allocation10 + $0x68] sm:$0xff] }
  0xaa   : > { %1550 = vmatpush3.bf16.msra.mxu0 %v1665_v2  ;;  %1562 = vmatpush3.bf16.msra.mxu1 %v1670_v5  ;;  %v584_v17 = vld [vmem:[#allocation10 + $0x60] sm:$0xff]  ;;  %v1481_v50 = vcombine.high %v581_v45, %v585_v46  ;;  %v589_v51 = vld [vmem:[#allocation10 + $0x88] sm:$0xff]  ;;  %v1480_v53 = vcombine.low %v581_v45, %v585_v46  ;;  %v590_v45 = vld [vmem:[#allocation10 + $0x90] sm:$0xff] }
  0xab   : > { %1551 = vmatprep.subr.bf16.mxu0 %v1891_v0  ;;  %1563 = vmatprep.subr.bf16.mxu1 %v1891_v0  ;;  %v1479_v20 = vcombine.high %v580_v16, %v584_v17  ;;  %v1478_v21 = vcombine.low %v580_v16, %v584_v17  ;;  %v588_v22 = vld [vmem:[#allocation10 + $0x80] sm:$0xff]  ;;  %v593_v52 = vld [vmem:[#allocation10 + $0xa8] sm:$0xff]  ;;  %v594_v46 = vld [vmem:[#allocation10 + $0xb0] sm:$0xff] }
  0xac   : > { %v592_v23 = vld [vmem:[#allocation10 + $0xa0] sm:$0xff]  ;;  %v1489_v54 = vcombine.high %v589_v51, %v593_v52  ;;  %v597_v55 = vld [vmem:[#allocation10 + $0xc8] sm:$0xff]  ;;  %v1488_v57 = vcombine.low %v589_v51, %v593_v52  ;;  %v1491_v51 = vcombine.high %v590_v45, %v594_v46 }
  0xad   : > { %v1487_v24 = vcombine.high %v588_v22, %v592_v23  ;;  %v1486_v25 = vcombine.low %v588_v22, %v592_v23  ;;  %v596_v26 = vld [vmem:[#allocation10 + $0xc0] sm:$0xff]  ;;  %v601_v56 = vld [vmem:[#allocation10 + $0xe8] sm:$0xff]  ;;  %v575_v22 = vld [vmem:[#allocation10 + $0x18] sm:$0xff] }
  0xae   : > { %1552 = vmatpush3.bf16.msra.mxu0 %v1666_v4  ;;  %1564 = vmatpush3.bf16.msra.mxu1 %v1671_v8  ;;  %v600_v27 = vld [vmem:[#allocation10 + $0xe0] sm:$0xff]  ;;  %v1497_v58 = vcombine.high %v597_v55, %v601_v56  ;;  %v605_v59 = vld [vmem:[#allocation10 + $0x108] sm:$0xff]  ;;  %v1496_v61 = vcombine.low %v597_v55, %v601_v56  ;;  %v599_v55 = vld [vmem:[#allocation10 + $0xd8] sm:$0xff] }
  0xaf   : > { %1553 = vmatprep.subr.bf16.mxu0 %v1891_v0  ;;  %1565 = vmatprep.subr.bf16.mxu1 %v1891_v0  ;;  %v1495_v28 = vcombine.high %v596_v26, %v600_v27  ;;  %v1494_v29 = vcombine.low %v596_v26, %v600_v27  ;;  %v604_v30 = vld [vmem:[#allocation10 + $0x100] sm:$0xff]  ;;  %v609_v60 = vld [vmem:[#allocation10 + $0x128] sm:$0xff]  ;;  %v603_v56 = vld [vmem:[#allocation10 + $0xf8] sm:$0xff] }
  0xb0   : > { %v608_v31 = vld [vmem:[#allocation10 + $0x120] sm:$0xff]  ;;  %v1505_v62 = vcombine.high %v605_v59, %v609_v60  ;;  %v613_v63 = vld [vmem:[#allocation10 + $0x148] sm:$0xff]  ;;  %v1504_v1 = vcombine.low %v605_v59, %v609_v60  ;;  %v1501_v60 = vcombine.high %v599_v55, %v603_v56 }
  0xb1   : > { %v1503_v32 = vcombine.high %v604_v30, %v608_v31  ;;  %v1502_v33 = vcombine.low %v604_v30, %v608_v31  ;;  %v612_v34 = vld [vmem:[#allocation10 + $0x140] sm:$0xff]  ;;  %v617_v0 = vld [vmem:[#allocation10 + $0x168] sm:$0xff] }
  0xb2   : > { %1554 = vmatpush3.bf16.msra.mxu0 %v1667_v6  ;;  %1566 = vmatpush3.bf16.msra.mxu1 %v1672_v9  ;;  %v616_v35 = vld [vmem:[#allocation10 + $0x160] sm:$0xff]  ;;  %v1513_v2 = vcombine.high %v613_v63, %v617_v0  ;;  %v1512_v3 = vcombine.low %v613_v63, %v617_v0  ;;  %v621_v6 = vld [vmem:[#allocation10 + $0x188] sm:$0xff]  ;;  %v607_v63 = vld [vmem:[#allocation10 + $0x118] sm:$0xff] }
  0xb3   : > { %999 = vmatprep.subr.bf16.mxu0 %v1471_v14  ;;  %1042 = vmatprep.subr.bf16.mxu1 %v1473_v19  ;;  %v1511_v36 = vcombine.high %v612_v34, %v616_v35  ;;  %v1510_v37 = vcombine.low %v612_v34, %v616_v35  ;;  %v620_v4 = vld [vmem:[#allocation10 + $0x180] sm:$0xff]  ;;  %v625_v8 = vld [vmem:[#allocation10 + $0x1a8] sm:$0xff]  ;;  %v611_v0 = vld [vmem:[#allocation10 + $0x138] sm:$0xff] }
  0xb4   : > { %v624_v5 = vld [vmem:[#allocation10 + $0x1a0] sm:$0xff]  ;;  %v1520_v10 = vcombine.low %v621_v6, %v625_v8  ;;  %v1521_v11 = vcombine.high %v621_v6, %v625_v8  ;;  %v629_v14 = vld [vmem:[#allocation10 + $0x1c8] sm:$0xff]  ;;  %v618_v6 = vld [vmem:[#allocation10 + $0x170] sm:$0xff] }
  0xb5   : > { %1556 = vmatmul.mubr.msk.bf16.vlgmr.msra.gmra.mrb[0].mxu0 %vm439_vm1, %v1668_v7  ;;  %v1519_v7 = vcombine.high %v620_v4, %v624_v5  ;;  %v1518_v9 = vcombine.low %v620_v4, %v624_v5  ;;  %v628_v12 = vld [vmem:[#allocation10 + $0x1c0] sm:$0xff]  ;;  %v633_v16 = vld [vmem:[#allocation10 + $0x1e8] sm:$0xff]  ;;  %v1509_v4 = vcombine.high %v607_v63, %v611_v0  ;;  %v614_v5 = vld [vmem:[#allocation10 + $0x150] sm:$0xff] }
  0xb6   : > { %1000 = vmatpush1.bf16.msra.mxu0 %v1470_v13  ;;  %v632_v13 = vld [vmem:[#allocation10 + $0x1e0] sm:$0xff]  ;;  %v1529_v19 = vcombine.high %v629_v14, %v633_v16  ;;  %v619_v8 = vld [vmem:[#allocation10 + $0x178] sm:$0xff] }
  0xb7   : > { %1001 = vmatprep.subr.bf16.mxu0 %v1479_v20  ;;  %v1527_v15 = vcombine.high %v628_v12, %v632_v13  ;;  %v1526_v17 = vcombine.low %v628_v12, %v632_v13  ;;  %v574_v20 = vld [vmem:[#allocation10 + $0x10] sm:$0xff] }
  0xb8   : > { %v622_v13 = vld [vmem:[#allocation10 + $0x190] sm:$0xff] }
  0xba   : > { %1002 = vmatpush1.bf16.msra.mxu0 %v1478_v21  ;;  %v578_v21 = vld [vmem:[#allocation10 + $0x30] sm:$0xff] }
  0xbb   : > { %1003 = vmatprep.subr.bf16.mxu0 %v1487_v24  ;;  %v1475_v23 = vcombine.high %v574_v20, %v578_v21  ;;  %v579_v24 = vld [vmem:[#allocation10 + $0x38] sm:$0xff] }
  0xbc   : > { %v1476_v26 = vcombine.low %v575_v22, %v579_v24  ;;  %v1477_v27 = vcombine.high %v575_v22, %v579_v24  ;;  %v634_v22 = vld [vmem:[#allocation10 + $0x1f0] sm:$0xff]  ;;  %v635_v24 = vld [vmem:[#allocation10 + $0x1f8] sm:$0xff] }
  0xbe   : > { %1004 = vmatpush1.bf16.msra.mxu0 %v1486_v25  ;;  %v1474_v25 = vcombine.low %v574_v20, %v578_v21  ;;  %v630_v21 = vld [vmem:[#allocation10 + $0x1d0] sm:$0xff] }
  0xbf   : > { %1005 = vmatprep.subr.bf16.mxu0 %v1495_v28  ;;  %v1893_v28 = vmov 0  }
  0xc0   : > { %1031 = vmatprep.mubr.bf16.mxu0 %v1893_v28 }
  0xc2   : > { %1006 = vmatpush1.bf16.msra.mxu0 %v1494_v29  ;;  %v1464_v29 = vld [vmem:[#allocation8] ss:$0 sm:$0xff] }
  0xc3   : > { %1007 = vmatprep.subr.bf16.mxu0 %v1503_v32 }
  0xc6   : > { %1008 = vmatpush1.bf16.msra.mxu0 %v1502_v33 }
  0xc7   : > { %1009 = vmatprep.subr.bf16.mxu0 %v1511_v36  ;;  %v582_v36 = vld [vmem:[#allocation10 + $0x50] sm:$0xff] }
  0xca   : > { %1010 = vmatpush1.bf16.msra.mxu0 %v1510_v37  ;;  %v586_v37 = vld [vmem:[#allocation10 + $0x70] sm:$0xff] }
  0xcb   : > { %1011 = vmatprep.subr.bf16.mxu0 %v1519_v7  ;;  %v615_v7 = vld [vmem:[#allocation10 + $0x158] sm:$0xff] }
  0xcc   : > { %v1517_v12 = vcombine.high %v615_v7, %v619_v8 }
  0xce   : > { %1012 = vmatpush1.bf16.msra.mxu0 %v1518_v9 }
  0xcf   : > { %1013 = vmatprep.subr.bf16.mxu0 %v1527_v15  ;;  %v623_v15 = vld [vmem:[#allocation10 + $0x198] sm:$0xff] }
  0xd2   : > { %1014 = vmatpush1.bf16.msra.mxu0 %v1526_v17  ;;  %v1514_v17 = vcombine.low %v614_v5, %v618_v6 }
  0xd3   : > { %1085 = vmatprep.subr.bf16.mxu0 %v1475_v23  ;;  %v631_v23 = vld [vmem:[#allocation10 + $0x1d8] sm:$0xff] }
 0x188   : > { %v477_v39 = vpop.f32.mrb[0].mxu0 }
 0x189   : > { %v478_v40 = vadd.f32 %v1457_v38, %v477_v39  ;;  %v1557_v41 = vpop.f32.mrb[1].mxu0  ;;  %v587_v39 = vld [vmem:[#allocation10 + $0x78] sm:$0xff] }
 0x18a   : > { %v480_v42 = vpop.f32.mrb[2].mxu0 }
 0x18b   : > { %v481_v43 = vadd.f32 %v1457_v38, %v480_v42  ;;  %v1558_v44 = vpop.f32.mrb[3].mxu0  ;;  %v484_v47 = vmax.f32 %v478_v40, 0.0  ;;  %v583_v38 = vld [vmem:[#allocation10 + $0x58] sm:$0xff] }
 0x18c   : > { %v1485_v44 = vcombine.high %v583_v38, %v587_v39 }
 0x18d   : > { %v485_v48 = vmax.f32 %v481_v43, 0.0  ;;  %v1483_v43 = vcombine.high %v582_v36, %v586_v37 }
 0x18f   : > { %v494_v49 = vpack.c.bf16 %v485_v48, %v484_v47  ;;  %v591_v47 = vld [vmem:[#allocation10 + $0x98] sm:$0xff] }
 0x190   : > { %v595_v48 = vld [vmem:[#allocation10 + $0xb8] sm:$0xff] }
 0x191   : > { %1568 = vmatmul.mubr.msk.bf16.vlgmr.msra.gmra.mrb[0].mxu1 %vm439_vm1, %v494_v49  ;;  %v1482_v49 = vcombine.low %v582_v36, %v586_v37  ;;  %v1493_v52 = vcombine.high %v591_v47, %v595_v48 }
 0x192   : > { %1043 = vmatpush1.bf16.msra.mxu1 %v1472_v18  ;;  %v1528_v18 = vcombine.low %v629_v14, %v633_v16  ;;  %1074 = vmatprep.mubr.bf16.mxu1 %v1893_v28  ;;  %v626_v14 = vld [vmem:[#allocation10 + $0x1b0] sm:$0xff]  ;;  %v627_v16 = vld [vmem:[#allocation10 + $0x1b8] sm:$0xff] }
 0x193   : > { %1044 = vmatprep.subr.bf16.mxu1 %v1481_v50  ;;  %v1484_v50 = vcombine.low %v583_v38, %v587_v39  ;;  %v1525_v20 = vcombine.high %v623_v15, %v627_v16 }
 0x196   : > { %1045 = vmatpush1.bf16.msra.mxu1 %v1480_v53  ;;  %v598_v53 = vld [vmem:[#allocation10 + $0xd0] sm:$0xff] }
 0x197   : > { %1046 = vmatprep.subr.bf16.mxu1 %v1489_v54  ;;  %v602_v54 = vld [vmem:[#allocation10 + $0xf0] sm:$0xff] }
 0x198   : > { %v1499_v59 = vcombine.high %v598_v53, %v602_v54 }
 0x19a   : > { %1047 = vmatpush1.bf16.msra.mxu1 %v1488_v57  ;;  %v1490_v57 = vcombine.low %v590_v45, %v594_v46 }
 0x19b   : > { %1048 = vmatprep.subr.bf16.mxu1 %v1497_v58  ;;  %v1492_v58 = vcombine.low %v591_v47, %v595_v48 }
 0x19e   : > { %1049 = vmatpush1.bf16.msra.mxu1 %v1496_v61  ;;  %v606_v61 = vld [vmem:[#allocation10 + $0x110] sm:$0xff] }
 0x19f   : > { %1050 = vmatprep.subr.bf16.mxu1 %v1505_v62  ;;  %v610_v62 = vld [vmem:[#allocation10 + $0x130] sm:$0xff] }
 0x1a0   : > { %v1506_v9 = vcombine.low %v606_v61, %v610_v62 }
 0x1a2   : > { %1051 = vmatpush1.bf16.msra.mxu1 %v1504_v1  ;;  %v1498_v1 = vcombine.low %v598_v53, %v602_v54 }
 0x1a3   : > { %1052 = vmatprep.subr.bf16.mxu1 %v1513_v2  ;;  %v1500_v2 = vcombine.low %v599_v55, %v603_v56 }
 0x1a6   : > { %1053 = vmatpush1.bf16.msra.mxu1 %v1512_v3  ;;  %v1507_v3 = vcombine.high %v606_v61, %v610_v62 }
 0x1a7   : > { %1054 = vmatprep.subr.bf16.mxu1 %v1521_v11  ;;  %v1515_v11 = vcombine.high %v614_v5, %v618_v6 }
 0x1aa   : > { %1055 = vmatpush1.bf16.msra.mxu1 %v1520_v10  ;;  %v1508_v10 = vcombine.low %v607_v63, %v611_v0 }
 0x1ab   : > { %1056 = vmatprep.subr.bf16.mxu1 %v1529_v19  ;;  %v1523_v19 = vcombine.high %v622_v13, %v626_v14 }
 0x1ae   : > { %1057 = vmatpush1.bf16.msra.mxu1 %v1528_v18  ;;  %v1516_v18 = vcombine.low %v615_v7, %v619_v8 }
 0x1af   : > { %1128 = vmatprep.subr.bf16.mxu1 %v1477_v27  ;;  %v1531_v27 = vcombine.high %v630_v21, %v634_v22 }
 0x264   : > { %v563_v30 = vpop.f32.mrb[0].mxu1 }
 0x265   : > { %v564_v31 = vadd.f32 %v1464_v29, %v563_v30  ;;  %v1569_v32 = vpop.f32.mrb[1].mxu1  ;;  %v1532_v30 = vcombine.low %v631_v23, %v635_v24 }
 0x266   : > { %v566_v33 = vpop.f32.mrb[2].mxu1 }
 0x267   : > { %v567_v34 = vadd.f32 %v1464_v29, %v566_v33  ;;  %v1570_v35 = vpop.f32.mrb[3].mxu1  ;;  %v570_v40 = vmax.f32 %v564_v31, 0.0  ;;  %v1530_v29 = vcombine.low %v630_v21, %v634_v22  ;;  %v639_v31 = vlaneseq }
 0x268   : > { %v2151_v35 = vld [vmem:[#allocation11] sm:$0xff] }
 0x269   : > { %v571_v41 = vmax.f32 %v567_v34, 0.0  ;;  %v2147_v32 = vshrl.u32 %v639_v31, 7 }
 0x26b   : > { %v2141_v42 = vpack.c.bf16 %v571_v41, %v570_v40  ;;  %v641_v33 = vsub.s32 0, %v2147_v32  ;;  %v649_v34 = vsub.s32 2, %v2147_v32  ;;  %v645_v36 = vsub.s32 1, %v2147_v32 }
 0x26c   : > { %v653_v37 = vsub.s32 3, %v2147_v32 }
 0x26d   : > { %1032 = vmatmul.mubr.bf16.vlgmr.msra.gmra.mrb[4].mxu0 %v2141_v42  ;;  %1075 = vmatmul.mubr.bf16.vlgmr.msra.gmra.mrb[4].mxu1 %v2141_v42  ;;  %v642_v38 = vrot.slane %v2151_v35, %v641_v33  ;;  %v650_v39 = vrot.slane %v2151_v35, %v649_v34  ;;  %v646_v40 = vrot.slane %v2151_v35, %v645_v36 }
 0x26e   : > { %1086 = vmatpush1.bf16.msra.mxu0 %v1474_v25  ;;  %1129 = vmatpush1.bf16.msra.mxu1 %v1476_v26  ;;  %v1522_v25 = vcombine.low %v622_v13, %v626_v14  ;;  %v1524_v26 = vcombine.low %v623_v15, %v627_v16  ;;  %v654_v41 = vrot.slane %v2151_v35, %v653_v37  ;;  %v1894_v13 = vmov 1966171168  }
 0x26f   : > { %1087 = vmatprep.subr.bf16.mxu0 %v1483_v43  ;;  %1130 = vmatprep.subr.bf16.mxu1 %v1485_v44  ;;  %v1257_v14 = vunpack.c.l.s4 %v1894_v13 }
 0x270   : > { %1117 = vmatprep.mubr.bf16.mxu0 %v1893_v28  ;;  %1160 = vmatprep.mubr.bf16.mxu1 %v1893_v28  ;;  %v1533_v28 = vcombine.high %v631_v23, %v635_v24 }
 0x271   : > { %v1258_v23 = vunpack.c.0.s8 %v1257_v14 }
 0x272   : > { %1088 = vmatpush1.bf16.msra.mxu0 %v1482_v49  ;;  %1131 = vmatpush1.bf16.msra.mxu1 %v1484_v50 }
 0x273   : > { %1089 = vmatprep.subr.bf16.mxu0 %v1491_v51  ;;  %1132 = vmatprep.subr.bf16.mxu1 %v1493_v52  ;;  %v2160_v33 = vsub.s32 %v1258_v23, %v2147_v32 }
 0x276   : > { %1090 = vmatpush1.bf16.msra.mxu0 %v1490_v57  ;;  %1133 = vmatpush1.bf16.msra.mxu1 %v1492_v58 }
 0x277   : > { %1091 = vmatprep.subr.bf16.mxu0 %v1499_v59  ;;  %1134 = vmatprep.subr.bf16.mxu1 %v1501_v60 }
 0x27a   : > { %1092 = vmatpush1.bf16.msra.mxu0 %v1498_v1  ;;  %1135 = vmatpush1.bf16.msra.mxu1 %v1500_v2 }
 0x27b   : > { %1093 = vmatprep.subr.bf16.mxu0 %v1507_v3  ;;  %1136 = vmatprep.subr.bf16.mxu1 %v1509_v4 }
 0x27e   : > { %1094 = vmatpush1.bf16.msra.mxu0 %v1506_v9  ;;  %1137 = vmatpush1.bf16.msra.mxu1 %v1508_v10 }
 0x27f   : > { %1095 = vmatprep.subr.bf16.mxu0 %v1515_v11  ;;  %1138 = vmatprep.subr.bf16.mxu1 %v1517_v12 }
 0x282   : > { %1096 = vmatpush1.bf16.msra.mxu0 %v1514_v17  ;;  %1139 = vmatpush1.bf16.msra.mxu1 %v1516_v18 }
 0x283   : > { %1097 = vmatprep.subr.bf16.mxu0 %v1523_v19  ;;  %1140 = vmatprep.subr.bf16.mxu1 %v1525_v20 }
 0x286   : > { %1098 = vmatpush1.bf16.msra.mxu0 %v1522_v25  ;;  %1141 = vmatpush1.bf16.msra.mxu1 %v1524_v26 }
 0x287   : > { %1099 = vmatprep.subr.bf16.mxu0 %v1531_v27  ;;  %1142 = vmatprep.subr.bf16.mxu1 %v1533_v28 }
 0x28a   : > { %1100 = vmatpush1.bf16.msra.mxu0 %v1530_v29  ;;  %1143 = vmatpush1.bf16.msra.mxu1 %v1532_v30 }
 0x28d   : > { %1118 = vmatmul.mubr.bf16.vlgmr.msra.gmra.mrb[8].mxu0 %v2141_v42  ;;  %1161 = vmatmul.mubr.bf16.vlgmr.msra.gmra.mrb[8].mxu1 %v2141_v42 }
 0x340   : > { %v1033_v42 = vpop.f32.mrb[4].mxu0  ;;  %v1076_v43 = vpop.f32.mrb[4].mxu1 }
 0x341   : > { %v1034_v44 = vadd.f32 %v1033_v42, %v642_v38  ;;  %v1077_v45 = vadd.f32 %v1076_v43, %v650_v39  ;;  %v1035_v46 = vpop.f32.mrb[5].mxu0  ;;  %v1078_v47 = vpop.f32.mrb[5].mxu1  ;;  %v661_v43 = vsub.s32 5, %v2147_v32 }
 0x342   : > { %v1036_v48 = vadd.f32 %v1035_v46, %v646_v40  ;;  %v1079_v49 = vadd.f32 %v1078_v47, %v654_v41  ;;  %v1037_v50 = vpop.f32.mrb[6].mxu0  ;;  %v1080_v51 = vpop.f32.mrb[6].mxu1 }
 0x343   : > { %v1038_v52 = vadd.f32 %v1037_v50, %v642_v38  ;;  %v1081_v53 = vadd.f32 %v1080_v51, %v650_v39  ;;  %v1039_v54 = vpop.f32.mrb[7].mxu0  ;;  %v1082_v55 = vpop.f32.mrb[7].mxu1  ;;  %v1171_v58 = vmax.f32 %v1034_v44, 0.0  ;;  %v1173_v59 = vmax.f32 %v1077_v45, 0.0 }
 0x344   : > { %v1040_v56 = vadd.f32 %v1039_v54, %v646_v40  ;;  %v1083_v57 = vadd.f32 %v1082_v55, %v654_v41  ;;  %v1172_v62 = vmax.f32 %v1036_v48, 0.0  ;;  %v1174_v63 = vmax.f32 %v1079_v49, 0.0 }
 0x345   : > { %v1179_v60 = vmax.f32 %v1038_v52, 0.0  ;;  %v1181_v61 = vmax.f32 %v1081_v53, 0.0  ;;  %v657_v40 = vsub.s32 4, %v2147_v32  ;;  %v665_v41 = vsub.s32 6, %v2147_v32 }
 0x346   : > { %v1180_v0 = vmax.f32 %v1040_v56, 0.0  ;;  %v1182_v1 = vmax.f32 %v1083_v57, 0.0  ;;  %v669_v44 = vsub.s32 7, %v2147_v32  ;;  %v662_v47 = vrot.slane %v2151_v35, %v661_v43 }
 0x347   : > { %v1188_v2 = vmax.f32 %v1171_v58, %v1179_v60  ;;  %v1202_v3 = vmax.f32 %v1173_v59, %v1181_v61  ;;  %v658_v45 = vrot.slane %v2151_v35, %v657_v40  ;;  %v666_v46 = vrot.slane %v2151_v35, %v665_v41 }
 0x348   : > { %v1195_v4 = vmax.f32 %v1172_v62, %v1180_v0  ;;  %v1209_v5 = vmax.f32 %v1174_v63, %v1182_v1  ;;  %v670_v48 = vrot.slane %v2151_v35, %v669_v44 }
 0x349   : > { %v1189_v6 = vrot.slane %v1188_v2, 4  ;;  %v1203_v7 = vrot.slane %v1202_v3, 4 }
 0x34a   : > { %v1196_v8 = vrot.slane %v1195_v4, 4  ;;  %v1210_v9 = vrot.slane %v1209_v5, 4 }
 0x34b   : > { %v1190_v10 = vmax.f32 %v1188_v2, %v1189_v6  ;;  %v1204_v11 = vmax.f32 %v1202_v3, %v1203_v7 }
 0x34c   : > { %v1197_v12 = vmax.f32 %v1195_v4, %v1196_v8  ;;  %v1211_v15 = vmax.f32 %v1209_v5, %v1210_v9 }
 0x34d   : > { %v1191_v16 = vrot.slane %v1190_v10, 2  ;;  %v1205_v17 = vrot.slane %v1204_v11, 2 }
 0x34e   : > { %v1198_v18 = vrot.slane %v1197_v12, 2  ;;  %v1212_v19 = vrot.slane %v1211_v15, 2 }
 0x34f   : > { %v1192_v20 = vmax.f32 %v1190_v10, %v1191_v16  ;;  %v1206_v21 = vmax.f32 %v1204_v11, %v1205_v17 }
 0x350   : > { %v1199_v22 = vmax.f32 %v1197_v12, %v1198_v18  ;;  %v1213_v24 = vmax.f32 %v1211_v15, %v1212_v19 }
 0x351   : > { %v1193_v25 = vrot.slane %v1192_v20, 1  ;;  %v1207_v26 = vrot.slane %v1206_v21, 1 }
 0x352   : > { %v1200_v27 = vrot.slane %v1199_v22, 1  ;;  %v1214_v28 = vrot.slane %v1213_v24, 1 }
 0x353   : > { %v1194_v29 = vmax.f32 %v1192_v20, %v1193_v25  ;;  %v1208_v30 = vmax.f32 %v1206_v21, %v1207_v26 }
 0x354   : > { %v1201_v31 = vmax.f32 %v1199_v22, %v1200_v27  ;;  %v1215_v34 = vmax.f32 %v1213_v24, %v1214_v28 }
 0x356   : > { %v1252_v36 = vcombine.low %v1194_v29, %v1201_v31  ;;  %v1253_v37 = vcombine.low %v1208_v30, %v1215_v34 }
 0x358   : > { %v2163_v38 = vrot.slane %v1252_v36, %v2160_v33  ;;  %v2166_v39 = vrot.slane %v1253_v37, %v2160_v33 }
 0x35a   : > { %v1284_v42 = vcombine.low %v2163_v38, %v2166_v39 }
 0x360   : > { %v1119_v49 = vpop.f32.mrb[8].mxu0  ;;  %v1162_v50 = vpop.f32.mrb[8].mxu1 }
 0x361   : > { %v1120_v51 = vadd.f32 %v1119_v49, %v658_v45  ;;  %v1163_v52 = vadd.f32 %v1162_v50, %v666_v46  ;;  %v1121_v53 = vpop.f32.mrb[9].mxu0  ;;  %v1164_v54 = vpop.f32.mrb[9].mxu1 }
 0x362   : > { %v1122_v55 = vadd.f32 %v1121_v53, %v662_v47  ;;  %v1165_v56 = vadd.f32 %v1164_v54, %v670_v48  ;;  %v1123_v57 = vpop.f32.mrb[10].mxu0  ;;  %v1166_v58 = vpop.f32.mrb[10].mxu1 }
 0x363   : > { %v1124_v59 = vadd.f32 %v1123_v57, %v658_v45  ;;  %v1167_v32 = vadd.f32 %v1166_v58, %v666_v46  ;;  %v1125_v60 = vpop.f32.mrb[11].mxu0  ;;  %v1168_v61 = vpop.f32.mrb[11].mxu1  ;;  %v1175_v0 = vmax.f32 %v1120_v51, 0.0  ;;  %v1177_v1 = vmax.f32 %v1163_v52, 0.0 }
 0x364   : > { %v1126_v62 = vadd.f32 %v1125_v60, %v662_v47  ;;  %v1169_v63 = vadd.f32 %v1168_v61, %v670_v48  ;;  %v1176_v3 = vmax.f32 %v1122_v55, 0.0  ;;  %v1178_v4 = vmax.f32 %v1165_v56, 0.0 }
 0x365   : > { %v1183_v2 = vmax.f32 %v1124_v59, 0.0  ;;  %v1185_v35 = vmax.f32 %v1167_v32, 0.0  ;;  %v1292_v46 = vrot.slane %v1284_v42, %v2160_v33 }
 0x366   : > { %v1184_v5 = vmax.f32 %v1126_v62, 0.0  ;;  %v1186_v6 = vmax.f32 %v1169_v63, 0.0 }
 0x367   : > { %v1216_v7 = vmax.f32 %v1175_v0, %v1183_v2  ;;  %v1230_v8 = vmax.f32 %v1177_v1, %v1185_v35 }
 0x368   : > { %v1223_v9 = vmax.f32 %v1176_v3, %v1184_v5  ;;  %v1237_v10 = vmax.f32 %v1178_v4, %v1186_v6 }
 0x369   : > { %v1217_v11 = vrot.slane %v1216_v7, 4  ;;  %v1231_v12 = vrot.slane %v1230_v8, 4 }
 0x36a   : > { %v1224_v13 = vrot.slane %v1223_v9, 4  ;;  %v1238_v14 = vrot.slane %v1237_v10, 4 }
 0x36b   : > { %v1218_v15 = vmax.f32 %v1216_v7, %v1217_v11  ;;  %v1232_v16 = vmax.f32 %v1230_v8, %v1231_v12 }
 0x36c   : > { %v1225_v17 = vmax.f32 %v1223_v9, %v1224_v13  ;;  %v1239_v18 = vmax.f32 %v1237_v10, %v1238_v14 }
 0x36d   : > { %v1219_v19 = vrot.slane %v1218_v15, 2  ;;  %v1233_v20 = vrot.slane %v1232_v16, 2 }
 0x36e   : > { %v1226_v21 = vrot.slane %v1225_v17, 2  ;;  %v1240_v22 = vrot.slane %v1239_v18, 2 }
 0x36f   : > { %v1220_v23 = vmax.f32 %v1218_v15, %v1219_v19  ;;  %v1234_v24 = vmax.f32 %v1232_v16, %v1233_v20 }
 0x370   : > { %v1227_v25 = vmax.f32 %v1225_v17, %v1226_v21  ;;  %v1241_v26 = vmax.f32 %v1239_v18, %v1240_v22 }
 0x371   : > { %v1221_v27 = vrot.slane %v1220_v23, 1  ;;  %v1235_v28 = vrot.slane %v1234_v24, 1 }
 0x372   : > { %v1228_v29 = vrot.slane %v1227_v25, 1  ;;  %v1242_v30 = vrot.slane %v1241_v26, 1 }
 0x373   : > { %v1222_v31 = vmax.f32 %v1220_v23, %v1221_v27  ;;  %v1236_v34 = vmax.f32 %v1234_v24, %v1235_v28 }
 0x374   : > { %v1229_v36 = vmax.f32 %v1227_v25, %v1228_v29  ;;  %v1243_v37 = vmax.f32 %v1241_v26, %v1242_v30 }
 0x376   : > { %v1254_v40 = vcombine.low %v1222_v31, %v1229_v36  ;;  %v1255_v41 = vcombine.low %v1236_v34, %v1243_v37 }
 0x378   : > { %v1276_v43 = vrot.slane %v1254_v40, %v2160_v33  ;;  %v1283_v44 = vrot.slane %v1255_v41, %v2160_v33 }
 0x37a   : > { %v1285_v45 = vcombine.low %v1276_v43, %v1283_v44 }
 0x37c   : > { %v1299_v47 = vrot.slane %v1285_v45, %v2160_v33 }
 0x37e   : > { %v1300_v48 = vcombine.low %v1292_v46, %v1299_v47 }
 0x380   : > { %1308 = vst [vmem:[%s386_s21] sm:$0xff] %v1300_v48 }
 0x381 PF: > { %s21_s26 = sadd.s32 1, %s1879_s26   ;;  %s2218_s24 = smov %s1875_s25 }
 0x382   : > { %p18_p8 = scmp.ge.s32.totalorder %s21_s26, 4   ;;  %s2219_s25 = smov %s2221_s12 }
 0x384   :  { %20 = sbr.rel (!%p18_p8) target bundleno = 5 (0x5), region = 111 }
 0x38b   :  { %1328 = vsyncpa [#allocation4], 1 }
 0x38c   :  { %1330 = vsyncpa [#allocation4 + $0x1], 1 }
 0x38d   :  { %1331 = vsyncpa [#allocation6], 1 }
 0x38e   :  { %1332 = vsyncpa [#allocation9], 1 }
 0x38f   :  { %1333 = vsyncpa [#allocation12], 1 }

// kernel: model_forward.7
= control target key start
LH: loop header
LB: loop body
LE: loop exit
PB: predicated region body
PF: predicated region fallthrough
CT: control target
= control target key end

     0   :  { %12 = vsyncpa [#allocation4], 0  ;;  %s2237_s0 = inlined_call_operand.vmem [shape: f32[2,16,6], index: 0, kind: input, shape index: {}]   ;;  %s2238_s1 = inlined_call_operand.hbm [shape: bf16[6,64], index: 1, kind: input, shape index: {}]   ;;  %s2239_s2 = inlined_call_operand.hbm [shape: f32[1,64], index: 2, kind: input, shape index: {}]   ;;  %s2240_s3 = inlined_call_operand.hbm [shape: bf16[64,128], index: 3, kind: input, shape index: {}]   ;;  %s2241_s4 = inlined_call_operand.hbm [shape: f32[1,128], index: 4, kind: input, shape index: {}]   ;;  %s2242_s5 = inlined_call_operand.hbm [shape: bf16[128,1024], index: 5, kind: input, shape index: {}]   ;;  %s2243_s6 = inlined_call_operand.hbm [shape: f32[1,1024], index: 6, kind: input, shape index: {}]   ;;  %s2244_s7 = inlined_call_operand.vmem [shape: f32[2,1,1024], index: 7, kind: output, shape index: {}]  }
   0x1   :  { %13 = vsyncpa [#allocation6], 0 }
   0x2   :  { %14 = vsyncpa [#allocation9], 0 }
   0x3   :  { %15 = vsyncpa [#allocation12], 0  ;;  %s1945_s24 = smov 0   ;;  %s1947_s25 = smov 0  }
   0x4   :  { %s1949_s26 = smov 0  }
   0x5 LB: > { %s1886_s27 = smov [#allocation5]   ;;  %s1456_s29 = sadd.s32 4294967295, %s1884_s26   ;;  %s1884_s26 = sphi %s1949_s26, %s21_s26   ;;  %s1880_s25 = sphi %s1947_s25, %s2257_s25   ;;  %s1876_s24 = sphi %s1945_s24, %s2256_s24  }
   0x6   : > { %s242_s28 = sshll.u32 %s1886_s27, 4  ;;  %p1458_p0 = scmp.ge.s32.totalorder %s1884_s26, 1  ;;  %s243_s28 = int_to_ptr.vmem [resolvable:$true] %s242_s28 }
   0x7   : > { %p218_p1 = scmp.lt.s32.totalorder %s1884_s26, 3  ;;  %p1963_p2 = scmp.eq.s32.totalorder %s1456_s29, 0 }
   0x8   : > { %s1887_s9 = smov [#allocation8]   ;;  %s33_s12 = sadd.s32 1, %s1880_s25 }
   0x9   : > { %s2248_s30 = scalar_select %p1963_p2, 1, 0 }
   0xa   : > { %p1967_p3 = pnand %p1458_p0, %p218_p1  ;;  %s266_s10 = sshll.u32 %s1887_s9, 4  ;;  %s1973_s10 = int_to_ptr.vmem [resolvable:$true] %s266_s10 }
   0xb   : > { %p1984_p6 = scmp.ge.s32.totalorder %s33_s12, 2  ;;  %s1678_s16 = scalar_lea.hbm %s2239_s2, 16 }
   0xc   : > { %s2249_s8 = scalar_select %p1967_p3, 1, 0 }
   0xd   : > { %p1591_p4 = pneg %p1967_p3  ;;  %p1679_p7 = scmp.ne.s32.totalorder %s2239_s2, %s1678_s16 }
   0xe   : > { %s2251_s13 = scalar_select %p1984_p6, 1, 0 }
   0xf   : > { %p1977_p5 = pnand %p1963_p2, %p1591_p4  ;;  %p1685_p11 = scmp.lt.u32.totalorder %s1678_s16, %s2239_s2 }
  0x11   : > { %p1996_p8 = pneg %p1977_p5 }
  0x13   : > { %p1681_p9 = pnand %p1996_p8, %p1679_p7 }
  0x15   : > { %p1682_p10 = pneg %p1681_p9 }
  0x17   : > { %p1687_p12 = pnand %p1685_p11, %p1682_p10 }
  0x19   : > { %1690 = shalt.err (!%p1687_p12)
}
  0x1a   : > { %s1691_s22 = scalar_lea.vmem %s243_s28, 16  ;;  %s1698_s23 = scalar_lea.vmem %s243_s28, 32 }
  0x1b   : > { %p1692_p13 = scmp.ne.s32.totalorder %s243_s28, %s1691_s22  ;;  %p1699_p4 = scmp.lt.s32.totalorder %s243_s28, %s243_s28 }
  0x1c   : > { %p1700_p2 = scmp.lt.s32.totalorder %s1698_s23, %s1691_s22 }
  0x1d   : > { %p1694_p0 = pnand %p1692_p13, %p1996_p8 }
  0x1e   : > { %p1701_p3 = por %p1700_p2, %p1699_p4 }
  0x1f   : > { %p1695_p1 = pneg %p1694_p0 }
  0x21   : > { %p1702_p6 = pnand %p1701_p3, %p1695_p1 }
  0x23   : > { %1705 = shalt.err (!%p1702_p6)
}
  0x24   : > { %1597 = dma.hbm_to_vmem [thread:$0]  (!%p1977_p5), %s2239_s2, 16, %s243_s28, [#allocation6]  }
  0x25   : > { %s1706_s15 = scalar_lea.hbm %s2241_s4, 16 }
  0x26   : > { %p1707_p7 = scmp.ne.s32.totalorder %s2241_s4, %s1706_s15  ;;  %p1713_p3 = scmp.lt.u32.totalorder %s1706_s15, %s2241_s4 }
  0x28   : > { %p1709_p9 = pnand %p1707_p7, %p1996_p8 }
  0x2a   : > { %p1710_p2 = pneg %p1709_p9 }
  0x2c   : > { %p1715_p6 = pnand %p1713_p3, %p1710_p2 }
  0x2e   : > { %1718 = shalt.err (!%p1715_p6)
}
  0x2f   : > { %s1719_s28 = scalar_lea.vmem %s1973_s10, 16  ;;  %s1726_s21 = scalar_lea.vmem %s1973_s10, 32 }
  0x30   : > { %p1720_p10 = scmp.ne.s32.totalorder %s1973_s10, %s1719_s28  ;;  %p1727_p13 = scmp.lt.s32.totalorder %s1973_s10, %s1973_s10 }
  0x31   : > { %p1728_p0 = scmp.lt.s32.totalorder %s1726_s21, %s1719_s28 }
  0x32   : > { %p1722_p11 = pnand %p1720_p10, %p1996_p8 }
  0x33   : > { %p1729_p1 = por %p1728_p0, %p1727_p13 }
  0x34   : > { %p1723_p12 = pneg %p1722_p11 }
  0x36   : > { %p1730_p4 = pnand %p1729_p1, %p1723_p12 }
  0x38   : > { %1733 = shalt.err (!%p1730_p4)
}
  0x39   : > { %1603 = dma.hbm_to_vmem [thread:$0]  (!%p1977_p5), %s2241_s4, 16, %s1973_s10, [#allocation9]  }
  0x3a   : > { %p2253_p7 = scmp.ne.s32.totalorder %s2251_s13, 0  ;;  %s1888_s27 = smov [#allocation3]  }
  0x3b   : > { %s231_s29 = sshll.u32 %s1888_s27, 4  ;;  %s1889_s9 = smov [#allocation7]   ;;  %s232_s29 = int_to_ptr.vmem [resolvable:$true] %s231_s29 }
  0x3c   : > { %s2259_s12 = smov (%p2253_p7, %s33_s12), 0  ;;  %s252_s14 = sshll.u32 %s1889_s9, 4  ;;  %s253_s14 = int_to_ptr.vmem [resolvable:$true] %s252_s14 }
  0x3d   : > { %s1734_s17 = scalar_lea.hbm %s2238_s1, 64 }
  0x3e   : > { %p1735_p9 = scmp.ne.s32.totalorder %s2238_s1, %s1734_s17  ;;  %p1741_p6 = scmp.lt.u32.totalorder %s1734_s17, %s2238_s1 }
  0x40   : > { %p1737_p2 = pnand %p1735_p9, %p1996_p8 }
  0x42   : > { %p1738_p3 = pneg %p1737_p2 }
  0x44   : > { %p1743_p10 = pnand %p1741_p6, %p1738_p3 }
  0x46   : > { %1746 = shalt.err (!%p1743_p10)
}
  0x47   : > { %s1747_s28 = scalar_lea.vmem %s232_s29, 64  ;;  %p1755_p0 = scmp.lt.s32.totalorder %s232_s29, %s232_s29 }
  0x48   : > { %p1748_p11 = scmp.ne.s32.totalorder %s232_s29, %s1747_s28  ;;  %p1756_p1 = scmp.lt.s32.totalorder %s1747_s28, %s1747_s28 }
  0x4a   : > { %p1750_p12 = pnand %p1748_p11, %p1996_p8  ;;  %p1757_p4 = por %p1756_p1, %p1755_p0 }
  0x4c   : > { %p1751_p13 = pneg %p1750_p12 }
  0x4e   : > { %p1758_p7 = pnand %p1757_p4, %p1751_p13 }
  0x50   : > { %1761 = shalt.err (!%p1758_p7)
}
  0x51   : > { %1594 = dma.hbm_to_vmem [thread:$0]  (!%p1977_p5), %s2238_s1, 64, %s232_s29, [#allocation4]  }
  0x52   : > { %s1762_s9 = scalar_lea.hbm %s2240_s3, 512 }
  0x53   : > { %p1763_p9 = scmp.ne.s32.totalorder %s2240_s3, %s1762_s9  ;;  %p1769_p6 = scmp.lt.u32.totalorder %s1762_s9, %s2240_s3 }
  0x55   : > { %p1765_p2 = pnand %p1763_p9, %p1996_p8 }
  0x57   : > { %p1766_p3 = pneg %p1765_p2 }
  0x59   : > { %p1771_p10 = pnand %p1769_p6, %p1766_p3 }
  0x5b   : > { %1774 = shalt.err (!%p1771_p10)
}
  0x5c   : > { %s1775_s20 = scalar_lea.vmem %s253_s14, 512  ;;  %p1783_p0 = scmp.lt.s32.totalorder %s253_s14, %s253_s14 }
  0x5d   : > { %p1776_p11 = scmp.ne.s32.totalorder %s253_s14, %s1775_s20  ;;  %p1784_p1 = scmp.lt.s32.totalorder %s1775_s20, %s1775_s20 }
  0x5f   : > { %p1778_p12 = pnand %p1776_p11, %p1996_p8  ;;  %p1785_p4 = por %p1784_p1, %p1783_p0 }
  0x61   : > { %p1779_p13 = pneg %p1778_p12 }
  0x63   : > { %p1786_p7 = pnand %p1785_p4, %p1779_p13 }
  0x65   : > { %1789 = shalt.err (!%p1786_p7)
}
  0x66   : > { %s1890_s29 = smov 64   ;;  %s1891_s10 = smov 4  }
  0x67   : > { %1600 = dma.hbm_to_vmem [thread:$0]  (!%p1977_p5), %s2240_s3, 512, %s253_s14, [#allocation6], %s1890_s29, %s1890_s29, %s1891_s10  }
  0x68   : > { %s1892_s21 = smov [#allocation10]   ;;  %s1790_s9 = scalar_lea.hbm %s2242_s5, 8192 }
  0x69   : > { %s276_s22 = sshll.u32 %s1892_s21, 4  ;;  %p1791_p9 = scmp.ne.s32.totalorder %s2242_s5, %s1790_s9  ;;  %s277_s22 = int_to_ptr.vmem [resolvable:$true] %s276_s22 }
  0x6a   : > { %p1797_p6 = scmp.lt.u32.totalorder %s1790_s9, %s2242_s5 }
  0x6b   : > { %p1793_p2 = pnand %p1791_p9, %p1996_p8 }
  0x6d   : > { %p1794_p3 = pneg %p1793_p2 }
  0x6f   : > { %p1799_p10 = pnand %p1797_p6, %p1794_p3 }
  0x71   : > { %1802 = shalt.err (!%p1799_p10)
}
  0x72   : > { %s1803_s14 = scalar_lea.vmem %s277_s22, 8192  ;;  %p1811_p0 = scmp.lt.s32.totalorder %s277_s22, %s277_s22 }
  0x73   : > { %p1804_p11 = scmp.ne.s32.totalorder %s277_s22, %s1803_s14  ;;  %p1812_p1 = scmp.lt.s32.totalorder %s1803_s14, %s1803_s14 }
  0x75   : > { %p1806_p12 = pnand %p1804_p11, %p1996_p8  ;;  %p1813_p4 = por %p1812_p1, %p1811_p0 }
  0x77   : > { %p1807_p13 = pneg %p1806_p12 }
  0x79   : > { %p1814_p7 = pnand %p1813_p4, %p1807_p13 }
  0x7b   : > { %1817 = shalt.err (!%p1814_p7)
}
  0x7c   : > { %s1893_s20 = smov 512   ;;  %s1894_s29 = smov 32  }
  0x7d   : > { %1606 = dma.hbm_to_vmem [thread:$0]  (!%p1977_p5), %s2242_s5, 8192, %s277_s22, [#allocation9], %s1893_s20, %s1893_s20, %s1894_s29  }
  0x7e   : > { %s1895_s28 = smov [#allocation11]   ;;  %s1818_s9 = scalar_lea.hbm %s2243_s6, 128 }
  0x7f   : > { %s290_s21 = sshll.u32 %s1895_s28, 4  ;;  %p1819_p9 = scmp.ne.s32.totalorder %s2243_s6, %s1818_s9  ;;  %s291_s21 = int_to_ptr.vmem [resolvable:$true] %s290_s21 }
  0x80   : > { %p1825_p6 = scmp.lt.u32.totalorder %s1818_s9, %s2243_s6 }
  0x81   : > { %p1821_p2 = pnand %p1819_p9, %p1996_p8 }
  0x83   : > { %p1822_p3 = pneg %p1821_p2 }
  0x85   : > { %p1827_p10 = pnand %p1825_p6, %p1822_p3 }
  0x87   : > { %1830 = shalt.err (!%p1827_p10)
}
  0x88   : > { %s1831_s22 = scalar_lea.vmem %s291_s21, 128  ;;  %p1839_p0 = scmp.lt.s32.totalorder %s291_s21, %s291_s21 }
  0x89   : > { %p1832_p11 = scmp.ne.s32.totalorder %s291_s21, %s1831_s22  ;;  %p1840_p1 = scmp.lt.s32.totalorder %s1831_s22, %s1831_s22 }
  0x8b   : > { %p1834_p12 = pnand %p1832_p11, %p1996_p8  ;;  %p1841_p4 = por %p1840_p1, %p1839_p0 }
  0x8d   : > { %p1835_p13 = pneg %p1834_p12 }
  0x8f   : > { %p1842_p7 = pnand %p1841_p4, %p1835_p13 }
  0x91   : > { %1845 = shalt.err (!%p1842_p7)
}
  0x92   : > { %1609 = dma.hbm_to_vmem [thread:$0]  (!%p1977_p5), %s2243_s6, 128, %s291_s21, [#allocation12]  }
  0x93   : > { %p2254_p9 = scmp.ne.s32.totalorder %s2249_s8, 0 }
  0x94   : > { %p2255_p2 = scmp.ne.s32.totalorder (!%p2254_p9), %s2248_s30, 0 }
  0x95   : > { %316 = sbr.rel (%p2254_p9) target bundleno = 831 (0x33f), region = 48 }
  0x9c   : > { %1859 = dma.done.wait (%p2255_p2), [#allocation4], 64  }
  0x9d   : > { %1861 = vsyncadd (%p2255_p2), [#allocation4], 4294967232 }
  0x9e   : > { %1863 = dma.done.wait (%p2255_p2), [#allocation6], 528  }
  0x9f   : > { %1865 = vsyncadd (%p2255_p2), [#allocation6], 4294966768 }
  0xa0   : > { %1867 = dma.done.wait (%p2255_p2), [#allocation9], 8208  }
  0xa1   : > { %1869 = vsyncadd (%p2255_p2), [#allocation9], 4294959088 }
  0xa2   : > { %1871 = dma.done.wait (%p2255_p2), [#allocation12], 128  }
  0xa3   : > { %1873 = vsyncadd (%p2255_p2), [#allocation12], 4294967168  ;;  %p372_p5 = scmp.lt.s32.totalorder %s1876_s24, 1  ;;  %v1896_v0 = vmov 1   ;;  %v1897_v1 = vmov 0   ;;  %v1898_v4 = vmov 2   ;;  %v405_v41 = vlaneseq }
  0xa4   : > { %1666 = vset.pattern.permute.xlu1 %v1896_v0  ;;  %1665 = vset.pattern.permute.xlu0 %v1897_v1  ;;  %v1899_v5 = vmov 3   ;;  %v1900_v6 = vmov 4   ;;  %v1901_v7 = vmov 5   ;;  %v1674_v8 = vld [vmem:[#allocation7] sm:$0xff]   ;;  %v1902_v9 = vmov 0.0   ;;  %v1675_v10 = vld [vmem:[#allocation7 + $0x8] sm:$0xff]  }
  0xa5   : > { %s2261_s24 = smov (!%p372_p5, %s1876_s24), 1  ;;  %1050 = vmatprep.mubr.bf16.mxu1 %v1897_v1  ;;  %1555 = vmatprep.subr.bf16.mxu0 %v1902_v9  ;;  %v1676_v11 = vld [vmem:[#allocation7 + $0x10] sm:$0xff]   ;;  %v1677_v12 = vld [vmem:[#allocation7 + $0x18] sm:$0xff]   ;;  %vm1903_vm0 = vmmov 0   ;;  %v591_v13 = vld [vmem:[#allocation10] sm:$0xff]  ;;  %v2150_v44 = vshrl.u32 %v405_v41, 7 }
  0xa6   : > { %s1549_s8 = sshll.u32 %s2261_s24, 4  ;;  %1556 = vmatpush3.bf16.msra.mxu0 %v1674_v8  ;;  %1563 = vmatprep.mubr.msk.bf16.mxu0 %vm1903_vm0, %v1902_v9  ;;  %v595_v14 = vld [vmem:[#allocation10 + $0x20] sm:$0xff]  ;;  %v2142_v15 = vld [vmem:[#allocation10 + $0x8] sm:$0xff]  ;;  %v393_v45 = vld [vmem:[#allocation3] sm:$0x7]  ;;  %vm544_vm1 = vcmask 523264  }
  0xa7   : > { %s379_s29 = scalar_lea.vmem %s2237_s0, %s1549_s8  ;;  %1557 = vmatprep.subr.bf16.mxu0 %v1902_v9  ;;  %v1484_v16 = vcombine.high %v591_v13, %v595_v14  ;;  %v2144_v17 = vld [vmem:[#allocation10 + $0x28] sm:$0xff]  ;;  %v1483_v18 = vcombine.low %v591_v13, %v595_v14  ;;  %v599_v19 = vld [vmem:[#allocation10 + $0x40] sm:$0xff]  ;;  %v394_v48 = vunpack.c.l.bf16 %v393_v45  ;;  %v423_v49 = vsub.s32 1, %v2150_v44  ;;  %s1475_s30 = sshll.u32 %s2261_s24, 3 }
  0xa8   : > { %v391_v2 = vld [vmem:[%s379_s29] sm:$0xff]  ;;  %v392_v3 = vld [vmem:[%s379_s29 + $0x8] sm:$0xff]  ;;  %v1485_v21 = vcombine.low %v2142_v15, %v2144_v17  ;;  %v1486_v22 = vcombine.high %v2142_v15, %v2144_v17  ;;  %v407_v50 = vsub.s32 0, %v2150_v44  ;;  %v439_v51 = vsub.s32 2, %v2150_v44  ;;  %v612_v41 = vld [vmem:[#allocation10 + $0xa8] sm:$0xff]  ;;  %s384_s28 = scalar_lea.vmem %s2244_s7, %s1475_s30 }
  0xa9   : > { %414 = vperm.xlu1 %1666, %v391_v2   ;;  %397 = vperm.xlu0 %1665, %v391_v2   ;;  %v603_v20 = vld [vmem:[#allocation10 + $0x60] sm:$0xff]  ;;  %v424_v52 = vrot.slane %v394_v48, %v423_v49  ;;  %v455_v55 = vsub.s32 3, %v2150_v44  ;;  %v471_v58 = vsub.s32 4, %v2150_v44  ;;  %v487_v0 = vsub.s32 5, %v2150_v44  ;;  %v616_v45 = vld [vmem:[#allocation10 + $0xc8] sm:$0xff] }
  0xaa   : > { %1558 = vmatpush3.bf16.msra.mxu0 %v1675_v10  ;;  %v1492_v23 = vcombine.high %v599_v19, %v603_v20  ;;  %1018 = vmatprep.subr.bf16.mxu1 %v1484_v16  ;;  %v1491_v24 = vcombine.low %v599_v19, %v603_v20  ;;  %v607_v25 = vld [vmem:[#allocation10 + $0x80] sm:$0xff]  ;;  %v408_v53 = vrot.slane %v394_v48, %v407_v50  ;;  %v636_v15 = vld [vmem:[#allocation10 + $0x168] sm:$0xff] }
  0xab   : > { %1559 = vmatprep.subr.bf16.mxu0 %v1902_v9  ;;  %1019 = vmatpush1.bf16.msra.mxu1 %v1483_v18  ;;  %v611_v26 = vld [vmem:[#allocation10 + $0xa0] sm:$0xff]  ;;  %v440_v57 = vrot.slane %v394_v48, %v439_v51  ;;  %v456_v61 = vrot.slane %v394_v48, %v455_v55  ;;  %v488_v10 = vrot.slane %v394_v48, %v487_v0 }
  0xac   : > { %1020 = vmatprep.subr.bf16.mxu1 %v1492_v23  ;;  %v1500_v27 = vcombine.high %v607_v25, %v611_v26  ;;  %v1499_v28 = vcombine.low %v607_v25, %v611_v26  ;;  %v615_v29 = vld [vmem:[#allocation10 + $0xc0] sm:$0xff] }
  0xad   : > { %418 = vperm.xlu1 %1666, %v392_v3   ;;  %402 = vperm.xlu0 %1665, %v392_v3   ;;  %v619_v30 = vld [vmem:[#allocation10 + $0xe0] sm:$0xff] }
  0xae   : > { %1560 = vmatpush3.bf16.msra.mxu0 %v1676_v11  ;;  %v1508_v31 = vcombine.high %v615_v29, %v619_v30  ;;  %v1507_v32 = vcombine.low %v615_v29, %v619_v30  ;;  %v623_v33 = vld [vmem:[#allocation10 + $0x100] sm:$0xff] }
  0xaf   : > { %1561 = vmatprep.subr.bf16.mxu0 %v1902_v9  ;;  %1021 = vmatpush1.bf16.msra.mxu1 %v1491_v24  ;;  %v627_v34 = vld [vmem:[#allocation10 + $0x120] sm:$0xff] }
  0xb0   : > { %1022 = vmatprep.subr.bf16.mxu1 %v1500_v27  ;;  %v1516_v35 = vcombine.high %v623_v33, %v627_v34  ;;  %v1515_v36 = vcombine.low %v623_v33, %v627_v34  ;;  %v631_v37 = vld [vmem:[#allocation10 + $0x140] sm:$0xff]  ;;  %v1476_v27 = vld [vmem:[#allocation5] ss:$0 sm:$0xff]  ;;  %v600_v34 = vld [vmem:[#allocation10 + $0x48] sm:$0xff] }
  0xb1   : > { %1668 = vset.pattern.permute.xlu1 %v1898_v4  ;;  %1667 = vset.pattern.permute.xlu0 %v1898_v4  ;;  %v635_v38 = vld [vmem:[#allocation10 + $0x160] sm:$0xff] }
  0xb2   : > { %434 = vperm.xlu1 %1668, %v392_v3   ;;  %430 = vperm.xlu0 %1667, %v391_v2   ;;  %v1524_v39 = vcombine.high %v631_v37, %v635_v38  ;;  %v1523_v40 = vcombine.low %v631_v37, %v635_v38 }
  0xb3   : > { %1562 = vmatpush3.bf16.msra.mxu0 %v1677_v12  ;;  %1023 = vmatpush1.bf16.msra.mxu1 %v1499_v28 }
  0xb4   : > { %1061 = vmatprep.subr.bf16.mxu0 %v1486_v22  ;;  %1024 = vmatprep.subr.bf16.mxu1 %v1508_v31 }
  0xb6   : > { %1669 = vset.pattern.permute.xlu1 %v1899_v5  ;;  %1670 = vset.pattern.permute.xlu0 %v1899_v5 }
  0xb7   : > { %446 = vperm.xlu1 %1669, %v391_v2   ;;  %450 = vperm.xlu0 %1670, %v392_v3  }
  0xb8   : > { %1025 = vmatpush1.bf16.msra.mxu1 %v1507_v32 }
  0xb9   : > { %1026 = vmatprep.subr.bf16.mxu1 %v1516_v35  ;;  %v604_v35 = vld [vmem:[#allocation10 + $0x68] sm:$0xff] }
  0xbb   : > { %1671 = vset.pattern.permute.xlu1 %v1900_v6  ;;  %1672 = vset.pattern.permute.xlu0 %v1901_v7 }
  0xbc   : > { %462 = vperm.xlu1 %1671, %v391_v2   ;;  %478 = vperm.xlu0 %1672, %v391_v2  }
  0xbd   : > { %1027 = vmatpush1.bf16.msra.mxu1 %v1515_v36 }
  0xbe   : > { %1028 = vmatprep.subr.bf16.mxu1 %v1524_v39  ;;  %v1494_v39 = vcombine.high %v600_v34, %v604_v35 }
  0xc0   : > { %466 = vperm.xlu1 %1671, %v392_v3  }
  0xc1   : > { %1029 = vmatpush1.bf16.msra.mxu1 %v1523_v40  ;;  %v608_v40 = vld [vmem:[#allocation10 + $0x88] sm:$0xff] }
  0xc4   : > { %1673 = vset.pattern.permute.xlu1 %v1901_v7 }
  0xc5   : > { %482 = vperm.xlu1 %1673, %v392_v3   ;;  %v472_v3 = vrot.slane %v394_v48, %v471_v58 }
 0x128   : > { %v415_v42 = vpop.permute.xlu1 %414  ;;  %v398_v43 = vpop.permute.xlu0 %397 }
 0x129   : > { %v425_v59 = vmul.f32 %v424_v52, %v415_v42  ;;  %v409_v60 = vmul.f32 %v408_v53, %v398_v43  ;;  %v1493_v42 = vcombine.low %v600_v34, %v604_v35  ;;  %v1502_v43 = vcombine.high %v608_v40, %v612_v41  ;;  %v602_v34 = vld [vmem:[#allocation10 + $0x58] sm:$0xff] }
 0x12a   : > { %v606_v35 = vld [vmem:[#allocation10 + $0x78] sm:$0xff] }
 0x12b   : > { %v427_v4 = vadd.f32 %v425_v59, %v409_v60  ;;  %v639_v60 = vld [vmem:[#allocation10 + $0x180] sm:$0xff] }
 0x12c   : > { %v419_v46 = vpop.permute.xlu1 %418  ;;  %v403_v47 = vpop.permute.xlu0 %402 }
 0x12d   : > { %v426_v6 = vmul.f32 %v424_v52, %v419_v46  ;;  %v410_v7 = vmul.f32 %v408_v53, %v403_v47  ;;  %v620_v46 = vld [vmem:[#allocation10 + $0xe8] sm:$0xff]  ;;  %v1501_v47 = vcombine.low %v608_v40, %v612_v41  ;;  %v1498_v40 = vcombine.high %v602_v34, %v606_v35  ;;  %v609_v41 = vld [vmem:[#allocation10 + $0x90] sm:$0xff] }
 0x12e   : > { %v1510_v48 = vcombine.high %v616_v45, %v620_v46  ;;  %v624_v52 = vld [vmem:[#allocation10 + $0x108] sm:$0xff] }
 0x12f   : > { %v428_v16 = vadd.f32 %v426_v6, %v410_v7  ;;  %v628_v53 = vld [vmem:[#allocation10 + $0x128] sm:$0xff]  ;;  %v647_v6 = vld [vmem:[#allocation10 + $0x1c0] sm:$0xff] }
 0x130   : > { %v1517_v17 = vcombine.low %v624_v52, %v628_v53  ;;  %v651_v7 = vld [vmem:[#allocation10 + $0x1e0] sm:$0xff] }
 0x131   : > { %v435_v54 = vpop.permute.xlu1 %434  ;;  %v431_v56 = vpop.permute.xlu0 %430 }
 0x132   : > { %v441_v63 = vmul.f32 %v440_v57, %v431_v56  ;;  %v442_v13 = vmul.f32 %v440_v57, %v435_v54  ;;  %v1509_v54 = vcombine.low %v616_v45, %v620_v46  ;;  %v1518_v56 = vcombine.high %v624_v52, %v628_v53  ;;  %v632_v57 = vld [vmem:[#allocation10 + $0x148] sm:$0xff]  ;;  %v614_v45 = vld [vmem:[#allocation10 + $0xb8] sm:$0xff]  ;;  %v617_v53 = vld [vmem:[#allocation10 + $0xd0] sm:$0xff] }
 0x133   : > { %v1525_v59 = vcombine.low %v632_v57, %v636_v15 }
 0x134   : > { %v443_v8 = vadd.f32 %v441_v63, %v427_v4  ;;  %v444_v23 = vadd.f32 %v442_v13, %v428_v16  ;;  %v1539_v13 = vcombine.low %v647_v6, %v651_v7  ;;  %v597_v16 = vld [vmem:[#allocation10 + $0x30] sm:$0xff] }
 0x136   : > { %v447_v62 = vpop.permute.xlu1 %446  ;;  %v451_v2 = vpop.permute.xlu0 %450 }
 0x137   : > { %v457_v5 = vmul.f32 %v456_v61, %v447_v62  ;;  %v458_v18 = vmul.f32 %v456_v61, %v451_v2  ;;  %v643_v61 = vld [vmem:[#allocation10 + $0x1a0] sm:$0xff]  ;;  %v640_v62 = vld [vmem:[#allocation10 + $0x188] sm:$0xff] }
 0x138   : > { %v1532_v63 = vcombine.high %v639_v60, %v643_v61  ;;  %v644_v2 = vld [vmem:[#allocation10 + $0x1a8] sm:$0xff] }
 0x139   : > { %v459_v14 = vadd.f32 %v457_v5, %v443_v8  ;;  %v460_v25 = vadd.f32 %v458_v18, %v444_v23  ;;  %v1534_v4 = vcombine.high %v640_v62, %v644_v2  ;;  %v1531_v5 = vcombine.low %v639_v60, %v643_v61  ;;  %v648_v8 = vld [vmem:[#allocation10 + $0x1c8] sm:$0xff]  ;;  %v594_v18 = vld [vmem:[#allocation10 + $0x18] sm:$0xff]  ;;  %v625_v60 = vld [vmem:[#allocation10 + $0x110] sm:$0xff] }
 0x13a   : > { %1030 = vmatprep.subr.bf16.mxu1 %v1532_v63  ;;  %v629_v61 = vld [vmem:[#allocation10 + $0x130] sm:$0xff]  ;;  %v630_v63 = vld [vmem:[#allocation10 + $0x138] sm:$0xff] }
 0x13b   : > { %v463_v9 = vpop.permute.xlu1 %462  ;;  %v479_v12 = vpop.permute.xlu0 %478  ;;  %1031 = vmatpush1.bf16.msra.mxu1 %v1531_v5  ;;  %v633_v5 = vld [vmem:[#allocation10 + $0x150] sm:$0xff] }
 0x13c   : > { %v473_v11 = vmul.f32 %v472_v3, %v463_v9  ;;  %v489_v20 = vmul.f32 %v488_v10, %v479_v12  ;;  %v1540_v9 = vcombine.high %v647_v6, %v651_v7  ;;  %v637_v6 = vld [vmem:[#allocation10 + $0x170] sm:$0xff]  ;;  %v634_v7 = vld [vmem:[#allocation10 + $0x158] sm:$0xff] }
 0x13e   : > { %v475_v19 = vadd.f32 %v473_v11, %v459_v14  ;;  %1032 = vmatprep.subr.bf16.mxu1 %v1540_v9  ;;  %v593_v14 = vld [vmem:[#allocation10 + $0x10] sm:$0xff]  ;;  %v1519_v9 = vcombine.low %v625_v60, %v629_v61 }
 0x13f   : > { %v467_v22 = vpop.permute.xlu1 %466  ;;  %1033 = vmatpush1.bf16.msra.mxu1 %v1539_v13  ;;  %v641_v13 = vld [vmem:[#allocation10 + $0x190] sm:$0xff] }
 0x140   : > { %v474_v24 = vmul.f32 %v472_v3, %v467_v22  ;;  %v491_v26 = vadd.f32 %v489_v20, %v475_v19  ;;  %v1533_v3 = vcombine.low %v640_v62, %v644_v2  ;;  %v1488_v19 = vcombine.high %v593_v14, %v597_v16  ;;  %v598_v20 = vld [vmem:[#allocation10 + $0x38] sm:$0xff] }
 0x141   : > { %v1487_v22 = vcombine.low %v593_v14, %v597_v16  ;;  %v1489_v23 = vcombine.low %v594_v18, %v598_v20  ;;  %v626_v62 = vld [vmem:[#allocation10 + $0x118] sm:$0xff]  ;;  %v645_v14 = vld [vmem:[#allocation10 + $0x1b0] sm:$0xff] }
 0x142   : > { %v476_v29 = vadd.f32 %v474_v24, %v460_v25  ;;  %v500_v31 = vadd.f32 %v1476_v27, %v491_v26  ;;  %v1490_v24 = vcombine.high %v594_v18, %v598_v20  ;;  %1104 = vmatprep.subr.bf16.mxu1 %v1488_v19  ;;  %v1477_v25 = vld [vmem:[#allocation8] ss:$0 sm:$0xff]  ;;  %v1527_v19 = vcombine.low %v633_v5, %v637_v6 }
 0x143   : > { %v642_v16 = vld [vmem:[#allocation10 + $0x198] sm:$0xff] }
 0x144   : > { %v483_v28 = vpop.permute.xlu1 %482  ;;  %v502_v36 = vmax.f32 %v500_v31, 0.0  ;;  %v646_v18 = vld [vmem:[#allocation10 + $0x1b8] sm:$0xff] }
 0x145   : > { %v490_v30 = vmul.f32 %v488_v10, %v483_v28  ;;  %v652_v10 = vld [vmem:[#allocation10 + $0x1e8] sm:$0xff] }
 0x146   : > { %v1541_v11 = vcombine.low %v648_v8, %v652_v10  ;;  %v1542_v12 = vcombine.high %v648_v8, %v652_v10  ;;  %v638_v8 = vld [vmem:[#allocation10 + $0x178] sm:$0xff]  ;;  %v1521_v10 = vcombine.low %v626_v62, %v630_v63 }
 0x147   : > { %v492_v32 = vadd.f32 %v490_v30, %v476_v29  ;;  %v1529_v20 = vcombine.low %v634_v7, %v638_v8 }
 0x149   : > { %v501_v33 = vadd.f32 %v1476_v27, %v492_v32  ;;  %v601_v32 = vld [vmem:[#allocation10 + $0x50] sm:$0xff] }
 0x14b   : > { %v503_v37 = vmax.f32 %v501_v33, 0.0  ;;  %v605_v33 = vld [vmem:[#allocation10 + $0x70] sm:$0xff] }
 0x14c   : > { %v1495_v46 = vcombine.low %v601_v32, %v605_v33 }
 0x14d   : > { %v512_v38 = vpack.c.bf16 %v503_v37, %v502_v36 }
 0x14f   : > { %1564 = vmatmul.mubr.msk.bf16.vlgmr.msra.gmra.mrb[0].mxu0 %vm544_vm1, %v512_v38 }
 0x150   : > { %1062 = vmatpush1.bf16.msra.mxu0 %v1485_v21  ;;  %1093 = vmatprep.mubr.bf16.mxu0 %v1897_v1  ;;  %v1526_v21 = vcombine.high %v632_v57, %v636_v15  ;;  %v622_v57 = vld [vmem:[#allocation10 + $0xf8] sm:$0xff] }
 0x151   : > { %1063 = vmatprep.subr.bf16.mxu0 %v1494_v39  ;;  %v1496_v39 = vcombine.high %v601_v32, %v605_v33 }
 0x154   : > { %1064 = vmatpush1.bf16.msra.mxu0 %v1493_v42  ;;  %v613_v42 = vld [vmem:[#allocation10 + $0xb0] sm:$0xff] }
 0x155   : > { %1065 = vmatprep.subr.bf16.mxu0 %v1502_v43  ;;  %v610_v43 = vld [vmem:[#allocation10 + $0x98] sm:$0xff]  ;;  %v1503_v15 = vcombine.low %v609_v41, %v613_v42 }
 0x156   : > { %v1506_v52 = vcombine.high %v610_v43, %v614_v45 }
 0x158   : > { %1066 = vmatpush1.bf16.msra.mxu0 %v1501_v47  ;;  %v1497_v47 = vcombine.low %v602_v34, %v606_v35  ;;  %v2182_v34 = vld [vmem:[#allocation11] sm:$0xff] }
 0x159   : > { %1067 = vmatprep.subr.bf16.mxu0 %v1510_v48  ;;  %v1504_v48 = vcombine.high %v609_v41, %v613_v42  ;;  %v661_v35 = vrot.slane %v2182_v34, %v407_v50 }
 0x15c   : > { %1068 = vmatpush1.bf16.msra.mxu0 %v1509_v54  ;;  %v621_v54 = vld [vmem:[#allocation10 + $0xf0] sm:$0xff] }
 0x15d   : > { %1069 = vmatprep.subr.bf16.mxu0 %v1518_v56  ;;  %v618_v56 = vld [vmem:[#allocation10 + $0xd8] sm:$0xff]  ;;  %v1511_v2 = vcombine.low %v617_v53, %v621_v54 }
 0x160   : > { %1070 = vmatpush1.bf16.msra.mxu0 %v1517_v17  ;;  %v1505_v17 = vcombine.low %v610_v43, %v614_v45 }
 0x161   : > { %1071 = vmatprep.subr.bf16.mxu0 %v1526_v21  ;;  %v1512_v21 = vcombine.high %v617_v53, %v621_v54 }
 0x164   : > { %1072 = vmatpush1.bf16.msra.mxu0 %v1525_v59  ;;  %v1514_v59 = vcombine.high %v618_v56, %v622_v57 }
 0x165   : > { %1073 = vmatprep.subr.bf16.mxu0 %v1534_v4  ;;  %v1520_v4 = vcombine.high %v625_v60, %v629_v61 }
 0x168   : > { %1074 = vmatpush1.bf16.msra.mxu0 %v1533_v3  ;;  %v1513_v3 = vcombine.low %v618_v56, %v622_v57 }
 0x169   : > { %1075 = vmatprep.subr.bf16.mxu0 %v1542_v12  ;;  %v1530_v12 = vcombine.high %v634_v7, %v638_v8 }
 0x16c   : > { %1076 = vmatpush1.bf16.msra.mxu0 %v1541_v11  ;;  %v1528_v11 = vcombine.high %v633_v5, %v637_v6 }
 0x16d   : > { %1147 = vmatprep.subr.bf16.mxu0 %v1490_v24  ;;  %v649_v24 = vld [vmem:[#allocation10 + $0x1d0] sm:$0xff] }
 0x222   : > { %v582_v26 = vpop.f32.mrb[0].mxu0 }
 0x223   : > { %v583_v27 = vadd.f32 %v1477_v25, %v582_v26  ;;  %v1565_v28 = vpop.f32.mrb[1].mxu0  ;;  %v650_v26 = vld [vmem:[#allocation10 + $0x1d8] sm:$0xff] }
 0x224   : > { %v585_v29 = vpop.f32.mrb[2].mxu0  ;;  %v1535_v28 = vcombine.low %v641_v13, %v645_v14 }
 0x225   : > { %v586_v30 = vadd.f32 %v1477_v25, %v585_v29  ;;  %v1566_v31 = vpop.f32.mrb[3].mxu0  ;;  %v589_v36 = vmax.f32 %v583_v27, 0.0  ;;  %v653_v25 = vld [vmem:[#allocation10 + $0x1f0] sm:$0xff]  ;;  %v654_v27 = vld [vmem:[#allocation10 + $0x1f8] sm:$0xff]  ;;  %v1537_v29 = vcombine.low %v642_v16, %v646_v18 }
 0x226   : > { %v1546_v31 = vcombine.high %v650_v26, %v654_v27  ;;  %v1543_v32 = vcombine.low %v649_v24, %v653_v25  ;;  %v1545_v33 = vcombine.low %v650_v26, %v654_v27 }
 0x227   : > { %v590_v37 = vmax.f32 %v586_v30, 0.0  ;;  %v1544_v30 = vcombine.high %v649_v24, %v653_v25 }
 0x229   : > { %v2174_v38 = vpack.c.bf16 %v590_v37, %v589_v36  ;;  %v669_v36 = vrot.slane %v2182_v34, %v439_v51  ;;  %v665_v37 = vrot.slane %v2182_v34, %v423_v49 }
 0x22b   : > { %1051 = vmatmul.mubr.bf16.vlgmr.msra.gmra.mrb[0].mxu1 %v2174_v38  ;;  %1094 = vmatmul.mubr.bf16.vlgmr.msra.gmra.mrb[4].mxu0 %v2174_v38 }
 0x22c   : > { %1105 = vmatpush1.bf16.msra.mxu1 %v1487_v22  ;;  %1148 = vmatpush1.bf16.msra.mxu0 %v1489_v23  ;;  %v1536_v22 = vcombine.high %v641_v13, %v645_v14  ;;  %v1538_v23 = vcombine.high %v642_v16, %v646_v18 }
 0x22d   : > { %1106 = vmatprep.subr.bf16.mxu1 %v1496_v39  ;;  %1149 = vmatprep.subr.bf16.mxu0 %v1498_v40  ;;  %v673_v39 = vrot.slane %v2182_v34, %v455_v55 }
 0x22e   : > { %1136 = vmatprep.mubr.bf16.mxu1 %v1897_v1  ;;  %1179 = vmatprep.mubr.bf16.mxu0 %v1897_v1  ;;  %v1522_v1 = vcombine.high %v626_v62, %v630_v63 }
 0x230   : > { %1107 = vmatpush1.bf16.msra.mxu1 %v1495_v46  ;;  %1150 = vmatpush1.bf16.msra.mxu0 %v1497_v47 }
 0x231   : > { %1108 = vmatprep.subr.bf16.mxu1 %v1504_v48  ;;  %1151 = vmatprep.subr.bf16.mxu0 %v1506_v52 }
 0x234   : > { %1109 = vmatpush1.bf16.msra.mxu1 %v1503_v15  ;;  %1152 = vmatpush1.bf16.msra.mxu0 %v1505_v17 }
 0x235   : > { %1110 = vmatprep.subr.bf16.mxu1 %v1512_v21  ;;  %1153 = vmatprep.subr.bf16.mxu0 %v1514_v59 }
 0x238   : > { %1111 = vmatpush1.bf16.msra.mxu1 %v1511_v2  ;;  %1154 = vmatpush1.bf16.msra.mxu0 %v1513_v3 }
 0x239   : > { %1112 = vmatprep.subr.bf16.mxu1 %v1520_v4  ;;  %1155 = vmatprep.subr.bf16.mxu0 %v1522_v1 }
 0x23c   : > { %1113 = vmatpush1.bf16.msra.mxu1 %v1519_v9  ;;  %1156 = vmatpush1.bf16.msra.mxu0 %v1521_v10  ;;  %v1904_v10 = vmov 1966171168  }
 0x23d   : > { %1114 = vmatprep.subr.bf16.mxu1 %v1528_v11  ;;  %1157 = vmatprep.subr.bf16.mxu0 %v1530_v12  ;;  %v1276_v11 = vunpack.c.l.s4 %v1904_v10 }
 0x240   : > { %1115 = vmatpush1.bf16.msra.mxu1 %v1527_v19  ;;  %1158 = vmatpush1.bf16.msra.mxu0 %v1529_v20 }
 0x241   : > { %1116 = vmatprep.subr.bf16.mxu1 %v1536_v22  ;;  %1159 = vmatprep.subr.bf16.mxu0 %v1538_v23  ;;  %v1277_v23 = vunpack.c.0.s8 %v1276_v11 }
 0x244   : > { %1117 = vmatpush1.bf16.msra.mxu1 %v1535_v28  ;;  %1160 = vmatpush1.bf16.msra.mxu0 %v1537_v29 }
 0x245   : > { %1118 = vmatprep.subr.bf16.mxu1 %v1544_v30  ;;  %1161 = vmatprep.subr.bf16.mxu0 %v1546_v31 }
 0x248   : > { %1119 = vmatpush1.bf16.msra.mxu1 %v1543_v32  ;;  %1162 = vmatpush1.bf16.msra.mxu0 %v1545_v33  ;;  %v2197_v32 = vsub.s32 %v1277_v23, %v2150_v44 }
 0x24b   : > { %1137 = vmatmul.mubr.bf16.vlgmr.msra.gmra.mrb[4].mxu1 %v2174_v38  ;;  %1180 = vmatmul.mubr.bf16.vlgmr.msra.gmra.mrb[8].mxu0 %v2174_v38 }
 0x2fe   : > { %v1052_v40 = vpop.f32.mrb[0].mxu1  ;;  %v1095_v38 = vpop.f32.mrb[4].mxu0 }
 0x2ff   : > { %v1053_v41 = vadd.f32 %v1052_v40, %v661_v35  ;;  %v1096_v42 = vadd.f32 %v1095_v38, %v669_v36  ;;  %v1054_v43 = vpop.f32.mrb[1].mxu1  ;;  %v1097_v45 = vpop.f32.mrb[5].mxu0  ;;  %v684_v40 = vsub.s32 6, %v2150_v44 }
 0x300   : > { %v1055_v46 = vadd.f32 %v1054_v43, %v665_v37  ;;  %v1098_v50 = vadd.f32 %v1097_v45, %v673_v39  ;;  %v1056_v47 = vpop.f32.mrb[2].mxu1  ;;  %v1099_v48 = vpop.f32.mrb[6].mxu0  ;;  %v681_v45 = vrot.slane %v2182_v34, %v487_v0 }
 0x301   : > { %v1057_v52 = vadd.f32 %v1056_v47, %v661_v35  ;;  %v1100_v51 = vadd.f32 %v1099_v48, %v669_v36  ;;  %v1058_v53 = vpop.f32.mrb[3].mxu1  ;;  %v1101_v54 = vpop.f32.mrb[7].mxu0  ;;  %v1190_v57 = vmax.f32 %v1053_v41, 0.0  ;;  %v1192_v15 = vmax.f32 %v1096_v42, 0.0 }
 0x302   : > { %v1059_v56 = vadd.f32 %v1058_v53, %v665_v37  ;;  %v1102_v49 = vadd.f32 %v1101_v54, %v673_v39  ;;  %v1191_v21 = vmax.f32 %v1055_v46, 0.0  ;;  %v1193_v59 = vmax.f32 %v1098_v50, 0.0 }
 0x303   : > { %v1198_v17 = vmax.f32 %v1057_v52, 0.0  ;;  %v1200_v55 = vmax.f32 %v1100_v51, 0.0  ;;  %v688_v41 = vsub.s32 7, %v2150_v44  ;;  %v677_v42 = vrot.slane %v2182_v34, %v471_v58 }
 0x304   : > { %v1199_v60 = vmax.f32 %v1059_v56, 0.0  ;;  %v1201_v61 = vmax.f32 %v1102_v49, 0.0  ;;  %v685_v43 = vrot.slane %v2182_v34, %v684_v40 }
 0x305   : > { %v1207_v62 = vmax.f32 %v1190_v57, %v1198_v17  ;;  %v1221_v63 = vmax.f32 %v1192_v15, %v1200_v55  ;;  %v689_v46 = vrot.slane %v2182_v34, %v688_v41 }
 0x306   : > { %v1214_v2 = vmax.f32 %v1191_v21, %v1199_v60  ;;  %v1228_v3 = vmax.f32 %v1193_v59, %v1201_v61 }
 0x307   : > { %v1208_v4 = vrot.slane %v1207_v62, 4  ;;  %v1222_v1 = vrot.slane %v1221_v63, 4 }
 0x308   : > { %v1215_v5 = vrot.slane %v1214_v2, 4  ;;  %v1229_v6 = vrot.slane %v1228_v3, 4 }
 0x309   : > { %v1209_v7 = vmax.f32 %v1207_v62, %v1208_v4  ;;  %v1223_v8 = vmax.f32 %v1221_v63, %v1222_v1 }
 0x30a   : > { %v1216_v9 = vmax.f32 %v1214_v2, %v1215_v5  ;;  %v1230_v12 = vmax.f32 %v1228_v3, %v1229_v6 }
 0x30b   : > { %v1210_v13 = vrot.slane %v1209_v7, 2  ;;  %v1224_v14 = vrot.slane %v1223_v8, 2 }
 0x30c   : > { %v1217_v16 = vrot.slane %v1216_v9, 2  ;;  %v1231_v18 = vrot.slane %v1230_v12, 2 }
 0x30d   : > { %v1211_v19 = vmax.f32 %v1209_v7, %v1210_v13  ;;  %v1225_v20 = vmax.f32 %v1223_v8, %v1224_v14 }
 0x30e   : > { %v1218_v22 = vmax.f32 %v1216_v9, %v1217_v16  ;;  %v1232_v24 = vmax.f32 %v1230_v12, %v1231_v18 }
 0x30f   : > { %v1212_v25 = vrot.slane %v1211_v19, 1  ;;  %v1226_v26 = vrot.slane %v1225_v20, 1 }
 0x310   : > { %v1219_v27 = vrot.slane %v1218_v22, 1  ;;  %v1233_v28 = vrot.slane %v1232_v24, 1 }
 0x311   : > { %v1213_v29 = vmax.f32 %v1211_v19, %v1212_v25  ;;  %v1227_v30 = vmax.f32 %v1225_v20, %v1226_v26 }
 0x312   : > { %v1220_v31 = vmax.f32 %v1218_v22, %v1219_v27  ;;  %v1234_v33 = vmax.f32 %v1232_v24, %v1233_v28 }
 0x314   : > { %v1271_v35 = vcombine.low %v1213_v29, %v1220_v31  ;;  %v1272_v36 = vcombine.low %v1227_v30, %v1234_v33 }
 0x316   : > { %v2200_v37 = vrot.slane %v1271_v35, %v2197_v32  ;;  %v2203_v39 = vrot.slane %v1272_v36, %v2197_v32 }
 0x318   : > { %v1303_v38 = vcombine.low %v2200_v37, %v2203_v39 }
 0x31e   : > { %v1138_v50 = vpop.f32.mrb[4].mxu1  ;;  %v1181_v47 = vpop.f32.mrb[8].mxu0 }
 0x31f   : > { %v1139_v48 = vadd.f32 %v1138_v50, %v677_v42  ;;  %v1182_v52 = vadd.f32 %v1181_v47, %v685_v43  ;;  %v1140_v51 = vpop.f32.mrb[5].mxu1  ;;  %v1183_v53 = vpop.f32.mrb[9].mxu0 }
 0x320   : > { %v1141_v54 = vadd.f32 %v1140_v51, %v681_v45  ;;  %v1184_v56 = vadd.f32 %v1183_v53, %v689_v46  ;;  %v1142_v49 = vpop.f32.mrb[6].mxu1  ;;  %v1185_v57 = vpop.f32.mrb[10].mxu0 }
 0x321   : > { %v1143_v15 = vadd.f32 %v1142_v49, %v677_v42  ;;  %v1186_v58 = vadd.f32 %v1185_v57, %v685_v43  ;;  %v1144_v17 = vpop.f32.mrb[7].mxu1  ;;  %v1187_v55 = vpop.f32.mrb[11].mxu0  ;;  %v1194_v59 = vmax.f32 %v1139_v48, 0.0  ;;  %v1196_v0 = vmax.f32 %v1182_v52, 0.0 }
 0x322   : > { %v1145_v21 = vadd.f32 %v1144_v17, %v681_v45  ;;  %v1188_v44 = vadd.f32 %v1187_v55, %v689_v46  ;;  %v1195_v61 = vmax.f32 %v1141_v54, 0.0  ;;  %v1197_v62 = vmax.f32 %v1184_v56, 0.0 }
 0x323   : > { %v1202_v60 = vmax.f32 %v1143_v15, 0.0  ;;  %v1204_v34 = vmax.f32 %v1186_v58, 0.0  ;;  %v1311_v43 = vrot.slane %v1303_v38, %v2197_v32 }
 0x324   : > { %v1203_v63 = vmax.f32 %v1145_v21, 0.0  ;;  %v1205_v2 = vmax.f32 %v1188_v44, 0.0 }
 0x325   : > { %v1235_v3 = vmax.f32 %v1194_v59, %v1202_v60  ;;  %v1249_v4 = vmax.f32 %v1196_v0, %v1204_v34 }
 0x326   : > { %v1242_v1 = vmax.f32 %v1195_v61, %v1203_v63  ;;  %v1256_v5 = vmax.f32 %v1197_v62, %v1205_v2 }
 0x327   : > { %v1236_v6 = vrot.slane %v1235_v3, 4  ;;  %v1250_v7 = vrot.slane %v1249_v4, 4 }
 0x328   : > { %v1243_v8 = vrot.slane %v1242_v1, 4  ;;  %v1257_v9 = vrot.slane %v1256_v5, 4 }
 0x329   : > { %v1237_v10 = vmax.f32 %v1235_v3, %v1236_v6  ;;  %v1251_v11 = vmax.f32 %v1249_v4, %v1250_v7 }
 0x32a   : > { %v1244_v12 = vmax.f32 %v1242_v1, %v1243_v8  ;;  %v1258_v13 = vmax.f32 %v1256_v5, %v1257_v9 }
 0x32b   : > { %v1238_v14 = vrot.slane %v1237_v10, 2  ;;  %v1252_v16 = vrot.slane %v1251_v11, 2 }
 0x32c   : > { %v1245_v18 = vrot.slane %v1244_v12, 2  ;;  %v1259_v19 = vrot.slane %v1258_v13, 2 }
 0x32d   : > { %v1239_v20 = vmax.f32 %v1237_v10, %v1238_v14  ;;  %v1253_v22 = vmax.f32 %v1251_v11, %v1252_v16 }
 0x32e   : > { %v1246_v23 = vmax.f32 %v1244_v12, %v1245_v18  ;;  %v1260_v24 = vmax.f32 %v1258_v13, %v1259_v19 }
 0x32f   : > { %v1240_v25 = vrot.slane %v1239_v20, 1  ;;  %v1254_v26 = vrot.slane %v1253_v22, 1 }
 0x330   : > { %v1247_v27 = vrot.slane %v1246_v23, 1  ;;  %v1261_v28 = vrot.slane %v1260_v24, 1 }
 0x331   : > { %v1241_v29 = vmax.f32 %v1239_v20, %v1240_v25  ;;  %v1255_v30 = vmax.f32 %v1253_v22, %v1254_v26 }
 0x332   : > { %v1248_v31 = vmax.f32 %v1246_v23, %v1247_v27  ;;  %v1262_v33 = vmax.f32 %v1260_v24, %v1261_v28 }
 0x334   : > { %v1273_v35 = vcombine.low %v1241_v29, %v1248_v31  ;;  %v1274_v36 = vcombine.low %v1255_v30, %v1262_v33 }
 0x336   : > { %v1295_v40 = vrot.slane %v1273_v35, %v2197_v32  ;;  %v1302_v41 = vrot.slane %v1274_v36, %v2197_v32 }
 0x338   : > { %v1304_v42 = vcombine.low %v1295_v40, %v1302_v41 }
 0x33a   : > { %v1318_v45 = vrot.slane %v1304_v42, %v2197_v32 }
 0x33c   : > { %v1319_v46 = vcombine.low %v1311_v43, %v1318_v45 }
 0x33e   : > { %1327 = vst [vmem:[%s384_s28] sm:$0xff] %v1319_v46 }
 0x33f PF: > { %s21_s26 = sadd.s32 1, %s1884_s26   ;;  %s2256_s24 = smov %s1880_s25 }
 0x340   : > { %p18_p8 = scmp.ge.s32.totalorder %s21_s26, 4   ;;  %s2257_s25 = smov %s2259_s12 }
 0x342   :  { %20 = sbr.rel (!%p18_p8) target bundleno = 5 (0x5), region = 111 }
 0x349   :  { %1347 = vsyncpa [#allocation4], 1 }
 0x34a   :  { %1349 = vsyncpa [#allocation4 + $0x1], 1 }
 0x34b   :  { %1350 = vsyncpa [#allocation6], 1 }
 0x34c   :  { %1351 = vsyncpa [#allocation9], 1 }
 0x34d   :  { %1352 = vsyncpa [#allocation12], 1 }

// kernel: model_forward.12
= control target key start
LH: loop header
LB: loop body
LE: loop exit
PB: predicated region body
PF: predicated region fallthrough
CT: control target
= control target key end

     0   :  { %s1470_s21 = smov 0   ;;  %s1472_s22 = smov 0   ;;  %s1761_s0 = inlined_call_operand.vmem [shape: bf16[2,16,64], index: 0, kind: input, shape index: {}]   ;;  %s1762_s1 = inlined_call_operand.vmem [shape: f32[2,64,64], index: 1, kind: input, shape index: {}]   ;;  %s1763_s2 = inlined_call_operand.vmem [shape: bf16[64,128], index: 2, kind: input, shape index: {}]   ;;  %s1764_s3 = inlined_call_operand.vmem [shape: f32[1,128], index: 3, kind: input, shape index: {}]   ;;  %s1765_s4 = inlined_call_operand.vmem [shape: bf16[128,1024], index: 4, kind: input, shape index: {}]   ;;  %s1766_s5 = inlined_call_operand.vmem [shape: f32[1,1024], index: 5, kind: input, shape index: {}]   ;;  %s1767_s6 = inlined_call_operand.vmem [shape: f32[2,1,1024], index: 6, kind: output, shape index: {}]  }
   0x1   :  { %s1474_s23 = smov 0  }
   0x2 LB: > { %s28_s24 = sadd.s32 1, %s1425_s22  ;;  %p1258_p0 = scmp.ge.s32.totalorder %s1429_s23, 1  ;;  %s1429_s23 = sphi %s1474_s23, %s16_s23   ;;  %s1425_s22 = sphi %s1472_s22, %s1769_s22   ;;  %s1421_s21 = sphi %s1470_s21, %s1768_s21  }
   0x3   : > { %p30_p1 = scmp.ge.s32.totalorder %s28_s24, 2  ;;  %p241_p2 = scmp.lt.s32.totalorder %s1429_s23, 3 }
   0x5   : > { %s1771_s24 = smov (%p30_p1, %s28_s24), 0  ;;  %p242_p3 = pnand %p1258_p0, %p241_p2 }
   0x6   : > { %p280_p4 = scmp.lt.s32.totalorder (!%p242_p3), %s1421_s21, 1  ;;  %v1431_v0 = vmov (!%p242_p3), 0.0   ;;  %vm1432_vm0 = vmmov (!%p242_p3), 0   ;;  %v1403_v1 = vld [vmem:[%s1763_s2] sm:$0xff] (!%p242_p3)   ;;  %v1404_v2 = vld [vmem:[%s1763_s2 + $0x8] sm:$0xff] (!%p242_p3)   ;;  %v1405_v8 = vld [vmem:[%s1763_s2 + $0x10] sm:$0xff] (!%p242_p3)  }
   0x7   : > { %245 = sbr.rel (%p242_p3) target bundleno = 745 (0x2e9), region = 44  ;;  %1350 = vmatprep.subr.bf16.mxu0 (!%p242_p3), %v1431_v0  ;;  %1358 = vmatprep.mubr.msk.bf16.mxu0 (!%p242_p3), %vm1432_vm0, %v1431_v0  ;;  %vm323_vm1 = vcmask (!%p242_p3), 523264   ;;  %v1406_v17 = vld [vmem:[%s1763_s2 + $0x18] sm:$0xff] (!%p242_p3)   ;;  %v454_v18 = vld [vmem:[%s1765_s4] sm:$0xff] (!%p242_p3)  ;;  %v455_v20 = vld [vmem:[%s1765_s4 + $0x8] sm:$0xff] (!%p242_p3) }
   0x8   : > { %1362 = vmatprep.subr.bf16.mxu1 (!%p242_p3), %v1431_v0  ;;  %1370 = vmatprep.mubr.msk.bf16.mxu1 (!%p242_p3), %vm1432_vm0, %v1431_v0  ;;  %v458_v19 = vld [vmem:[%s1765_s4 + $0x20] sm:$0xff] (!%p242_p3)  ;;  %v459_v23 = vld [vmem:[%s1765_s4 + $0x28] sm:$0xff] (!%p242_p3) }
   0x9   : > { %1363 = vmatpush3.bf16.msra.mxu1 (!%p242_p3), %v1403_v1  ;;  %v1272_v21 = vcombine.low (!%p242_p3), %v454_v18, %v458_v19  ;;  %v1273_v22 = vcombine.high (!%p242_p3), %v454_v18, %v458_v19  ;;  %v462_v24 = vld [vmem:[%s1765_s4 + $0x40] sm:$0xff] (!%p242_p3)  ;;  %v1274_v26 = vcombine.low (!%p242_p3), %v455_v20, %v459_v23  ;;  %v1275_v27 = vcombine.high (!%p242_p3), %v455_v20, %v459_v23  ;;  %v463_v47 = vld [vmem:[%s1765_s4 + $0x48] sm:$0xff] (!%p242_p3)  ;;  %v456_v23 = vld [vmem:[%s1765_s4 + $0x10] sm:$0xff] (!%p242_p3) }
   0xa   : > { %1364 = vmatprep.subr.bf16.mxu1 (!%p242_p3), %v1431_v0  ;;  %v466_v25 = vld [vmem:[%s1765_s4 + $0x60] sm:$0xff] (!%p242_p3)  ;;  %v467_v48 = vld [vmem:[%s1765_s4 + $0x68] sm:$0xff] (!%p242_p3) }
   0xb   : > { %v1281_v28 = vcombine.high (!%p242_p3), %v462_v24, %v466_v25  ;;  %v1280_v29 = vcombine.low (!%p242_p3), %v462_v24, %v466_v25  ;;  %v470_v30 = vld [vmem:[%s1765_s4 + $0x80] sm:$0xff] (!%p242_p3)  ;;  %v1283_v53 = vcombine.high (!%p242_p3), %v463_v47, %v467_v48  ;;  %v471_v54 = vld [vmem:[%s1765_s4 + $0x88] sm:$0xff] (!%p242_p3)  ;;  %v1282_v56 = vcombine.low (!%p242_p3), %v463_v47, %v467_v48  ;;  %v460_v24 = vld [vmem:[%s1765_s4 + $0x30] sm:$0xff] (!%p242_p3) }
   0xc   : > { %v474_v31 = vld [vmem:[%s1765_s4 + $0xa0] sm:$0xff] (!%p242_p3)  ;;  %v475_v55 = vld [vmem:[%s1765_s4 + $0xa8] sm:$0xff] (!%p242_p3)  ;;  %v457_v25 = vld [vmem:[%s1765_s4 + $0x18] sm:$0xff] (!%p242_p3) }
   0xd   : > { %1365 = vmatpush3.bf16.msra.mxu1 (!%p242_p3), %v1404_v2  ;;  %v1289_v32 = vcombine.high (!%p242_p3), %v470_v30, %v474_v31  ;;  %v1288_v33 = vcombine.low (!%p242_p3), %v470_v30, %v474_v31  ;;  %v478_v34 = vld [vmem:[%s1765_s4 + $0xc0] sm:$0xff] (!%p242_p3)  ;;  %v1291_v57 = vcombine.high (!%p242_p3), %v471_v54, %v475_v55  ;;  %v479_v58 = vld [vmem:[%s1765_s4 + $0xc8] sm:$0xff] (!%p242_p3)  ;;  %v1290_v60 = vcombine.low (!%p242_p3), %v471_v54, %v475_v55  ;;  %v472_v48 = vld [vmem:[%s1765_s4 + $0x90] sm:$0xff] (!%p242_p3) }
   0xe   : > { %s1773_s21 = smov (!%p280_p4, %s1421_s21), 1  ;;  %1366 = vmatprep.subr.bf16.mxu1 %v1431_v0  ;;  %v482_v35 = vld [vmem:[%s1765_s4 + $0xe0] sm:$0xff]  ;;  %v483_v59 = vld [vmem:[%s1765_s4 + $0xe8] sm:$0xff]  ;;  %v1433_v31 = vmov 0  }
   0xf   : > { %s1339_s29 = sshll.u32 %s1773_s21, 6  ;;  %s1338_s30 = sshll.u32 %s1773_s21, 3  ;;  %v1297_v36 = vcombine.high %v478_v34, %v482_v35  ;;  %v1296_v37 = vcombine.low %v478_v34, %v482_v35  ;;  %v486_v38 = vld [vmem:[%s1765_s4 + $0x100] sm:$0xff]  ;;  %v1299_v61 = vcombine.high %v479_v58, %v483_v59  ;;  %v487_v62 = vld [vmem:[%s1765_s4 + $0x108] sm:$0xff] }
  0x10   : > { %s293_s9 = scalar_lea.vmem %s1762_s1, %s1339_s29  ;;  %s287_s12 = scalar_lea.vmem %s1761_s0, %s1338_s30  ;;  %v490_v39 = vld [vmem:[%s1765_s4 + $0x120] sm:$0xff]  ;;  %v491_v63 = vld [vmem:[%s1765_s4 + $0x128] sm:$0xff] }
  0x11   : > { %v306_v3 = vld [vmem:[%s293_s9] sm:$0xff]  ;;  %v307_v4 = vld [vmem:[%s293_s9 + $0x8] sm:$0xff]  ;;  %v308_v5 = vld [vmem:[%s293_s9 + $0x10] sm:$0xff]  ;;  %1367 = vmatpush3.bf16.msra.mxu1 %v1405_v8  ;;  %v1305_v40 = vcombine.high %v486_v38, %v490_v39  ;;  %v1304_v41 = vcombine.low %v486_v38, %v490_v39  ;;  %v1307_v1 = vcombine.high %v487_v62, %v491_v63  ;;  %s297_s18 = scalar_lea.vmem %s1767_s6, %s1338_s30 }
  0x12   : > { %v314_v6 = vpack.c.bf16 %v307_v4, %v306_v3  ;;  %v309_v7 = vld [vmem:[%s293_s9 + $0x18] sm:$0xff]  ;;  %v310_v10 = vld [vmem:[%s293_s9 + $0x20] sm:$0xff]  ;;  %v311_v11 = vld [vmem:[%s293_s9 + $0x28] sm:$0xff]  ;;  %1368 = vmatprep.subr.bf16.mxu1 %v1431_v0  ;;  %v1306_v4 = vcombine.low %v487_v62, %v491_v63 }
  0x13   : > { %v315_v9 = vpack.c.bf16 %v309_v7, %v308_v5  ;;  %v316_v12 = vpack.c.bf16 %v311_v11, %v310_v10  ;;  %v312_v13 = vld [vmem:[%s293_s9 + $0x30] sm:$0xff]  ;;  %v313_v14 = vld [vmem:[%s293_s9 + $0x38] sm:$0xff]  ;;  %v1402_v16 = vld [vmem:[%s287_s12] sm:$0xff]  }
  0x14   : > { %1351 = vmatpush3.bf16.msra.mxu0 %v314_v6  ;;  %v317_v15 = vpack.c.bf16 %v313_v14, %v312_v13  ;;  %v494_v42 = vld [vmem:[%s1765_s4 + $0x140] sm:$0xff]  ;;  %v495_v2 = vld [vmem:[%s1765_s4 + $0x148] sm:$0xff]  ;;  %v464_v39 = vld [vmem:[%s1765_s4 + $0x50] sm:$0xff] }
  0x15   : > { %1352 = vmatprep.subr.bf16.mxu0 %v1431_v0  ;;  %1369 = vmatpush3.bf16.msra.mxu1 %v1406_v17  ;;  %v498_v43 = vld [vmem:[%s1765_s4 + $0x160] sm:$0xff]  ;;  %v499_v3 = vld [vmem:[%s1765_s4 + $0x168] sm:$0xff] }
  0x16   : > { %924 = vmatprep.subr.bf16.mxu1 %v1275_v27  ;;  %v1313_v44 = vcombine.high %v494_v42, %v498_v43  ;;  %v1312_v45 = vcombine.low %v494_v42, %v498_v43  ;;  %v1315_v5 = vcombine.high %v495_v2, %v499_v3  ;;  %v1314_v6 = vcombine.low %v495_v2, %v499_v3  ;;  %v502_v7 = vld [vmem:[%s1765_s4 + $0x180] sm:$0xff]  ;;  %v507_v11 = vld [vmem:[%s1765_s4 + $0x1a8] sm:$0xff]  ;;  %v461_v27 = vld [vmem:[%s1765_s4 + $0x38] sm:$0xff] }
  0x17   : > { %v506_v8 = vld [vmem:[%s1765_s4 + $0x1a0] sm:$0xff]  ;;  %v511_v17 = vld [vmem:[%s1765_s4 + $0x1c8] sm:$0xff]  ;;  %v1279_v30 = vcombine.high %v457_v25, %v461_v27  ;;  %v469_v42 = vld [vmem:[%s1765_s4 + $0x78] sm:$0xff] }
  0x18   : > { %1353 = vmatpush3.bf16.msra.mxu0 %v315_v9  ;;  %v503_v9 = vld [vmem:[%s1765_s4 + $0x188] sm:$0xff]  ;;  %v1321_v10 = vcombine.high %v502_v7, %v506_v8  ;;  %v489_v2 = vld [vmem:[%s1765_s4 + $0x118] sm:$0xff] }
  0x19   : > { %1354 = vmatprep.subr.bf16.mxu0 %v1431_v0  ;;  %v1322_v13 = vcombine.low %v503_v9, %v507_v11  ;;  %v1323_v14 = vcombine.high %v503_v9, %v507_v11  ;;  %v515_v19 = vld [vmem:[%s1765_s4 + $0x1e8] sm:$0xff]  ;;  %v493_v3 = vld [vmem:[%s1765_s4 + $0x138] sm:$0xff]  ;;  %v500_v9 = vld [vmem:[%s1765_s4 + $0x170] sm:$0xff] }
  0x1a   : > { %v501_v11 = vld [vmem:[%s1765_s4 + $0x178] sm:$0xff] }
  0x1c   : > { %1355 = vmatpush3.bf16.msra.mxu0 %v316_v12  ;;  %v1320_v12 = vcombine.low %v502_v7, %v506_v8  ;;  %v1311_v7 = vcombine.high %v489_v2, %v493_v3  ;;  %v496_v8 = vld [vmem:[%s1765_s4 + $0x150] sm:$0xff] }
  0x1d   : > { %1356 = vmatprep.subr.bf16.mxu0 %v1431_v0  ;;  %v1298_v0 = vcombine.low %v479_v58, %v483_v59  ;;  %v481_v58 = vld [vmem:[%s1765_s4 + $0xd8] sm:$0xff] }
  0x1e   : > { %v485_v59 = vld [vmem:[%s1765_s4 + $0xf8] sm:$0xff] }
  0x1f   : > { %v1303_v63 = vcombine.high %v481_v58, %v485_v59 }
  0x20   : > { %1357 = vmatpush3.bf16.msra.mxu0 %v317_v15  ;;  %v510_v15 = vld [vmem:[%s1765_s4 + $0x1c0] sm:$0xff] }
  0x21   : > { %881 = vmatprep.subr.bf16.mxu0 %v1273_v22  ;;  %v1331_v22 = vcombine.high %v511_v17, %v515_v19 }
  0x23   : > { %1359 = vmatmul.mubr.msk.bf16.vlgmr.msra.gmra.mrb[0].mxu0 %vm323_vm1, %v1402_v16  ;;  %v514_v16 = vld [vmem:[%s1765_s4 + $0x1e0] sm:$0xff] }
  0x24   : > { %882 = vmatpush1.bf16.msra.mxu0 %v1272_v21  ;;  %v1329_v18 = vcombine.high %v510_v15, %v514_v16  ;;  %v1328_v20 = vcombine.low %v510_v15, %v514_v16  ;;  %v1330_v21 = vcombine.low %v511_v17, %v515_v19  ;;  %913 = vmatprep.mubr.bf16.mxu0 %v1433_v31  ;;  %v504_v16 = vld [vmem:[%s1765_s4 + $0x190] sm:$0xff]  ;;  %v509_v19 = vld [vmem:[%s1765_s4 + $0x1b8] sm:$0xff] }
  0x25   : > { %883 = vmatprep.subr.bf16.mxu0 %v1281_v28  ;;  %v1276_v28 = vcombine.low %v456_v23, %v460_v24  ;;  %v508_v17 = vld [vmem:[%s1765_s4 + $0x1b0] sm:$0xff] }
  0x28   : > { %884 = vmatpush1.bf16.msra.mxu0 %v1280_v29  ;;  %v1278_v29 = vcombine.low %v457_v25, %v461_v27  ;;  %v516_v25 = vld [vmem:[%s1765_s4 + $0x1f0] sm:$0xff]  ;;  %v517_v27 = vld [vmem:[%s1765_s4 + $0x1f8] sm:$0xff] }
  0x29   : > { %885 = vmatprep.subr.bf16.mxu0 %v1289_v32  ;;  %v1266_v32 = vld [vmem:[%s1764_s3] ss:$0 sm:$0xff] }
  0x2c   : > { %886 = vmatpush1.bf16.msra.mxu0 %v1288_v33 }
  0x2d   : > { %887 = vmatprep.subr.bf16.mxu0 %v1297_v36 }
  0x30   : > { %888 = vmatpush1.bf16.msra.mxu0 %v1296_v37 }
  0x31   : > { %889 = vmatprep.subr.bf16.mxu0 %v1305_v40  ;;  %v468_v40 = vld [vmem:[%s1765_s4 + $0x70] sm:$0xff] }
  0x34   : > { %890 = vmatpush1.bf16.msra.mxu0 %v1304_v41  ;;  %v465_v41 = vld [vmem:[%s1765_s4 + $0x58] sm:$0xff] }
  0x35   : > { %891 = vmatprep.subr.bf16.mxu0 %v1313_v44  ;;  %v1287_v47 = vcombine.high %v465_v41, %v469_v42 }
  0x38   : > { %892 = vmatpush1.bf16.msra.mxu0 %v1312_v45 }
  0x39   : > { %893 = vmatprep.subr.bf16.mxu0 %v1321_v10  ;;  %v497_v10 = vld [vmem:[%s1765_s4 + $0x158] sm:$0xff] }
  0x3a   : > { %v1319_v15 = vcombine.high %v497_v10, %v501_v11 }
  0x3c   : > { %894 = vmatpush1.bf16.msra.mxu0 %v1320_v12 }
  0x3d   : > { %895 = vmatprep.subr.bf16.mxu0 %v1329_v18  ;;  %v505_v18 = vld [vmem:[%s1765_s4 + $0x198] sm:$0xff] }
  0x40   : > { %896 = vmatpush1.bf16.msra.mxu0 %v1328_v20  ;;  %v1316_v20 = vcombine.low %v496_v8, %v500_v9 }
  0xf6   : > { %v361_v46 = vpop.f32.mrb[0].mxu0 }
  0xf7   : > { %v1360_v49 = vpop.f32.mrb[1].mxu0 }
  0xf8   : > { %v364_v50 = vpop.f32.mrb[2].mxu0  ;;  %v476_v49 = vld [vmem:[%s1765_s4 + $0xb0] sm:$0xff] }
  0xf9   : > { %v376_v51 = vpack.c.bf16 %v364_v50, %v361_v46  ;;  %v1361_v52 = vpop.f32.mrb[3].mxu0  ;;  %v1285_v46 = vcombine.high %v464_v39, %v468_v40  ;;  %v473_v50 = vld [vmem:[%s1765_s4 + $0x98] sm:$0xff]  ;;  %v1293_v54 = vcombine.high %v472_v48, %v476_v49 }
  0xfa   : > { %v1284_v52 = vcombine.low %v464_v39, %v468_v40 }
  0xfb   : > { %1371 = vmatmul.mubr.msk.bf16.vlgmr.msra.gmra.mrb[0].mxu1 %vm323_vm1, %v376_v51  ;;  %v477_v51 = vld [vmem:[%s1765_s4 + $0xb8] sm:$0xff] }
  0xfc   : > { %925 = vmatpush1.bf16.msra.mxu1 %v1274_v26  ;;  %v1277_v26 = vcombine.high %v456_v23, %v460_v24  ;;  %956 = vmatprep.mubr.bf16.mxu1 %v1433_v31  ;;  %v1295_v55 = vcombine.high %v473_v50, %v477_v51  ;;  %v1327_v23 = vcombine.high %v505_v18, %v509_v19  ;;  %v512_v24 = vld [vmem:[%s1765_s4 + $0x1d0] sm:$0xff] }
  0xfd   : > { %926 = vmatprep.subr.bf16.mxu1 %v1283_v53  ;;  %v1286_v53 = vcombine.low %v465_v41, %v469_v42 }
  0xfe   : > { %967 = vmatprep.subr.bf16.mxu0 %v1277_v26  ;;  %v513_v26 = vld [vmem:[%s1765_s4 + $0x1d8] sm:$0xff] }
 0x100   : > { %927 = vmatpush1.bf16.msra.mxu1 %v1282_v56  ;;  %v480_v56 = vld [vmem:[%s1765_s4 + $0xd0] sm:$0xff] }
 0x101   : > { %928 = vmatprep.subr.bf16.mxu1 %v1291_v57  ;;  %v484_v57 = vld [vmem:[%s1765_s4 + $0xf0] sm:$0xff] }
 0x102   : > { %v1301_v62 = vcombine.high %v480_v56, %v484_v57 }
 0x104   : > { %929 = vmatpush1.bf16.msra.mxu1 %v1290_v60  ;;  %v1292_v60 = vcombine.low %v472_v48, %v476_v49 }
 0x105   : > { %930 = vmatprep.subr.bf16.mxu1 %v1299_v61  ;;  %v1294_v61 = vcombine.low %v473_v50, %v477_v51 }
 0x108   : > { %931 = vmatpush1.bf16.msra.mxu1 %v1298_v0  ;;  %v488_v0 = vld [vmem:[%s1765_s4 + $0x110] sm:$0xff] }
 0x109   : > { %932 = vmatprep.subr.bf16.mxu1 %v1307_v1  ;;  %v492_v1 = vld [vmem:[%s1765_s4 + $0x130] sm:$0xff] }
 0x10a   : > { %v1308_v12 = vcombine.low %v488_v0, %v492_v1 }
 0x10c   : > { %933 = vmatpush1.bf16.msra.mxu1 %v1306_v4  ;;  %v1300_v4 = vcombine.low %v480_v56, %v484_v57 }
 0x10d   : > { %934 = vmatprep.subr.bf16.mxu1 %v1315_v5  ;;  %v1302_v5 = vcombine.low %v481_v58, %v485_v59 }
 0x110   : > { %935 = vmatpush1.bf16.msra.mxu1 %v1314_v6  ;;  %v1309_v6 = vcombine.high %v488_v0, %v492_v1 }
 0x111   : > { %936 = vmatprep.subr.bf16.mxu1 %v1323_v14  ;;  %v1317_v14 = vcombine.high %v496_v8, %v500_v9  ;;  %v1434_v8 = vmov 1966171168  }
 0x112   : > { %v1123_v9 = vunpack.c.l.s4 %v1434_v8 }
 0x114   : > { %937 = vmatpush1.bf16.msra.mxu1 %v1322_v13  ;;  %v1310_v13 = vcombine.low %v489_v2, %v493_v3 }
 0x115   : > { %938 = vmatprep.subr.bf16.mxu1 %v1331_v22  ;;  %v1325_v22 = vcombine.high %v504_v16, %v508_v17 }
 0x118   : > { %939 = vmatpush1.bf16.msra.mxu1 %v1330_v21  ;;  %v1318_v21 = vcombine.low %v497_v10, %v501_v11 }
 0x119   : > { %1010 = vmatprep.subr.bf16.mxu1 %v1279_v30  ;;  %v1333_v30 = vcombine.high %v512_v24, %v516_v25 }
 0x1ce   : > { %v445_v33 = vpop.f32.mrb[0].mxu1 }
 0x1cf   : > { %v446_v34 = vadd.f32 %v1266_v32, %v445_v33  ;;  %v1372_v35 = vpop.f32.mrb[1].mxu1  ;;  %v1334_v33 = vcombine.low %v513_v26, %v517_v27 }
 0x1d0   : > { %v448_v36 = vpop.f32.mrb[2].mxu1 }
 0x1d1   : > { %v449_v37 = vadd.f32 %v1266_v32, %v448_v36  ;;  %v1373_v38 = vpop.f32.mrb[3].mxu1  ;;  %v452_v43 = vmax.f32 %v446_v34, 0.0  ;;  %v1332_v32 = vcombine.low %v512_v24, %v516_v25  ;;  %v521_v34 = vlaneseq }
 0x1d2   : > { %v1722_v38 = vld [vmem:[%s1766_s5] sm:$0xff] }
 0x1d3   : > { %v453_v44 = vmax.f32 %v449_v37, 0.0  ;;  %v1715_v35 = vshrl.u32 %v521_v34, 7 }
 0x1d5   : > { %v1637_v45 = vpack.c.bf16 %v453_v44, %v452_v43  ;;  %v523_v36 = vsub.s32 0, %v1715_v35  ;;  %v531_v37 = vsub.s32 2, %v1715_v35  ;;  %v527_v39 = vsub.s32 1, %v1715_v35 }
 0x1d6   : > { %v535_v40 = vsub.s32 3, %v1715_v35  ;;  %v539_v34 = vsub.s32 4, %v1715_v35 }
 0x1d7   : > { %914 = vmatmul.mubr.bf16.vlgmr.msra.gmra.mrb[4].mxu0 %v1637_v45  ;;  %957 = vmatmul.mubr.bf16.vlgmr.msra.gmra.mrb[4].mxu1 %v1637_v45  ;;  %v524_v41 = vrot.slane %v1722_v38, %v523_v36  ;;  %v532_v42 = vrot.slane %v1722_v38, %v531_v37  ;;  %v547_v36 = vsub.s32 6, %v1715_v35  ;;  %v543_v37 = vsub.s32 5, %v1715_v35 }
 0x1d8   : > { %968 = vmatpush1.bf16.msra.mxu0 %v1276_v28  ;;  %1011 = vmatpush1.bf16.msra.mxu1 %v1278_v29  ;;  %v1324_v28 = vcombine.low %v504_v16, %v508_v17  ;;  %v1326_v29 = vcombine.low %v505_v18, %v509_v19  ;;  %v1124_v18 = vunpack.c.0.s8 %v1123_v9 }
 0x1d9   : > { %969 = vmatprep.subr.bf16.mxu0 %v1285_v46  ;;  %1012 = vmatprep.subr.bf16.mxu1 %v1287_v47  ;;  %v536_v46 = vrot.slane %v1722_v38, %v535_v40  ;;  %v540_v40 = vrot.slane %v1722_v38, %v539_v34 }
 0x1da   : > { %999 = vmatprep.mubr.bf16.mxu0 %v1433_v31  ;;  %1042 = vmatprep.mubr.bf16.mxu1 %v1433_v31  ;;  %v1335_v31 = vcombine.high %v513_v26, %v517_v27  ;;  %v1731_v27 = vsub.s32 %v1124_v18, %v1715_v35 }
 0x1dc   : > { %970 = vmatpush1.bf16.msra.mxu0 %v1284_v52  ;;  %1013 = vmatpush1.bf16.msra.mxu1 %v1286_v53 }
 0x1dd   : > { %971 = vmatprep.subr.bf16.mxu0 %v1293_v54  ;;  %1014 = vmatprep.subr.bf16.mxu1 %v1295_v55 }
 0x1e0   : > { %972 = vmatpush1.bf16.msra.mxu0 %v1292_v60  ;;  %1015 = vmatpush1.bf16.msra.mxu1 %v1294_v61 }
 0x1e1   : > { %973 = vmatprep.subr.bf16.mxu0 %v1301_v62  ;;  %1016 = vmatprep.subr.bf16.mxu1 %v1303_v63 }
 0x1e4   : > { %974 = vmatpush1.bf16.msra.mxu0 %v1300_v4  ;;  %1017 = vmatpush1.bf16.msra.mxu1 %v1302_v5 }
 0x1e5   : > { %975 = vmatprep.subr.bf16.mxu0 %v1309_v6  ;;  %1018 = vmatprep.subr.bf16.mxu1 %v1311_v7 }
 0x1e8   : > { %976 = vmatpush1.bf16.msra.mxu0 %v1308_v12  ;;  %1019 = vmatpush1.bf16.msra.mxu1 %v1310_v13 }
 0x1e9   : > { %977 = vmatprep.subr.bf16.mxu0 %v1317_v14  ;;  %1020 = vmatprep.subr.bf16.mxu1 %v1319_v15 }
 0x1ec   : > { %978 = vmatpush1.bf16.msra.mxu0 %v1316_v20  ;;  %1021 = vmatpush1.bf16.msra.mxu1 %v1318_v21 }
 0x1ed   : > { %979 = vmatprep.subr.bf16.mxu0 %v1325_v22  ;;  %1022 = vmatprep.subr.bf16.mxu1 %v1327_v23 }
 0x1f0   : > { %980 = vmatpush1.bf16.msra.mxu0 %v1324_v28  ;;  %1023 = vmatpush1.bf16.msra.mxu1 %v1326_v29 }
 0x1f1   : > { %981 = vmatprep.subr.bf16.mxu0 %v1333_v30  ;;  %1024 = vmatprep.subr.bf16.mxu1 %v1335_v31 }
 0x1f4   : > { %982 = vmatpush1.bf16.msra.mxu0 %v1332_v32  ;;  %1025 = vmatpush1.bf16.msra.mxu1 %v1334_v33 }
 0x1f7   : > { %1000 = vmatmul.mubr.bf16.vlgmr.msra.gmra.mrb[8].mxu0 %v1637_v45  ;;  %1043 = vmatmul.mubr.bf16.vlgmr.msra.gmra.mrb[8].mxu1 %v1637_v45  ;;  %v528_v45 = vrot.slane %v1722_v38, %v527_v39  ;;  %v551_v39 = vsub.s32 7, %v1715_v35 }
 0x2aa   : > { %v915_v43 = vpop.f32.mrb[4].mxu0  ;;  %v958_v44 = vpop.f32.mrb[4].mxu1 }
 0x2ab   : > { %v917_v47 = vpop.f32.mrb[5].mxu0  ;;  %v960_v48 = vpop.f32.mrb[5].mxu1  ;;  %v916_v51 = vadd.f32 %v915_v43, %v524_v41  ;;  %v959_v52 = vadd.f32 %v958_v44, %v532_v42  ;;  %v544_v44 = vrot.slane %v1722_v38, %v543_v37 }
 0x2ac   : > { %v919_v49 = vpop.f32.mrb[6].mxu0  ;;  %v962_v50 = vpop.f32.mrb[6].mxu1  ;;  %v918_v57 = vadd.f32 %v917_v47, %v528_v45  ;;  %v961_v58 = vadd.f32 %v960_v48, %v536_v46 }
 0x2ad   : > { %v920_v53 = vadd.f32 %v919_v49, %v524_v41  ;;  %v963_v54 = vadd.f32 %v962_v50, %v532_v42  ;;  %v921_v55 = vpop.f32.mrb[7].mxu0  ;;  %v964_v56 = vpop.f32.mrb[7].mxu1  ;;  %v548_v41 = vrot.slane %v1722_v38, %v547_v36 }
 0x2ae   : > { %v922_v59 = vadd.f32 %v921_v55, %v528_v45  ;;  %v965_v60 = vadd.f32 %v964_v56, %v536_v46  ;;  %v552_v45 = vrot.slane %v1722_v38, %v551_v39 }
 0x2af   : > { %v1054_v61 = vmax.f32 %v916_v51, %v920_v53  ;;  %v1068_v62 = vmax.f32 %v959_v52, %v963_v54 }
 0x2b0   : > { %v1061_v63 = vmax.f32 %v918_v57, %v922_v59  ;;  %v1075_v0 = vmax.f32 %v961_v58, %v965_v60 }
 0x2b1   : > { %v1055_v1 = vrot.slane %v1054_v61, 4  ;;  %v1069_v2 = vrot.slane %v1068_v62, 4 }
 0x2b2   : > { %v1062_v3 = vrot.slane %v1061_v63, 4  ;;  %v1076_v4 = vrot.slane %v1075_v0, 4 }
 0x2b3   : > { %v1056_v5 = vmax.f32 %v1054_v61, %v1055_v1  ;;  %v1070_v6 = vmax.f32 %v1068_v62, %v1069_v2 }
 0x2b4   : > { %v1063_v7 = vmax.f32 %v1061_v63, %v1062_v3  ;;  %v1077_v10 = vmax.f32 %v1075_v0, %v1076_v4 }
 0x2b5   : > { %v1057_v11 = vrot.slane %v1056_v5, 2  ;;  %v1071_v12 = vrot.slane %v1070_v6, 2 }
 0x2b6   : > { %v1064_v13 = vrot.slane %v1063_v7, 2  ;;  %v1078_v14 = vrot.slane %v1077_v10, 2 }
 0x2b7   : > { %v1058_v15 = vmax.f32 %v1056_v5, %v1057_v11  ;;  %v1072_v16 = vmax.f32 %v1070_v6, %v1071_v12 }
 0x2b8   : > { %v1065_v17 = vmax.f32 %v1063_v7, %v1064_v13  ;;  %v1079_v19 = vmax.f32 %v1077_v10, %v1078_v14 }
 0x2b9   : > { %v1059_v20 = vrot.slane %v1058_v15, 1  ;;  %v1073_v21 = vrot.slane %v1072_v16, 1 }
 0x2ba   : > { %v1066_v22 = vrot.slane %v1065_v17, 1  ;;  %v1080_v23 = vrot.slane %v1079_v19, 1 }
 0x2bb   : > { %v1060_v24 = vmax.f32 %v1058_v15, %v1059_v20  ;;  %v1074_v25 = vmax.f32 %v1072_v16, %v1073_v21 }
 0x2bc   : > { %v1067_v26 = vmax.f32 %v1065_v17, %v1066_v22  ;;  %v1081_v28 = vmax.f32 %v1079_v19, %v1080_v23 }
 0x2be   : > { %v1118_v29 = vcombine.low %v1060_v24, %v1067_v26  ;;  %v1119_v30 = vcombine.low %v1074_v25, %v1081_v28 }
 0x2c0   : > { %v1128_v31 = vrot.slane %v1118_v29, %v1731_v27  ;;  %v1135_v32 = vrot.slane %v1119_v30, %v1731_v27 }
 0x2c2   : > { %v1150_v33 = vcombine.low %v1128_v31, %v1135_v32 }
 0x2c4   : > { %v1158_v28 = vrot.slane %v1150_v33, %v1731_v27 }
 0x2ca   : > { %v1001_v42 = vpop.f32.mrb[8].mxu0  ;;  %v1044_v43 = vpop.f32.mrb[8].mxu1 }
 0x2cb   : > { %v1003_v46 = vpop.f32.mrb[9].mxu0  ;;  %v1046_v47 = vpop.f32.mrb[9].mxu1  ;;  %v1002_v50 = vadd.f32 %v1001_v42, %v540_v40  ;;  %v1045_v51 = vadd.f32 %v1044_v43, %v548_v41 }
 0x2cc   : > { %v1005_v48 = vpop.f32.mrb[10].mxu0  ;;  %v1048_v49 = vpop.f32.mrb[10].mxu1  ;;  %v1004_v55 = vadd.f32 %v1003_v46, %v544_v44  ;;  %v1047_v56 = vadd.f32 %v1046_v47, %v552_v45 }
 0x2cd   : > { %v1006_v52 = vadd.f32 %v1005_v48, %v540_v40  ;;  %v1049_v53 = vadd.f32 %v1048_v49, %v548_v41  ;;  %v1007_v54 = vpop.f32.mrb[11].mxu0  ;;  %v1050_v35 = vpop.f32.mrb[11].mxu1 }
 0x2ce   : > { %v1008_v57 = vadd.f32 %v1007_v54, %v544_v44  ;;  %v1051_v58 = vadd.f32 %v1050_v35, %v552_v45 }
 0x2cf   : > { %v1082_v59 = vmax.f32 %v1002_v50, %v1006_v52  ;;  %v1096_v60 = vmax.f32 %v1045_v51, %v1049_v53 }
 0x2d0   : > { %v1089_v61 = vmax.f32 %v1004_v55, %v1008_v57  ;;  %v1103_v62 = vmax.f32 %v1047_v56, %v1051_v58 }
 0x2d1   : > { %v1083_v63 = vrot.slane %v1082_v59, 4  ;;  %v1097_v38 = vrot.slane %v1096_v60, 4 }
 0x2d2   : > { %v1090_v0 = vrot.slane %v1089_v61, 4  ;;  %v1104_v1 = vrot.slane %v1103_v62, 4 }
 0x2d3   : > { %v1084_v2 = vmax.f32 %v1082_v59, %v1083_v63  ;;  %v1098_v3 = vmax.f32 %v1096_v60, %v1097_v38 }
 0x2d4   : > { %v1091_v4 = vmax.f32 %v1089_v61, %v1090_v0  ;;  %v1105_v5 = vmax.f32 %v1103_v62, %v1104_v1 }
 0x2d5   : > { %v1085_v6 = vrot.slane %v1084_v2, 2  ;;  %v1099_v7 = vrot.slane %v1098_v3, 2 }
 0x2d6   : > { %v1092_v8 = vrot.slane %v1091_v4, 2  ;;  %v1106_v9 = vrot.slane %v1105_v5, 2 }
 0x2d7   : > { %v1086_v10 = vmax.f32 %v1084_v2, %v1085_v6  ;;  %v1100_v11 = vmax.f32 %v1098_v3, %v1099_v7 }
 0x2d8   : > { %v1093_v12 = vmax.f32 %v1091_v4, %v1092_v8  ;;  %v1107_v13 = vmax.f32 %v1105_v5, %v1106_v9 }
 0x2d9   : > { %v1087_v14 = vrot.slane %v1086_v10, 1  ;;  %v1101_v15 = vrot.slane %v1100_v11, 1 }
 0x2da   : > { %v1094_v16 = vrot.slane %v1093_v12, 1  ;;  %v1108_v17 = vrot.slane %v1107_v13, 1 }
 0x2db   : > { %v1088_v18 = vmax.f32 %v1086_v10, %v1087_v14  ;;  %v1102_v19 = vmax.f32 %v1100_v11, %v1101_v15 }
 0x2dc   : > { %v1095_v20 = vmax.f32 %v1093_v12, %v1094_v16  ;;  %v1109_v21 = vmax.f32 %v1107_v13, %v1108_v17 }
 0x2de   : > { %v1120_v22 = vcombine.low %v1088_v18, %v1095_v20  ;;  %v1121_v23 = vcombine.low %v1102_v19, %v1109_v21 }
 0x2e0   : > { %v1142_v24 = vrot.slane %v1120_v22, %v1731_v27  ;;  %v1149_v25 = vrot.slane %v1121_v23, %v1731_v27 }
 0x2e2   : > { %v1151_v26 = vcombine.low %v1142_v24, %v1149_v25 }
 0x2e4   : > { %v1165_v29 = vrot.slane %v1151_v26, %v1731_v27 }
 0x2e6   : > { %v1166_v30 = vcombine.low %v1158_v28, %v1165_v29 }
 0x2e8   : > { %1174 = vst [vmem:[%s297_s18] sm:$0xff] %v1166_v30 }
 0x2e9 PF: > { %s16_s23 = sadd.s32 1, %s1429_s23   ;;  %s1768_s21 = smov %s1425_s22 }
 0x2ea   : > { %p13_p5 = scmp.ge.s32.totalorder %s16_s23, 4   ;;  %s1769_s22 = smov %s1771_s24 }
 0x2ec   :  { %15 = sbr.rel (!%p13_p5) target bundleno = 2 (0x2), region = 85 }

// kernel: model_forward.8
= control target key start
LH: loop header
LB: loop body
LE: loop exit
PB: predicated region body
PF: predicated region fallthrough
CT: control target
= control target key end

     0   :  { %12 = vsyncpa [#allocation3], 0  ;;  %s3957_s0 = inlined_call_operand.vmem [shape: f32[2,1024], index: 0, kind: input, shape index: {}]   ;;  %s3958_s1 = inlined_call_operand.hbm [shape: bf16[1024,512], index: 1, kind: input, shape index: {}]   ;;  %s3959_s2 = inlined_call_operand.hbm [shape: f32[1,512], index: 2, kind: input, shape index: {}]   ;;  %s3960_s3 = inlined_call_operand.hbm [shape: bf16[512,256], index: 3, kind: input, shape index: {}]   ;;  %s3961_s4 = inlined_call_operand.hbm [shape: f32[1,256], index: 4, kind: input, shape index: {}]   ;;  %s3962_s5 = inlined_call_operand.vmem [shape: bf16[256,9], index: 5, kind: input, shape index: {}]   ;;  %s3963_s6 = inlined_call_operand.hbm [shape: f32[1,9], index: 6, kind: input, shape index: {}]   ;;  %s3964_s7 = inlined_call_operand.vmem [shape: f32[2,9], index: 7, kind: output, shape index: {}]  }
   0x1   :  { %13 = vsyncpa [#allocation5], 0 }
   0x2   :  { %14 = vsyncpa [#allocation8], 0  ;;  %s3718_s24 = smov [#allocation4]   ;;  %s3719_s26 = smov [#allocation7]  }
   0x3   :  { %s35_s25 = sshll.u32 %s3718_s24, 4  ;;  %s57_s27 = sshll.u32 %s3719_s26, 4  ;;  %s36_s25 = int_to_ptr.vmem [resolvable:$true] %s35_s25  ;;  %s58_s27 = int_to_ptr.vmem [resolvable:$true] %s57_s27 }
   0x4   :  { %s3602_s30 = scalar_lea.hbm %s3959_s2, 64 }
   0x5   :  { %p3603_p0 = scmp.ne.s32.totalorder %s3959_s2, %s3602_s30  ;;  %p3606_p1 = scmp.lt.u32.totalorder %s3602_s30, %s3959_s2 }
   0x7   :  { %p3608_p2 = pnand %p3606_p1, %p3603_p0 }
   0x9   :  { %3611 = shalt.err (!%p3608_p2)
}
   0xa   :  { %s3612_s12 = scalar_lea.vmem %s36_s25, 64  ;;  %p3617_p4 = scmp.lt.s32.totalorder %s36_s25, %s36_s25 }
   0xb   :  { %p3613_p3 = scmp.ne.s32.totalorder %s36_s25, %s3612_s12  ;;  %p3618_p5 = scmp.lt.s32.totalorder %s3612_s12, %s3612_s12 }
   0xd   :  { %p3619_p6 = por %p3618_p5, %p3617_p4 }
   0xf   :  { %p3620_p7 = pnand %p3619_p6, %p3613_p3 }
  0x11   :  { %3623 = shalt.err (!%p3620_p7)
}
  0x12   :  { %38 = dma.hbm_to_vmem [thread:$0]  %s3959_s2, 64, %s36_s25, [#allocation5]  }
  0x13   :  { %s3624_s17 = scalar_lea.hbm %s3961_s4, 32 }
  0x14   :  { %p3625_p8 = scmp.ne.s32.totalorder %s3961_s4, %s3624_s17  ;;  %p3628_p9 = scmp.lt.u32.totalorder %s3624_s17, %s3961_s4 }
  0x16   :  { %p3630_p10 = pnand %p3628_p9, %p3625_p8 }
  0x18   :  { %3633 = shalt.err (!%p3630_p10)
}
  0x19   :  { %s3634_s22 = scalar_lea.vmem %s58_s27, 32  ;;  %p3639_p12 = scmp.lt.s32.totalorder %s58_s27, %s58_s27 }
  0x1a   :  { %p3635_p11 = scmp.ne.s32.totalorder %s58_s27, %s3634_s22  ;;  %p3640_p13 = scmp.lt.s32.totalorder %s3634_s22, %s3634_s22 }
  0x1c   :  { %p3641_p0 = por %p3640_p13, %p3639_p12 }
  0x1e   :  { %p3642_p1 = pnand %p3641_p0, %p3635_p11 }
  0x20   :  { %3645 = shalt.err (!%p3642_p1)
}
  0x21   :  { %60 = dma.hbm_to_vmem [thread:$0]  %s3961_s4, 32, %s58_s27, [#allocation8]  }
  0x22   :  { %s3720_s24 = smov [#allocation2]   ;;  %s3646_s29 = scalar_lea.hbm %s3958_s1, 32768 }
  0x23   :  { %s22_s25 = sshll.u32 %s3720_s24, 4  ;;  %p3647_p2 = scmp.ne.s32.totalorder %s3958_s1, %s3646_s29  ;;  %s23_s25 = int_to_ptr.vmem [resolvable:$true] %s22_s25 }
  0x24   :  { %p3650_p3 = scmp.lt.u32.totalorder %s3646_s29, %s3958_s1 }
  0x26   :  { %p3652_p4 = pnand %p3650_p3, %p3647_p2 }
  0x28   :  { %3655 = shalt.err (!%p3652_p4)
}
  0x29   :  { %s3656_s11 = scalar_lea.vmem %s23_s25, 32768  ;;  %p3661_p6 = scmp.lt.s32.totalorder %s23_s25, %s23_s25 }
  0x2a   :  { %p3657_p5 = scmp.ne.s32.totalorder %s23_s25, %s3656_s11  ;;  %p3662_p7 = scmp.lt.s32.totalorder %s3656_s11, %s3656_s11 }
  0x2c   :  { %p3663_p8 = por %p3662_p7, %p3661_p6 }
  0x2e   :  { %p3664_p9 = pnand %p3663_p8, %p3657_p5 }
  0x30   :  { %3667 = shalt.err (!%p3664_p9)
}
  0x31   :  { %s3721_s4 = smov 256   ;;  %s3722_s27 = smov 16  }
  0x32   :  { %28 = dma.hbm_to_vmem [thread:$0]  %s3958_s1, 32768, %s23_s25, [#allocation3], %s3721_s4, %s3721_s4, %s3722_s27  }
  0x33   :  { %s3723_s14 = smov [#allocation6]   ;;  %s3668_s18 = scalar_lea.hbm %s3960_s3, 8192 }
  0x34   :  { %s44_s15 = sshll.u32 %s3723_s14, 4  ;;  %p3669_p10 = scmp.ne.s32.totalorder %s3960_s3, %s3668_s18  ;;  %s45_s15 = int_to_ptr.vmem [resolvable:$true] %s44_s15 }
  0x35   :  { %p3672_p11 = scmp.lt.u32.totalorder %s3668_s18, %s3960_s3 }
  0x37   :  { %p3674_p12 = pnand %p3672_p11, %p3669_p10 }
  0x39   :  { %3677 = shalt.err (!%p3674_p12)
}
  0x3a   :  { %s3678_s2 = scalar_lea.vmem %s45_s15, 8192  ;;  %p3683_p0 = scmp.lt.s32.totalorder %s45_s15, %s45_s15 }
  0x3b   :  { %p3679_p13 = scmp.ne.s32.totalorder %s45_s15, %s3678_s2  ;;  %p3684_p1 = scmp.lt.s32.totalorder %s3678_s2, %s3678_s2 }
  0x3d   :  { %p3685_p2 = por %p3684_p1, %p3683_p0 }
  0x3f   :  { %p3686_p3 = pnand %p3685_p2, %p3679_p13 }
  0x41   :  { %3689 = shalt.err (!%p3686_p3)
}
  0x42   :  { %s3724_s1 = smov 128   ;;  %s3725_s23 = smov 8  }
  0x43   :  { %50 = dma.hbm_to_vmem [thread:$0]  %s3960_s3, 8192, %s45_s15, [#allocation5], %s3724_s1, %s3724_s1, %s3725_s23  }
  0x44   :  { %s3726_s26 = smov [#allocation9]   ;;  %s3690_s8 = scalar_lea.hbm %s3963_s6, 16 }
  0x45   :  { %s69_s28 = sshll.u32 %s3726_s26, 4  ;;  %p3691_p4 = scmp.ne.s32.totalorder %s3963_s6, %s3690_s8  ;;  %s70_s28 = int_to_ptr.vmem [resolvable:$true] %s69_s28 }
  0x46   :  { %p3694_p5 = scmp.lt.u32.totalorder %s3690_s8, %s3963_s6 }
  0x48   :  { %p3696_p6 = pnand %p3694_p5, %p3691_p4 }
  0x4a   :  { %3699 = shalt.err (!%p3696_p6)
}
  0x4b   :  { %s3700_s27 = scalar_lea.vmem %s70_s28, 16  ;;  %s3704_s3 = scalar_lea.vmem %s70_s28, 32 }
  0x4c   :  { %p3701_p7 = scmp.ne.s32.totalorder %s70_s28, %s3700_s27  ;;  %p3705_p8 = scmp.lt.s32.totalorder %s70_s28, %s70_s28 }
  0x4d   :  { %p3706_p9 = scmp.lt.s32.totalorder %s3704_s3, %s3700_s27 }
  0x4f   :  { %p3707_p10 = por %p3706_p9, %p3705_p8 }
  0x51   :  { %p3708_p11 = pnand %p3707_p10, %p3701_p7 }
  0x53   :  { %3711 = shalt.err (!%p3708_p11)
}
  0x54   :  { %72 = dma.hbm_to_vmem [thread:$0]  %s3963_s6, 16, %s70_s28, [#allocation8]  }
  0x55   :  { %3712 = dma.done.wait [#allocation3], 32768  }
  0x56   :  { %3713 = vsyncadd [#allocation3], 4294934528 }
  0x57   :  { %3714 = dma.done.wait [#allocation5], 8256  }
  0x58   :  { %3715 = vsyncadd [#allocation5], 4294959040 }
  0x59   :  { %3716 = dma.done.wait [#allocation8], 48  }
  0x5a   :  { %3717 = vsyncadd [#allocation8], 4294967248  ;;  %v3104_v0 = vld [vmem:[#allocation2 + $0x4] ss:$16 sps:$4 sm:$0xff]   ;;  %v3108_v2 = vld [vmem:[#allocation2] ss:$16 sps:$4 sm:$0xff]   ;;  %v353_v38 = vlaneseq }
  0x5b   :  { %v3106_v1 = vld [vmem:[#allocation2 + $0x204] ss:$16 sps:$4 sm:$0xff]   ;;  %1701 = vmatprep.subr.bf16.mxu1 %v3104_v0  ;;  %v3109_v3 = vld [vmem:[#allocation2 + $0x200] ss:$16 sps:$4 sm:$0xff]   ;;  %v3727_v36 = vmov 1983009808  }
  0x5c   :  { %1742 = vmatprep.subr.bf16.mxu0 %v3106_v1  ;;  %v3110_v4 = vld [vmem:[#allocation2 + $0x24] ss:$16 sps:$4 sm:$0xff]   ;;  %1702 = vmatpush1.bf16.msra.mxu1 %v3108_v2  ;;  %v3114_v6 = vld [vmem:[#allocation2 + $0x20] ss:$16 sps:$4 sm:$0xff]   ;;  %v351_v37 = vunpack.c.l.s4 %v3727_v36  ;;  %v3828_v43 = vshrl.u32 %v353_v38, 7  ;;  %vm2694_vm0 = vcmask 66560  }
  0x5d   :  { %1743 = vmatpush1.bf16.msra.mxu0 %v3109_v3  ;;  %v3112_v5 = vld [vmem:[#allocation2 + $0x224] ss:$16 sps:$4 sm:$0xff]   ;;  %1703 = vmatprep.subr.bf16.mxu1 %v3110_v4  ;;  %v3115_v7 = vld [vmem:[#allocation2 + $0x220] ss:$16 sps:$4 sm:$0xff]  }
  0x5e   :  { %1744 = vmatprep.subr.bf16.mxu0 %v3112_v5  ;;  %v3116_v8 = vld [vmem:[#allocation2 + $0x44] ss:$16 sps:$4 sm:$0xff]   ;;  %v3120_v10 = vld [vmem:[#allocation2 + $0x40] ss:$16 sps:$4 sm:$0xff]   ;;  %v352_v42 = vunpack.c.0.s8 %v351_v37  ;;  %v3236_v37 = vld [vmem:[#allocation2 + $0xac] ss:$16 sps:$4 sm:$0xff]  }
  0x5f   :  { %v3118_v9 = vld [vmem:[#allocation2 + $0x244] ss:$16 sps:$4 sm:$0xff]   ;;  %v3121_v11 = vld [vmem:[#allocation2 + $0x240] ss:$16 sps:$4 sm:$0xff]  }
  0x60   :  { %1704 = vmatpush1.bf16.msra.mxu1 %v3114_v6  ;;  %v3122_v12 = vld [vmem:[#allocation2 + $0x64] ss:$16 sps:$4 sm:$0xff]   ;;  %v3126_v14 = vld [vmem:[#allocation2 + $0x60] ss:$16 sps:$4 sm:$0xff]   ;;  %v3831_v49 = vsub.s32 %v352_v42, %v3828_v43  ;;  %v3850_v42 = vld [vmem:[%s3957_s0 + $0x8] sm:$0xff] }
  0x61   :  { %1745 = vmatpush1.bf16.msra.mxu0 %v3115_v7  ;;  %1705 = vmatprep.subr.bf16.mxu1 %v3116_v8  ;;  %v3124_v13 = vld [vmem:[#allocation2 + $0x264] ss:$16 sps:$4 sm:$0xff]   ;;  %v3127_v15 = vld [vmem:[#allocation2 + $0x260] ss:$16 sps:$4 sm:$0xff]  }
  0x62   :  { %1746 = vmatprep.subr.bf16.mxu0 %v3118_v9  ;;  %v3128_v16 = vld [vmem:[#allocation2 + $0x84] ss:$16 sps:$4 sm:$0xff]   ;;  %v3132_v18 = vld [vmem:[#allocation2 + $0x80] ss:$16 sps:$4 sm:$0xff]  }
  0x63   :  { %v3130_v17 = vld [vmem:[#allocation2 + $0x284] ss:$16 sps:$4 sm:$0xff]   ;;  %v3133_v19 = vld [vmem:[#allocation2 + $0x280] ss:$16 sps:$4 sm:$0xff]  }
  0x64   :  { %1706 = vmatpush1.bf16.msra.mxu1 %v3120_v10  ;;  %v3134_v20 = vld [vmem:[#allocation2 + $0xa4] ss:$16 sps:$4 sm:$0xff]   ;;  %v3138_v22 = vld [vmem:[#allocation2 + $0xa0] ss:$16 sps:$4 sm:$0xff]  }
  0x65   :  { %1747 = vmatpush1.bf16.msra.mxu0 %v3121_v11  ;;  %1707 = vmatprep.subr.bf16.mxu1 %v3122_v12  ;;  %v3136_v21 = vld [vmem:[#allocation2 + $0x2a4] ss:$16 sps:$4 sm:$0xff]   ;;  %v3139_v23 = vld [vmem:[#allocation2 + $0x2a0] ss:$16 sps:$4 sm:$0xff]  }
  0x66   :  { %1748 = vmatprep.subr.bf16.mxu0 %v3124_v13  ;;  %v3140_v24 = vld [vmem:[#allocation2 + $0xc4] ss:$16 sps:$4 sm:$0xff]   ;;  %v3144_v26 = vld [vmem:[#allocation2 + $0xc0] ss:$16 sps:$4 sm:$0xff]  }
  0x67   :  { %v3142_v25 = vld [vmem:[#allocation2 + $0x2c4] ss:$16 sps:$4 sm:$0xff]   ;;  %v3145_v27 = vld [vmem:[#allocation2 + $0x2c0] ss:$16 sps:$4 sm:$0xff]  }
  0x68   :  { %1708 = vmatpush1.bf16.msra.mxu1 %v3126_v14  ;;  %v3146_v28 = vld [vmem:[#allocation2 + $0xe4] ss:$16 sps:$4 sm:$0xff]   ;;  %v3150_v30 = vld [vmem:[#allocation2 + $0xe0] ss:$16 sps:$4 sm:$0xff]  }
  0x69   :  { %1749 = vmatpush1.bf16.msra.mxu0 %v3127_v15  ;;  %1709 = vmatprep.subr.bf16.mxu1 %v3128_v16  ;;  %v3148_v29 = vld [vmem:[#allocation2 + $0x2e4] ss:$16 sps:$4 sm:$0xff]   ;;  %v3151_v31 = vld [vmem:[#allocation2 + $0x2e0] ss:$16 sps:$4 sm:$0xff]   ;;  %v3206_v15 = vld [vmem:[#allocation2 + $0xc] ss:$16 sps:$4 sm:$0xff]  }
  0x6a   :  { %1750 = vmatprep.subr.bf16.mxu0 %v3130_v17  ;;  %v3152_v32 = vld [vmem:[#allocation2 + $0x104] ss:$16 sps:$4 sm:$0xff]   ;;  %v3156_v34 = vld [vmem:[#allocation2 + $0x100] ss:$16 sps:$4 sm:$0xff]  }
  0x6b   :  { %v3154_v33 = vld [vmem:[#allocation2 + $0x304] ss:$16 sps:$4 sm:$0xff]   ;;  %v3157_v35 = vld [vmem:[#allocation2 + $0x300] ss:$16 sps:$4 sm:$0xff]  }
  0x6c   :  { %1710 = vmatpush1.bf16.msra.mxu1 %v3132_v18  ;;  %v3158_v39 = vld [vmem:[#allocation2 + $0x124] ss:$16 sps:$4 sm:$0xff]   ;;  %v3162_v41 = vld [vmem:[#allocation2 + $0x120] ss:$16 sps:$4 sm:$0xff]  }
  0x6d   :  { %1751 = vmatpush1.bf16.msra.mxu0 %v3133_v19  ;;  %1711 = vmatprep.subr.bf16.mxu1 %v3134_v20  ;;  %v3160_v40 = vld [vmem:[#allocation2 + $0x324] ss:$16 sps:$4 sm:$0xff]   ;;  %v3163_v44 = vld [vmem:[#allocation2 + $0x320] ss:$16 sps:$4 sm:$0xff]   ;;  %v3204_v19 = vld [vmem:[#allocation2 + $0x8] ss:$16 sps:$4 sm:$0xff]  }
  0x6e   :  { %1752 = vmatprep.subr.bf16.mxu0 %v3136_v21  ;;  %v3164_v45 = vld [vmem:[#allocation2 + $0x144] ss:$16 sps:$4 sm:$0xff]   ;;  %v3168_v47 = vld [vmem:[#allocation2 + $0x140] ss:$16 sps:$4 sm:$0xff]   ;;  %v3212_v21 = vld [vmem:[#allocation2 + $0x2c] ss:$16 sps:$4 sm:$0xff]  }
  0x6f   :  { %v3166_v46 = vld [vmem:[#allocation2 + $0x344] ss:$16 sps:$4 sm:$0xff]   ;;  %v3169_v48 = vld [vmem:[#allocation2 + $0x340] ss:$16 sps:$4 sm:$0xff]  }
  0x70   :  { %1712 = vmatpush1.bf16.msra.mxu1 %v3138_v22  ;;  %v3170_v50 = vld [vmem:[#allocation2 + $0x164] ss:$16 sps:$4 sm:$0xff]   ;;  %v3174_v53 = vld [vmem:[#allocation2 + $0x160] ss:$16 sps:$4 sm:$0xff]  }
  0x71   :  { %1753 = vmatpush1.bf16.msra.mxu0 %v3139_v23  ;;  %1713 = vmatprep.subr.bf16.mxu1 %v3140_v24  ;;  %v3172_v51 = vld [vmem:[#allocation2 + $0x364] ss:$16 sps:$4 sm:$0xff]   ;;  %v3175_v56 = vld [vmem:[#allocation2 + $0x360] ss:$16 sps:$4 sm:$0xff]   ;;  %v3210_v23 = vld [vmem:[#allocation2 + $0x28] ss:$16 sps:$4 sm:$0xff]  }
  0x72   :  { %1754 = vmatprep.subr.bf16.mxu0 %v3142_v25  ;;  %v89_v52 = vld [vmem:[%s3957_s0] sm:$0xff]  ;;  %v3218_v25 = vld [vmem:[#allocation2 + $0x4c] ss:$16 sps:$4 sm:$0xff]  }
  0x73   :  { %v356_v54 = vrot.slane %v89_v52, %v3831_v49  ;;  %v349_v55 = vcombine.high %v89_v52, %v89_v52  ;;  %v3176_v57 = vld [vmem:[#allocation2 + $0x184] ss:$16 sps:$4 sm:$0xff]   ;;  %v3180_v61 = vld [vmem:[#allocation2 + $0x180] ss:$16 sps:$4 sm:$0xff]  }
  0x74   :  { %1714 = vmatpush1.bf16.msra.mxu1 %v3144_v26  ;;  %v3178_v58 = vld [vmem:[#allocation2 + $0x384] ss:$16 sps:$4 sm:$0xff]   ;;  %v3181_v0 = vld [vmem:[#allocation2 + $0x380] ss:$16 sps:$4 sm:$0xff]  }
  0x75   :  { %1755 = vmatpush1.bf16.msra.mxu0 %v3145_v27  ;;  %1715 = vmatprep.subr.bf16.mxu1 %v3146_v28  ;;  %v364_v59 = vcombine.high %v356_v54, %v356_v54  ;;  %v363_v60 = vrot.slane %v349_v55, %v3831_v49  ;;  %v3182_v1 = vld [vmem:[#allocation2 + $0x1a4] ss:$16 sps:$4 sm:$0xff]   ;;  %v3186_v4 = vld [vmem:[#allocation2 + $0x1a0] ss:$16 sps:$4 sm:$0xff]   ;;  %v3841_v16 = vpack.c.bf16 %v356_v54, %v356_v54  ;;  %v3216_v27 = vld [vmem:[#allocation2 + $0x48] ss:$16 sps:$4 sm:$0xff]  }
  0x76   :  { %1756 = vmatprep.subr.bf16.mxu0 %v3148_v29  ;;  %v3184_v2 = vld [vmem:[#allocation2 + $0x3a4] ss:$16 sps:$4 sm:$0xff]   ;;  %v3187_v5 = vld [vmem:[#allocation2 + $0x3a0] ss:$16 sps:$4 sm:$0xff]   ;;  %v3224_v29 = vld [vmem:[#allocation2 + $0x6c] ss:$16 sps:$4 sm:$0xff]  }
  0x77   :  { %v392_v62 = vpack.c.bf16 %v364_v59, %v364_v59  ;;  %v365_v63 = vcombine.high %v363_v60, %v363_v60  ;;  %v3188_v6 = vld [vmem:[#allocation2 + $0x1c4] ss:$16 sps:$4 sm:$0xff]   ;;  %v3192_v8 = vld [vmem:[#allocation2 + $0x1c0] ss:$16 sps:$4 sm:$0xff]   ;;  %v3843_v18 = vpack.c.bf16 %v363_v60, %v363_v60  ;;  %v3254_v55 = vld [vmem:[#allocation2 + $0x10c] ss:$16 sps:$4 sm:$0xff]  }
  0x78   :  { %1716 = vmatpush1.bf16.msra.mxu1 %v3150_v30  ;;  %v3190_v7 = vld [vmem:[#allocation2 + $0x3c4] ss:$16 sps:$4 sm:$0xff]   ;;  %v3193_v9 = vld [vmem:[#allocation2 + $0x3c0] ss:$16 sps:$4 sm:$0xff]   ;;  %v3260_v59 = vld [vmem:[#allocation2 + $0x12c] ss:$16 sps:$4 sm:$0xff]  }
  0x79   :  { %1757 = vmatpush1.bf16.msra.mxu0 %v3151_v31  ;;  %1717 = vmatprep.subr.bf16.mxu1 %v3152_v32  ;;  %v3838_v3 = vpack.c.bf16 %v365_v63, %v365_v63  ;;  %v3194_v10 = vld [vmem:[#allocation2 + $0x1e4] ss:$16 sps:$4 sm:$0xff]   ;;  %v3198_v12 = vld [vmem:[#allocation2 + $0x1e0] ss:$16 sps:$4 sm:$0xff]   ;;  %v3222_v31 = vld [vmem:[#allocation2 + $0x68] ss:$16 sps:$4 sm:$0xff]  }
  0x7a   :  { %1758 = vmatprep.subr.bf16.mxu0 %v3154_v33  ;;  %1733 = vmatprep.mubr.bf16.mxu1 %v392_v62  ;;  %v3196_v11 = vld [vmem:[#allocation2 + $0x3e4] ss:$16 sps:$4 sm:$0xff]   ;;  %v3199_v13 = vld [vmem:[#allocation2 + $0x3e0] ss:$16 sps:$4 sm:$0xff]   ;;  %v3230_v33 = vld [vmem:[#allocation2 + $0x8c] ss:$16 sps:$4 sm:$0xff]  }
  0x7b   :  { %1774 = vmatprep.mubr.bf16.mxu0 %v3838_v3  ;;  %v3203_v14 = vld [vmem:[#allocation2 + $0x404] ss:$16 sps:$4 sm:$0xff]   ;;  %v3201_v17 = vld [vmem:[#allocation2 + $0x400] ss:$16 sps:$4 sm:$0xff]   ;;  %v3266_v63 = vld [vmem:[#allocation2 + $0x14c] ss:$16 sps:$4 sm:$0xff]  }
  0x7c   :  { %1718 = vmatpush1.bf16.msra.mxu1 %v3156_v34  ;;  %v3209_v20 = vld [vmem:[#allocation2 + $0x424] ss:$16 sps:$4 sm:$0xff]   ;;  %v3207_v22 = vld [vmem:[#allocation2 + $0x420] ss:$16 sps:$4 sm:$0xff]  }
  0x7d   :  { %1759 = vmatpush1.bf16.msra.mxu0 %v3157_v35  ;;  %1719 = vmatprep.subr.bf16.mxu1 %v3158_v39  ;;  %v3215_v24 = vld [vmem:[#allocation2 + $0x444] ss:$16 sps:$4 sm:$0xff]   ;;  %v3213_v26 = vld [vmem:[#allocation2 + $0x440] ss:$16 sps:$4 sm:$0xff]   ;;  %v3228_v35 = vld [vmem:[#allocation2 + $0x88] ss:$16 sps:$4 sm:$0xff]  }
  0x7e   :  { %1760 = vmatprep.subr.bf16.mxu0 %v3160_v40  ;;  %v3221_v28 = vld [vmem:[#allocation2 + $0x464] ss:$16 sps:$4 sm:$0xff]   ;;  %v3219_v30 = vld [vmem:[#allocation2 + $0x460] ss:$16 sps:$4 sm:$0xff]   ;;  %v3234_v39 = vld [vmem:[#allocation2 + $0xa8] ss:$16 sps:$4 sm:$0xff]  }
  0x7f   :  { %v3227_v32 = vld [vmem:[#allocation2 + $0x484] ss:$16 sps:$4 sm:$0xff]   ;;  %v3225_v34 = vld [vmem:[#allocation2 + $0x480] ss:$16 sps:$4 sm:$0xff]  }
  0x80   :  { %1720 = vmatpush1.bf16.msra.mxu1 %v3162_v41  ;;  %v3233_v36 = vld [vmem:[#allocation2 + $0x4a4] ss:$16 sps:$4 sm:$0xff]   ;;  %v3231_v38 = vld [vmem:[#allocation2 + $0x4a0] ss:$16 sps:$4 sm:$0xff]   ;;  %v3242_v41 = vld [vmem:[#allocation2 + $0xcc] ss:$16 sps:$4 sm:$0xff]  }
  0x81   :  { %1761 = vmatpush1.bf16.msra.mxu0 %v3163_v44  ;;  %1721 = vmatprep.subr.bf16.mxu1 %v3164_v45  ;;  %v3239_v40 = vld [vmem:[#allocation2 + $0x4c4] ss:$16 sps:$4 sm:$0xff]   ;;  %v3854_v44 = vrot.slane %v3850_v42, %v3831_v49  ;;  %v3237_v45 = vld [vmem:[#allocation2 + $0x4c0] ss:$16 sps:$4 sm:$0xff]  }
  0x82   :  { %1762 = vmatprep.subr.bf16.mxu0 %v3166_v46  ;;  %v3240_v46 = vld [vmem:[#allocation2 + $0xc8] ss:$16 sps:$4 sm:$0xff]   ;;  %v3243_v52 = vld [vmem:[#allocation2 + $0x4e0] ss:$16 sps:$4 sm:$0xff]   ;;  %v3251_v54 = vld [vmem:[#allocation2 + $0x504] ss:$16 sps:$4 sm:$0xff]  }
  0x83   :  { %v3255_v60 = vld [vmem:[#allocation2 + $0x520] ss:$16 sps:$4 sm:$0xff]  }
  0x84   :  { %1722 = vmatpush1.bf16.msra.mxu1 %v3168_v47  ;;  %v381_v47 = vcombine.high %v3854_v44, %v3854_v44 }
  0x85   :  { %1763 = vmatpush1.bf16.msra.mxu0 %v3169_v48  ;;  %1723 = vmatprep.subr.bf16.mxu1 %v3170_v50  ;;  %v3245_v48 = vld [vmem:[#allocation2 + $0x4e4] ss:$16 sps:$4 sm:$0xff]   ;;  %v3248_v50 = vld [vmem:[#allocation2 + $0xec] ss:$16 sps:$4 sm:$0xff]  }
  0x86   :  { %1764 = vmatprep.subr.bf16.mxu0 %v3172_v51  ;;  %v3858_v51 = vpack.c.bf16 %v381_v47, %v381_v47  ;;  %v3321_v47 = vld [vmem:[#allocation2 + $0x680] ss:$16 sps:$4 sm:$0xff]  }
  0x88   :  { %1724 = vmatpush1.bf16.msra.mxu1 %v3174_v53  ;;  %v3246_v53 = vld [vmem:[#allocation2 + $0xe8] ss:$16 sps:$4 sm:$0xff]  }
  0x89   :  { %1765 = vmatpush1.bf16.msra.mxu0 %v3175_v56  ;;  %1725 = vmatprep.subr.bf16.mxu1 %v3176_v57  ;;  %v3249_v56 = vld [vmem:[#allocation2 + $0x500] ss:$16 sps:$4 sm:$0xff]   ;;  %v3252_v57 = vld [vmem:[#allocation2 + $0x108] ss:$16 sps:$4 sm:$0xff]  }
  0x8a   :  { %1766 = vmatprep.subr.bf16.mxu0 %v3178_v58  ;;  %v3257_v58 = vld [vmem:[#allocation2 + $0x524] ss:$16 sps:$4 sm:$0xff]  }
  0x8c   :  { %1726 = vmatpush1.bf16.msra.mxu1 %v3180_v61  ;;  %v3258_v61 = vld [vmem:[#allocation2 + $0x128] ss:$16 sps:$4 sm:$0xff]  }
  0x8d   :  { %1767 = vmatpush1.bf16.msra.mxu0 %v3181_v0  ;;  %1727 = vmatprep.subr.bf16.mxu1 %v3182_v1  ;;  %v3261_v0 = vld [vmem:[#allocation2 + $0x540] ss:$16 sps:$4 sm:$0xff]   ;;  %v3264_v1 = vld [vmem:[#allocation2 + $0x148] ss:$16 sps:$4 sm:$0xff]  }
  0x8e   :  { %1768 = vmatprep.subr.bf16.mxu0 %v3184_v2  ;;  %v3269_v2 = vld [vmem:[#allocation2 + $0x564] ss:$16 sps:$4 sm:$0xff]  }
  0x90   :  { %1728 = vmatpush1.bf16.msra.mxu1 %v3186_v4  ;;  %v3272_v4 = vld [vmem:[#allocation2 + $0x16c] ss:$16 sps:$4 sm:$0xff]  }
  0x91   :  { %1769 = vmatpush1.bf16.msra.mxu0 %v3187_v5  ;;  %1729 = vmatprep.subr.bf16.mxu1 %v3188_v6  ;;  %v3267_v5 = vld [vmem:[#allocation2 + $0x560] ss:$16 sps:$4 sm:$0xff]   ;;  %v3270_v6 = vld [vmem:[#allocation2 + $0x168] ss:$16 sps:$4 sm:$0xff]  }
  0x92   :  { %1770 = vmatprep.subr.bf16.mxu0 %v3190_v7  ;;  %v3275_v7 = vld [vmem:[#allocation2 + $0x584] ss:$16 sps:$4 sm:$0xff]  }
  0x94   :  { %1730 = vmatpush1.bf16.msra.mxu1 %v3192_v8  ;;  %v3278_v8 = vld [vmem:[#allocation2 + $0x18c] ss:$16 sps:$4 sm:$0xff]  }
  0x95   :  { %1771 = vmatpush1.bf16.msra.mxu0 %v3193_v9  ;;  %1731 = vmatprep.subr.bf16.mxu1 %v3194_v10  ;;  %v3273_v9 = vld [vmem:[#allocation2 + $0x580] ss:$16 sps:$4 sm:$0xff]   ;;  %v3276_v10 = vld [vmem:[#allocation2 + $0x188] ss:$16 sps:$4 sm:$0xff]  }
  0x96   :  { %1772 = vmatprep.subr.bf16.mxu0 %v3196_v11  ;;  %v3281_v11 = vld [vmem:[#allocation2 + $0x5a4] ss:$16 sps:$4 sm:$0xff]  }
  0x98   :  { %1732 = vmatpush1.bf16.msra.mxu1 %v3198_v12  ;;  %v3284_v12 = vld [vmem:[#allocation2 + $0x1ac] ss:$16 sps:$4 sm:$0xff]  }
  0x99   :  { %1773 = vmatpush1.bf16.msra.mxu0 %v3199_v13  ;;  %1865 = vmatprep.subr.bf16.mxu1 %v3206_v15  ;;  %v3279_v13 = vld [vmem:[#allocation2 + $0x5a0] ss:$16 sps:$4 sm:$0xff]   ;;  %v3287_v15 = vld [vmem:[#allocation2 + $0x5c4] ss:$16 sps:$4 sm:$0xff]  }
  0x9a   :  { %1783 = vmatprep.subr.bf16.mxu0 %v3203_v14  ;;  %v3282_v14 = vld [vmem:[#allocation2 + $0x1a8] ss:$16 sps:$4 sm:$0xff]  }
  0x9b   :  { %1734 = vmatmul.mubr.bf16.vlgmr.msra.gmra.mrb[0].mxu1 %v3841_v16 }
  0x9c   :  { %1775 = vmatmul.mubr.bf16.vlgmr.msra.gmra.mrb[0].mxu0 %v3843_v18  ;;  %1866 = vmatpush1.bf16.msra.mxu1 %v3204_v19  ;;  %v366_v19 = vcombine.high %v3850_v42, %v3850_v42  ;;  %v3315_v42 = vld [vmem:[#allocation2 + $0x660] ss:$16 sps:$4 sm:$0xff]  }
  0x9d   :  { %1784 = vmatpush1.bf16.msra.mxu0 %v3201_v17  ;;  %1867 = vmatprep.subr.bf16.mxu1 %v3212_v21  ;;  %v3290_v17 = vld [vmem:[#allocation2 + $0x1cc] ss:$16 sps:$4 sm:$0xff]   ;;  %v3288_v21 = vld [vmem:[#allocation2 + $0x1c8] ss:$16 sps:$4 sm:$0xff]  }
  0x9e   :  { %1785 = vmatprep.subr.bf16.mxu0 %v3209_v20  ;;  %1897 = vmatprep.mubr.bf16.mxu1 %v392_v62  ;;  %v3263_v62 = vld [vmem:[#allocation2 + $0x544] ss:$16 sps:$4 sm:$0xff]   ;;  %v3285_v20 = vld [vmem:[#allocation2 + $0x5c0] ss:$16 sps:$4 sm:$0xff]  }
  0x9f   :  { %1815 = vmatprep.mubr.bf16.mxu0 %v3858_v51 }
  0xa0   :  { %1868 = vmatpush1.bf16.msra.mxu1 %v3210_v23  ;;  %v3296_v23 = vld [vmem:[#allocation2 + $0x1ec] ss:$16 sps:$4 sm:$0xff]  }
  0xa1   :  { %1786 = vmatpush1.bf16.msra.mxu0 %v3207_v22  ;;  %1869 = vmatprep.subr.bf16.mxu1 %v3218_v25  ;;  %v3293_v22 = vld [vmem:[#allocation2 + $0x5e4] ss:$16 sps:$4 sm:$0xff]   ;;  %v3291_v25 = vld [vmem:[#allocation2 + $0x5e0] ss:$16 sps:$4 sm:$0xff]  }
  0xa2   :  { %1787 = vmatprep.subr.bf16.mxu0 %v3215_v24  ;;  %v3864_v24 = vrot.slane %v366_v19, %v3831_v49  ;;  %v3300_v49 = vld [vmem:[#allocation2 + $0x208] ss:$16 sps:$4 sm:$0xff]   ;;  %v3369_v19 = vld [vmem:[#allocation2 + $0x780] ss:$16 sps:$4 sm:$0xff]  }
  0xa4   :  { %1870 = vmatpush1.bf16.msra.mxu1 %v3216_v27  ;;  %v3299_v27 = vld [vmem:[#allocation2 + $0x604] ss:$16 sps:$4 sm:$0xff]  }
  0xa5   :  { %1788 = vmatpush1.bf16.msra.mxu0 %v3213_v26  ;;  %1871 = vmatprep.subr.bf16.mxu1 %v3224_v29  ;;  %v3294_v26 = vld [vmem:[#allocation2 + $0x1e8] ss:$16 sps:$4 sm:$0xff]   ;;  %v382_v29 = vcombine.high %v3864_v24, %v3864_v24 }
  0xa6   :  { %1789 = vmatprep.subr.bf16.mxu0 %v3221_v28  ;;  %v3302_v28 = vld [vmem:[#allocation2 + $0x20c] ss:$16 sps:$4 sm:$0xff]  }
  0xa8   :  { %1872 = vmatpush1.bf16.msra.mxu1 %v3222_v31  ;;  %v3297_v31 = vld [vmem:[#allocation2 + $0x600] ss:$16 sps:$4 sm:$0xff]  }
  0xa9   :  { %1790 = vmatpush1.bf16.msra.mxu0 %v3219_v30  ;;  %1873 = vmatprep.subr.bf16.mxu1 %v3230_v33  ;;  %v3870_v30 = vpack.c.bf16 %v3854_v44, %v3854_v44  ;;  %v3308_v33 = vld [vmem:[#allocation2 + $0x22c] ss:$16 sps:$4 sm:$0xff]   ;;  %v3318_v44 = vld [vmem:[#allocation2 + $0x268] ss:$16 sps:$4 sm:$0xff]  }
  0xaa   :  { %1791 = vmatprep.subr.bf16.mxu0 %v3227_v32  ;;  %v3305_v32 = vld [vmem:[#allocation2 + $0x624] ss:$16 sps:$4 sm:$0xff]  }
  0xac   :  { %1874 = vmatpush1.bf16.msra.mxu1 %v3228_v35  ;;  %v3303_v35 = vld [vmem:[#allocation2 + $0x620] ss:$16 sps:$4 sm:$0xff]  }
  0xad   :  { %1792 = vmatpush1.bf16.msra.mxu0 %v3225_v34  ;;  %1875 = vmatprep.subr.bf16.mxu1 %v3236_v37  ;;  %v3872_v34 = vpack.c.bf16 %v382_v29, %v382_v29  ;;  %v3311_v37 = vld [vmem:[#allocation2 + $0x644] ss:$16 sps:$4 sm:$0xff]   ;;  %v3384_v29 = vld [vmem:[#allocation2 + $0x3c8] ss:$16 sps:$4 sm:$0xff]  }
  0xae   :  { %1793 = vmatprep.subr.bf16.mxu0 %v3233_v36  ;;  %v3306_v36 = vld [vmem:[#allocation2 + $0x228] ss:$16 sps:$4 sm:$0xff]  }
  0xb0   :  { %1876 = vmatpush1.bf16.msra.mxu1 %v3234_v39  ;;  %v3309_v39 = vld [vmem:[#allocation2 + $0x640] ss:$16 sps:$4 sm:$0xff]  }
  0xb1   :  { %1794 = vmatpush1.bf16.msra.mxu0 %v3231_v38  ;;  %1877 = vmatprep.subr.bf16.mxu1 %v3242_v41  ;;  %v3314_v38 = vld [vmem:[#allocation2 + $0x24c] ss:$16 sps:$4 sm:$0xff]   ;;  %v3317_v41 = vld [vmem:[#allocation2 + $0x664] ss:$16 sps:$4 sm:$0xff]  }
  0xb2   :  { %1795 = vmatprep.subr.bf16.mxu0 %v3239_v40  ;;  %v3312_v40 = vld [vmem:[#allocation2 + $0x248] ss:$16 sps:$4 sm:$0xff]  }
  0xb4   :  { %1878 = vmatpush1.bf16.msra.mxu1 %v3240_v46  ;;  %v3326_v46 = vld [vmem:[#allocation2 + $0x28c] ss:$16 sps:$4 sm:$0xff]  }
  0xb5   :  { %1796 = vmatpush1.bf16.msra.mxu0 %v3237_v45  ;;  %1879 = vmatprep.subr.bf16.mxu1 %v3248_v50  ;;  %v3323_v45 = vld [vmem:[#allocation2 + $0x684] ss:$16 sps:$4 sm:$0xff]   ;;  %v3332_v50 = vld [vmem:[#allocation2 + $0x2ac] ss:$16 sps:$4 sm:$0xff]  }
  0xb6   :  { %1797 = vmatprep.subr.bf16.mxu0 %v3245_v48  ;;  %v3329_v48 = vld [vmem:[#allocation2 + $0x6a4] ss:$16 sps:$4 sm:$0xff]  }
  0xb8   :  { %1880 = vmatpush1.bf16.msra.mxu1 %v3246_v53  ;;  %v3330_v53 = vld [vmem:[#allocation2 + $0x2a8] ss:$16 sps:$4 sm:$0xff]  }
  0xb9   :  { %1798 = vmatpush1.bf16.msra.mxu0 %v3243_v52  ;;  %1881 = vmatprep.subr.bf16.mxu1 %v3254_v55  ;;  %v3327_v52 = vld [vmem:[#allocation2 + $0x6a0] ss:$16 sps:$4 sm:$0xff]   ;;  %v3338_v55 = vld [vmem:[#allocation2 + $0x2cc] ss:$16 sps:$4 sm:$0xff]  }
  0xba   :  { %1799 = vmatprep.subr.bf16.mxu0 %v3251_v54  ;;  %v3335_v54 = vld [vmem:[#allocation2 + $0x6c4] ss:$16 sps:$4 sm:$0xff]  }
  0xbc   :  { %1882 = vmatpush1.bf16.msra.mxu1 %v3252_v57  ;;  %v3336_v57 = vld [vmem:[#allocation2 + $0x2c8] ss:$16 sps:$4 sm:$0xff]  }
  0xbd   :  { %1800 = vmatpush1.bf16.msra.mxu0 %v3249_v56  ;;  %1883 = vmatprep.subr.bf16.mxu1 %v3260_v59  ;;  %v3333_v56 = vld [vmem:[#allocation2 + $0x6c0] ss:$16 sps:$4 sm:$0xff]   ;;  %v3344_v59 = vld [vmem:[#allocation2 + $0x2ec] ss:$16 sps:$4 sm:$0xff]  }
  0xbe   :  { %1801 = vmatprep.subr.bf16.mxu0 %v3257_v58  ;;  %v3341_v58 = vld [vmem:[#allocation2 + $0x6e4] ss:$16 sps:$4 sm:$0xff]  }
  0xc0   :  { %1884 = vmatpush1.bf16.msra.mxu1 %v3258_v61  ;;  %v3342_v61 = vld [vmem:[#allocation2 + $0x2e8] ss:$16 sps:$4 sm:$0xff]  }
  0xc1   :  { %1802 = vmatpush1.bf16.msra.mxu0 %v3255_v60  ;;  %1885 = vmatprep.subr.bf16.mxu1 %v3266_v63  ;;  %v3339_v60 = vld [vmem:[#allocation2 + $0x6e0] ss:$16 sps:$4 sm:$0xff]   ;;  %v3350_v63 = vld [vmem:[#allocation2 + $0x30c] ss:$16 sps:$4 sm:$0xff]  }
  0xc2   :  { %1803 = vmatprep.subr.bf16.mxu0 %v3263_v62  ;;  %v3347_v62 = vld [vmem:[#allocation2 + $0x704] ss:$16 sps:$4 sm:$0xff]  }
  0xc4   :  { %1886 = vmatpush1.bf16.msra.mxu1 %v3264_v1  ;;  %v3348_v1 = vld [vmem:[#allocation2 + $0x308] ss:$16 sps:$4 sm:$0xff]  }
  0xc5   :  { %1804 = vmatpush1.bf16.msra.mxu0 %v3261_v0  ;;  %1887 = vmatprep.subr.bf16.mxu1 %v3272_v4  ;;  %v3345_v0 = vld [vmem:[#allocation2 + $0x700] ss:$16 sps:$4 sm:$0xff]   ;;  %v3356_v4 = vld [vmem:[#allocation2 + $0x32c] ss:$16 sps:$4 sm:$0xff]  }
  0xc6   :  { %1805 = vmatprep.subr.bf16.mxu0 %v3269_v2  ;;  %v3353_v2 = vld [vmem:[#allocation2 + $0x724] ss:$16 sps:$4 sm:$0xff]  }
  0xc8   :  { %1888 = vmatpush1.bf16.msra.mxu1 %v3270_v6  ;;  %v3354_v6 = vld [vmem:[#allocation2 + $0x328] ss:$16 sps:$4 sm:$0xff]  }
  0xc9   :  { %1806 = vmatpush1.bf16.msra.mxu0 %v3267_v5  ;;  %1889 = vmatprep.subr.bf16.mxu1 %v3278_v8  ;;  %v3351_v5 = vld [vmem:[#allocation2 + $0x720] ss:$16 sps:$4 sm:$0xff]   ;;  %v3362_v8 = vld [vmem:[#allocation2 + $0x34c] ss:$16 sps:$4 sm:$0xff]  }
  0xca   :  { %1807 = vmatprep.subr.bf16.mxu0 %v3275_v7  ;;  %v3359_v7 = vld [vmem:[#allocation2 + $0x744] ss:$16 sps:$4 sm:$0xff]  }
  0xcc   :  { %1890 = vmatpush1.bf16.msra.mxu1 %v3276_v10  ;;  %v3360_v10 = vld [vmem:[#allocation2 + $0x348] ss:$16 sps:$4 sm:$0xff]  }
  0xcd   :  { %1808 = vmatpush1.bf16.msra.mxu0 %v3273_v9  ;;  %1891 = vmatprep.subr.bf16.mxu1 %v3284_v12  ;;  %v3357_v9 = vld [vmem:[#allocation2 + $0x740] ss:$16 sps:$4 sm:$0xff]   ;;  %v3368_v12 = vld [vmem:[#allocation2 + $0x36c] ss:$16 sps:$4 sm:$0xff]  }
  0xce   :  { %1809 = vmatprep.subr.bf16.mxu0 %v3281_v11  ;;  %v3365_v11 = vld [vmem:[#allocation2 + $0x764] ss:$16 sps:$4 sm:$0xff]  }
  0xd0   :  { %1892 = vmatpush1.bf16.msra.mxu1 %v3282_v14  ;;  %v3366_v14 = vld [vmem:[#allocation2 + $0x368] ss:$16 sps:$4 sm:$0xff]  }
  0xd1   :  { %1810 = vmatpush1.bf16.msra.mxu0 %v3279_v13  ;;  %1893 = vmatprep.subr.bf16.mxu1 %v3290_v17  ;;  %v3363_v13 = vld [vmem:[#allocation2 + $0x760] ss:$16 sps:$4 sm:$0xff]   ;;  %v3374_v17 = vld [vmem:[#allocation2 + $0x38c] ss:$16 sps:$4 sm:$0xff]  }
  0xd2   :  { %1811 = vmatprep.subr.bf16.mxu0 %v3287_v15  ;;  %v3371_v15 = vld [vmem:[#allocation2 + $0x784] ss:$16 sps:$4 sm:$0xff]  }
  0xd4   :  { %1894 = vmatpush1.bf16.msra.mxu1 %v3288_v21  ;;  %v3377_v21 = vld [vmem:[#allocation2 + $0x7a4] ss:$16 sps:$4 sm:$0xff]  }
  0xd5   :  { %1812 = vmatpush1.bf16.msra.mxu0 %v3285_v20  ;;  %1895 = vmatprep.subr.bf16.mxu1 %v3296_v23  ;;  %v3372_v20 = vld [vmem:[#allocation2 + $0x388] ss:$16 sps:$4 sm:$0xff]   ;;  %v3375_v23 = vld [vmem:[#allocation2 + $0x7a0] ss:$16 sps:$4 sm:$0xff]  }
  0xd6   :  { %1813 = vmatprep.subr.bf16.mxu0 %v3293_v22  ;;  %v3380_v22 = vld [vmem:[#allocation2 + $0x3ac] ss:$16 sps:$4 sm:$0xff]  }
  0xd8   :  { %1896 = vmatpush1.bf16.msra.mxu1 %v3294_v26  ;;  %v3383_v26 = vld [vmem:[#allocation2 + $0x7c4] ss:$16 sps:$4 sm:$0xff]  }
  0xd9   :  { %1814 = vmatpush1.bf16.msra.mxu0 %v3291_v25  ;;  %1906 = vmatprep.subr.bf16.mxu1 %v3302_v28  ;;  %v3378_v25 = vld [vmem:[#allocation2 + $0x3a8] ss:$16 sps:$4 sm:$0xff]   ;;  %v3381_v28 = vld [vmem:[#allocation2 + $0x7c0] ss:$16 sps:$4 sm:$0xff]  }
  0xda   :  { %1824 = vmatprep.subr.bf16.mxu0 %v3299_v27  ;;  %v3386_v27 = vld [vmem:[#allocation2 + $0x3cc] ss:$16 sps:$4 sm:$0xff]  }
  0xdb   :  { %1898 = vmatmul.mubr.bf16.vlgmr.msra.gmra.mrb[4].mxu1 %v3841_v16  ;;  %v3320_v16 = vld [vmem:[#allocation2 + $0x26c] ss:$16 sps:$4 sm:$0xff]  }
  0xdc   :  { %1816 = vmatmul.mubr.bf16.vlgmr.msra.gmra.mrb[0].mxu0 %v3870_v30  ;;  %1907 = vmatpush1.bf16.msra.mxu1 %v3300_v49  ;;  %v3392_v49 = vld [vmem:[#allocation2 + $0x3ec] ss:$16 sps:$4 sm:$0xff]  }
  0xdd   :  { %1825 = vmatpush1.bf16.msra.mxu0 %v3297_v31  ;;  %1908 = vmatprep.subr.bf16.mxu1 %v3308_v33  ;;  %v3389_v31 = vld [vmem:[#allocation2 + $0x7e4] ss:$16 sps:$4 sm:$0xff]   ;;  %v3390_v33 = vld [vmem:[#allocation2 + $0x3e8] ss:$16 sps:$4 sm:$0xff]  }
  0xde   :  { %1826 = vmatprep.subr.bf16.mxu0 %v3305_v32  ;;  %1856 = vmatprep.mubr.bf16.mxu0 %v3872_v34  ;;  %v3387_v32 = vld [vmem:[#allocation2 + $0x7e0] ss:$16 sps:$4 sm:$0xff]  }
  0xdf   :  { %1938 = vmatprep.mubr.bf16.mxu1 %v3838_v3  ;;  %v3324_v3 = vld [vmem:[#allocation2 + $0x288] ss:$16 sps:$4 sm:$0xff]  }
  0xe0   :  { %1909 = vmatpush1.bf16.msra.mxu1 %v3306_v36  ;;  %v3394_v36 = vld [vmem:[#allocation2 + $0x408] ss:$16 sps:$4 sm:$0xff]  }
  0xe1   :  { %1827 = vmatpush1.bf16.msra.mxu0 %v3303_v35  ;;  %1910 = vmatprep.subr.bf16.mxu1 %v3314_v38  ;;  %v3396_v35 = vld [vmem:[#allocation2 + $0x40c] ss:$16 sps:$4 sm:$0xff]  }
  0xe2   :  { %1828 = vmatprep.subr.bf16.mxu0 %v3311_v37  ;;  %v3880_v37 = vpack.c.bf16 %v3864_v24, %v3864_v24  ;;  %v3399_v38 = vld [vmem:[#allocation2 + $0x42c] ss:$16 sps:$4 sm:$0xff]  }
  0xe3   :  { %v3493_v24 = vld [vmem:[#allocation6 + $0x10] ss:$8 sps:$4 sm:$0xff]  }
  0xe4   :  { %1911 = vmatpush1.bf16.msra.mxu1 %v3312_v40  ;;  %v3492_v40 = vld [vmem:[#allocation6 + $0x4] ss:$8 sps:$4 sm:$0xff]  }
  0xe5   :  { %1829 = vmatpush1.bf16.msra.mxu0 %v3309_v39  ;;  %1912 = vmatprep.subr.bf16.mxu1 %v3320_v16  ;;  %v3490_v39 = vld [vmem:[#allocation6] ss:$8 sps:$4 sm:$0xff]   ;;  %v3495_v16 = vld [vmem:[#allocation6 + $0x14] ss:$8 sps:$4 sm:$0xff]  }
  0xe6   :  { %1830 = vmatprep.subr.bf16.mxu0 %v3317_v41  ;;  %v3397_v41 = vld [vmem:[#allocation2 + $0x428] ss:$16 sps:$4 sm:$0xff]  }
  0xe8   :  { %1913 = vmatpush1.bf16.msra.mxu1 %v3318_v44  ;;  %v3498_v44 = vld [vmem:[#allocation6 + $0x24] ss:$8 sps:$4 sm:$0xff]  }
  0xe9   :  { %1831 = vmatpush1.bf16.msra.mxu0 %v3315_v42  ;;  %1914 = vmatprep.subr.bf16.mxu1 %v3326_v46  ;;  %v3402_v42 = vld [vmem:[#allocation2 + $0x44c] ss:$16 sps:$4 sm:$0xff]  }
  0xea   :  { %1832 = vmatprep.subr.bf16.mxu0 %v3323_v45  ;;  %v3400_v45 = vld [vmem:[#allocation2 + $0x448] ss:$16 sps:$4 sm:$0xff]   ;;  %v3405_v46 = vld [vmem:[#allocation2 + $0x46c] ss:$16 sps:$4 sm:$0xff]  }
  0xec   :  { %1915 = vmatpush1.bf16.msra.mxu1 %v3324_v3  ;;  %v3408_v3 = vld [vmem:[#allocation2 + $0x48c] ss:$16 sps:$4 sm:$0xff]  }
  0xed   :  { %1833 = vmatpush1.bf16.msra.mxu0 %v3321_v47  ;;  %1916 = vmatprep.subr.bf16.mxu1 %v3332_v50  ;;  %v3403_v47 = vld [vmem:[#allocation2 + $0x468] ss:$16 sps:$4 sm:$0xff]  }
  0xee   :  { %1834 = vmatprep.subr.bf16.mxu0 %v3329_v48  ;;  %v3501_v48 = vld [vmem:[#allocation6 + $0x34] ss:$8 sps:$4 sm:$0xff]   ;;  %v3504_v50 = vld [vmem:[#allocation6 + $0x44] ss:$8 sps:$4 sm:$0xff]  }
  0xf0   :  { %1917 = vmatpush1.bf16.msra.mxu1 %v3330_v53  ;;  %v3411_v53 = vld [vmem:[#allocation2 + $0x4ac] ss:$16 sps:$4 sm:$0xff]  }
  0xf1   :  { %1835 = vmatpush1.bf16.msra.mxu0 %v3327_v52  ;;  %1918 = vmatprep.subr.bf16.mxu1 %v3338_v55  ;;  %v3406_v52 = vld [vmem:[#allocation2 + $0x488] ss:$16 sps:$4 sm:$0xff]  }
  0xf2   :  { %1836 = vmatprep.subr.bf16.mxu0 %v3335_v54  ;;  %v3502_v54 = vld [vmem:[#allocation6 + $0x40] ss:$8 sps:$4 sm:$0xff]   ;;  %v3507_v55 = vld [vmem:[#allocation6 + $0x54] ss:$8 sps:$4 sm:$0xff]  }
  0xf4   :  { %1919 = vmatpush1.bf16.msra.mxu1 %v3336_v57  ;;  %v3414_v57 = vld [vmem:[#allocation2 + $0x4cc] ss:$16 sps:$4 sm:$0xff]  }
  0xf5   :  { %1837 = vmatpush1.bf16.msra.mxu0 %v3333_v56  ;;  %1920 = vmatprep.subr.bf16.mxu1 %v3344_v59  ;;  %v3409_v56 = vld [vmem:[#allocation2 + $0x4a8] ss:$16 sps:$4 sm:$0xff]  }
  0xf6   :  { %1838 = vmatprep.subr.bf16.mxu0 %v3341_v58  ;;  %v3505_v58 = vld [vmem:[#allocation6 + $0x50] ss:$8 sps:$4 sm:$0xff]   ;;  %v3510_v59 = vld [vmem:[#allocation6 + $0x64] ss:$8 sps:$4 sm:$0xff]  }
  0xf8   :  { %1921 = vmatpush1.bf16.msra.mxu1 %v3342_v61  ;;  %v3417_v61 = vld [vmem:[#allocation2 + $0x4ec] ss:$16 sps:$4 sm:$0xff]  }
  0xf9   :  { %1839 = vmatpush1.bf16.msra.mxu0 %v3339_v60  ;;  %1922 = vmatprep.subr.bf16.mxu1 %v3350_v63  ;;  %v3412_v60 = vld [vmem:[#allocation2 + $0x4c8] ss:$16 sps:$4 sm:$0xff]  }
  0xfa   :  { %1840 = vmatprep.subr.bf16.mxu0 %v3347_v62  ;;  %v3508_v62 = vld [vmem:[#allocation6 + $0x60] ss:$8 sps:$4 sm:$0xff]   ;;  %v3513_v63 = vld [vmem:[#allocation6 + $0x74] ss:$8 sps:$4 sm:$0xff]  }
  0xfc   :  { %1923 = vmatpush1.bf16.msra.mxu1 %v3348_v1  ;;  %v3420_v1 = vld [vmem:[#allocation2 + $0x50c] ss:$16 sps:$4 sm:$0xff]  }
  0xfd   :  { %1841 = vmatpush1.bf16.msra.mxu0 %v3345_v0  ;;  %1924 = vmatprep.subr.bf16.mxu1 %v3356_v4  ;;  %v3415_v0 = vld [vmem:[#allocation2 + $0x4e8] ss:$16 sps:$4 sm:$0xff]  }
  0xfe   :  { %1842 = vmatprep.subr.bf16.mxu0 %v3353_v2  ;;  %v3511_v2 = vld [vmem:[#allocation6 + $0x70] ss:$8 sps:$4 sm:$0xff]   ;;  %v3516_v4 = vld [vmem:[#allocation6 + $0x84] ss:$8 sps:$4 sm:$0xff]  }
 0x100   :  { %1925 = vmatpush1.bf16.msra.mxu1 %v3354_v6  ;;  %v3423_v6 = vld [vmem:[#allocation2 + $0x52c] ss:$16 sps:$4 sm:$0xff]  }
 0x101   :  { %1843 = vmatpush1.bf16.msra.mxu0 %v3351_v5  ;;  %1926 = vmatprep.subr.bf16.mxu1 %v3362_v8  ;;  %v3418_v5 = vld [vmem:[#allocation2 + $0x508] ss:$16 sps:$4 sm:$0xff]  }
 0x102   :  { %1844 = vmatprep.subr.bf16.mxu0 %v3359_v7  ;;  %v3514_v7 = vld [vmem:[#allocation6 + $0x80] ss:$8 sps:$4 sm:$0xff]   ;;  %v3519_v8 = vld [vmem:[#allocation6 + $0x94] ss:$8 sps:$4 sm:$0xff]  }
 0x104   :  { %1927 = vmatpush1.bf16.msra.mxu1 %v3360_v10  ;;  %v3426_v10 = vld [vmem:[#allocation2 + $0x54c] ss:$16 sps:$4 sm:$0xff]  }
 0x105   :  { %1845 = vmatpush1.bf16.msra.mxu0 %v3357_v9  ;;  %1928 = vmatprep.subr.bf16.mxu1 %v3368_v12  ;;  %v3421_v9 = vld [vmem:[#allocation2 + $0x528] ss:$16 sps:$4 sm:$0xff]  }
 0x106   :  { %1846 = vmatprep.subr.bf16.mxu0 %v3365_v11  ;;  %v3517_v11 = vld [vmem:[#allocation6 + $0x90] ss:$8 sps:$4 sm:$0xff]   ;;  %v3522_v12 = vld [vmem:[#allocation6 + $0xa4] ss:$8 sps:$4 sm:$0xff]  }
 0x108   :  { %1929 = vmatpush1.bf16.msra.mxu1 %v3366_v14  ;;  %v3429_v14 = vld [vmem:[#allocation2 + $0x56c] ss:$16 sps:$4 sm:$0xff]  }
 0x109   :  { %1847 = vmatpush1.bf16.msra.mxu0 %v3363_v13  ;;  %1930 = vmatprep.subr.bf16.mxu1 %v3374_v17  ;;  %v3424_v13 = vld [vmem:[#allocation2 + $0x548] ss:$16 sps:$4 sm:$0xff]  }
 0x10a   :  { %1848 = vmatprep.subr.bf16.mxu0 %v3371_v15  ;;  %v3520_v15 = vld [vmem:[#allocation6 + $0xa0] ss:$8 sps:$4 sm:$0xff]   ;;  %v3525_v17 = vld [vmem:[#allocation6 + $0xb4] ss:$8 sps:$4 sm:$0xff]  }
 0x10c   :  { %1931 = vmatpush1.bf16.msra.mxu1 %v3372_v20  ;;  %v3432_v20 = vld [vmem:[#allocation2 + $0x58c] ss:$16 sps:$4 sm:$0xff]  }
 0x10d   :  { %1849 = vmatpush1.bf16.msra.mxu0 %v3369_v19  ;;  %1932 = vmatprep.subr.bf16.mxu1 %v3380_v22  ;;  %v3427_v19 = vld [vmem:[#allocation2 + $0x568] ss:$16 sps:$4 sm:$0xff]  }
 0x10e   :  { %1850 = vmatprep.subr.bf16.mxu0 %v3377_v21  ;;  %v3523_v21 = vld [vmem:[#allocation6 + $0xb0] ss:$8 sps:$4 sm:$0xff]   ;;  %v3528_v22 = vld [vmem:[#allocation6 + $0xc4] ss:$8 sps:$4 sm:$0xff]  }
 0x110   :  { %1933 = vmatpush1.bf16.msra.mxu1 %v3378_v25  ;;  %v3435_v25 = vld [vmem:[#allocation2 + $0x5ac] ss:$16 sps:$4 sm:$0xff]  }
 0x111   :  { %1851 = vmatpush1.bf16.msra.mxu0 %v3375_v23  ;;  %1934 = vmatprep.subr.bf16.mxu1 %v3386_v27  ;;  %v3430_v23 = vld [vmem:[#allocation2 + $0x588] ss:$16 sps:$4 sm:$0xff]  }
 0x112   :  { %1852 = vmatprep.subr.bf16.mxu0 %v3383_v26  ;;  %v3526_v26 = vld [vmem:[#allocation6 + $0xc0] ss:$8 sps:$4 sm:$0xff]   ;;  %v3531_v27 = vld [vmem:[#allocation6 + $0xd4] ss:$8 sps:$4 sm:$0xff]  }
 0x114   :  { %1935 = vmatpush1.bf16.msra.mxu1 %v3384_v29  ;;  %v3438_v29 = vld [vmem:[#allocation2 + $0x5cc] ss:$16 sps:$4 sm:$0xff]  }
 0x115   :  { %1853 = vmatpush1.bf16.msra.mxu0 %v3381_v28  ;;  %1936 = vmatprep.subr.bf16.mxu1 %v3392_v49  ;;  %v3433_v28 = vld [vmem:[#allocation2 + $0x5a8] ss:$16 sps:$4 sm:$0xff]  }
 0x116   :  { %1854 = vmatprep.subr.bf16.mxu0 %v3389_v31  ;;  %v3529_v31 = vld [vmem:[#allocation6 + $0xd0] ss:$8 sps:$4 sm:$0xff]   ;;  %v3436_v49 = vld [vmem:[#allocation2 + $0x5c8] ss:$16 sps:$4 sm:$0xff]  }
 0x118   :  { %1937 = vmatpush1.bf16.msra.mxu1 %v3390_v33  ;;  %v3439_v33 = vld [vmem:[#allocation2 + $0x5e8] ss:$16 sps:$4 sm:$0xff]  }
 0x119   :  { %1855 = vmatpush1.bf16.msra.mxu0 %v3387_v32  ;;  %1947 = vmatprep.subr.bf16.mxu1 %v3396_v35  ;;  %v3441_v32 = vld [vmem:[#allocation2 + $0x5ec] ss:$16 sps:$4 sm:$0xff]  }
 0x11a   :  { %2433 = vmatprep.subr.bf16.mxu0 %v3492_v40  ;;  %v3444_v35 = vld [vmem:[#allocation2 + $0x60c] ss:$16 sps:$4 sm:$0xff]  }
 0x11b   :  { %1939 = vmatmul.mubr.bf16.vlgmr.msra.gmra.mrb[4].mxu1 %v3843_v18  ;;  %v3496_v18 = vld [vmem:[#allocation6 + $0x20] ss:$8 sps:$4 sm:$0xff]  }
 0x11c   :  { %1857 = vmatmul.mubr.bf16.vlgmr.msra.gmra.mrb[0].mxu0 %v3880_v37  ;;  %1948 = vmatpush1.bf16.msra.mxu1 %v3394_v36  ;;  %v3442_v36 = vld [vmem:[#allocation2 + $0x608] ss:$16 sps:$4 sm:$0xff]   ;;  %v3450_v40 = vld [vmem:[#allocation2 + $0x64c] ss:$16 sps:$4 sm:$0xff]  }
 0x11d   :  { %1979 = vmatprep.mubr.bf16.mxu1 %v3858_v51  ;;  %1949 = vmatprep.subr.bf16.mxu1 %v3399_v38  ;;  %v3499_v51 = vld [vmem:[#allocation6 + $0x30] ss:$8 sps:$4 sm:$0xff]  }
 0x11e   :  { %2434 = vmatpush1.bf16.msra.mxu0 %v3490_v39  ;;  %v3447_v38 = vld [vmem:[#allocation2 + $0x62c] ss:$16 sps:$4 sm:$0xff]   ;;  %v3445_v39 = vld [vmem:[#allocation2 + $0x628] ss:$16 sps:$4 sm:$0xff]  }
 0x11f   :  { %2435 = vmatprep.subr.bf16.mxu0 %v3495_v16  ;;  %v3453_v16 = vld [vmem:[#allocation2 + $0x66c] ss:$16 sps:$4 sm:$0xff]  }
 0x120   :  { %1950 = vmatpush1.bf16.msra.mxu1 %v3397_v41  ;;  %v3448_v41 = vld [vmem:[#allocation2 + $0x648] ss:$16 sps:$4 sm:$0xff]  }
 0x121   :  { %1951 = vmatprep.subr.bf16.mxu1 %v3402_v42  ;;  %v3451_v42 = vld [vmem:[#allocation2 + $0x668] ss:$16 sps:$4 sm:$0xff]  }
 0x122   :  { %2436 = vmatpush1.bf16.msra.mxu0 %v3493_v24  ;;  %v3456_v24 = vld [vmem:[#allocation2 + $0x68c] ss:$16 sps:$4 sm:$0xff]  }
 0x123   :  { %2437 = vmatprep.subr.bf16.mxu0 %v3498_v44  ;;  %v3454_v44 = vld [vmem:[#allocation2 + $0x688] ss:$16 sps:$4 sm:$0xff]  }
 0x124   :  { %1952 = vmatpush1.bf16.msra.mxu1 %v3400_v45  ;;  %v3459_v45 = vld [vmem:[#allocation2 + $0x6ac] ss:$16 sps:$4 sm:$0xff]  }
 0x125   :  { %1953 = vmatprep.subr.bf16.mxu1 %v3405_v46  ;;  %v3462_v46 = vld [vmem:[#allocation2 + $0x6cc] ss:$16 sps:$4 sm:$0xff]  }
 0x126   :  { %2438 = vmatpush1.bf16.msra.mxu0 %v3496_v18  ;;  %v3534_v18 = vld [vmem:[#allocation6 + $0xe4] ss:$8 sps:$4 sm:$0xff]  }
 0x127   :  { %2439 = vmatprep.subr.bf16.mxu0 %v3501_v48 }
 0x128   :  { %1954 = vmatpush1.bf16.msra.mxu1 %v3403_v47  ;;  %v3532_v47 = vld [vmem:[#allocation6 + $0xe0] ss:$8 sps:$4 sm:$0xff]  }
 0x129   :  { %1955 = vmatprep.subr.bf16.mxu1 %v3408_v3 }
 0x12a   :  { %2440 = vmatpush1.bf16.msra.mxu0 %v3499_v51  ;;  %v3460_v51 = vld [vmem:[#allocation2 + $0x6c8] ss:$16 sps:$4 sm:$0xff]  }
 0x12b   :  { %2441 = vmatprep.subr.bf16.mxu0 %v3504_v50 }
 0x12c   :  { %1956 = vmatpush1.bf16.msra.mxu1 %v3406_v52  ;;  %v3465_v52 = vld [vmem:[#allocation2 + $0x6ec] ss:$16 sps:$4 sm:$0xff]  }
 0x12d   :  { %1957 = vmatprep.subr.bf16.mxu1 %v3411_v53  ;;  %v3537_v53 = vld [vmem:[#allocation6 + $0xf4] ss:$8 sps:$4 sm:$0xff]  }
 0x12e   :  { %2442 = vmatpush1.bf16.msra.mxu0 %v3502_v54  ;;  %v3535_v54 = vld [vmem:[#allocation6 + $0xf0] ss:$8 sps:$4 sm:$0xff]  }
 0x12f   :  { %2443 = vmatprep.subr.bf16.mxu0 %v3507_v55  ;;  %v3463_v55 = vld [vmem:[#allocation2 + $0x6e8] ss:$16 sps:$4 sm:$0xff]  }
 0x130   :  { %1958 = vmatpush1.bf16.msra.mxu1 %v3409_v56  ;;  %v3468_v56 = vld [vmem:[#allocation2 + $0x70c] ss:$16 sps:$4 sm:$0xff]  }
 0x131   :  { %1959 = vmatprep.subr.bf16.mxu1 %v3414_v57  ;;  %v3540_v57 = vld [vmem:[#allocation6 + $0x104] ss:$8 sps:$4 sm:$0xff]  }
 0x132   :  { %2444 = vmatpush1.bf16.msra.mxu0 %v3505_v58  ;;  %v3466_v58 = vld [vmem:[#allocation2 + $0x708] ss:$16 sps:$4 sm:$0xff]  }
 0x133   :  { %2445 = vmatprep.subr.bf16.mxu0 %v3510_v59  ;;  %v3471_v59 = vld [vmem:[#allocation2 + $0x72c] ss:$16 sps:$4 sm:$0xff]  }
 0x134   :  { %1960 = vmatpush1.bf16.msra.mxu1 %v3412_v60  ;;  %v3469_v60 = vld [vmem:[#allocation2 + $0x728] ss:$16 sps:$4 sm:$0xff]  }
 0x135   :  { %1961 = vmatprep.subr.bf16.mxu1 %v3417_v61  ;;  %v3474_v61 = vld [vmem:[#allocation2 + $0x74c] ss:$16 sps:$4 sm:$0xff]  }
 0x136   :  { %2446 = vmatpush1.bf16.msra.mxu0 %v3508_v62  ;;  %v3472_v62 = vld [vmem:[#allocation2 + $0x748] ss:$16 sps:$4 sm:$0xff]  }
 0x137   :  { %2447 = vmatprep.subr.bf16.mxu0 %v3513_v63  ;;  %v3477_v63 = vld [vmem:[#allocation2 + $0x76c] ss:$16 sps:$4 sm:$0xff]  }
 0x138   :  { %1962 = vmatpush1.bf16.msra.mxu1 %v3415_v0  ;;  %v3475_v0 = vld [vmem:[#allocation2 + $0x768] ss:$16 sps:$4 sm:$0xff]  }
 0x139   :  { %1963 = vmatprep.subr.bf16.mxu1 %v3420_v1  ;;  %v3480_v1 = vld [vmem:[#allocation2 + $0x78c] ss:$16 sps:$4 sm:$0xff]  }
 0x13a   :  { %2448 = vmatpush1.bf16.msra.mxu0 %v3511_v2  ;;  %v3478_v2 = vld [vmem:[#allocation2 + $0x788] ss:$16 sps:$4 sm:$0xff]  }
 0x13b   :  { %2449 = vmatprep.subr.bf16.mxu0 %v3516_v4  ;;  %v3483_v4 = vld [vmem:[#allocation2 + $0x7ac] ss:$16 sps:$4 sm:$0xff]  }
 0x13c   :  { %1964 = vmatpush1.bf16.msra.mxu1 %v3418_v5  ;;  %v3481_v5 = vld [vmem:[#allocation2 + $0x7a8] ss:$16 sps:$4 sm:$0xff]  }
 0x13d   :  { %1965 = vmatprep.subr.bf16.mxu1 %v3423_v6  ;;  %v3486_v6 = vld [vmem:[#allocation2 + $0x7cc] ss:$16 sps:$4 sm:$0xff]  }
 0x13e   :  { %2450 = vmatpush1.bf16.msra.mxu0 %v3514_v7  ;;  %v3484_v7 = vld [vmem:[#allocation2 + $0x7c8] ss:$16 sps:$4 sm:$0xff]  }
 0x13f   :  { %2451 = vmatprep.subr.bf16.mxu0 %v3519_v8  ;;  %v3489_v8 = vld [vmem:[#allocation2 + $0x7ec] ss:$16 sps:$4 sm:$0xff]  }
 0x140   :  { %1966 = vmatpush1.bf16.msra.mxu1 %v3421_v9  ;;  %v3487_v9 = vld [vmem:[#allocation2 + $0x7e8] ss:$16 sps:$4 sm:$0xff]  }
 0x141   :  { %1967 = vmatprep.subr.bf16.mxu1 %v3426_v10  ;;  %v403_v10 = vsub.s32 0, %v3828_v43 }
 0x142   :  { %2452 = vmatpush1.bf16.msra.mxu0 %v3517_v11  ;;  %v3889_v11 = vld [vmem:[#allocation4] sm:$0xf] }
 0x143   :  { %2453 = vmatprep.subr.bf16.mxu0 %v3522_v12  ;;  %v407_v12 = vsub.s32 1, %v3828_v43 }
 0x144   :  { %1968 = vmatpush1.bf16.msra.mxu1 %v3424_v13  ;;  %v404_v13 = vrot.slane %v3889_v11, %v403_v10 }
 0x145   :  { %1969 = vmatprep.subr.bf16.mxu1 %v3429_v14  ;;  %v408_v14 = vrot.slane %v3889_v11, %v407_v12 }
 0x146   :  { %2454 = vmatpush1.bf16.msra.mxu0 %v3520_v15 }
 0x147   :  { %2455 = vmatprep.subr.bf16.mxu0 %v3525_v17 }
 0x148   :  { %1970 = vmatpush1.bf16.msra.mxu1 %v3427_v19 }
 0x149   :  { %1971 = vmatprep.subr.bf16.mxu1 %v3432_v20 }
 0x14a   :  { %2456 = vmatpush1.bf16.msra.mxu0 %v3523_v21 }
 0x14b   :  { %2457 = vmatprep.subr.bf16.mxu0 %v3528_v22 }
 0x14c   :  { %1972 = vmatpush1.bf16.msra.mxu1 %v3430_v23 }
 0x14d   :  { %1973 = vmatprep.subr.bf16.mxu1 %v3435_v25 }
 0x14e   :  { %2458 = vmatpush1.bf16.msra.mxu0 %v3526_v26 }
 0x14f   :  { %2459 = vmatprep.subr.bf16.mxu0 %v3531_v27 }
 0x150   :  { %1974 = vmatpush1.bf16.msra.mxu1 %v3433_v28  ;;  %v3538_v28 = vld [vmem:[#allocation6 + $0x100] ss:$8 sps:$4 sm:$0xff]  }
 0x151   :  { %1975 = vmatprep.subr.bf16.mxu1 %v3438_v29 }
 0x152   :  { %2460 = vmatpush1.bf16.msra.mxu0 %v3529_v31  ;;  %v3543_v31 = vld [vmem:[#allocation6 + $0x114] ss:$8 sps:$4 sm:$0xff]  }
 0x153   :  { %2461 = vmatprep.subr.bf16.mxu0 %v3534_v18  ;;  %v3555_v18 = vld [vmem:[#allocation6 + $0x154] ss:$8 sps:$4 sm:$0xff]  }
 0x154   :  { %1976 = vmatpush1.bf16.msra.mxu1 %v3436_v49  ;;  %v3586_v49 = vld [vmem:[%s3962_s5 + $0x40] sm:$0xff]  }
 0x155   :  { %1977 = vmatprep.subr.bf16.mxu1 %v3441_v32  ;;  %v3587_v32 = vld [vmem:[%s3962_s5] sm:$0xff]  }
 0x156   :  { %2462 = vmatpush1.bf16.msra.mxu0 %v3532_v47  ;;  %v3596_v47 = vld [vmem:[%s3962_s5 + $0x68] sm:$0xff]  }
 0x157   :  { %2463 = vmatprep.subr.bf16.mxu0 %v3537_v53  ;;  %v3559_v53 = vld [vmem:[#allocation6 + $0x170] ss:$8 sps:$4 sm:$0xff]  }
 0x158   :  { %1978 = vmatpush1.bf16.msra.mxu1 %v3439_v33  ;;  %v3588_v33 = vld [vmem:[%s3962_s5 + $0x48] sm:$0xff]  }
 0x159   :  { %1988 = vmatprep.subr.bf16.mxu1 %v3444_v35  ;;  %v3541_v35 = vld [vmem:[#allocation6 + $0x110] ss:$8 sps:$4 sm:$0xff]  }
 0x15a   :  { %2464 = vmatpush1.bf16.msra.mxu0 %v3535_v54  ;;  %v3564_v54 = vld [vmem:[#allocation6 + $0x184] ss:$8 sps:$4 sm:$0xff]  }
 0x15b   :  { %1980 = vmatmul.mubr.bf16.vlgmr.msra.gmra.mrb[4].mxu1 %v3870_v30  ;;  %v3457_v30 = vld [vmem:[#allocation2 + $0x6a8] ss:$16 sps:$4 sm:$0xff]   ;;  %2474 = vmatprep.subr.bf16.mxu0 %v3540_v57  ;;  %v3565_v57 = vld [vmem:[#allocation6 + $0x190] ss:$8 sps:$4 sm:$0xff]  }
 0x15c   :  { %1989 = vmatpush1.bf16.msra.mxu1 %v3442_v36  ;;  %2020 = vmatprep.mubr.bf16.mxu1 %v3872_v34  ;;  %v3546_v36 = vld [vmem:[#allocation6 + $0x124] ss:$8 sps:$4 sm:$0xff]  }
 0x15d   :  { %1990 = vmatprep.subr.bf16.mxu1 %v3447_v38  ;;  %v3589_v38 = vld [vmem:[%s3962_s5 + $0x8] sm:$0xff]  }
 0x160   :  { %1991 = vmatpush1.bf16.msra.mxu1 %v3445_v39  ;;  %v3590_v39 = vld [vmem:[%s3962_s5 + $0x50] sm:$0xff]  }
 0x161   :  { %1992 = vmatprep.subr.bf16.mxu1 %v3450_v40  ;;  %v3544_v40 = vld [vmem:[#allocation6 + $0x120] ss:$8 sps:$4 sm:$0xff]  }
 0x164   :  { %1993 = vmatpush1.bf16.msra.mxu1 %v3448_v41  ;;  %v3549_v41 = vld [vmem:[#allocation6 + $0x134] ss:$8 sps:$4 sm:$0xff]  }
 0x165   :  { %1994 = vmatprep.subr.bf16.mxu1 %v3453_v16  ;;  %v3591_v16 = vld [vmem:[%s3962_s5 + $0x10] sm:$0xff]  }
 0x168   :  { %1995 = vmatpush1.bf16.msra.mxu1 %v3451_v42  ;;  %v3592_v42 = vld [vmem:[%s3962_s5 + $0x58] sm:$0xff]  }
 0x169   :  { %1996 = vmatprep.subr.bf16.mxu1 %v3456_v24  ;;  %v3547_v24 = vld [vmem:[#allocation6 + $0x130] ss:$8 sps:$4 sm:$0xff]  }
 0x16c   :  { %1997 = vmatpush1.bf16.msra.mxu1 %v3454_v44  ;;  %v3552_v44 = vld [vmem:[#allocation6 + $0x144] ss:$8 sps:$4 sm:$0xff]  }
 0x16d   :  { %1998 = vmatprep.subr.bf16.mxu1 %v3459_v45  ;;  %v3593_v45 = vld [vmem:[%s3962_s5 + $0x18] sm:$0xff]  }
 0x16e   :  { %v1735_v34 = vpop.f32.mrb[0].mxu1 }
 0x16f   :  { %v1737_v3 = vpop.f32.mrb[1].mxu1  ;;  %v1736_v15 = vadd.f32 %v1735_v34, %v404_v13  ;;  %v3595_v34 = vld [vmem:[%s3962_s5 + $0x20] sm:$0xff]  }
 0x170   :  { %v1739_v48 = vpop.f32.mrb[2].mxu1  ;;  %1999 = vmatpush1.bf16.msra.mxu1 %v3457_v30  ;;  %v1738_v17 = vadd.f32 %v1737_v3, %v408_v14  ;;  %v3594_v30 = vld [vmem:[%s3962_s5 + $0x60] sm:$0xff]   ;;  %v3553_v3 = vld [vmem:[#allocation6 + $0x150] ss:$8 sps:$4 sm:$0xff]  }
 0x171   :  { %v1740_v50 = vpop.f32.mrb[3].mxu1  ;;  %2000 = vmatprep.subr.bf16.mxu1 %v3462_v46  ;;  %v3550_v46 = vld [vmem:[#allocation6 + $0x140] ss:$8 sps:$4 sm:$0xff]   ;;  %v3558_v48 = vld [vmem:[#allocation6 + $0x164] ss:$8 sps:$4 sm:$0xff]  }
 0x172   :  { %v3556_v50 = vld [vmem:[#allocation6 + $0x160] ss:$8 sps:$4 sm:$0xff]  }
 0x174   :  { %2001 = vmatpush1.bf16.msra.mxu1 %v3460_v51  ;;  %v3597_v51 = vld [vmem:[%s3962_s5 + $0x28] sm:$0xff]  }
 0x175   :  { %2002 = vmatprep.subr.bf16.mxu1 %v3465_v52  ;;  %v3561_v52 = vld [vmem:[#allocation6 + $0x174] ss:$8 sps:$4 sm:$0xff]  }
 0x178   :  { %2003 = vmatpush1.bf16.msra.mxu1 %v3463_v55  ;;  %v3562_v55 = vld [vmem:[#allocation6 + $0x180] ss:$8 sps:$4 sm:$0xff]  }
 0x179   :  { %2004 = vmatprep.subr.bf16.mxu1 %v3468_v56  ;;  %v3567_v56 = vld [vmem:[#allocation6 + $0x194] ss:$8 sps:$4 sm:$0xff]  }
 0x17c   :  { %2005 = vmatpush1.bf16.msra.mxu1 %v3466_v58  ;;  %v3570_v58 = vld [vmem:[#allocation6 + $0x1a4] ss:$8 sps:$4 sm:$0xff]  }
 0x17d   :  { %2006 = vmatprep.subr.bf16.mxu1 %v3471_v59  ;;  %v3568_v59 = vld [vmem:[#allocation6 + $0x1a0] ss:$8 sps:$4 sm:$0xff]  }
 0x180   :  { %2007 = vmatpush1.bf16.msra.mxu1 %v3469_v60  ;;  %v3573_v60 = vld [vmem:[#allocation6 + $0x1b4] ss:$8 sps:$4 sm:$0xff]  }
 0x181   :  { %2008 = vmatprep.subr.bf16.mxu1 %v3474_v61  ;;  %v3571_v61 = vld [vmem:[#allocation6 + $0x1b0] ss:$8 sps:$4 sm:$0xff]  }
 0x184   :  { %2009 = vmatpush1.bf16.msra.mxu1 %v3472_v62  ;;  %v3576_v62 = vld [vmem:[#allocation6 + $0x1c4] ss:$8 sps:$4 sm:$0xff]  }
 0x185   :  { %2010 = vmatprep.subr.bf16.mxu1 %v3477_v63  ;;  %v3574_v63 = vld [vmem:[#allocation6 + $0x1c0] ss:$8 sps:$4 sm:$0xff]  }
 0x188   :  { %2011 = vmatpush1.bf16.msra.mxu1 %v3475_v0  ;;  %v3579_v0 = vld [vmem:[#allocation6 + $0x1d4] ss:$8 sps:$4 sm:$0xff]  }
 0x189   :  { %2012 = vmatprep.subr.bf16.mxu1 %v3480_v1  ;;  %v3577_v1 = vld [vmem:[#allocation6 + $0x1d0] ss:$8 sps:$4 sm:$0xff]  }
 0x18c   :  { %2013 = vmatpush1.bf16.msra.mxu1 %v3478_v2  ;;  %v3582_v2 = vld [vmem:[#allocation6 + $0x1e4] ss:$8 sps:$4 sm:$0xff]  }
 0x18d   :  { %2014 = vmatprep.subr.bf16.mxu1 %v3483_v4  ;;  %v3580_v4 = vld [vmem:[#allocation6 + $0x1e0] ss:$8 sps:$4 sm:$0xff]  }
 0x190   :  { %2015 = vmatpush1.bf16.msra.mxu1 %v3481_v5  ;;  %v3585_v5 = vld [vmem:[#allocation6 + $0x1f4] ss:$8 sps:$4 sm:$0xff]  }
 0x191   :  { %2016 = vmatprep.subr.bf16.mxu1 %v3486_v6  ;;  %v3583_v6 = vld [vmem:[#allocation6 + $0x1f0] ss:$8 sps:$4 sm:$0xff]  }
 0x194   :  { %2017 = vmatpush1.bf16.msra.mxu1 %v3484_v7  ;;  %v411_v7 = vsub.s32 2, %v3828_v43 }
 0x195   :  { %2018 = vmatprep.subr.bf16.mxu1 %v3489_v8  ;;  %v415_v8 = vsub.s32 3, %v3828_v43 }
 0x197   :  { %v416_v13 = vrot.slane %v3889_v11, %v415_v8 }
 0x198   :  { %2019 = vmatpush1.bf16.msra.mxu1 %v3487_v9  ;;  %v412_v9 = vrot.slane %v3889_v11, %v411_v7  ;;  %v3599_v11 = vld [vmem:[%s3962_s5 + $0x30] sm:$0xff]  }
 0x199   :  { %3040 = vmatprep.subr.bf16.mxu1 %v3586_v49 }
 0x19b   :  { %2021 = vmatmul.mubr.bf16.vlgmr.msra.gmra.mrb[4].mxu1 %v3880_v37 }
 0x19c   :  { %3041 = vmatpush3.bf16.msra.mxu1 %v3587_v32 }
 0x19d   :  { %3042 = vmatprep.subr.bf16.mxu1 %v3588_v33 }
 0x1a0   :  { %3043 = vmatpush3.bf16.msra.mxu1 %v3589_v38 }
 0x1a1   :  { %3044 = vmatprep.subr.bf16.mxu1 %v3590_v39 }
 0x1a4   :  { %3045 = vmatpush3.bf16.msra.mxu1 %v3591_v16 }
 0x1a5   :  { %3046 = vmatprep.subr.bf16.mxu1 %v3592_v42 }
 0x1a8   :  { %3047 = vmatpush3.bf16.msra.mxu1 %v3593_v45 }
 0x1a9   :  { %3048 = vmatprep.subr.bf16.mxu1 %v3594_v30 }
 0x1ac   :  { %3049 = vmatpush3.bf16.msra.mxu1 %v3595_v34 }
 0x1ad   :  { %3050 = vmatprep.subr.bf16.mxu1 %v3596_v47 }
 0x1b0   :  { %3051 = vmatpush3.bf16.msra.mxu1 %v3597_v51 }
 0x1ef   :  { %v1858_v19 = vpop.f32.mrb[0].mxu0 }
 0x1f0   :  { %v3063_v20 = vadd.f32 %v1858_v19, %v1736_v15  ;;  %v1860_v21 = vpop.f32.mrb[1].mxu0 }
 0x1f1   :  { %v3065_v37 = vadd.f32 %v1860_v21, %v1738_v17  ;;  %v1862_v22 = vpop.f32.mrb[2].mxu0 }
 0x1f2   :  { %v2029_v23 = vmax.f32 %v3063_v20, 0.0  ;;  %v1863_v25 = vpop.f32.mrb[3].mxu0 }
 0x1f3   :  { %v2030_v26 = vmax.f32 %v3065_v37, 0.0 }
 0x1f4   :  { %v2097_v29 = vpack.c.bf16 %v2029_v23, %v2029_v23 }
 0x1f5   :  { %v2098_v27 = vpack.c.bf16 %v2030_v26, %v2030_v26  ;;  %v3598_v26 = vld [vmem:[%s3962_s5 + $0x70] sm:$0xff]  }
 0x1f6   :  { %3052 = vmatprep.subr.bf16.mxu1 %v3598_v26 }
 0x1f7   :  { %2465 = vmatprep.mubr.bf16.mxu0 %v2098_v27  ;;  %3053 = vmatpush3.bf16.msra.mxu1 %v3599_v11  ;;  %v3600_v27 = vld [vmem:[%s3962_s5 + $0x78] sm:$0xff]  }
 0x1f8   :  { %2466 = vmatmul.mubr.bf16.vlgmr.msra.gmra.mrb[4].mxu0 %v2097_v29  ;;  %3054 = vmatprep.subr.bf16.mxu1 %v3600_v27  ;;  %v2101_v29 = vld [vmem:[#allocation7] sm:$0x3] }
 0x1f9   :  { %2475 = vmatpush1.bf16.msra.mxu0 %v3538_v28  ;;  %v3601_v28 = vld [vmem:[%s3962_s5 + $0x38] sm:$0xff]   ;;  %v2110_v49 = vrot.slane %v2101_v29, %v407_v12 }
 0x1fa   :  { %2476 = vmatprep.subr.bf16.mxu0 %v3543_v31  ;;  %v2106_v31 = vrot.slane %v2101_v29, %v403_v10 }
 0x1fb   :  { %3055 = vmatpush3.bf16.msra.mxu1 %v3601_v28 }
 0x1fd   :  { %2477 = vmatpush1.bf16.msra.mxu0 %v3541_v35 }
 0x1fe   :  { %2478 = vmatprep.subr.bf16.mxu0 %v3546_v36 }
 0x201   :  { %2479 = vmatpush1.bf16.msra.mxu0 %v3544_v40 }
 0x202   :  { %2480 = vmatprep.subr.bf16.mxu0 %v3549_v41 }
 0x205   :  { %2481 = vmatpush1.bf16.msra.mxu0 %v3547_v24 }
 0x206   :  { %2482 = vmatprep.subr.bf16.mxu0 %v3552_v44  ;;  %v3023_v44 = vld [vmem:[#allocation9] ss:$0 sm:$0xff] }
 0x209   :  { %2483 = vmatpush1.bf16.msra.mxu0 %v3550_v46 }
 0x20a   :  { %2484 = vmatprep.subr.bf16.mxu0 %v3555_v18 }
 0x20d   :  { %2485 = vmatpush1.bf16.msra.mxu0 %v3553_v3 }
 0x20e   :  { %2486 = vmatprep.subr.bf16.mxu0 %v3558_v48 }
 0x211   :  { %2487 = vmatpush1.bf16.msra.mxu0 %v3556_v50 }
 0x212   :  { %2488 = vmatprep.subr.bf16.mxu0 %v3561_v52 }
 0x215   :  { %2489 = vmatpush1.bf16.msra.mxu0 %v3559_v53 }
 0x216   :  { %2490 = vmatprep.subr.bf16.mxu0 %v3564_v54 }
 0x219   :  { %2491 = vmatpush1.bf16.msra.mxu0 %v3562_v55 }
 0x21a   :  { %2492 = vmatprep.subr.bf16.mxu0 %v3567_v56 }
 0x21d   :  { %2493 = vmatpush1.bf16.msra.mxu0 %v3565_v57 }
 0x21e   :  { %2494 = vmatprep.subr.bf16.mxu0 %v3570_v58 }
 0x221   :  { %2495 = vmatpush1.bf16.msra.mxu0 %v3568_v59 }
 0x222   :  { %2496 = vmatprep.subr.bf16.mxu0 %v3573_v60 }
 0x225   :  { %2497 = vmatpush1.bf16.msra.mxu0 %v3571_v61 }
 0x226   :  { %2498 = vmatprep.subr.bf16.mxu0 %v3576_v62 }
 0x229   :  { %2499 = vmatpush1.bf16.msra.mxu0 %v3574_v63 }
 0x22a   :  { %2500 = vmatprep.subr.bf16.mxu0 %v3579_v0 }
 0x22d   :  { %2501 = vmatpush1.bf16.msra.mxu0 %v3577_v1 }
 0x22e   :  { %2502 = vmatprep.subr.bf16.mxu0 %v3582_v2 }
 0x231   :  { %2503 = vmatpush1.bf16.msra.mxu0 %v3580_v4 }
 0x232   :  { %2504 = vmatprep.subr.bf16.mxu0 %v3585_v5 }
 0x235   :  { %2505 = vmatpush1.bf16.msra.mxu0 %v3583_v6 }
 0x26e   :  { %v2022_v14 = vpop.f32.mrb[4].mxu1 }
 0x26f   :  { %v3066_v15 = vadd.f32 %v2022_v14, %v412_v9  ;;  %v2024_v17 = vpop.f32.mrb[5].mxu1 }
 0x270   :  { %v3067_v19 = vadd.f32 %v2024_v17, %v416_v13  ;;  %v2026_v20 = vpop.f32.mrb[6].mxu1 }
 0x271   :  { %v2031_v21 = vmax.f32 %v3066_v15, 0.0  ;;  %v2027_v37 = vpop.f32.mrb[7].mxu1 }
 0x272   :  { %v2032_v22 = vmax.f32 %v3067_v19, 0.0 }
 0x273   :  { %v2099_v25 = vpack.c.bf16 %v2031_v21, %v2031_v21 }
 0x274   :  { %v2100_v23 = vpack.c.bf16 %v2032_v22, %v2032_v22 }
 0x276   :  { %2506 = vmatprep.mubr.bf16.mxu0 %v2100_v23 }
 0x277   :  { %2507 = vmatmul.mubr.bf16.vlgmr.msra.gmra.mrb[4].mxu0 %v2099_v25 }
 0x34a   :  { %v2508_v32 = vpop.f32.mrb[4].mxu0 }
 0x34b   :  { %v3068_v33 = vadd.f32 %v2508_v32, %v2106_v31  ;;  %v2510_v35 = vpop.f32.mrb[5].mxu0 }
 0x34c   :  { %v3069_v36 = vadd.f32 %v2510_v35, %v2110_v49  ;;  %v2512_v38 = vpop.f32.mrb[6].mxu0 }
 0x34d   :  { %v2515_v39 = vmax.f32 %v3068_v33, 0.0  ;;  %v2513_v40 = vpop.f32.mrb[7].mxu0 }
 0x34e   :  { %v2516_v41 = vmax.f32 %v3069_v36, 0.0 }
 0x34f   :  { %v2549_v42 = vpack.c.bf16 %v2515_v39, %v2515_v39 }
 0x350   :  { %v2550_v16 = vpack.c.bf16 %v2516_v41, %v2516_v41 }
 0x352   :  { %2686 = vmatprep.mubr.bf16.mxu1 %v2550_v16 }
 0x353   :  { %2687 = vmatmul.mubr.bf16.vlgmr.msra.gmra.mrb[8].mxu1 %v2549_v42 }
 0x426   :  { %v3056_v24 = vpop.f32.mrb[8].mxu1 }
 0x427   :  { %v3057_v45 = vpop.f32.mrb[9].mxu1 }
 0x428   :  { %v3058_v30 = vadd.f32 %v3057_v45, %v3056_v24  ;;  %v3059_v10 = vpop.f32.mrb[10].mxu1 }
 0x429   :  { %v3060_v43 = vpop.f32.mrb[11].mxu1 }
 0x42a   :  { %v2689_v12 = vadd.f32 %v3058_v30, %v3023_v44 }
 0x42c   :  { %2695 = vst.msk [vmem:[%s3964_s7] sm:$0x3] %vm2694_vm0, %v2689_v12 }
 0x42d   :  { %2700 = vsyncpa [#allocation3], 1 }
 0x42e   :  { %2701 = vsyncpa [#allocation5], 1 }
 0x42f   :  { %2702 = vsyncpa [#allocation8], 1 }

// kernel: model_forward.13
= control target key start
LH: loop header
LB: loop body
LE: loop exit
PB: predicated region body
PF: predicated region fallthrough
CT: control target
= control target key end

     0   :  { %v3580_v36 = vmov 1983009808   ;;  %v292_v38 = vlaneseq  ;;  %s4732_s0 = inlined_call_operand.vmem [shape: f32[2,1024], index: 0, kind: input, shape index: {}]   ;;  %s4733_s1 = inlined_call_operand.vmem [shape: bf16[1024,512], index: 1, kind: input, shape index: {}]   ;;  %s4734_s2 = inlined_call_operand.vmem [shape: f32[1,512], index: 2, kind: input, shape index: {}]   ;;  %s4735_s3 = inlined_call_operand.vmem [shape: bf16[512,256], index: 3, kind: input, shape index: {}]   ;;  %s4736_s4 = inlined_call_operand.vmem [shape: f32[1,256], index: 4, kind: input, shape index: {}]   ;;  %s4737_s5 = inlined_call_operand.vmem [shape: bf16[256,40], index: 5, kind: input, shape index: {}]   ;;  %s4738_s6 = inlined_call_operand.vmem [shape: f32[1,40], index: 6, kind: input, shape index: {}]   ;;  %s4739_s7 = inlined_call_operand.hbm [shape: f32[2,40], index: 7, kind: output, shape index: {}]  }
   0x1   :  { %v3054_v0 = vld [vmem:[%s4733_s1 + $0x4] ss:$16 sps:$4 sm:$0xff]   ;;  %v3058_v2 = vld [vmem:[%s4733_s1] ss:$16 sps:$4 sm:$0xff]   ;;  %v290_v37 = vunpack.c.l.s4 %v3580_v36 }
   0x2   :  { %v3056_v1 = vld [vmem:[%s4733_s1 + $0x204] ss:$16 sps:$4 sm:$0xff]   ;;  %1640 = vmatprep.subr.bf16.mxu1 %v3054_v0  ;;  %v3059_v3 = vld [vmem:[%s4733_s1 + $0x200] ss:$16 sps:$4 sm:$0xff]   ;;  %v3739_v43 = vshrl.u32 %v292_v38, 7 }
   0x3   :  { %1681 = vmatprep.subr.bf16.mxu0 %v3056_v1  ;;  %v3060_v4 = vld [vmem:[%s4733_s1 + $0x24] ss:$16 sps:$4 sm:$0xff]   ;;  %1641 = vmatpush1.bf16.msra.mxu1 %v3058_v2  ;;  %v3064_v6 = vld [vmem:[%s4733_s1 + $0x20] ss:$16 sps:$4 sm:$0xff]   ;;  %v291_v42 = vunpack.c.0.s8 %v290_v37  ;;  %v3186_v37 = vld [vmem:[%s4733_s1 + $0xac] ss:$16 sps:$4 sm:$0xff]  }
   0x4   :  { %1682 = vmatpush1.bf16.msra.mxu0 %v3059_v3  ;;  %v3062_v5 = vld [vmem:[%s4733_s1 + $0x224] ss:$16 sps:$4 sm:$0xff]   ;;  %1642 = vmatprep.subr.bf16.mxu1 %v3060_v4  ;;  %v3065_v7 = vld [vmem:[%s4733_s1 + $0x220] ss:$16 sps:$4 sm:$0xff]  }
   0x5   :  { %1683 = vmatprep.subr.bf16.mxu0 %v3062_v5  ;;  %v3066_v8 = vld [vmem:[%s4733_s1 + $0x44] ss:$16 sps:$4 sm:$0xff]   ;;  %v3070_v10 = vld [vmem:[%s4733_s1 + $0x40] ss:$16 sps:$4 sm:$0xff]   ;;  %v3757_v49 = vsub.s32 %v291_v42, %v3739_v43  ;;  %v3914_v42 = vld [vmem:[%s4732_s0 + $0x8] sm:$0xff] }
   0x6   :  { %v3068_v9 = vld [vmem:[%s4733_s1 + $0x244] ss:$16 sps:$4 sm:$0xff]   ;;  %v3071_v11 = vld [vmem:[%s4733_s1 + $0x240] ss:$16 sps:$4 sm:$0xff]  }
   0x7   :  { %1643 = vmatpush1.bf16.msra.mxu1 %v3064_v6  ;;  %v3072_v12 = vld [vmem:[%s4733_s1 + $0x64] ss:$16 sps:$4 sm:$0xff]   ;;  %v3076_v14 = vld [vmem:[%s4733_s1 + $0x60] ss:$16 sps:$4 sm:$0xff]  }
   0x8   :  { %1684 = vmatpush1.bf16.msra.mxu0 %v3065_v7  ;;  %1644 = vmatprep.subr.bf16.mxu1 %v3066_v8  ;;  %v3074_v13 = vld [vmem:[%s4733_s1 + $0x264] ss:$16 sps:$4 sm:$0xff]   ;;  %v3077_v15 = vld [vmem:[%s4733_s1 + $0x260] ss:$16 sps:$4 sm:$0xff]  }
   0x9   :  { %1685 = vmatprep.subr.bf16.mxu0 %v3068_v9  ;;  %v3078_v16 = vld [vmem:[%s4733_s1 + $0x84] ss:$16 sps:$4 sm:$0xff]   ;;  %v3082_v18 = vld [vmem:[%s4733_s1 + $0x80] ss:$16 sps:$4 sm:$0xff]  }
   0xa   :  { %v3080_v17 = vld [vmem:[%s4733_s1 + $0x284] ss:$16 sps:$4 sm:$0xff]   ;;  %v3083_v19 = vld [vmem:[%s4733_s1 + $0x280] ss:$16 sps:$4 sm:$0xff]  }
   0xb   :  { %1645 = vmatpush1.bf16.msra.mxu1 %v3070_v10  ;;  %v3084_v20 = vld [vmem:[%s4733_s1 + $0xa4] ss:$16 sps:$4 sm:$0xff]   ;;  %v3088_v22 = vld [vmem:[%s4733_s1 + $0xa0] ss:$16 sps:$4 sm:$0xff]  }
   0xc   :  { %1686 = vmatpush1.bf16.msra.mxu0 %v3071_v11  ;;  %1646 = vmatprep.subr.bf16.mxu1 %v3072_v12  ;;  %v3086_v21 = vld [vmem:[%s4733_s1 + $0x2a4] ss:$16 sps:$4 sm:$0xff]   ;;  %v3089_v23 = vld [vmem:[%s4733_s1 + $0x2a0] ss:$16 sps:$4 sm:$0xff]  }
   0xd   :  { %1687 = vmatprep.subr.bf16.mxu0 %v3074_v13  ;;  %v3090_v24 = vld [vmem:[%s4733_s1 + $0xc4] ss:$16 sps:$4 sm:$0xff]   ;;  %v3094_v26 = vld [vmem:[%s4733_s1 + $0xc0] ss:$16 sps:$4 sm:$0xff]  }
   0xe   :  { %v3092_v25 = vld [vmem:[%s4733_s1 + $0x2c4] ss:$16 sps:$4 sm:$0xff]   ;;  %v3095_v27 = vld [vmem:[%s4733_s1 + $0x2c0] ss:$16 sps:$4 sm:$0xff]  }
   0xf   :  { %1647 = vmatpush1.bf16.msra.mxu1 %v3076_v14  ;;  %v3096_v28 = vld [vmem:[%s4733_s1 + $0xe4] ss:$16 sps:$4 sm:$0xff]   ;;  %v3100_v30 = vld [vmem:[%s4733_s1 + $0xe0] ss:$16 sps:$4 sm:$0xff]  }
  0x10   :  { %1688 = vmatpush1.bf16.msra.mxu0 %v3077_v15  ;;  %1648 = vmatprep.subr.bf16.mxu1 %v3078_v16  ;;  %v3098_v29 = vld [vmem:[%s4733_s1 + $0x2e4] ss:$16 sps:$4 sm:$0xff]   ;;  %v3101_v31 = vld [vmem:[%s4733_s1 + $0x2e0] ss:$16 sps:$4 sm:$0xff]   ;;  %v3156_v15 = vld [vmem:[%s4733_s1 + $0xc] ss:$16 sps:$4 sm:$0xff]  }
  0x11   :  { %1689 = vmatprep.subr.bf16.mxu0 %v3080_v17  ;;  %v3102_v32 = vld [vmem:[%s4733_s1 + $0x104] ss:$16 sps:$4 sm:$0xff]   ;;  %v3106_v34 = vld [vmem:[%s4733_s1 + $0x100] ss:$16 sps:$4 sm:$0xff]  }
  0x12   :  { %v3104_v33 = vld [vmem:[%s4733_s1 + $0x304] ss:$16 sps:$4 sm:$0xff]   ;;  %v3107_v35 = vld [vmem:[%s4733_s1 + $0x300] ss:$16 sps:$4 sm:$0xff]  }
  0x13   :  { %1649 = vmatpush1.bf16.msra.mxu1 %v3082_v18  ;;  %v3108_v39 = vld [vmem:[%s4733_s1 + $0x124] ss:$16 sps:$4 sm:$0xff]   ;;  %v3112_v41 = vld [vmem:[%s4733_s1 + $0x120] ss:$16 sps:$4 sm:$0xff]  }
  0x14   :  { %1690 = vmatpush1.bf16.msra.mxu0 %v3083_v19  ;;  %1650 = vmatprep.subr.bf16.mxu1 %v3084_v20  ;;  %v3110_v40 = vld [vmem:[%s4733_s1 + $0x324] ss:$16 sps:$4 sm:$0xff]   ;;  %v3113_v44 = vld [vmem:[%s4733_s1 + $0x320] ss:$16 sps:$4 sm:$0xff]   ;;  %v3154_v19 = vld [vmem:[%s4733_s1 + $0x8] ss:$16 sps:$4 sm:$0xff]  }
  0x15   :  { %1691 = vmatprep.subr.bf16.mxu0 %v3086_v21  ;;  %v3114_v45 = vld [vmem:[%s4733_s1 + $0x144] ss:$16 sps:$4 sm:$0xff]   ;;  %v3118_v47 = vld [vmem:[%s4733_s1 + $0x140] ss:$16 sps:$4 sm:$0xff]   ;;  %v3162_v21 = vld [vmem:[%s4733_s1 + $0x2c] ss:$16 sps:$4 sm:$0xff]  }
  0x16   :  { %v3116_v46 = vld [vmem:[%s4733_s1 + $0x344] ss:$16 sps:$4 sm:$0xff]   ;;  %v3119_v48 = vld [vmem:[%s4733_s1 + $0x340] ss:$16 sps:$4 sm:$0xff]  }
  0x17   :  { %1651 = vmatpush1.bf16.msra.mxu1 %v3088_v22  ;;  %v3120_v50 = vld [vmem:[%s4733_s1 + $0x164] ss:$16 sps:$4 sm:$0xff]   ;;  %v3124_v53 = vld [vmem:[%s4733_s1 + $0x160] ss:$16 sps:$4 sm:$0xff]  }
  0x18   :  { %1692 = vmatpush1.bf16.msra.mxu0 %v3089_v23  ;;  %1652 = vmatprep.subr.bf16.mxu1 %v3090_v24  ;;  %v3122_v51 = vld [vmem:[%s4733_s1 + $0x364] ss:$16 sps:$4 sm:$0xff]   ;;  %v3125_v56 = vld [vmem:[%s4733_s1 + $0x360] ss:$16 sps:$4 sm:$0xff]   ;;  %v3160_v23 = vld [vmem:[%s4733_s1 + $0x28] ss:$16 sps:$4 sm:$0xff]  }
  0x19   :  { %1693 = vmatprep.subr.bf16.mxu0 %v3092_v25  ;;  %v28_v52 = vld [vmem:[%s4732_s0] sm:$0xff]  ;;  %v3168_v25 = vld [vmem:[%s4733_s1 + $0x4c] ss:$16 sps:$4 sm:$0xff]  }
  0x1a   :  { %v295_v54 = vrot.slane %v28_v52, %v3757_v49  ;;  %v288_v55 = vcombine.high %v28_v52, %v28_v52  ;;  %v3126_v57 = vld [vmem:[%s4733_s1 + $0x184] ss:$16 sps:$4 sm:$0xff]   ;;  %v3130_v61 = vld [vmem:[%s4733_s1 + $0x180] ss:$16 sps:$4 sm:$0xff]  }
  0x1b   :  { %1653 = vmatpush1.bf16.msra.mxu1 %v3094_v26  ;;  %v3128_v58 = vld [vmem:[%s4733_s1 + $0x384] ss:$16 sps:$4 sm:$0xff]   ;;  %v3131_v0 = vld [vmem:[%s4733_s1 + $0x380] ss:$16 sps:$4 sm:$0xff]  }
  0x1c   :  { %1694 = vmatpush1.bf16.msra.mxu0 %v3095_v27  ;;  %1654 = vmatprep.subr.bf16.mxu1 %v3096_v28  ;;  %v303_v59 = vcombine.high %v295_v54, %v295_v54  ;;  %v302_v60 = vrot.slane %v288_v55, %v3757_v49  ;;  %v3132_v1 = vld [vmem:[%s4733_s1 + $0x1a4] ss:$16 sps:$4 sm:$0xff]   ;;  %v3136_v4 = vld [vmem:[%s4733_s1 + $0x1a0] ss:$16 sps:$4 sm:$0xff]   ;;  %v3833_v16 = vpack.c.bf16 %v295_v54, %v295_v54  ;;  %v3166_v27 = vld [vmem:[%s4733_s1 + $0x48] ss:$16 sps:$4 sm:$0xff]  }
  0x1d   :  { %1695 = vmatprep.subr.bf16.mxu0 %v3098_v29  ;;  %v3134_v2 = vld [vmem:[%s4733_s1 + $0x3a4] ss:$16 sps:$4 sm:$0xff]   ;;  %v3137_v5 = vld [vmem:[%s4733_s1 + $0x3a0] ss:$16 sps:$4 sm:$0xff]   ;;  %v3174_v29 = vld [vmem:[%s4733_s1 + $0x6c] ss:$16 sps:$4 sm:$0xff]  }
  0x1e   :  { %v331_v62 = vpack.c.bf16 %v303_v59, %v303_v59  ;;  %v304_v63 = vcombine.high %v302_v60, %v302_v60  ;;  %v3138_v6 = vld [vmem:[%s4733_s1 + $0x1c4] ss:$16 sps:$4 sm:$0xff]   ;;  %v3142_v8 = vld [vmem:[%s4733_s1 + $0x1c0] ss:$16 sps:$4 sm:$0xff]   ;;  %v3838_v18 = vpack.c.bf16 %v302_v60, %v302_v60  ;;  %v3204_v55 = vld [vmem:[%s4733_s1 + $0x10c] ss:$16 sps:$4 sm:$0xff]  }
  0x1f   :  { %1655 = vmatpush1.bf16.msra.mxu1 %v3100_v30  ;;  %v3140_v7 = vld [vmem:[%s4733_s1 + $0x3c4] ss:$16 sps:$4 sm:$0xff]   ;;  %v3143_v9 = vld [vmem:[%s4733_s1 + $0x3c0] ss:$16 sps:$4 sm:$0xff]   ;;  %v3210_v59 = vld [vmem:[%s4733_s1 + $0x12c] ss:$16 sps:$4 sm:$0xff]  }
  0x20   :  { %1696 = vmatpush1.bf16.msra.mxu0 %v3101_v31  ;;  %1656 = vmatprep.subr.bf16.mxu1 %v3102_v32  ;;  %v3794_v3 = vpack.c.bf16 %v304_v63, %v304_v63  ;;  %v3144_v10 = vld [vmem:[%s4733_s1 + $0x1e4] ss:$16 sps:$4 sm:$0xff]   ;;  %v3148_v12 = vld [vmem:[%s4733_s1 + $0x1e0] ss:$16 sps:$4 sm:$0xff]   ;;  %v3172_v31 = vld [vmem:[%s4733_s1 + $0x68] ss:$16 sps:$4 sm:$0xff]  }
  0x21   :  { %1697 = vmatprep.subr.bf16.mxu0 %v3104_v33  ;;  %1672 = vmatprep.mubr.bf16.mxu1 %v331_v62  ;;  %v3146_v11 = vld [vmem:[%s4733_s1 + $0x3e4] ss:$16 sps:$4 sm:$0xff]   ;;  %v3149_v13 = vld [vmem:[%s4733_s1 + $0x3e0] ss:$16 sps:$4 sm:$0xff]   ;;  %v3180_v33 = vld [vmem:[%s4733_s1 + $0x8c] ss:$16 sps:$4 sm:$0xff]  }
  0x22   :  { %1713 = vmatprep.mubr.bf16.mxu0 %v3794_v3  ;;  %v3153_v14 = vld [vmem:[%s4733_s1 + $0x404] ss:$16 sps:$4 sm:$0xff]   ;;  %v3151_v17 = vld [vmem:[%s4733_s1 + $0x400] ss:$16 sps:$4 sm:$0xff]   ;;  %v3216_v63 = vld [vmem:[%s4733_s1 + $0x14c] ss:$16 sps:$4 sm:$0xff]  }
  0x23   :  { %1657 = vmatpush1.bf16.msra.mxu1 %v3106_v34  ;;  %v3159_v20 = vld [vmem:[%s4733_s1 + $0x424] ss:$16 sps:$4 sm:$0xff]   ;;  %v3157_v22 = vld [vmem:[%s4733_s1 + $0x420] ss:$16 sps:$4 sm:$0xff]  }
  0x24   :  { %1698 = vmatpush1.bf16.msra.mxu0 %v3107_v35  ;;  %1658 = vmatprep.subr.bf16.mxu1 %v3108_v39  ;;  %v3165_v24 = vld [vmem:[%s4733_s1 + $0x444] ss:$16 sps:$4 sm:$0xff]   ;;  %v3163_v26 = vld [vmem:[%s4733_s1 + $0x440] ss:$16 sps:$4 sm:$0xff]   ;;  %v3178_v35 = vld [vmem:[%s4733_s1 + $0x88] ss:$16 sps:$4 sm:$0xff]  }
  0x25   :  { %1699 = vmatprep.subr.bf16.mxu0 %v3110_v40  ;;  %v3171_v28 = vld [vmem:[%s4733_s1 + $0x464] ss:$16 sps:$4 sm:$0xff]   ;;  %v3169_v30 = vld [vmem:[%s4733_s1 + $0x460] ss:$16 sps:$4 sm:$0xff]   ;;  %v3184_v39 = vld [vmem:[%s4733_s1 + $0xa8] ss:$16 sps:$4 sm:$0xff]  }
  0x26   :  { %v3177_v32 = vld [vmem:[%s4733_s1 + $0x484] ss:$16 sps:$4 sm:$0xff]   ;;  %v3175_v34 = vld [vmem:[%s4733_s1 + $0x480] ss:$16 sps:$4 sm:$0xff]  }
  0x27   :  { %1659 = vmatpush1.bf16.msra.mxu1 %v3112_v41  ;;  %v3183_v36 = vld [vmem:[%s4733_s1 + $0x4a4] ss:$16 sps:$4 sm:$0xff]   ;;  %v3181_v38 = vld [vmem:[%s4733_s1 + $0x4a0] ss:$16 sps:$4 sm:$0xff]   ;;  %v3192_v41 = vld [vmem:[%s4733_s1 + $0xcc] ss:$16 sps:$4 sm:$0xff]  }
  0x28   :  { %1700 = vmatpush1.bf16.msra.mxu0 %v3113_v44  ;;  %1660 = vmatprep.subr.bf16.mxu1 %v3114_v45  ;;  %v3189_v40 = vld [vmem:[%s4733_s1 + $0x4c4] ss:$16 sps:$4 sm:$0xff]   ;;  %v3918_v44 = vrot.slane %v3914_v42, %v3757_v49  ;;  %v3187_v45 = vld [vmem:[%s4733_s1 + $0x4c0] ss:$16 sps:$4 sm:$0xff]  }
  0x29   :  { %1701 = vmatprep.subr.bf16.mxu0 %v3116_v46  ;;  %v3190_v46 = vld [vmem:[%s4733_s1 + $0xc8] ss:$16 sps:$4 sm:$0xff]   ;;  %v3193_v52 = vld [vmem:[%s4733_s1 + $0x4e0] ss:$16 sps:$4 sm:$0xff]   ;;  %v3201_v54 = vld [vmem:[%s4733_s1 + $0x504] ss:$16 sps:$4 sm:$0xff]  }
  0x2a   :  { %v3205_v60 = vld [vmem:[%s4733_s1 + $0x520] ss:$16 sps:$4 sm:$0xff]  }
  0x2b   :  { %1661 = vmatpush1.bf16.msra.mxu1 %v3118_v47  ;;  %v320_v47 = vcombine.high %v3918_v44, %v3918_v44 }
  0x2c   :  { %1702 = vmatpush1.bf16.msra.mxu0 %v3119_v48  ;;  %1662 = vmatprep.subr.bf16.mxu1 %v3120_v50  ;;  %v3195_v48 = vld [vmem:[%s4733_s1 + $0x4e4] ss:$16 sps:$4 sm:$0xff]   ;;  %v3198_v50 = vld [vmem:[%s4733_s1 + $0xec] ss:$16 sps:$4 sm:$0xff]  }
  0x2d   :  { %1703 = vmatprep.subr.bf16.mxu0 %v3122_v51  ;;  %v3934_v51 = vpack.c.bf16 %v320_v47, %v320_v47  ;;  %v3274_v47 = vld [vmem:[%s4733_s1 + $0x288] ss:$16 sps:$4 sm:$0xff]  }
  0x2f   :  { %1663 = vmatpush1.bf16.msra.mxu1 %v3124_v53  ;;  %v3196_v53 = vld [vmem:[%s4733_s1 + $0xe8] ss:$16 sps:$4 sm:$0xff]  }
  0x30   :  { %1704 = vmatpush1.bf16.msra.mxu0 %v3125_v56  ;;  %1664 = vmatprep.subr.bf16.mxu1 %v3126_v57  ;;  %v3199_v56 = vld [vmem:[%s4733_s1 + $0x500] ss:$16 sps:$4 sm:$0xff]   ;;  %v3202_v57 = vld [vmem:[%s4733_s1 + $0x108] ss:$16 sps:$4 sm:$0xff]  }
  0x31   :  { %1705 = vmatprep.subr.bf16.mxu0 %v3128_v58  ;;  %v3207_v58 = vld [vmem:[%s4733_s1 + $0x524] ss:$16 sps:$4 sm:$0xff]  }
  0x33   :  { %1665 = vmatpush1.bf16.msra.mxu1 %v3130_v61  ;;  %v3208_v61 = vld [vmem:[%s4733_s1 + $0x128] ss:$16 sps:$4 sm:$0xff]  }
  0x34   :  { %1706 = vmatpush1.bf16.msra.mxu0 %v3131_v0  ;;  %1666 = vmatprep.subr.bf16.mxu1 %v3132_v1  ;;  %v3211_v0 = vld [vmem:[%s4733_s1 + $0x540] ss:$16 sps:$4 sm:$0xff]   ;;  %v3214_v1 = vld [vmem:[%s4733_s1 + $0x148] ss:$16 sps:$4 sm:$0xff]  }
  0x35   :  { %1707 = vmatprep.subr.bf16.mxu0 %v3134_v2  ;;  %v3219_v2 = vld [vmem:[%s4733_s1 + $0x564] ss:$16 sps:$4 sm:$0xff]  }
  0x37   :  { %1667 = vmatpush1.bf16.msra.mxu1 %v3136_v4  ;;  %v3222_v4 = vld [vmem:[%s4733_s1 + $0x16c] ss:$16 sps:$4 sm:$0xff]  }
  0x38   :  { %1708 = vmatpush1.bf16.msra.mxu0 %v3137_v5  ;;  %1668 = vmatprep.subr.bf16.mxu1 %v3138_v6  ;;  %v3217_v5 = vld [vmem:[%s4733_s1 + $0x560] ss:$16 sps:$4 sm:$0xff]   ;;  %v3220_v6 = vld [vmem:[%s4733_s1 + $0x168] ss:$16 sps:$4 sm:$0xff]  }
  0x39   :  { %1709 = vmatprep.subr.bf16.mxu0 %v3140_v7  ;;  %v3225_v7 = vld [vmem:[%s4733_s1 + $0x584] ss:$16 sps:$4 sm:$0xff]  }
  0x3b   :  { %1669 = vmatpush1.bf16.msra.mxu1 %v3142_v8  ;;  %v3228_v8 = vld [vmem:[%s4733_s1 + $0x18c] ss:$16 sps:$4 sm:$0xff]  }
  0x3c   :  { %1710 = vmatpush1.bf16.msra.mxu0 %v3143_v9  ;;  %1670 = vmatprep.subr.bf16.mxu1 %v3144_v10  ;;  %v3223_v9 = vld [vmem:[%s4733_s1 + $0x580] ss:$16 sps:$4 sm:$0xff]   ;;  %v3226_v10 = vld [vmem:[%s4733_s1 + $0x188] ss:$16 sps:$4 sm:$0xff]  }
  0x3d   :  { %1711 = vmatprep.subr.bf16.mxu0 %v3146_v11  ;;  %v3231_v11 = vld [vmem:[%s4733_s1 + $0x5a4] ss:$16 sps:$4 sm:$0xff]  }
  0x3f   :  { %1671 = vmatpush1.bf16.msra.mxu1 %v3148_v12  ;;  %v3234_v12 = vld [vmem:[%s4733_s1 + $0x1ac] ss:$16 sps:$4 sm:$0xff]  }
  0x40   :  { %1712 = vmatpush1.bf16.msra.mxu0 %v3149_v13  ;;  %1804 = vmatprep.subr.bf16.mxu1 %v3156_v15  ;;  %v3229_v13 = vld [vmem:[%s4733_s1 + $0x5a0] ss:$16 sps:$4 sm:$0xff]   ;;  %v3237_v15 = vld [vmem:[%s4733_s1 + $0x5c4] ss:$16 sps:$4 sm:$0xff]  }
  0x41   :  { %1722 = vmatprep.subr.bf16.mxu0 %v3153_v14  ;;  %v3232_v14 = vld [vmem:[%s4733_s1 + $0x1a8] ss:$16 sps:$4 sm:$0xff]  }
  0x42   :  { %1673 = vmatmul.mubr.bf16.vlgmr.msra.gmra.mrb[0].mxu1 %v3833_v16 }
  0x43   :  { %1714 = vmatmul.mubr.bf16.vlgmr.msra.gmra.mrb[0].mxu0 %v3838_v18  ;;  %1805 = vmatpush1.bf16.msra.mxu1 %v3154_v19  ;;  %v305_v19 = vcombine.high %v3914_v42, %v3914_v42  ;;  %v3268_v42 = vld [vmem:[%s4733_s1 + $0x268] ss:$16 sps:$4 sm:$0xff]  }
  0x44   :  { %1723 = vmatpush1.bf16.msra.mxu0 %v3151_v17  ;;  %1806 = vmatprep.subr.bf16.mxu1 %v3162_v21  ;;  %v3240_v17 = vld [vmem:[%s4733_s1 + $0x1cc] ss:$16 sps:$4 sm:$0xff]   ;;  %v3238_v21 = vld [vmem:[%s4733_s1 + $0x1c8] ss:$16 sps:$4 sm:$0xff]  }
  0x45   :  { %1724 = vmatprep.subr.bf16.mxu0 %v3159_v20  ;;  %1836 = vmatprep.mubr.bf16.mxu1 %v331_v62  ;;  %v3213_v62 = vld [vmem:[%s4733_s1 + $0x544] ss:$16 sps:$4 sm:$0xff]   ;;  %v3235_v20 = vld [vmem:[%s4733_s1 + $0x5c0] ss:$16 sps:$4 sm:$0xff]  }
  0x46   :  { %1754 = vmatprep.mubr.bf16.mxu0 %v3934_v51 }
  0x47   :  { %1807 = vmatpush1.bf16.msra.mxu1 %v3160_v23  ;;  %v3246_v23 = vld [vmem:[%s4733_s1 + $0x1ec] ss:$16 sps:$4 sm:$0xff]  }
  0x48   :  { %1725 = vmatpush1.bf16.msra.mxu0 %v3157_v22  ;;  %1808 = vmatprep.subr.bf16.mxu1 %v3168_v25  ;;  %v3243_v22 = vld [vmem:[%s4733_s1 + $0x5e4] ss:$16 sps:$4 sm:$0xff]   ;;  %v3241_v25 = vld [vmem:[%s4733_s1 + $0x5e0] ss:$16 sps:$4 sm:$0xff]  }
  0x49   :  { %1726 = vmatprep.subr.bf16.mxu0 %v3165_v24  ;;  %v4036_v24 = vrot.slane %v305_v19, %v3757_v49  ;;  %v3252_v49 = vld [vmem:[%s4733_s1 + $0x20c] ss:$16 sps:$4 sm:$0xff]   ;;  %v3319_v19 = vld [vmem:[%s4733_s1 + $0x780] ss:$16 sps:$4 sm:$0xff]  }
  0x4b   :  { %1809 = vmatpush1.bf16.msra.mxu1 %v3166_v27  ;;  %v3249_v27 = vld [vmem:[%s4733_s1 + $0x604] ss:$16 sps:$4 sm:$0xff]  }
  0x4c   :  { %1727 = vmatpush1.bf16.msra.mxu0 %v3163_v26  ;;  %1810 = vmatprep.subr.bf16.mxu1 %v3174_v29  ;;  %v3244_v26 = vld [vmem:[%s4733_s1 + $0x1e8] ss:$16 sps:$4 sm:$0xff]   ;;  %v4054_v29 = vpack.c.bf16 %v3918_v44, %v3918_v44  ;;  %v3273_v44 = vld [vmem:[%s4733_s1 + $0x684] ss:$16 sps:$4 sm:$0xff]  }
  0x4d   :  { %1728 = vmatprep.subr.bf16.mxu0 %v3171_v28  ;;  %v321_v28 = vcombine.high %v4036_v24, %v4036_v24 }
  0x4f   :  { %1811 = vmatpush1.bf16.msra.mxu1 %v3172_v31  ;;  %v3250_v31 = vld [vmem:[%s4733_s1 + $0x208] ss:$16 sps:$4 sm:$0xff]  }
  0x50   :  { %1729 = vmatpush1.bf16.msra.mxu0 %v3169_v30  ;;  %1812 = vmatprep.subr.bf16.mxu1 %v3180_v33  ;;  %v3247_v30 = vld [vmem:[%s4733_s1 + $0x600] ss:$16 sps:$4 sm:$0xff]   ;;  %v3258_v33 = vld [vmem:[%s4733_s1 + $0x22c] ss:$16 sps:$4 sm:$0xff]  }
  0x51   :  { %1730 = vmatprep.subr.bf16.mxu0 %v3177_v32  ;;  %v3255_v32 = vld [vmem:[%s4733_s1 + $0x624] ss:$16 sps:$4 sm:$0xff]  }
  0x53   :  { %1813 = vmatpush1.bf16.msra.mxu1 %v3178_v35  ;;  %v3253_v35 = vld [vmem:[%s4733_s1 + $0x620] ss:$16 sps:$4 sm:$0xff]  }
  0x54   :  { %1731 = vmatpush1.bf16.msra.mxu0 %v3175_v34  ;;  %1814 = vmatprep.subr.bf16.mxu1 %v3186_v37  ;;  %v4068_v34 = vpack.c.bf16 %v321_v28, %v321_v28  ;;  %v3261_v37 = vld [vmem:[%s4733_s1 + $0x644] ss:$16 sps:$4 sm:$0xff]   ;;  %v3334_v28 = vld [vmem:[%s4733_s1 + $0x3c8] ss:$16 sps:$4 sm:$0xff]  }
  0x55   :  { %1732 = vmatprep.subr.bf16.mxu0 %v3183_v36  ;;  %v3256_v36 = vld [vmem:[%s4733_s1 + $0x228] ss:$16 sps:$4 sm:$0xff]  }
  0x57   :  { %1815 = vmatpush1.bf16.msra.mxu1 %v3184_v39  ;;  %v3262_v39 = vld [vmem:[%s4733_s1 + $0x248] ss:$16 sps:$4 sm:$0xff]  }
  0x58   :  { %1733 = vmatpush1.bf16.msra.mxu0 %v3181_v38  ;;  %1816 = vmatprep.subr.bf16.mxu1 %v3192_v41  ;;  %v3259_v38 = vld [vmem:[%s4733_s1 + $0x640] ss:$16 sps:$4 sm:$0xff]  }
  0x59   :  { %1734 = vmatprep.subr.bf16.mxu0 %v3189_v40  ;;  %v3267_v40 = vld [vmem:[%s4733_s1 + $0x664] ss:$16 sps:$4 sm:$0xff]   ;;  %v3265_v41 = vld [vmem:[%s4733_s1 + $0x660] ss:$16 sps:$4 sm:$0xff]  }
  0x5b   :  { %1817 = vmatpush1.bf16.msra.mxu1 %v3190_v46  ;;  %v3271_v46 = vld [vmem:[%s4733_s1 + $0x680] ss:$16 sps:$4 sm:$0xff]  }
  0x5c   :  { %1735 = vmatpush1.bf16.msra.mxu0 %v3187_v45  ;;  %1818 = vmatprep.subr.bf16.mxu1 %v3198_v50  ;;  %v3276_v45 = vld [vmem:[%s4733_s1 + $0x28c] ss:$16 sps:$4 sm:$0xff]  }
  0x5d   :  { %1736 = vmatprep.subr.bf16.mxu0 %v3195_v48  ;;  %v3279_v48 = vld [vmem:[%s4733_s1 + $0x6a4] ss:$16 sps:$4 sm:$0xff]   ;;  %v3282_v50 = vld [vmem:[%s4733_s1 + $0x2ac] ss:$16 sps:$4 sm:$0xff]  }
  0x5f   :  { %1819 = vmatpush1.bf16.msra.mxu1 %v3196_v53  ;;  %v3280_v53 = vld [vmem:[%s4733_s1 + $0x2a8] ss:$16 sps:$4 sm:$0xff]  }
  0x60   :  { %1737 = vmatpush1.bf16.msra.mxu0 %v3193_v52  ;;  %1820 = vmatprep.subr.bf16.mxu1 %v3204_v55  ;;  %v3277_v52 = vld [vmem:[%s4733_s1 + $0x6a0] ss:$16 sps:$4 sm:$0xff]   ;;  %v3288_v55 = vld [vmem:[%s4733_s1 + $0x2cc] ss:$16 sps:$4 sm:$0xff]  }
  0x61   :  { %1738 = vmatprep.subr.bf16.mxu0 %v3201_v54  ;;  %v3285_v54 = vld [vmem:[%s4733_s1 + $0x6c4] ss:$16 sps:$4 sm:$0xff]  }
  0x63   :  { %1821 = vmatpush1.bf16.msra.mxu1 %v3202_v57  ;;  %v3286_v57 = vld [vmem:[%s4733_s1 + $0x2c8] ss:$16 sps:$4 sm:$0xff]  }
  0x64   :  { %1739 = vmatpush1.bf16.msra.mxu0 %v3199_v56  ;;  %1822 = vmatprep.subr.bf16.mxu1 %v3210_v59  ;;  %v3283_v56 = vld [vmem:[%s4733_s1 + $0x6c0] ss:$16 sps:$4 sm:$0xff]   ;;  %v3294_v59 = vld [vmem:[%s4733_s1 + $0x2ec] ss:$16 sps:$4 sm:$0xff]  }
  0x65   :  { %1740 = vmatprep.subr.bf16.mxu0 %v3207_v58  ;;  %v3291_v58 = vld [vmem:[%s4733_s1 + $0x6e4] ss:$16 sps:$4 sm:$0xff]  }
  0x67   :  { %1823 = vmatpush1.bf16.msra.mxu1 %v3208_v61  ;;  %v3292_v61 = vld [vmem:[%s4733_s1 + $0x2e8] ss:$16 sps:$4 sm:$0xff]  }
  0x68   :  { %1741 = vmatpush1.bf16.msra.mxu0 %v3205_v60  ;;  %1824 = vmatprep.subr.bf16.mxu1 %v3216_v63  ;;  %v3289_v60 = vld [vmem:[%s4733_s1 + $0x6e0] ss:$16 sps:$4 sm:$0xff]   ;;  %v3300_v63 = vld [vmem:[%s4733_s1 + $0x30c] ss:$16 sps:$4 sm:$0xff]  }
  0x69   :  { %1742 = vmatprep.subr.bf16.mxu0 %v3213_v62  ;;  %v3297_v62 = vld [vmem:[%s4733_s1 + $0x704] ss:$16 sps:$4 sm:$0xff]  }
  0x6b   :  { %1825 = vmatpush1.bf16.msra.mxu1 %v3214_v1  ;;  %v3298_v1 = vld [vmem:[%s4733_s1 + $0x308] ss:$16 sps:$4 sm:$0xff]  }
  0x6c   :  { %1743 = vmatpush1.bf16.msra.mxu0 %v3211_v0  ;;  %1826 = vmatprep.subr.bf16.mxu1 %v3222_v4  ;;  %v3295_v0 = vld [vmem:[%s4733_s1 + $0x700] ss:$16 sps:$4 sm:$0xff]   ;;  %v3306_v4 = vld [vmem:[%s4733_s1 + $0x32c] ss:$16 sps:$4 sm:$0xff]  }
  0x6d   :  { %1744 = vmatprep.subr.bf16.mxu0 %v3219_v2  ;;  %v3303_v2 = vld [vmem:[%s4733_s1 + $0x724] ss:$16 sps:$4 sm:$0xff]  }
  0x6f   :  { %1827 = vmatpush1.bf16.msra.mxu1 %v3220_v6  ;;  %v3304_v6 = vld [vmem:[%s4733_s1 + $0x328] ss:$16 sps:$4 sm:$0xff]  }
  0x70   :  { %1745 = vmatpush1.bf16.msra.mxu0 %v3217_v5  ;;  %1828 = vmatprep.subr.bf16.mxu1 %v3228_v8  ;;  %v3301_v5 = vld [vmem:[%s4733_s1 + $0x720] ss:$16 sps:$4 sm:$0xff]   ;;  %v3312_v8 = vld [vmem:[%s4733_s1 + $0x34c] ss:$16 sps:$4 sm:$0xff]  }
  0x71   :  { %1746 = vmatprep.subr.bf16.mxu0 %v3225_v7  ;;  %v3309_v7 = vld [vmem:[%s4733_s1 + $0x744] ss:$16 sps:$4 sm:$0xff]  }
  0x73   :  { %1829 = vmatpush1.bf16.msra.mxu1 %v3226_v10  ;;  %v3310_v10 = vld [vmem:[%s4733_s1 + $0x348] ss:$16 sps:$4 sm:$0xff]  }
  0x74   :  { %1747 = vmatpush1.bf16.msra.mxu0 %v3223_v9  ;;  %1830 = vmatprep.subr.bf16.mxu1 %v3234_v12  ;;  %v3307_v9 = vld [vmem:[%s4733_s1 + $0x740] ss:$16 sps:$4 sm:$0xff]   ;;  %v3318_v12 = vld [vmem:[%s4733_s1 + $0x36c] ss:$16 sps:$4 sm:$0xff]  }
  0x75   :  { %1748 = vmatprep.subr.bf16.mxu0 %v3231_v11  ;;  %v3315_v11 = vld [vmem:[%s4733_s1 + $0x764] ss:$16 sps:$4 sm:$0xff]  }
  0x77   :  { %1831 = vmatpush1.bf16.msra.mxu1 %v3232_v14  ;;  %v3316_v14 = vld [vmem:[%s4733_s1 + $0x368] ss:$16 sps:$4 sm:$0xff]  }
  0x78   :  { %1749 = vmatpush1.bf16.msra.mxu0 %v3229_v13  ;;  %1832 = vmatprep.subr.bf16.mxu1 %v3240_v17  ;;  %v3313_v13 = vld [vmem:[%s4733_s1 + $0x760] ss:$16 sps:$4 sm:$0xff]   ;;  %v3324_v17 = vld [vmem:[%s4733_s1 + $0x38c] ss:$16 sps:$4 sm:$0xff]  }
  0x79   :  { %1750 = vmatprep.subr.bf16.mxu0 %v3237_v15  ;;  %v3321_v15 = vld [vmem:[%s4733_s1 + $0x784] ss:$16 sps:$4 sm:$0xff]  }
  0x7b   :  { %1833 = vmatpush1.bf16.msra.mxu1 %v3238_v21  ;;  %v3327_v21 = vld [vmem:[%s4733_s1 + $0x7a4] ss:$16 sps:$4 sm:$0xff]  }
  0x7c   :  { %1751 = vmatpush1.bf16.msra.mxu0 %v3235_v20  ;;  %1834 = vmatprep.subr.bf16.mxu1 %v3246_v23  ;;  %v3322_v20 = vld [vmem:[%s4733_s1 + $0x388] ss:$16 sps:$4 sm:$0xff]   ;;  %v3325_v23 = vld [vmem:[%s4733_s1 + $0x7a0] ss:$16 sps:$4 sm:$0xff]  }
  0x7d   :  { %1752 = vmatprep.subr.bf16.mxu0 %v3243_v22  ;;  %v3330_v22 = vld [vmem:[%s4733_s1 + $0x3ac] ss:$16 sps:$4 sm:$0xff]  }
  0x7f   :  { %1835 = vmatpush1.bf16.msra.mxu1 %v3244_v26  ;;  %v3333_v26 = vld [vmem:[%s4733_s1 + $0x7c4] ss:$16 sps:$4 sm:$0xff]  }
  0x80   :  { %1753 = vmatpush1.bf16.msra.mxu0 %v3241_v25  ;;  %1845 = vmatprep.subr.bf16.mxu1 %v3252_v49  ;;  %v3328_v25 = vld [vmem:[%s4733_s1 + $0x3a8] ss:$16 sps:$4 sm:$0xff]   ;;  %v3331_v49 = vld [vmem:[%s4733_s1 + $0x7c0] ss:$16 sps:$4 sm:$0xff]  }
  0x81   :  { %1763 = vmatprep.subr.bf16.mxu0 %v3249_v27  ;;  %v3336_v27 = vld [vmem:[%s4733_s1 + $0x3cc] ss:$16 sps:$4 sm:$0xff]  }
  0x82   :  { %1837 = vmatmul.mubr.bf16.vlgmr.msra.gmra.mrb[4].mxu1 %v3833_v16  ;;  %v3264_v16 = vld [vmem:[%s4733_s1 + $0x24c] ss:$16 sps:$4 sm:$0xff]  }
  0x83   :  { %1755 = vmatmul.mubr.bf16.vlgmr.msra.gmra.mrb[0].mxu0 %v4054_v29  ;;  %1846 = vmatpush1.bf16.msra.mxu1 %v3250_v31  ;;  %v3342_v31 = vld [vmem:[%s4733_s1 + $0x3ec] ss:$16 sps:$4 sm:$0xff]  }
  0x84   :  { %1764 = vmatpush1.bf16.msra.mxu0 %v3247_v30  ;;  %1847 = vmatprep.subr.bf16.mxu1 %v3258_v33  ;;  %v3339_v30 = vld [vmem:[%s4733_s1 + $0x7e4] ss:$16 sps:$4 sm:$0xff]   ;;  %v3340_v33 = vld [vmem:[%s4733_s1 + $0x3e8] ss:$16 sps:$4 sm:$0xff]  }
  0x85   :  { %1765 = vmatprep.subr.bf16.mxu0 %v3255_v32  ;;  %1795 = vmatprep.mubr.bf16.mxu0 %v4068_v34  ;;  %v3337_v32 = vld [vmem:[%s4733_s1 + $0x7e0] ss:$16 sps:$4 sm:$0xff]  }
  0x86   :  { %1877 = vmatprep.mubr.bf16.mxu1 %v3794_v3  ;;  %v3270_v3 = vld [vmem:[%s4733_s1 + $0x26c] ss:$16 sps:$4 sm:$0xff]  }
  0x87   :  { %1848 = vmatpush1.bf16.msra.mxu1 %v3256_v36  ;;  %v3344_v36 = vld [vmem:[%s4733_s1 + $0x408] ss:$16 sps:$4 sm:$0xff]  }
  0x88   :  { %1766 = vmatpush1.bf16.msra.mxu0 %v3253_v35  ;;  %1849 = vmatprep.subr.bf16.mxu1 %v3264_v16  ;;  %v3346_v35 = vld [vmem:[%s4733_s1 + $0x40c] ss:$16 sps:$4 sm:$0xff]  }
  0x89   :  { %1767 = vmatprep.subr.bf16.mxu0 %v3261_v37  ;;  %v4256_v37 = vpack.c.bf16 %v4036_v24, %v4036_v24  ;;  %v3349_v16 = vld [vmem:[%s4733_s1 + $0x42c] ss:$16 sps:$4 sm:$0xff]  }
  0x8a   :  { %v3442_v24 = vld [vmem:[%s4735_s3 + $0x4] ss:$8 sps:$4 sm:$0xff]  }
  0x8b   :  { %1850 = vmatpush1.bf16.msra.mxu1 %v3262_v39  ;;  %v3347_v39 = vld [vmem:[%s4733_s1 + $0x428] ss:$16 sps:$4 sm:$0xff]  }
  0x8c   :  { %1768 = vmatpush1.bf16.msra.mxu0 %v3259_v38  ;;  %1851 = vmatprep.subr.bf16.mxu1 %v3270_v3  ;;  %v3440_v38 = vld [vmem:[%s4735_s3] ss:$8 sps:$4 sm:$0xff]   ;;  %v3443_v3 = vld [vmem:[%s4735_s3 + $0x10] ss:$8 sps:$4 sm:$0xff]  }
  0x8d   :  { %1769 = vmatprep.subr.bf16.mxu0 %v3267_v40  ;;  %v3445_v40 = vld [vmem:[%s4735_s3 + $0x14] ss:$8 sps:$4 sm:$0xff]  }
  0x8f   :  { %1852 = vmatpush1.bf16.msra.mxu1 %v3268_v42  ;;  %v3355_v42 = vld [vmem:[%s4733_s1 + $0x46c] ss:$16 sps:$4 sm:$0xff]  }
  0x90   :  { %1770 = vmatpush1.bf16.msra.mxu0 %v3265_v41  ;;  %1853 = vmatprep.subr.bf16.mxu1 %v3276_v45  ;;  %v3350_v41 = vld [vmem:[%s4733_s1 + $0x448] ss:$16 sps:$4 sm:$0xff]  }
  0x91   :  { %1771 = vmatprep.subr.bf16.mxu0 %v3273_v44  ;;  %v3446_v44 = vld [vmem:[%s4735_s3 + $0x20] ss:$8 sps:$4 sm:$0xff]  }
  0x92   :  { %v3353_v45 = vld [vmem:[%s4733_s1 + $0x468] ss:$16 sps:$4 sm:$0xff]  }
  0x93   :  { %1854 = vmatpush1.bf16.msra.mxu1 %v3274_v47  ;;  %v3451_v47 = vld [vmem:[%s4735_s3 + $0x34] ss:$8 sps:$4 sm:$0xff]  }
  0x94   :  { %1772 = vmatpush1.bf16.msra.mxu0 %v3271_v46  ;;  %1855 = vmatprep.subr.bf16.mxu1 %v3282_v50  ;;  %v3358_v46 = vld [vmem:[%s4733_s1 + $0x48c] ss:$16 sps:$4 sm:$0xff]  }
  0x95   :  { %1773 = vmatprep.subr.bf16.mxu0 %v3279_v48  ;;  %v3449_v48 = vld [vmem:[%s4735_s3 + $0x30] ss:$8 sps:$4 sm:$0xff]   ;;  %v3454_v50 = vld [vmem:[%s4735_s3 + $0x44] ss:$8 sps:$4 sm:$0xff]  }
  0x97   :  { %1856 = vmatpush1.bf16.msra.mxu1 %v3280_v53  ;;  %v3361_v53 = vld [vmem:[%s4733_s1 + $0x4ac] ss:$16 sps:$4 sm:$0xff]  }
  0x98   :  { %1774 = vmatpush1.bf16.msra.mxu0 %v3277_v52  ;;  %1857 = vmatprep.subr.bf16.mxu1 %v3288_v55  ;;  %v3356_v52 = vld [vmem:[%s4733_s1 + $0x488] ss:$16 sps:$4 sm:$0xff]   ;;  %v3457_v55 = vld [vmem:[%s4735_s3 + $0x54] ss:$8 sps:$4 sm:$0xff]  }
  0x99   :  { %1775 = vmatprep.subr.bf16.mxu0 %v3285_v54  ;;  %v3452_v54 = vld [vmem:[%s4735_s3 + $0x40] ss:$8 sps:$4 sm:$0xff]  }
  0x9b   :  { %1858 = vmatpush1.bf16.msra.mxu1 %v3286_v57  ;;  %v3364_v57 = vld [vmem:[%s4733_s1 + $0x4cc] ss:$16 sps:$4 sm:$0xff]  }
  0x9c   :  { %1776 = vmatpush1.bf16.msra.mxu0 %v3283_v56  ;;  %1859 = vmatprep.subr.bf16.mxu1 %v3294_v59  ;;  %v3359_v56 = vld [vmem:[%s4733_s1 + $0x4a8] ss:$16 sps:$4 sm:$0xff]  }
  0x9d   :  { %1777 = vmatprep.subr.bf16.mxu0 %v3291_v58 }
  0x9f   :  { %1860 = vmatpush1.bf16.msra.mxu1 %v3292_v61 }
  0xa0   :  { %1778 = vmatpush1.bf16.msra.mxu0 %v3289_v60  ;;  %1861 = vmatprep.subr.bf16.mxu1 %v3300_v63 }
  0xa1   :  { %1779 = vmatprep.subr.bf16.mxu0 %v3297_v62 }
  0xa3   :  { %1862 = vmatpush1.bf16.msra.mxu1 %v3298_v1 }
  0xa4   :  { %1780 = vmatpush1.bf16.msra.mxu0 %v3295_v0  ;;  %1863 = vmatprep.subr.bf16.mxu1 %v3306_v4 }
  0xa5   :  { %1781 = vmatprep.subr.bf16.mxu0 %v3303_v2 }
  0xa7   :  { %1864 = vmatpush1.bf16.msra.mxu1 %v3304_v6 }
  0xa8   :  { %1782 = vmatpush1.bf16.msra.mxu0 %v3301_v5  ;;  %1865 = vmatprep.subr.bf16.mxu1 %v3312_v8 }
  0xa9   :  { %1783 = vmatprep.subr.bf16.mxu0 %v3309_v7 }
  0xab   :  { %1866 = vmatpush1.bf16.msra.mxu1 %v3310_v10 }
  0xac   :  { %1784 = vmatpush1.bf16.msra.mxu0 %v3307_v9  ;;  %1867 = vmatprep.subr.bf16.mxu1 %v3318_v12 }
  0xad   :  { %1785 = vmatprep.subr.bf16.mxu0 %v3315_v11 }
  0xaf   :  { %1868 = vmatpush1.bf16.msra.mxu1 %v3316_v14 }
  0xb0   :  { %1786 = vmatpush1.bf16.msra.mxu0 %v3313_v13  ;;  %1869 = vmatprep.subr.bf16.mxu1 %v3324_v17 }
  0xb1   :  { %1787 = vmatprep.subr.bf16.mxu0 %v3321_v15 }
  0xb3   :  { %1870 = vmatpush1.bf16.msra.mxu1 %v3322_v20 }
  0xb4   :  { %1788 = vmatpush1.bf16.msra.mxu0 %v3319_v19  ;;  %1871 = vmatprep.subr.bf16.mxu1 %v3330_v22 }
  0xb5   :  { %1789 = vmatprep.subr.bf16.mxu0 %v3327_v21 }
  0xb7   :  { %1872 = vmatpush1.bf16.msra.mxu1 %v3328_v25 }
  0xb8   :  { %1790 = vmatpush1.bf16.msra.mxu0 %v3325_v23  ;;  %1873 = vmatprep.subr.bf16.mxu1 %v3336_v27 }
  0xb9   :  { %1791 = vmatprep.subr.bf16.mxu0 %v3333_v26 }
  0xbb   :  { %1874 = vmatpush1.bf16.msra.mxu1 %v3334_v28 }
  0xbc   :  { %1792 = vmatpush1.bf16.msra.mxu0 %v3331_v49  ;;  %1875 = vmatprep.subr.bf16.mxu1 %v3342_v31 }
  0xbd   :  { %1793 = vmatprep.subr.bf16.mxu0 %v3339_v30 }
  0xbf   :  { %1876 = vmatpush1.bf16.msra.mxu1 %v3340_v33 }
  0xc0   :  { %1794 = vmatpush1.bf16.msra.mxu0 %v3337_v32  ;;  %1886 = vmatprep.subr.bf16.mxu1 %v3346_v35 }
  0xc1   :  { %2372 = vmatprep.subr.bf16.mxu0 %v3442_v24 }
  0xc2   :  { %1878 = vmatmul.mubr.bf16.vlgmr.msra.gmra.mrb[4].mxu1 %v3838_v18  ;;  %v3352_v18 = vld [vmem:[%s4733_s1 + $0x44c] ss:$16 sps:$4 sm:$0xff]  }
  0xc3   :  { %1796 = vmatmul.mubr.bf16.vlgmr.msra.gmra.mrb[0].mxu0 %v4256_v37  ;;  %1887 = vmatpush1.bf16.msra.mxu1 %v3344_v36 }
  0xc4   :  { %1918 = vmatprep.mubr.bf16.mxu1 %v3934_v51  ;;  %1888 = vmatprep.subr.bf16.mxu1 %v3349_v16  ;;  %v3448_v51 = vld [vmem:[%s4735_s3 + $0x24] ss:$8 sps:$4 sm:$0xff]  }
  0xc5   :  { %2373 = vmatpush1.bf16.msra.mxu0 %v3440_v38 }
  0xc6   :  { %2374 = vmatprep.subr.bf16.mxu0 %v3445_v40 }
  0xc7   :  { %1889 = vmatpush1.bf16.msra.mxu1 %v3347_v39 }
  0xc8   :  { %1890 = vmatprep.subr.bf16.mxu1 %v3352_v18 }
  0xc9   :  { %2375 = vmatpush1.bf16.msra.mxu0 %v3443_v3 }
  0xca   :  { %2376 = vmatprep.subr.bf16.mxu0 %v3448_v51 }
  0xcb   :  { %1891 = vmatpush1.bf16.msra.mxu1 %v3350_v41 }
  0xcc   :  { %1892 = vmatprep.subr.bf16.mxu1 %v3355_v42 }
  0xcd   :  { %2377 = vmatpush1.bf16.msra.mxu0 %v3446_v44 }
  0xce   :  { %2378 = vmatprep.subr.bf16.mxu0 %v3451_v47 }
  0xcf   :  { %1893 = vmatpush1.bf16.msra.mxu1 %v3353_v45 }
  0xd0   :  { %1894 = vmatprep.subr.bf16.mxu1 %v3358_v46 }
  0xd1   :  { %2379 = vmatpush1.bf16.msra.mxu0 %v3449_v48 }
  0xd2   :  { %2380 = vmatprep.subr.bf16.mxu0 %v3454_v50 }
  0xd3   :  { %1895 = vmatpush1.bf16.msra.mxu1 %v3356_v52 }
  0xd4   :  { %1896 = vmatprep.subr.bf16.mxu1 %v3361_v53 }
  0xd5   :  { %12 = vsyncpa [#allocation3], 0  ;;  %2381 = vmatpush1.bf16.msra.mxu0 %v3452_v54  ;;  %v3455_v58 = vld [vmem:[%s4735_s3 + $0x50] ss:$8 sps:$4 sm:$0xff]   ;;  %v3460_v59 = vld [vmem:[%s4735_s3 + $0x64] ss:$8 sps:$4 sm:$0xff]  }
  0xd6   :  { %2382 = vmatprep.subr.bf16.mxu0 %v3457_v55  ;;  %v3362_v60 = vld [vmem:[%s4733_s1 + $0x4c8] ss:$16 sps:$4 sm:$0xff]   ;;  %v3367_v61 = vld [vmem:[%s4733_s1 + $0x4ec] ss:$16 sps:$4 sm:$0xff]   ;;  %vm2633_vm0 = vcmask 320512  }
  0xd7   :  { %1897 = vmatpush1.bf16.msra.mxu1 %v3359_v56  ;;  %v3458_v62 = vld [vmem:[%s4735_s3 + $0x60] ss:$8 sps:$4 sm:$0xff]   ;;  %v3463_v63 = vld [vmem:[%s4735_s3 + $0x74] ss:$8 sps:$4 sm:$0xff]   ;;  %v3461_v2 = vld [vmem:[%s4735_s3 + $0x70] ss:$8 sps:$4 sm:$0xff]  }
  0xd8   :  { %1898 = vmatprep.subr.bf16.mxu1 %v3364_v57  ;;  %v3365_v0 = vld [vmem:[%s4733_s1 + $0x4e8] ss:$16 sps:$4 sm:$0xff]   ;;  %v3370_v1 = vld [vmem:[%s4733_s1 + $0x50c] ss:$16 sps:$4 sm:$0xff]  }
  0xd9   :  { %2383 = vmatpush1.bf16.msra.mxu0 %v3455_v58  ;;  %v3466_v4 = vld [vmem:[%s4735_s3 + $0x84] ss:$8 sps:$4 sm:$0xff]   ;;  %v3368_v5 = vld [vmem:[%s4733_s1 + $0x508] ss:$16 sps:$4 sm:$0xff]   ;;  %v3469_v8 = vld [vmem:[%s4735_s3 + $0x94] ss:$8 sps:$4 sm:$0xff]  }
  0xda   :  { %2384 = vmatprep.subr.bf16.mxu0 %v3460_v59  ;;  %v3373_v6 = vld [vmem:[%s4733_s1 + $0x52c] ss:$16 sps:$4 sm:$0xff]   ;;  %v3464_v7 = vld [vmem:[%s4735_s3 + $0x80] ss:$8 sps:$4 sm:$0xff]   ;;  %v3467_v11 = vld [vmem:[%s4735_s3 + $0x90] ss:$8 sps:$4 sm:$0xff]  }
  0xdb   :  { %1899 = vmatpush1.bf16.msra.mxu1 %v3362_v60  ;;  %v3371_v9 = vld [vmem:[%s4733_s1 + $0x528] ss:$16 sps:$4 sm:$0xff]   ;;  %v3376_v10 = vld [vmem:[%s4733_s1 + $0x54c] ss:$16 sps:$4 sm:$0xff]  }
  0xdc   :  { %1900 = vmatprep.subr.bf16.mxu1 %v3367_v61  ;;  %v3472_v12 = vld [vmem:[%s4735_s3 + $0xa4] ss:$8 sps:$4 sm:$0xff]   ;;  %v3374_v13 = vld [vmem:[%s4733_s1 + $0x548] ss:$16 sps:$4 sm:$0xff]   ;;  %v3475_v17 = vld [vmem:[%s4735_s3 + $0xb4] ss:$8 sps:$4 sm:$0xff]  }
  0xdd   :  { %2385 = vmatpush1.bf16.msra.mxu0 %v3458_v62  ;;  %v3379_v14 = vld [vmem:[%s4733_s1 + $0x56c] ss:$16 sps:$4 sm:$0xff]   ;;  %v3470_v15 = vld [vmem:[%s4735_s3 + $0xa0] ss:$8 sps:$4 sm:$0xff]   ;;  %v3473_v21 = vld [vmem:[%s4735_s3 + $0xb0] ss:$8 sps:$4 sm:$0xff]  }
  0xde   :  { %2386 = vmatprep.subr.bf16.mxu0 %v3463_v63  ;;  %v3377_v19 = vld [vmem:[%s4733_s1 + $0x568] ss:$16 sps:$4 sm:$0xff]   ;;  %v3382_v20 = vld [vmem:[%s4733_s1 + $0x58c] ss:$16 sps:$4 sm:$0xff]  }
  0xdf   :  { %1901 = vmatpush1.bf16.msra.mxu1 %v3365_v0  ;;  %v3478_v22 = vld [vmem:[%s4735_s3 + $0xc4] ss:$8 sps:$4 sm:$0xff]   ;;  %v3380_v23 = vld [vmem:[%s4733_s1 + $0x588] ss:$16 sps:$4 sm:$0xff]   ;;  %v3481_v27 = vld [vmem:[%s4735_s3 + $0xd4] ss:$8 sps:$4 sm:$0xff]  }
  0xe0   :  { %1902 = vmatprep.subr.bf16.mxu1 %v3370_v1  ;;  %v3385_v25 = vld [vmem:[%s4733_s1 + $0x5ac] ss:$16 sps:$4 sm:$0xff]   ;;  %v3476_v26 = vld [vmem:[%s4735_s3 + $0xc0] ss:$8 sps:$4 sm:$0xff]   ;;  %v3479_v30 = vld [vmem:[%s4735_s3 + $0xd0] ss:$8 sps:$4 sm:$0xff]  }
  0xe1   :  { %2387 = vmatpush1.bf16.msra.mxu0 %v3461_v2  ;;  %v3383_v49 = vld [vmem:[%s4733_s1 + $0x5a8] ss:$16 sps:$4 sm:$0xff]   ;;  %v3388_v28 = vld [vmem:[%s4733_s1 + $0x5cc] ss:$16 sps:$4 sm:$0xff]  }
  0xe2   :  { %2388 = vmatprep.subr.bf16.mxu0 %v3466_v4  ;;  %v3386_v31 = vld [vmem:[%s4733_s1 + $0x5c8] ss:$16 sps:$4 sm:$0xff]   ;;  %v3391_v32 = vld [vmem:[%s4733_s1 + $0x5ec] ss:$16 sps:$4 sm:$0xff]  }
  0xe3   :  { %1903 = vmatpush1.bf16.msra.mxu1 %v3368_v5  ;;  %v3389_v33 = vld [vmem:[%s4733_s1 + $0x5e8] ss:$16 sps:$4 sm:$0xff]   ;;  %v3394_v35 = vld [vmem:[%s4733_s1 + $0x60c] ss:$16 sps:$4 sm:$0xff]  }
  0xe4   :  { %1904 = vmatprep.subr.bf16.mxu1 %v3373_v6  ;;  %v3392_v36 = vld [vmem:[%s4733_s1 + $0x608] ss:$16 sps:$4 sm:$0xff]   ;;  %v3397_v16 = vld [vmem:[%s4733_s1 + $0x62c] ss:$16 sps:$4 sm:$0xff]  }
  0xe5   :  { %2389 = vmatpush1.bf16.msra.mxu0 %v3464_v7  ;;  %v3395_v38 = vld [vmem:[%s4733_s1 + $0x628] ss:$16 sps:$4 sm:$0xff]   ;;  %v3400_v24 = vld [vmem:[%s4733_s1 + $0x64c] ss:$16 sps:$4 sm:$0xff]  }
  0xe6   :  { %2390 = vmatprep.subr.bf16.mxu0 %v3469_v8  ;;  %v3398_v39 = vld [vmem:[%s4733_s1 + $0x648] ss:$16 sps:$4 sm:$0xff]   ;;  %v3406_v40 = vld [vmem:[%s4733_s1 + $0x68c] ss:$16 sps:$4 sm:$0xff]  }
  0xe7   :  { %1905 = vmatpush1.bf16.msra.mxu1 %v3371_v9  ;;  %v3404_v18 = vld [vmem:[%s4733_s1 + $0x688] ss:$16 sps:$4 sm:$0xff]   ;;  %v3409_v3 = vld [vmem:[%s4733_s1 + $0x6ac] ss:$16 sps:$4 sm:$0xff]  }
  0xe8   :  { %1906 = vmatprep.subr.bf16.mxu1 %v3376_v10  ;;  %v3407_v51 = vld [vmem:[%s4733_s1 + $0x6a8] ss:$16 sps:$4 sm:$0xff]   ;;  %v3412_v41 = vld [vmem:[%s4733_s1 + $0x6cc] ss:$16 sps:$4 sm:$0xff]   ;;  %v342_v10 = vsub.s32 0, %v3739_v43 }
  0xe9   :  { %2391 = vmatpush1.bf16.msra.mxu0 %v3467_v11  ;;  %v3484_v42 = vld [vmem:[%s4735_s3 + $0xe4] ss:$8 sps:$4 sm:$0xff]   ;;  %v3482_v45 = vld [vmem:[%s4735_s3 + $0xe0] ss:$8 sps:$4 sm:$0xff]   ;;  %v3487_v53 = vld [vmem:[%s4735_s3 + $0xf4] ss:$8 sps:$4 sm:$0xff]  }
  0xea   :  { %2392 = vmatprep.subr.bf16.mxu0 %v3472_v12  ;;  %v3410_v48 = vld [vmem:[%s4733_s1 + $0x6c8] ss:$16 sps:$4 sm:$0xff]   ;;  %v3415_v52 = vld [vmem:[%s4733_s1 + $0x6ec] ss:$16 sps:$4 sm:$0xff]   ;;  %v4553_v11 = vld [vmem:[%s4734_s2] sm:$0xf] }
  0xeb   :  { %1907 = vmatpush1.bf16.msra.mxu1 %v3374_v13  ;;  %v3485_v54 = vld [vmem:[%s4735_s3 + $0xf0] ss:$8 sps:$4 sm:$0xff]   ;;  %v3418_v56 = vld [vmem:[%s4733_s1 + $0x70c] ss:$16 sps:$4 sm:$0xff]   ;;  %v346_v12 = vsub.s32 1, %v3739_v43  ;;  %v343_v13 = vrot.slane %v4553_v11, %v342_v10 }
  0xec   :  { %1908 = vmatprep.subr.bf16.mxu1 %v3379_v14  ;;  %v3413_v55 = vld [vmem:[%s4733_s1 + $0x6e8] ss:$16 sps:$4 sm:$0xff]   ;;  %v3490_v57 = vld [vmem:[%s4735_s3 + $0x104] ss:$8 sps:$4 sm:$0xff]  }
  0xed   :  { %2393 = vmatpush1.bf16.msra.mxu0 %v3470_v15  ;;  %v3416_v58 = vld [vmem:[%s4733_s1 + $0x708] ss:$16 sps:$4 sm:$0xff]   ;;  %v3421_v59 = vld [vmem:[%s4733_s1 + $0x72c] ss:$16 sps:$4 sm:$0xff]   ;;  %v347_v14 = vrot.slane %v4553_v11, %v346_v12 }
  0xee   :  { %2394 = vmatprep.subr.bf16.mxu0 %v3475_v17  ;;  %v3419_v60 = vld [vmem:[%s4733_s1 + $0x728] ss:$16 sps:$4 sm:$0xff]   ;;  %v3424_v61 = vld [vmem:[%s4733_s1 + $0x74c] ss:$16 sps:$4 sm:$0xff]  }
  0xef   :  { %1909 = vmatpush1.bf16.msra.mxu1 %v3377_v19  ;;  %v3422_v62 = vld [vmem:[%s4733_s1 + $0x748] ss:$16 sps:$4 sm:$0xff]   ;;  %v3427_v63 = vld [vmem:[%s4733_s1 + $0x76c] ss:$16 sps:$4 sm:$0xff]  }
  0xf0   :  { %1910 = vmatprep.subr.bf16.mxu1 %v3382_v20  ;;  %v3425_v0 = vld [vmem:[%s4733_s1 + $0x768] ss:$16 sps:$4 sm:$0xff]   ;;  %v3430_v1 = vld [vmem:[%s4733_s1 + $0x78c] ss:$16 sps:$4 sm:$0xff]  }
  0xf1   :  { %2395 = vmatpush1.bf16.msra.mxu0 %v3473_v21  ;;  %v3428_v2 = vld [vmem:[%s4733_s1 + $0x788] ss:$16 sps:$4 sm:$0xff]   ;;  %v3433_v4 = vld [vmem:[%s4733_s1 + $0x7ac] ss:$16 sps:$4 sm:$0xff]  }
  0xf2   :  { %2396 = vmatprep.subr.bf16.mxu0 %v3478_v22  ;;  %v3431_v5 = vld [vmem:[%s4733_s1 + $0x7a8] ss:$16 sps:$4 sm:$0xff]   ;;  %v3436_v6 = vld [vmem:[%s4733_s1 + $0x7cc] ss:$16 sps:$4 sm:$0xff]  }
  0xf3   :  { %1911 = vmatpush1.bf16.msra.mxu1 %v3380_v23  ;;  %v3434_v7 = vld [vmem:[%s4733_s1 + $0x7c8] ss:$16 sps:$4 sm:$0xff]   ;;  %v3439_v8 = vld [vmem:[%s4733_s1 + $0x7ec] ss:$16 sps:$4 sm:$0xff]  }
  0xf4   :  { %1912 = vmatprep.subr.bf16.mxu1 %v3385_v25  ;;  %v3437_v9 = vld [vmem:[%s4733_s1 + $0x7e8] ss:$16 sps:$4 sm:$0xff]  }
  0xf5   :  { %2397 = vmatpush1.bf16.msra.mxu0 %v3476_v26 }
  0xf6   :  { %2398 = vmatprep.subr.bf16.mxu0 %v3481_v27 }
  0xf7   :  { %1913 = vmatpush1.bf16.msra.mxu1 %v3383_v49  ;;  %v3488_v49 = vld [vmem:[%s4735_s3 + $0x100] ss:$8 sps:$4 sm:$0xff]  }
  0xf8   :  { %1914 = vmatprep.subr.bf16.mxu1 %v3388_v28 }
  0xf9   :  { %2399 = vmatpush1.bf16.msra.mxu0 %v3479_v30  ;;  %v3493_v30 = vld [vmem:[%s4735_s3 + $0x114] ss:$8 sps:$4 sm:$0xff]  }
  0xfa   :  { %2400 = vmatprep.subr.bf16.mxu0 %v3484_v42  ;;  %v3505_v42 = vld [vmem:[%s4735_s3 + $0x154] ss:$8 sps:$4 sm:$0xff]  }
  0xfb   :  { %1915 = vmatpush1.bf16.msra.mxu1 %v3386_v31  ;;  %v3536_v31 = vld [vmem:[%s4737_s5 + $0x40] sm:$0xff]  }
  0xfc   :  { %1916 = vmatprep.subr.bf16.mxu1 %v3391_v32  ;;  %v3537_v32 = vld [vmem:[%s4737_s5] sm:$0xff]  }
  0xfd   :  { %2401 = vmatpush1.bf16.msra.mxu0 %v3482_v45  ;;  %v3546_v45 = vld [vmem:[%s4737_s5 + $0x68] sm:$0xff]  }
  0xfe   :  { %2402 = vmatprep.subr.bf16.mxu0 %v3487_v53  ;;  %v3509_v53 = vld [vmem:[%s4735_s3 + $0x170] ss:$8 sps:$4 sm:$0xff]  }
  0xff   :  { %1917 = vmatpush1.bf16.msra.mxu1 %v3389_v33  ;;  %v3538_v33 = vld [vmem:[%s4737_s5 + $0x48] sm:$0xff]  }
 0x100   :  { %1927 = vmatprep.subr.bf16.mxu1 %v3394_v35  ;;  %v3491_v35 = vld [vmem:[%s4735_s3 + $0x110] ss:$8 sps:$4 sm:$0xff]  }
 0x101   :  { %2403 = vmatpush1.bf16.msra.mxu0 %v3485_v54  ;;  %v3514_v54 = vld [vmem:[%s4735_s3 + $0x184] ss:$8 sps:$4 sm:$0xff]  }
 0x102   :  { %1919 = vmatmul.mubr.bf16.vlgmr.msra.gmra.mrb[4].mxu1 %v4054_v29  ;;  %v3403_v29 = vld [vmem:[%s4733_s1 + $0x66c] ss:$16 sps:$4 sm:$0xff]   ;;  %2413 = vmatprep.subr.bf16.mxu0 %v3490_v57  ;;  %v3515_v57 = vld [vmem:[%s4735_s3 + $0x190] ss:$8 sps:$4 sm:$0xff]  }
 0x103   :  { %1928 = vmatpush1.bf16.msra.mxu1 %v3392_v36  ;;  %1959 = vmatprep.mubr.bf16.mxu1 %v4068_v34  ;;  %v3401_v34 = vld [vmem:[%s4733_s1 + $0x668] ss:$16 sps:$4 sm:$0xff]   ;;  %v3496_v36 = vld [vmem:[%s4735_s3 + $0x124] ss:$8 sps:$4 sm:$0xff]  }
 0x104   :  { %1929 = vmatprep.subr.bf16.mxu1 %v3397_v16  ;;  %v3539_v16 = vld [vmem:[%s4737_s5 + $0x8] sm:$0xff]  }
 0x107   :  { %1930 = vmatpush1.bf16.msra.mxu1 %v3395_v38  ;;  %v3540_v38 = vld [vmem:[%s4737_s5 + $0x50] sm:$0xff]  }
 0x108   :  { %1931 = vmatprep.subr.bf16.mxu1 %v3400_v24  ;;  %v3494_v24 = vld [vmem:[%s4735_s3 + $0x120] ss:$8 sps:$4 sm:$0xff]  }
 0x10b   :  { %1932 = vmatpush1.bf16.msra.mxu1 %v3398_v39  ;;  %v3499_v39 = vld [vmem:[%s4735_s3 + $0x134] ss:$8 sps:$4 sm:$0xff]  }
 0x10c   :  { %1933 = vmatprep.subr.bf16.mxu1 %v3403_v29  ;;  %v3541_v29 = vld [vmem:[%s4737_s5 + $0x10] sm:$0xff]  }
 0x10f   :  { %1934 = vmatpush1.bf16.msra.mxu1 %v3401_v34  ;;  %v3542_v34 = vld [vmem:[%s4737_s5 + $0x58] sm:$0xff]  }
 0x110   :  { %1935 = vmatprep.subr.bf16.mxu1 %v3406_v40  ;;  %v3497_v40 = vld [vmem:[%s4735_s3 + $0x130] ss:$8 sps:$4 sm:$0xff]  }
 0x113   :  { %1936 = vmatpush1.bf16.msra.mxu1 %v3404_v18  ;;  %v3502_v18 = vld [vmem:[%s4735_s3 + $0x144] ss:$8 sps:$4 sm:$0xff]  }
 0x114   :  { %1937 = vmatprep.subr.bf16.mxu1 %v3409_v3  ;;  %v3543_v3 = vld [vmem:[%s4737_s5 + $0x18] sm:$0xff]  }
 0x115   :  { %v1674_v44 = vpop.f32.mrb[0].mxu1 }
 0x116   :  { %v1676_v46 = vpop.f32.mrb[1].mxu1  ;;  %v1675_v15 = vadd.f32 %v1674_v44, %v343_v13  ;;  %v3545_v44 = vld [vmem:[%s4737_s5 + $0x20] sm:$0xff]  }
 0x117   :  { %v1678_v47 = vpop.f32.mrb[2].mxu1  ;;  %1938 = vmatpush1.bf16.msra.mxu1 %v3407_v51  ;;  %v1677_v17 = vadd.f32 %v1676_v46, %v347_v14  ;;  %v3544_v51 = vld [vmem:[%s4737_s5 + $0x60] sm:$0xff]   ;;  %v3503_v46 = vld [vmem:[%s4735_s3 + $0x150] ss:$8 sps:$4 sm:$0xff]  }
 0x118   :  { %v1679_v50 = vpop.f32.mrb[3].mxu1  ;;  %1939 = vmatprep.subr.bf16.mxu1 %v3412_v41  ;;  %v3500_v41 = vld [vmem:[%s4735_s3 + $0x140] ss:$8 sps:$4 sm:$0xff]   ;;  %v3508_v47 = vld [vmem:[%s4735_s3 + $0x164] ss:$8 sps:$4 sm:$0xff]  }
 0x119   :  { %v3506_v50 = vld [vmem:[%s4735_s3 + $0x160] ss:$8 sps:$4 sm:$0xff]  }
 0x11b   :  { %1940 = vmatpush1.bf16.msra.mxu1 %v3410_v48  ;;  %v3547_v48 = vld [vmem:[%s4737_s5 + $0x28] sm:$0xff]  }
 0x11c   :  { %1941 = vmatprep.subr.bf16.mxu1 %v3415_v52  ;;  %v3511_v52 = vld [vmem:[%s4735_s3 + $0x174] ss:$8 sps:$4 sm:$0xff]  }
 0x11f   :  { %1942 = vmatpush1.bf16.msra.mxu1 %v3413_v55  ;;  %v3512_v55 = vld [vmem:[%s4735_s3 + $0x180] ss:$8 sps:$4 sm:$0xff]  }
 0x120   :  { %1943 = vmatprep.subr.bf16.mxu1 %v3418_v56  ;;  %v3517_v56 = vld [vmem:[%s4735_s3 + $0x194] ss:$8 sps:$4 sm:$0xff]  }
 0x123   :  { %1944 = vmatpush1.bf16.msra.mxu1 %v3416_v58  ;;  %v3520_v58 = vld [vmem:[%s4735_s3 + $0x1a4] ss:$8 sps:$4 sm:$0xff]  }
 0x124   :  { %1945 = vmatprep.subr.bf16.mxu1 %v3421_v59  ;;  %v3518_v59 = vld [vmem:[%s4735_s3 + $0x1a0] ss:$8 sps:$4 sm:$0xff]  }
 0x127   :  { %1946 = vmatpush1.bf16.msra.mxu1 %v3419_v60  ;;  %v3523_v60 = vld [vmem:[%s4735_s3 + $0x1b4] ss:$8 sps:$4 sm:$0xff]  }
 0x128   :  { %1947 = vmatprep.subr.bf16.mxu1 %v3424_v61  ;;  %v3521_v61 = vld [vmem:[%s4735_s3 + $0x1b0] ss:$8 sps:$4 sm:$0xff]  }
 0x12b   :  { %1948 = vmatpush1.bf16.msra.mxu1 %v3422_v62  ;;  %v3526_v62 = vld [vmem:[%s4735_s3 + $0x1c4] ss:$8 sps:$4 sm:$0xff]  }
 0x12c   :  { %1949 = vmatprep.subr.bf16.mxu1 %v3427_v63  ;;  %v3524_v63 = vld [vmem:[%s4735_s3 + $0x1c0] ss:$8 sps:$4 sm:$0xff]  }
 0x12f   :  { %1950 = vmatpush1.bf16.msra.mxu1 %v3425_v0  ;;  %v3529_v0 = vld [vmem:[%s4735_s3 + $0x1d4] ss:$8 sps:$4 sm:$0xff]  }
 0x130   :  { %1951 = vmatprep.subr.bf16.mxu1 %v3430_v1  ;;  %v3527_v1 = vld [vmem:[%s4735_s3 + $0x1d0] ss:$8 sps:$4 sm:$0xff]  }
 0x133   :  { %1952 = vmatpush1.bf16.msra.mxu1 %v3428_v2  ;;  %v3532_v2 = vld [vmem:[%s4735_s3 + $0x1e4] ss:$8 sps:$4 sm:$0xff]  }
 0x134   :  { %1953 = vmatprep.subr.bf16.mxu1 %v3433_v4  ;;  %v3530_v4 = vld [vmem:[%s4735_s3 + $0x1e0] ss:$8 sps:$4 sm:$0xff]  }
 0x137   :  { %1954 = vmatpush1.bf16.msra.mxu1 %v3431_v5  ;;  %v3535_v5 = vld [vmem:[%s4735_s3 + $0x1f4] ss:$8 sps:$4 sm:$0xff]  }
 0x138   :  { %1955 = vmatprep.subr.bf16.mxu1 %v3436_v6  ;;  %v3533_v6 = vld [vmem:[%s4735_s3 + $0x1f0] ss:$8 sps:$4 sm:$0xff]  }
 0x13b   :  { %1956 = vmatpush1.bf16.msra.mxu1 %v3434_v7  ;;  %v350_v7 = vsub.s32 2, %v3739_v43 }
 0x13c   :  { %1957 = vmatprep.subr.bf16.mxu1 %v3439_v8  ;;  %v354_v8 = vsub.s32 3, %v3739_v43 }
 0x13e   :  { %v355_v13 = vrot.slane %v4553_v11, %v354_v8 }
 0x13f   :  { %1958 = vmatpush1.bf16.msra.mxu1 %v3437_v9  ;;  %v351_v9 = vrot.slane %v4553_v11, %v350_v7  ;;  %v3549_v11 = vld [vmem:[%s4737_s5 + $0x30] sm:$0xff]  }
 0x140   :  { %2998 = vmatprep.subr.bf16.mxu1 %v3536_v31 }
 0x142   :  { %1960 = vmatmul.mubr.bf16.vlgmr.msra.gmra.mrb[4].mxu1 %v4256_v37 }
 0x143   :  { %2999 = vmatpush3.bf16.msra.mxu1 %v3537_v32 }
 0x144   :  { %3000 = vmatprep.subr.bf16.mxu1 %v3538_v33 }
 0x147   :  { %3001 = vmatpush3.bf16.msra.mxu1 %v3539_v16 }
 0x148   :  { %3002 = vmatprep.subr.bf16.mxu1 %v3540_v38 }
 0x14b   :  { %3003 = vmatpush3.bf16.msra.mxu1 %v3541_v29 }
 0x14c   :  { %3004 = vmatprep.subr.bf16.mxu1 %v3542_v34 }
 0x14f   :  { %3005 = vmatpush3.bf16.msra.mxu1 %v3543_v3 }
 0x150   :  { %3006 = vmatprep.subr.bf16.mxu1 %v3544_v51 }
 0x153   :  { %3007 = vmatpush3.bf16.msra.mxu1 %v3545_v44 }
 0x154   :  { %3008 = vmatprep.subr.bf16.mxu1 %v3546_v45 }
 0x157   :  { %3009 = vmatpush3.bf16.msra.mxu1 %v3547_v48 }
 0x196   :  { %v1797_v37 = vpop.f32.mrb[0].mxu0 }
 0x197   :  { %v3021_v19 = vadd.f32 %v1797_v37, %v1675_v15  ;;  %v1799_v20 = vpop.f32.mrb[1].mxu0 }
 0x198   :  { %v3023_v21 = vadd.f32 %v1799_v20, %v1677_v17  ;;  %v1801_v22 = vpop.f32.mrb[2].mxu0 }
 0x199   :  { %v1968_v23 = vmax.f32 %v3021_v19, 0.0  ;;  %v1802_v25 = vpop.f32.mrb[3].mxu0 }
 0x19a   :  { %v1969_v26 = vmax.f32 %v3023_v21, 0.0 }
 0x19b   :  { %v2036_v28 = vpack.c.bf16 %v1968_v23, %v1968_v23 }
 0x19c   :  { %v2037_v27 = vpack.c.bf16 %v1969_v26, %v1969_v26  ;;  %v3548_v26 = vld [vmem:[%s4737_s5 + $0x70] sm:$0xff]  }
 0x19d   :  { %3010 = vmatprep.subr.bf16.mxu1 %v3548_v26 }
 0x19e   :  { %2404 = vmatprep.mubr.bf16.mxu0 %v2037_v27  ;;  %3011 = vmatpush3.bf16.msra.mxu1 %v3549_v11  ;;  %v3550_v27 = vld [vmem:[%s4737_s5 + $0x78] sm:$0xff]  }
 0x19f   :  { %2405 = vmatmul.mubr.bf16.vlgmr.msra.gmra.mrb[4].mxu0 %v2036_v28  ;;  %3012 = vmatprep.subr.bf16.mxu1 %v3550_v27  ;;  %v2040_v28 = vld [vmem:[%s4736_s4] sm:$0x3] }
 0x1a0   :  { %2414 = vmatpush1.bf16.msra.mxu0 %v3488_v49  ;;  %v3551_v49 = vld [vmem:[%s4737_s5 + $0x38] sm:$0xff]   ;;  %v2049_v31 = vrot.slane %v2040_v28, %v346_v12 }
 0x1a1   :  { %2415 = vmatprep.subr.bf16.mxu0 %v3493_v30  ;;  %v2045_v30 = vrot.slane %v2040_v28, %v342_v10  ;;  %v2981_v10 = vld [vmem:[%s4738_s6] ss:$0 sm:$0xff]  ;;  %s3581_s6 = smov [#allocation2]  }
 0x1a2   :  { %3013 = vmatpush3.bf16.msra.mxu1 %v3551_v49  ;;  %s2653_s30 = sshll.u32 %s3581_s6, 4  ;;  %s2654_s30 = int_to_ptr.vmem [resolvable:$true] %s2653_s30 }
 0x1a3   :  { %s3556_s8 = scalar_lea.vmem %s2654_s30, 32  ;;  %p3561_p1 = scmp.lt.s32.totalorder %s2654_s30, %s2654_s30 }
 0x1a4   :  { %2416 = vmatpush1.bf16.msra.mxu0 %v3491_v35  ;;  %p3557_p0 = scmp.ne.s32.totalorder %s2654_s30, %s3556_s8  ;;  %p3562_p2 = scmp.lt.s32.totalorder %s3556_s8, %s3556_s8 }
 0x1a5   :  { %2417 = vmatprep.subr.bf16.mxu0 %v3496_v36 }
 0x1a6   :  { %p3563_p3 = por %p3562_p2, %p3561_p1 }
 0x1a8   :  { %2418 = vmatpush1.bf16.msra.mxu0 %v3494_v24  ;;  %p3564_p4 = pnand %p3563_p3, %p3557_p0 }
 0x1a9   :  { %2419 = vmatprep.subr.bf16.mxu0 %v3499_v39 }
 0x1ac   :  { %2420 = vmatpush1.bf16.msra.mxu0 %v3497_v40 }
 0x1ad   :  { %2421 = vmatprep.subr.bf16.mxu0 %v3502_v18 }
 0x1b0   :  { %2422 = vmatpush1.bf16.msra.mxu0 %v3500_v41 }
 0x1b1   :  { %2423 = vmatprep.subr.bf16.mxu0 %v3505_v42 }
 0x1b4   :  { %2424 = vmatpush1.bf16.msra.mxu0 %v3503_v46 }
 0x1b5   :  { %2425 = vmatprep.subr.bf16.mxu0 %v3508_v47 }
 0x1b8   :  { %2426 = vmatpush1.bf16.msra.mxu0 %v3506_v50 }
 0x1b9   :  { %2427 = vmatprep.subr.bf16.mxu0 %v3511_v52 }
 0x1bc   :  { %2428 = vmatpush1.bf16.msra.mxu0 %v3509_v53 }
 0x1bd   :  { %2429 = vmatprep.subr.bf16.mxu0 %v3514_v54 }
 0x1c0   :  { %2430 = vmatpush1.bf16.msra.mxu0 %v3512_v55 }
 0x1c1   :  { %2431 = vmatprep.subr.bf16.mxu0 %v3517_v56 }
 0x1c4   :  { %2432 = vmatpush1.bf16.msra.mxu0 %v3515_v57 }
 0x1c5   :  { %2433 = vmatprep.subr.bf16.mxu0 %v3520_v58 }
 0x1c8   :  { %2434 = vmatpush1.bf16.msra.mxu0 %v3518_v59 }
 0x1c9   :  { %2435 = vmatprep.subr.bf16.mxu0 %v3523_v60 }
 0x1cc   :  { %2436 = vmatpush1.bf16.msra.mxu0 %v3521_v61 }
 0x1cd   :  { %2437 = vmatprep.subr.bf16.mxu0 %v3526_v62 }
 0x1d0   :  { %2438 = vmatpush1.bf16.msra.mxu0 %v3524_v63 }
 0x1d1   :  { %2439 = vmatprep.subr.bf16.mxu0 %v3529_v0 }
 0x1d4   :  { %2440 = vmatpush1.bf16.msra.mxu0 %v3527_v1 }
 0x1d5   :  { %2441 = vmatprep.subr.bf16.mxu0 %v3532_v2 }
 0x1d8   :  { %2442 = vmatpush1.bf16.msra.mxu0 %v3530_v4 }
 0x1d9   :  { %2443 = vmatprep.subr.bf16.mxu0 %v3535_v5 }
 0x1dc   :  { %2444 = vmatpush1.bf16.msra.mxu0 %v3533_v6 }
 0x215   :  { %v1961_v14 = vpop.f32.mrb[4].mxu1 }
 0x216   :  { %v3024_v15 = vadd.f32 %v1961_v14, %v351_v9  ;;  %v1963_v17 = vpop.f32.mrb[5].mxu1 }
 0x217   :  { %v3025_v37 = vadd.f32 %v1963_v17, %v355_v13  ;;  %v1965_v19 = vpop.f32.mrb[6].mxu1 }
 0x218   :  { %v1970_v20 = vmax.f32 %v3024_v15, 0.0  ;;  %v1966_v21 = vpop.f32.mrb[7].mxu1 }
 0x219   :  { %v1971_v22 = vmax.f32 %v3025_v37, 0.0 }
 0x21a   :  { %v2038_v25 = vpack.c.bf16 %v1970_v20, %v1970_v20 }
 0x21b   :  { %v2039_v23 = vpack.c.bf16 %v1971_v22, %v1971_v22 }
 0x21d   :  { %2445 = vmatprep.mubr.bf16.mxu0 %v2039_v23 }
 0x21e   :  { %2446 = vmatmul.mubr.bf16.vlgmr.msra.gmra.mrb[4].mxu0 %v2038_v25 }
 0x2f1   :  { %v2447_v32 = vpop.f32.mrb[4].mxu0 }
 0x2f2   :  { %v3026_v33 = vadd.f32 %v2447_v32, %v2045_v30  ;;  %v2449_v35 = vpop.f32.mrb[5].mxu0 }
 0x2f3   :  { %v3027_v36 = vadd.f32 %v2449_v35, %v2049_v31  ;;  %v2451_v16 = vpop.f32.mrb[6].mxu0 }
 0x2f4   :  { %v2454_v38 = vmax.f32 %v3026_v33, 0.0  ;;  %v2452_v24 = vpop.f32.mrb[7].mxu0 }
 0x2f5   :  { %v2455_v39 = vmax.f32 %v3027_v36, 0.0 }
 0x2f6   :  { %v2488_v34 = vpack.c.bf16 %v2454_v38, %v2454_v38 }
 0x2f7   :  { %v2489_v29 = vpack.c.bf16 %v2455_v39, %v2455_v39 }
 0x2f9   :  { %2625 = vmatprep.mubr.bf16.mxu1 %v2489_v29 }
 0x2fa   :  { %2626 = vmatmul.mubr.bf16.vlgmr.msra.gmra.mrb[8].mxu1 %v2488_v34 }
 0x3cd   :  { %v3014_v40 = vpop.f32.mrb[8].mxu1 }
 0x3ce   :  { %v3015_v18 = vpop.f32.mrb[9].mxu1 }
 0x3cf   :  { %v3016_v43 = vadd.f32 %v3015_v18, %v3014_v40  ;;  %v3017_v12 = vpop.f32.mrb[10].mxu1 }
 0x3d0   :  { %v3018_v3 = vpop.f32.mrb[11].mxu1 }
 0x3d1   :  { %v2628_v51 = vadd.f32 %v3016_v43, %v2981_v10 }
 0x3d3   :  { %v2634_v41 = vsel %vm2633_vm0, %v2628_v51, -inf }
 0x3d4   :  { %2635 = vmax.xlane.f32.xlu0 %v2634_v41 }
 0x461   :  { %v2636_v42 = vpop.xlane.xlu0 %2635 }
 0x462   :  { %v2637_v44 = vsub.f32 %v2628_v51, %v2636_v42 }
 0x464   :  { %v2638_v45 = vmul.f32 1.442695, %v2637_v44 }
 0x466   :  { %3552 = vpow2.f32 %v2638_v45 }
 0x470   :  { %v3553_v46 = vpop.eup %3552 }
 0x471   :  { %v2640_v47 = vsel %vm2633_vm0, %v3553_v46, 0.0 }
 0x472   :  { %2641 = vadd.xlane.f32.xlu0 %v2640_v47 }
 0x4ff   :  { %v2642_v48 = vpop.xlane.xlu0 %2641 }
 0x500   :  { %3554 = vlog2.f32 %v2642_v48 }
 0x50a   :  { %v3555_v50 = vpop.eup %3554 }
 0x50b   :  { %v2644_v52 = vmul.f32 0.6931472, %v3555_v50 }
 0x50d   :  { %v2645_v53 = vsub.f32 %v2637_v44, %v2644_v52 }
 0x50f   :  { %2646 = vst.msk [vmem:[#allocation2] sm:$0x3] %vm2633_vm0, %v2645_v53 }
 0x510   :  { %3567 = shalt.err (!%p3564_p4)
}
 0x511   :  { %s3568_s11 = scalar_lea.hbm %s4739_s7, 32 }
 0x512   :  { %p3569_p5 = scmp.ne.s32.totalorder %s4739_s7, %s3568_s11  ;;  %p3572_p6 = scmp.lt.u32.totalorder %s3568_s11, %s4739_s7 }
 0x514   :  { %p3574_p7 = pnand %p3572_p6, %p3569_p5 }
 0x516   :  { %3577 = shalt.err (!%p3574_p7)
}
 0x517   :  { %2656 = dma.vmem_to_hbm [thread:$0]  %s2654_s30, 32, %s4739_s7, [#allocation3]  }
 0x518   :  { %3578 = dma.done.wait [#allocation3], 32  }
 0x519   :  { %3579 = vsyncadd [#allocation3], 4294967264 }
 0x51a   :  { %2660 = vsyncpa [#allocation3], 1 }

// kernel: model_forward.11
= control target key start
LH: loop header
LB: loop body
LE: loop exit
PB: predicated region body
PF: predicated region fallthrough
CT: control target
= control target key end

     0   :  { %12 = vsyncpa [#allocation3], 0  ;;  %s9879_s0 = inlined_call_operand.vmem [shape: f32[2,1024], index: 0, kind: input, shape index: {}]   ;;  %s9880_s1 = inlined_call_operand.hbm [shape: bf16[1024,512], index: 1, kind: input, shape index: {}]   ;;  %s9881_s2 = inlined_call_operand.vmem [shape: f32[1,512], index: 2, kind: input, shape index: {}]   ;;  %s9882_s3 = inlined_call_operand.hbm [shape: bf16[512,256], index: 3, kind: input, shape index: {}]   ;;  %s9883_s4 = inlined_call_operand.vmem [shape: f32[1,256], index: 4, kind: input, shape index: {}]   ;;  %s9884_s5 = inlined_call_operand.vmem [shape: bf16[256,4096], index: 5, kind: input, shape index: {}]   ;;  %s9885_s6 = inlined_call_operand.vmem [shape: f32[1,4096], index: 6, kind: input, shape index: {}]   ;;  %s9886_s7 = inlined_call_operand.vmem [shape: f32[2,4096], index: 7, kind: output, shape index: {}]  }
   0x1   :  { %13 = vsyncpa [#allocation5], 0  ;;  %s7974_s24 = smov [#allocation2]   ;;  %s7926_s28 = scalar_lea.hbm %s9880_s1, 32768 }
   0x2   :  { %s21_s25 = sshll.u32 %s7974_s24, 4  ;;  %p7927_p0 = scmp.ne.s32.totalorder %s9880_s1, %s7926_s28  ;;  %s22_s25 = int_to_ptr.vmem [resolvable:$true] %s21_s25 }
   0x3   :  { %p7930_p1 = scmp.lt.u32.totalorder %s7926_s28, %s9880_s1 }
   0x5   :  { %p7932_p2 = pnand %p7930_p1, %p7927_p0 }
   0x7   :  { %7935 = shalt.err (!%p7932_p2)
}
   0x8   :  { %s7936_s10 = scalar_lea.vmem %s22_s25, 32768  ;;  %p7941_p4 = scmp.lt.s32.totalorder %s22_s25, %s22_s25 }
   0x9   :  { %p7937_p3 = scmp.ne.s32.totalorder %s22_s25, %s7936_s10  ;;  %p7942_p5 = scmp.lt.s32.totalorder %s7936_s10, %s7936_s10 }
   0xb   :  { %p7943_p6 = por %p7942_p5, %p7941_p4 }
   0xd   :  { %p7944_p7 = pnand %p7943_p6, %p7937_p3 }
   0xf   :  { %7947 = shalt.err (!%p7944_p7)
}
  0x10   :  { %s7975_s11 = smov 256   ;;  %s7976_s12 = smov 16  }
  0x11   :  { %27 = dma.hbm_to_vmem [thread:$0]  %s9880_s1, 32768, %s22_s25, [#allocation3], %s7975_s11, %s7975_s11, %s7976_s12  }
  0x12   :  { %s7977_s15 = smov [#allocation4]   ;;  %s7948_s19 = scalar_lea.hbm %s9882_s3, 8192 }
  0x13   :  { %s35_s16 = sshll.u32 %s7977_s15, 4  ;;  %p7949_p8 = scmp.ne.s32.totalorder %s9882_s3, %s7948_s19  ;;  %s36_s16 = int_to_ptr.vmem [resolvable:$true] %s35_s16 }
  0x14   :  { %p7952_p9 = scmp.lt.u32.totalorder %s7948_s19, %s9882_s3 }
  0x16   :  { %p7954_p10 = pnand %p7952_p9, %p7949_p8 }
  0x18   :  { %7957 = shalt.err (!%p7954_p10)
}
  0x19   :  { %s7958_s24 = scalar_lea.vmem %s36_s16, 8192  ;;  %p7963_p12 = scmp.lt.s32.totalorder %s36_s16, %s36_s16 }
  0x1a   :  { %p7959_p11 = scmp.ne.s32.totalorder %s36_s16, %s7958_s24  ;;  %p7964_p13 = scmp.lt.s32.totalorder %s7958_s24, %s7958_s24 }
  0x1c   :  { %p7965_p0 = por %p7964_p13, %p7963_p12 }
  0x1e   :  { %p7966_p1 = pnand %p7965_p0, %p7959_p11 }
  0x20   :  { %7969 = shalt.err (!%p7966_p1)
}
  0x21   :  { %s7978_s1 = smov 128   ;;  %s7979_s25 = smov 8  }
  0x22   :  { %41 = dma.hbm_to_vmem [thread:$0]  %s9882_s3, 8192, %s36_s16, [#allocation5], %s7978_s1, %s7978_s1, %s7979_s25  }
  0x23   :  { %7970 = dma.done.wait [#allocation3], 32768  }
  0x24   :  { %7971 = vsyncadd [#allocation3], 4294934528 }
  0x25   :  { %7972 = dma.done.wait [#allocation5], 8192  }
  0x26   :  { %7973 = vsyncadd [#allocation5], 4294959104  ;;  %v7443_v0 = vld [vmem:[#allocation2 + $0x4] ss:$16 sps:$4 sm:$0xff]   ;;  %v7445_v1 = vld [vmem:[#allocation2 + $0xc] ss:$16 sps:$4 sm:$0xff]   ;;  %v318_v38 = vlaneseq }
  0x27   :  { %1666 = vmatprep.subr.bf16.mxu0 %v7443_v0  ;;  %v7447_v2 = vld [vmem:[#allocation2] ss:$16 sps:$4 sm:$0xff]   ;;  %v7448_v3 = vld [vmem:[#allocation2 + $0x8] ss:$16 sps:$4 sm:$0xff]   ;;  %1830 = vmatprep.subr.bf16.mxu1 %v7445_v1  ;;  %v7449_v4 = vld [vmem:[#allocation2 + $0x24] ss:$16 sps:$4 sm:$0xff]  }
  0x28   :  { %1667 = vmatpush1.bf16.msra.mxu0 %v7447_v2  ;;  %1831 = vmatpush1.bf16.msra.mxu1 %v7448_v3  ;;  %v7451_v5 = vld [vmem:[#allocation2 + $0x2c] ss:$16 sps:$4 sm:$0xff]   ;;  %v7453_v6 = vld [vmem:[#allocation2 + $0x20] ss:$16 sps:$4 sm:$0xff]   ;;  %v7454_v7 = vld [vmem:[#allocation2 + $0x28] ss:$16 sps:$4 sm:$0xff]  }
  0x29   :  { %1668 = vmatprep.subr.bf16.mxu0 %v7449_v4  ;;  %1832 = vmatprep.subr.bf16.mxu1 %v7451_v5  ;;  %v7455_v8 = vld [vmem:[#allocation2 + $0x44] ss:$16 sps:$4 sm:$0xff]   ;;  %v7457_v9 = vld [vmem:[#allocation2 + $0x4c] ss:$16 sps:$4 sm:$0xff]   ;;  %v7459_v10 = vld [vmem:[#allocation2 + $0x40] ss:$16 sps:$4 sm:$0xff]  }
  0x2a   :  { %v7460_v11 = vld [vmem:[#allocation2 + $0x48] ss:$16 sps:$4 sm:$0xff]   ;;  %v7461_v12 = vld [vmem:[#allocation2 + $0x64] ss:$16 sps:$4 sm:$0xff]   ;;  %v7463_v13 = vld [vmem:[#allocation2 + $0x6c] ss:$16 sps:$4 sm:$0xff]  }
  0x2b   :  { %v7465_v14 = vld [vmem:[#allocation2 + $0x60] ss:$16 sps:$4 sm:$0xff]   ;;  %v7466_v15 = vld [vmem:[#allocation2 + $0x68] ss:$16 sps:$4 sm:$0xff]   ;;  %v7467_v16 = vld [vmem:[#allocation2 + $0x84] ss:$16 sps:$4 sm:$0xff]  }
  0x2c   :  { %1669 = vmatpush1.bf16.msra.mxu0 %v7453_v6  ;;  %1833 = vmatpush1.bf16.msra.mxu1 %v7454_v7  ;;  %v7469_v17 = vld [vmem:[#allocation2 + $0x8c] ss:$16 sps:$4 sm:$0xff]   ;;  %v7471_v18 = vld [vmem:[#allocation2 + $0x80] ss:$16 sps:$4 sm:$0xff]   ;;  %v7472_v19 = vld [vmem:[#allocation2 + $0x88] ss:$16 sps:$4 sm:$0xff]  }
  0x2d   :  { %1670 = vmatprep.subr.bf16.mxu0 %v7455_v8  ;;  %1834 = vmatprep.subr.bf16.mxu1 %v7457_v9  ;;  %v7473_v20 = vld [vmem:[#allocation2 + $0xa4] ss:$16 sps:$4 sm:$0xff]   ;;  %v7475_v21 = vld [vmem:[#allocation2 + $0xac] ss:$16 sps:$4 sm:$0xff]   ;;  %v7477_v22 = vld [vmem:[#allocation2 + $0xa0] ss:$16 sps:$4 sm:$0xff]  }
  0x2e   :  { %v7478_v23 = vld [vmem:[#allocation2 + $0xa8] ss:$16 sps:$4 sm:$0xff]   ;;  %v7479_v24 = vld [vmem:[#allocation2 + $0xc4] ss:$16 sps:$4 sm:$0xff]   ;;  %v7481_v25 = vld [vmem:[#allocation2 + $0xcc] ss:$16 sps:$4 sm:$0xff]  }
  0x2f   :  { %v7483_v26 = vld [vmem:[#allocation2 + $0xc0] ss:$16 sps:$4 sm:$0xff]   ;;  %v7484_v27 = vld [vmem:[#allocation2 + $0xc8] ss:$16 sps:$4 sm:$0xff]   ;;  %v7485_v28 = vld [vmem:[#allocation2 + $0xe4] ss:$16 sps:$4 sm:$0xff]  }
  0x30   :  { %1671 = vmatpush1.bf16.msra.mxu0 %v7459_v10  ;;  %1835 = vmatpush1.bf16.msra.mxu1 %v7460_v11  ;;  %v7487_v29 = vld [vmem:[#allocation2 + $0xec] ss:$16 sps:$4 sm:$0xff]   ;;  %v7489_v30 = vld [vmem:[#allocation2 + $0xe0] ss:$16 sps:$4 sm:$0xff]   ;;  %v7490_v31 = vld [vmem:[#allocation2 + $0xe8] ss:$16 sps:$4 sm:$0xff]  }
  0x31   :  { %1672 = vmatprep.subr.bf16.mxu0 %v7461_v12  ;;  %1836 = vmatprep.subr.bf16.mxu1 %v7463_v13  ;;  %v7491_v32 = vld [vmem:[#allocation2 + $0x104] ss:$16 sps:$4 sm:$0xff]   ;;  %v7493_v33 = vld [vmem:[#allocation2 + $0x10c] ss:$16 sps:$4 sm:$0xff]   ;;  %v7495_v34 = vld [vmem:[#allocation2 + $0x100] ss:$16 sps:$4 sm:$0xff]  }
  0x32   :  { %v7496_v35 = vld [vmem:[#allocation2 + $0x108] ss:$16 sps:$4 sm:$0xff]   ;;  %v7980_v36 = vmov 1983009808   ;;  %v7497_v39 = vld [vmem:[#allocation2 + $0x124] ss:$16 sps:$4 sm:$0xff]  }
  0x33   :  { %v316_v37 = vunpack.c.l.s4 %v7980_v36  ;;  %v7499_v40 = vld [vmem:[#allocation2 + $0x12c] ss:$16 sps:$4 sm:$0xff]   ;;  %v7501_v41 = vld [vmem:[#allocation2 + $0x120] ss:$16 sps:$4 sm:$0xff]   ;;  %v8045_v43 = vshrl.u32 %v318_v38, 7 }
  0x34   :  { %1673 = vmatpush1.bf16.msra.mxu0 %v7465_v14  ;;  %1837 = vmatpush1.bf16.msra.mxu1 %v7466_v15  ;;  %v7502_v44 = vld [vmem:[#allocation2 + $0x128] ss:$16 sps:$4 sm:$0xff]   ;;  %v7503_v45 = vld [vmem:[#allocation2 + $0x144] ss:$16 sps:$4 sm:$0xff]   ;;  %v7505_v46 = vld [vmem:[#allocation2 + $0x14c] ss:$16 sps:$4 sm:$0xff]  }
  0x35   :  { %1674 = vmatprep.subr.bf16.mxu0 %v7467_v16  ;;  %1838 = vmatprep.subr.bf16.mxu1 %v7469_v17  ;;  %v317_v42 = vunpack.c.0.s8 %v316_v37  ;;  %v7507_v47 = vld [vmem:[#allocation2 + $0x140] ss:$16 sps:$4 sm:$0xff]   ;;  %v7508_v48 = vld [vmem:[#allocation2 + $0x148] ss:$16 sps:$4 sm:$0xff]   ;;  %v7509_v50 = vld [vmem:[#allocation2 + $0x164] ss:$16 sps:$4 sm:$0xff]  }
  0x36   :  { %v7511_v51 = vld [vmem:[#allocation2 + $0x16c] ss:$16 sps:$4 sm:$0xff]   ;;  %v54_v52 = vld [vmem:[%s9879_s0] sm:$0xff]  ;;  %v7514_v55 = vld [vmem:[#allocation2 + $0x168] ss:$16 sps:$4 sm:$0xff]  }
  0x37   :  { %v8048_v49 = vsub.s32 %v317_v42, %v8045_v43  ;;  %v7513_v53 = vld [vmem:[#allocation2 + $0x160] ss:$16 sps:$4 sm:$0xff]   ;;  %v7515_v56 = vld [vmem:[#allocation2 + $0x184] ss:$16 sps:$4 sm:$0xff]   ;;  %v7517_v57 = vld [vmem:[#allocation2 + $0x18c] ss:$16 sps:$4 sm:$0xff]   ;;  %v314_v4 = vcombine.high %v54_v52, %v54_v52 }
  0x38   :  { %1675 = vmatpush1.bf16.msra.mxu0 %v7471_v18  ;;  %1839 = vmatpush1.bf16.msra.mxu1 %v7472_v19  ;;  %v7519_v59 = vld [vmem:[#allocation2 + $0x180] ss:$16 sps:$4 sm:$0xff]   ;;  %v7520_v61 = vld [vmem:[#allocation2 + $0x188] ss:$16 sps:$4 sm:$0xff]   ;;  %v7521_v62 = vld [vmem:[#allocation2 + $0x1a4] ss:$16 sps:$4 sm:$0xff]  }
  0x39   :  { %1676 = vmatprep.subr.bf16.mxu0 %v7473_v20  ;;  %1840 = vmatprep.subr.bf16.mxu1 %v7475_v21  ;;  %v321_v54 = vrot.slane %v54_v52, %v8048_v49  ;;  %v7523_v63 = vld [vmem:[#allocation2 + $0x1ac] ss:$16 sps:$4 sm:$0xff]   ;;  %v7525_v0 = vld [vmem:[#allocation2 + $0x1a0] ss:$16 sps:$4 sm:$0xff]   ;;  %v7526_v1 = vld [vmem:[#allocation2 + $0x1a8] ss:$16 sps:$4 sm:$0xff]   ;;  %v8055_v9 = vrot.slane %v314_v4, %v8048_v49 }
  0x3a   :  { %v7527_v2 = vld [vmem:[#allocation2 + $0x1c4] ss:$16 sps:$4 sm:$0xff]   ;;  %v7529_v3 = vld [vmem:[#allocation2 + $0x1cc] ss:$16 sps:$4 sm:$0xff]   ;;  %v7531_v5 = vld [vmem:[#allocation2 + $0x1c0] ss:$16 sps:$4 sm:$0xff]  }
  0x3b   :  { %v329_v58 = vcombine.high %v321_v54, %v321_v54  ;;  %v7532_v6 = vld [vmem:[#allocation2 + $0x1c8] ss:$16 sps:$4 sm:$0xff]   ;;  %v7533_v7 = vld [vmem:[#allocation2 + $0x1e4] ss:$16 sps:$4 sm:$0xff]   ;;  %v7535_v8 = vld [vmem:[#allocation2 + $0x1ec] ss:$16 sps:$4 sm:$0xff]   ;;  %v330_v14 = vcombine.high %v8055_v9, %v8055_v9  ;;  %v356_v16 = vpack.c.bf16 %v321_v54, %v321_v54 }
  0x3c   :  { %1677 = vmatpush1.bf16.msra.mxu0 %v7477_v22  ;;  %1841 = vmatpush1.bf16.msra.mxu1 %v7478_v23  ;;  %v7537_v10 = vld [vmem:[#allocation2 + $0x1e0] ss:$16 sps:$4 sm:$0xff]   ;;  %v7538_v11 = vld [vmem:[#allocation2 + $0x1e8] ss:$16 sps:$4 sm:$0xff]   ;;  %v7542_v12 = vld [vmem:[#allocation2 + $0x204] ss:$16 sps:$4 sm:$0xff]  }
  0x3d   :  { %1678 = vmatprep.subr.bf16.mxu0 %v7479_v24  ;;  %1842 = vmatprep.subr.bf16.mxu1 %v7481_v25  ;;  %v357_v60 = vpack.c.bf16 %v329_v58, %v329_v58  ;;  %v7545_v13 = vld [vmem:[#allocation2 + $0x20c] ss:$16 sps:$4 sm:$0xff]   ;;  %v7540_v15 = vld [vmem:[#allocation2 + $0x200] ss:$16 sps:$4 sm:$0xff]   ;;  %v7543_v17 = vld [vmem:[#allocation2 + $0x208] ss:$16 sps:$4 sm:$0xff]   ;;  %v359_v20 = vpack.c.bf16 %v330_v14, %v330_v14 }
  0x3e   :  { %v7548_v18 = vld [vmem:[#allocation2 + $0x224] ss:$16 sps:$4 sm:$0xff]   ;;  %v7551_v19 = vld [vmem:[#allocation2 + $0x22c] ss:$16 sps:$4 sm:$0xff]   ;;  %v7546_v21 = vld [vmem:[#allocation2 + $0x220] ss:$16 sps:$4 sm:$0xff]  }
  0x3f   :  { %1698 = vmatprep.mubr.bf16.mxu0 %v357_v60  ;;  %1862 = vmatprep.mubr.bf16.mxu1 %v357_v60  ;;  %v7549_v22 = vld [vmem:[#allocation2 + $0x228] ss:$16 sps:$4 sm:$0xff]   ;;  %v7554_v23 = vld [vmem:[#allocation2 + $0x244] ss:$16 sps:$4 sm:$0xff]   ;;  %v7557_v24 = vld [vmem:[#allocation2 + $0x24c] ss:$16 sps:$4 sm:$0xff]  }
  0x40   :  { %1679 = vmatpush1.bf16.msra.mxu0 %v7483_v26  ;;  %1843 = vmatpush1.bf16.msra.mxu1 %v7484_v27  ;;  %v7552_v25 = vld [vmem:[#allocation2 + $0x240] ss:$16 sps:$4 sm:$0xff]   ;;  %v7555_v26 = vld [vmem:[#allocation2 + $0x248] ss:$16 sps:$4 sm:$0xff]   ;;  %v7560_v27 = vld [vmem:[#allocation2 + $0x264] ss:$16 sps:$4 sm:$0xff]  }
  0x41   :  { %1680 = vmatprep.subr.bf16.mxu0 %v7485_v28  ;;  %1844 = vmatprep.subr.bf16.mxu1 %v7487_v29  ;;  %v7563_v28 = vld [vmem:[#allocation2 + $0x26c] ss:$16 sps:$4 sm:$0xff]   ;;  %v7558_v29 = vld [vmem:[#allocation2 + $0x260] ss:$16 sps:$4 sm:$0xff]   ;;  %v7573_v38 = vld [vmem:[#allocation2 + $0x2a8] ss:$16 sps:$4 sm:$0xff]  }
  0x42   :  { %v7575_v36 = vld [vmem:[#allocation2 + $0x2ac] ss:$16 sps:$4 sm:$0xff]   ;;  %v7570_v37 = vld [vmem:[#allocation2 + $0x2a0] ss:$16 sps:$4 sm:$0xff]   ;;  %v7579_v42 = vld [vmem:[#allocation2 + $0x2c8] ss:$16 sps:$4 sm:$0xff]  }
  0x43   :  { %v7591_v52 = vld [vmem:[#allocation2 + $0x308] ss:$16 sps:$4 sm:$0xff]   ;;  %v7599_v54 = vld [vmem:[#allocation2 + $0x32c] ss:$16 sps:$4 sm:$0xff]   ;;  %v7632_v14 = vld [vmem:[#allocation2 + $0x3e4] ss:$16 sps:$4 sm:$0xff]  }
  0x44   :  { %1681 = vmatpush1.bf16.msra.mxu0 %v7489_v30  ;;  %1845 = vmatpush1.bf16.msra.mxu1 %v7490_v31  ;;  %v7561_v30 = vld [vmem:[#allocation2 + $0x268] ss:$16 sps:$4 sm:$0xff]   ;;  %v7566_v31 = vld [vmem:[#allocation2 + $0x284] ss:$16 sps:$4 sm:$0xff]   ;;  %v7605_v58 = vld [vmem:[#allocation2 + $0x34c] ss:$16 sps:$4 sm:$0xff]  }
  0x45   :  { %1682 = vmatprep.subr.bf16.mxu0 %v7491_v32  ;;  %1846 = vmatprep.subr.bf16.mxu1 %v7493_v33  ;;  %v7569_v32 = vld [vmem:[#allocation2 + $0x28c] ss:$16 sps:$4 sm:$0xff]   ;;  %v7564_v33 = vld [vmem:[#allocation2 + $0x280] ss:$16 sps:$4 sm:$0xff]   ;;  %v7603_v60 = vld [vmem:[#allocation2 + $0x348] ss:$16 sps:$4 sm:$0xff]  }
  0x46   :  { %v7615_v4 = vld [vmem:[#allocation2 + $0x388] ss:$16 sps:$4 sm:$0xff]  }
  0x48   :  { %1683 = vmatpush1.bf16.msra.mxu0 %v7495_v34  ;;  %1847 = vmatpush1.bf16.msra.mxu1 %v7496_v35  ;;  %v7567_v34 = vld [vmem:[#allocation2 + $0x288] ss:$16 sps:$4 sm:$0xff]   ;;  %v7572_v35 = vld [vmem:[#allocation2 + $0x2a4] ss:$16 sps:$4 sm:$0xff]  }
  0x49   :  { %1684 = vmatprep.subr.bf16.mxu0 %v7497_v39  ;;  %1848 = vmatprep.subr.bf16.mxu1 %v7499_v40  ;;  %v7578_v39 = vld [vmem:[#allocation2 + $0x2c4] ss:$16 sps:$4 sm:$0xff]   ;;  %v7581_v40 = vld [vmem:[#allocation2 + $0x2cc] ss:$16 sps:$4 sm:$0xff]  }
  0x4c   :  { %1685 = vmatpush1.bf16.msra.mxu0 %v7501_v41  ;;  %1849 = vmatpush1.bf16.msra.mxu1 %v7502_v44  ;;  %v7576_v41 = vld [vmem:[#allocation2 + $0x2c0] ss:$16 sps:$4 sm:$0xff]   ;;  %v7584_v44 = vld [vmem:[#allocation2 + $0x2e4] ss:$16 sps:$4 sm:$0xff]  }
  0x4d   :  { %1686 = vmatprep.subr.bf16.mxu0 %v7503_v45  ;;  %1850 = vmatprep.subr.bf16.mxu1 %v7505_v46  ;;  %v7587_v45 = vld [vmem:[#allocation2 + $0x2ec] ss:$16 sps:$4 sm:$0xff]   ;;  %v7582_v46 = vld [vmem:[#allocation2 + $0x2e0] ss:$16 sps:$4 sm:$0xff]  }
  0x50   :  { %1687 = vmatpush1.bf16.msra.mxu0 %v7507_v47  ;;  %1851 = vmatpush1.bf16.msra.mxu1 %v7508_v48  ;;  %v7585_v47 = vld [vmem:[#allocation2 + $0x2e8] ss:$16 sps:$4 sm:$0xff]   ;;  %v7590_v48 = vld [vmem:[#allocation2 + $0x304] ss:$16 sps:$4 sm:$0xff]  }
  0x51   :  { %1688 = vmatprep.subr.bf16.mxu0 %v7509_v50  ;;  %1852 = vmatprep.subr.bf16.mxu1 %v7511_v51  ;;  %v7593_v50 = vld [vmem:[#allocation2 + $0x30c] ss:$16 sps:$4 sm:$0xff]   ;;  %v7588_v51 = vld [vmem:[#allocation2 + $0x300] ss:$16 sps:$4 sm:$0xff]  }
  0x54   :  { %1689 = vmatpush1.bf16.msra.mxu0 %v7513_v53  ;;  %1853 = vmatpush1.bf16.msra.mxu1 %v7514_v55  ;;  %v7596_v53 = vld [vmem:[#allocation2 + $0x324] ss:$16 sps:$4 sm:$0xff]   ;;  %v7594_v55 = vld [vmem:[#allocation2 + $0x320] ss:$16 sps:$4 sm:$0xff]  }
  0x55   :  { %1690 = vmatprep.subr.bf16.mxu0 %v7515_v56  ;;  %1854 = vmatprep.subr.bf16.mxu1 %v7517_v57  ;;  %v7597_v56 = vld [vmem:[#allocation2 + $0x328] ss:$16 sps:$4 sm:$0xff]   ;;  %v7602_v57 = vld [vmem:[#allocation2 + $0x344] ss:$16 sps:$4 sm:$0xff]  }
  0x58   :  { %1691 = vmatpush1.bf16.msra.mxu0 %v7519_v59  ;;  %1855 = vmatpush1.bf16.msra.mxu1 %v7520_v61  ;;  %v7600_v59 = vld [vmem:[#allocation2 + $0x340] ss:$16 sps:$4 sm:$0xff]   ;;  %v7608_v61 = vld [vmem:[#allocation2 + $0x364] ss:$16 sps:$4 sm:$0xff]  }
  0x59   :  { %1692 = vmatprep.subr.bf16.mxu0 %v7521_v62  ;;  %1856 = vmatprep.subr.bf16.mxu1 %v7523_v63  ;;  %v7611_v62 = vld [vmem:[#allocation2 + $0x36c] ss:$16 sps:$4 sm:$0xff]   ;;  %v7606_v63 = vld [vmem:[#allocation2 + $0x360] ss:$16 sps:$4 sm:$0xff]  }
  0x5c   :  { %1693 = vmatpush1.bf16.msra.mxu0 %v7525_v0  ;;  %1857 = vmatpush1.bf16.msra.mxu1 %v7526_v1  ;;  %v7609_v0 = vld [vmem:[#allocation2 + $0x368] ss:$16 sps:$4 sm:$0xff]   ;;  %v7614_v1 = vld [vmem:[#allocation2 + $0x384] ss:$16 sps:$4 sm:$0xff]  }
  0x5d   :  { %1694 = vmatprep.subr.bf16.mxu0 %v7527_v2  ;;  %1858 = vmatprep.subr.bf16.mxu1 %v7529_v3  ;;  %v7617_v2 = vld [vmem:[#allocation2 + $0x38c] ss:$16 sps:$4 sm:$0xff]   ;;  %v7612_v3 = vld [vmem:[#allocation2 + $0x380] ss:$16 sps:$4 sm:$0xff]  }
  0x60   :  { %1695 = vmatpush1.bf16.msra.mxu0 %v7531_v5  ;;  %1859 = vmatpush1.bf16.msra.mxu1 %v7532_v6  ;;  %v7620_v5 = vld [vmem:[#allocation2 + $0x3a4] ss:$16 sps:$4 sm:$0xff]   ;;  %v7623_v6 = vld [vmem:[#allocation2 + $0x3ac] ss:$16 sps:$4 sm:$0xff]  }
  0x61   :  { %1696 = vmatprep.subr.bf16.mxu0 %v7533_v7  ;;  %1860 = vmatprep.subr.bf16.mxu1 %v7535_v8  ;;  %v7618_v7 = vld [vmem:[#allocation2 + $0x3a0] ss:$16 sps:$4 sm:$0xff]   ;;  %v7621_v8 = vld [vmem:[#allocation2 + $0x3a8] ss:$16 sps:$4 sm:$0xff]  }
  0x64   :  { %1697 = vmatpush1.bf16.msra.mxu0 %v7537_v10  ;;  %1861 = vmatpush1.bf16.msra.mxu1 %v7538_v11  ;;  %v7626_v10 = vld [vmem:[#allocation2 + $0x3c4] ss:$16 sps:$4 sm:$0xff]   ;;  %v7629_v11 = vld [vmem:[#allocation2 + $0x3cc] ss:$16 sps:$4 sm:$0xff]  }
  0x65   :  { %1707 = vmatprep.subr.bf16.mxu0 %v7542_v12  ;;  %1871 = vmatprep.subr.bf16.mxu1 %v7545_v13  ;;  %v7624_v12 = vld [vmem:[#allocation2 + $0x3c0] ss:$16 sps:$4 sm:$0xff]   ;;  %v7627_v13 = vld [vmem:[#allocation2 + $0x3c8] ss:$16 sps:$4 sm:$0xff]  }
  0x67   :  { %1699 = vmatmul.mubr.bf16.vlgmr.msra.gmra.mrb[0].mxu0 %v356_v16  ;;  %1863 = vmatmul.mubr.bf16.vlgmr.msra.gmra.mrb[0].mxu1 %v356_v16  ;;  %v7630_v16 = vld [vmem:[#allocation2 + $0x3e0] ss:$16 sps:$4 sm:$0xff]  }
  0x68   :  { %1708 = vmatpush1.bf16.msra.mxu0 %v7540_v15  ;;  %1872 = vmatpush1.bf16.msra.mxu1 %v7543_v17  ;;  %v7635_v15 = vld [vmem:[#allocation2 + $0x3ec] ss:$16 sps:$4 sm:$0xff]   ;;  %v7633_v17 = vld [vmem:[#allocation2 + $0x3e8] ss:$16 sps:$4 sm:$0xff]  }
  0x69   :  { %1709 = vmatprep.subr.bf16.mxu0 %v7548_v18  ;;  %1873 = vmatprep.subr.bf16.mxu1 %v7551_v19  ;;  %v7638_v18 = vld [vmem:[#allocation2 + $0x404] ss:$16 sps:$4 sm:$0xff]   ;;  %v7641_v19 = vld [vmem:[#allocation2 + $0x40c] ss:$16 sps:$4 sm:$0xff]  }
  0x6a   :  { %1739 = vmatprep.mubr.bf16.mxu0 %v359_v20  ;;  %1903 = vmatprep.mubr.bf16.mxu1 %v359_v20  ;;  %v7636_v20 = vld [vmem:[#allocation2 + $0x400] ss:$16 sps:$4 sm:$0xff]  }
  0x6c   :  { %1710 = vmatpush1.bf16.msra.mxu0 %v7546_v21  ;;  %1874 = vmatpush1.bf16.msra.mxu1 %v7549_v22  ;;  %v358_v21 = vpack.c.bf16 %v8055_v9, %v8055_v9  ;;  %v7639_v22 = vld [vmem:[#allocation2 + $0x408] ss:$16 sps:$4 sm:$0xff]  }
  0x6d   :  { %1711 = vmatprep.subr.bf16.mxu0 %v7554_v23  ;;  %1875 = vmatprep.subr.bf16.mxu1 %v7557_v24  ;;  %v8064_v23 = vld [vmem:[%s9879_s0 + $0x8] sm:$0xff]  ;;  %v7644_v24 = vld [vmem:[#allocation2 + $0x424] ss:$16 sps:$4 sm:$0xff]  }
  0x70   :  { %1712 = vmatpush1.bf16.msra.mxu0 %v7552_v25  ;;  %1876 = vmatpush1.bf16.msra.mxu1 %v7555_v26  ;;  %v7647_v25 = vld [vmem:[#allocation2 + $0x42c] ss:$16 sps:$4 sm:$0xff]   ;;  %v8068_v26 = vrot.slane %v8064_v23, %v8048_v49 }
  0x71   :  { %1713 = vmatprep.subr.bf16.mxu0 %v7560_v27  ;;  %1877 = vmatprep.subr.bf16.mxu1 %v7563_v28  ;;  %v7642_v27 = vld [vmem:[#allocation2 + $0x420] ss:$16 sps:$4 sm:$0xff]   ;;  %v7645_v28 = vld [vmem:[#allocation2 + $0x428] ss:$16 sps:$4 sm:$0xff]  }
  0x72   :  { %v346_v9 = vcombine.high %v8068_v26, %v8068_v26 }
  0x74   :  { %1714 = vmatpush1.bf16.msra.mxu0 %v7558_v29  ;;  %1878 = vmatpush1.bf16.msra.mxu1 %v7561_v30  ;;  %v7650_v29 = vld [vmem:[#allocation2 + $0x444] ss:$16 sps:$4 sm:$0xff]   ;;  %v7653_v30 = vld [vmem:[#allocation2 + $0x44c] ss:$16 sps:$4 sm:$0xff]  }
  0x75   :  { %1715 = vmatprep.subr.bf16.mxu0 %v7566_v31  ;;  %1879 = vmatprep.subr.bf16.mxu1 %v7569_v32  ;;  %v361_v31 = vpack.c.bf16 %v346_v9, %v346_v9  ;;  %v7648_v32 = vld [vmem:[#allocation2 + $0x440] ss:$16 sps:$4 sm:$0xff]  }
  0x76   :  { %v7726_v9 = vld [vmem:[#allocation2 + $0x5e0] ss:$16 sps:$4 sm:$0xff]  }
  0x78   :  { %1716 = vmatpush1.bf16.msra.mxu0 %v7564_v33  ;;  %1880 = vmatpush1.bf16.msra.mxu1 %v7567_v34  ;;  %v7651_v33 = vld [vmem:[#allocation2 + $0x448] ss:$16 sps:$4 sm:$0xff]   ;;  %v7656_v34 = vld [vmem:[#allocation2 + $0x464] ss:$16 sps:$4 sm:$0xff]  }
  0x79   :  { %1717 = vmatprep.subr.bf16.mxu0 %v7572_v35  ;;  %1881 = vmatprep.subr.bf16.mxu1 %v7575_v36  ;;  %v7659_v35 = vld [vmem:[#allocation2 + $0x46c] ss:$16 sps:$4 sm:$0xff]   ;;  %v7654_v36 = vld [vmem:[#allocation2 + $0x460] ss:$16 sps:$4 sm:$0xff]  }
  0x7c   :  { %1718 = vmatpush1.bf16.msra.mxu0 %v7570_v37  ;;  %1882 = vmatpush1.bf16.msra.mxu1 %v7573_v38  ;;  %v7657_v37 = vld [vmem:[#allocation2 + $0x468] ss:$16 sps:$4 sm:$0xff]   ;;  %v7662_v38 = vld [vmem:[#allocation2 + $0x484] ss:$16 sps:$4 sm:$0xff]  }
  0x7d   :  { %1719 = vmatprep.subr.bf16.mxu0 %v7578_v39  ;;  %1883 = vmatprep.subr.bf16.mxu1 %v7581_v40  ;;  %v7665_v39 = vld [vmem:[#allocation2 + $0x48c] ss:$16 sps:$4 sm:$0xff]   ;;  %v7660_v40 = vld [vmem:[#allocation2 + $0x480] ss:$16 sps:$4 sm:$0xff]  }
  0x80   :  { %1720 = vmatpush1.bf16.msra.mxu0 %v7576_v41  ;;  %1884 = vmatpush1.bf16.msra.mxu1 %v7579_v42  ;;  %v7663_v41 = vld [vmem:[#allocation2 + $0x488] ss:$16 sps:$4 sm:$0xff]   ;;  %v7668_v42 = vld [vmem:[#allocation2 + $0x4a4] ss:$16 sps:$4 sm:$0xff]  }
  0x81   :  { %1721 = vmatprep.subr.bf16.mxu0 %v7584_v44  ;;  %1885 = vmatprep.subr.bf16.mxu1 %v7587_v45  ;;  %v7671_v44 = vld [vmem:[#allocation2 + $0x4ac] ss:$16 sps:$4 sm:$0xff]   ;;  %v7666_v45 = vld [vmem:[#allocation2 + $0x4a0] ss:$16 sps:$4 sm:$0xff]  }
  0x84   :  { %1722 = vmatpush1.bf16.msra.mxu0 %v7582_v46  ;;  %1886 = vmatpush1.bf16.msra.mxu1 %v7585_v47  ;;  %v7669_v46 = vld [vmem:[#allocation2 + $0x4a8] ss:$16 sps:$4 sm:$0xff]   ;;  %v7674_v47 = vld [vmem:[#allocation2 + $0x4c4] ss:$16 sps:$4 sm:$0xff]  }
  0x85   :  { %1723 = vmatprep.subr.bf16.mxu0 %v7590_v48  ;;  %1887 = vmatprep.subr.bf16.mxu1 %v7593_v50  ;;  %v7677_v48 = vld [vmem:[#allocation2 + $0x4cc] ss:$16 sps:$4 sm:$0xff]   ;;  %v7672_v50 = vld [vmem:[#allocation2 + $0x4c0] ss:$16 sps:$4 sm:$0xff]  }
  0x88   :  { %1724 = vmatpush1.bf16.msra.mxu0 %v7588_v51  ;;  %1888 = vmatpush1.bf16.msra.mxu1 %v7591_v52  ;;  %v7675_v51 = vld [vmem:[#allocation2 + $0x4c8] ss:$16 sps:$4 sm:$0xff]   ;;  %v7680_v52 = vld [vmem:[#allocation2 + $0x4e4] ss:$16 sps:$4 sm:$0xff]  }
  0x89   :  { %1725 = vmatprep.subr.bf16.mxu0 %v7596_v53  ;;  %1889 = vmatprep.subr.bf16.mxu1 %v7599_v54  ;;  %v7683_v53 = vld [vmem:[#allocation2 + $0x4ec] ss:$16 sps:$4 sm:$0xff]   ;;  %v7678_v54 = vld [vmem:[#allocation2 + $0x4e0] ss:$16 sps:$4 sm:$0xff]  }
  0x8c   :  { %1726 = vmatpush1.bf16.msra.mxu0 %v7594_v55  ;;  %1890 = vmatpush1.bf16.msra.mxu1 %v7597_v56  ;;  %v7681_v55 = vld [vmem:[#allocation2 + $0x4e8] ss:$16 sps:$4 sm:$0xff]   ;;  %v7686_v56 = vld [vmem:[#allocation2 + $0x504] ss:$16 sps:$4 sm:$0xff]  }
  0x8d   :  { %1727 = vmatprep.subr.bf16.mxu0 %v7602_v57  ;;  %1891 = vmatprep.subr.bf16.mxu1 %v7605_v58  ;;  %v7689_v57 = vld [vmem:[#allocation2 + $0x50c] ss:$16 sps:$4 sm:$0xff]   ;;  %v7684_v58 = vld [vmem:[#allocation2 + $0x500] ss:$16 sps:$4 sm:$0xff]  }
  0x90   :  { %1728 = vmatpush1.bf16.msra.mxu0 %v7600_v59  ;;  %1892 = vmatpush1.bf16.msra.mxu1 %v7603_v60  ;;  %v7687_v59 = vld [vmem:[#allocation2 + $0x508] ss:$16 sps:$4 sm:$0xff]   ;;  %v7692_v60 = vld [vmem:[#allocation2 + $0x524] ss:$16 sps:$4 sm:$0xff]  }
  0x91   :  { %1729 = vmatprep.subr.bf16.mxu0 %v7608_v61  ;;  %1893 = vmatprep.subr.bf16.mxu1 %v7611_v62  ;;  %v7695_v61 = vld [vmem:[#allocation2 + $0x52c] ss:$16 sps:$4 sm:$0xff]   ;;  %v7690_v62 = vld [vmem:[#allocation2 + $0x520] ss:$16 sps:$4 sm:$0xff]  }
  0x94   :  { %1730 = vmatpush1.bf16.msra.mxu0 %v7606_v63  ;;  %1894 = vmatpush1.bf16.msra.mxu1 %v7609_v0  ;;  %v7693_v63 = vld [vmem:[#allocation2 + $0x528] ss:$16 sps:$4 sm:$0xff]   ;;  %v7698_v0 = vld [vmem:[#allocation2 + $0x544] ss:$16 sps:$4 sm:$0xff]  }
  0x95   :  { %1731 = vmatprep.subr.bf16.mxu0 %v7614_v1  ;;  %1895 = vmatprep.subr.bf16.mxu1 %v7617_v2  ;;  %v7701_v1 = vld [vmem:[#allocation2 + $0x54c] ss:$16 sps:$4 sm:$0xff]   ;;  %v7696_v2 = vld [vmem:[#allocation2 + $0x540] ss:$16 sps:$4 sm:$0xff]  }
  0x98   :  { %1732 = vmatpush1.bf16.msra.mxu0 %v7612_v3  ;;  %1896 = vmatpush1.bf16.msra.mxu1 %v7615_v4  ;;  %v7699_v3 = vld [vmem:[#allocation2 + $0x548] ss:$16 sps:$4 sm:$0xff]   ;;  %v7704_v4 = vld [vmem:[#allocation2 + $0x564] ss:$16 sps:$4 sm:$0xff]  }
  0x99   :  { %1733 = vmatprep.subr.bf16.mxu0 %v7620_v5  ;;  %1897 = vmatprep.subr.bf16.mxu1 %v7623_v6  ;;  %v7707_v5 = vld [vmem:[#allocation2 + $0x56c] ss:$16 sps:$4 sm:$0xff]   ;;  %v7702_v6 = vld [vmem:[#allocation2 + $0x560] ss:$16 sps:$4 sm:$0xff]  }
  0x9c   :  { %1734 = vmatpush1.bf16.msra.mxu0 %v7618_v7  ;;  %1898 = vmatpush1.bf16.msra.mxu1 %v7621_v8  ;;  %v7705_v7 = vld [vmem:[#allocation2 + $0x568] ss:$16 sps:$4 sm:$0xff]   ;;  %v7710_v8 = vld [vmem:[#allocation2 + $0x584] ss:$16 sps:$4 sm:$0xff]  }
  0x9d   :  { %1735 = vmatprep.subr.bf16.mxu0 %v7626_v10  ;;  %1899 = vmatprep.subr.bf16.mxu1 %v7629_v11  ;;  %v7713_v10 = vld [vmem:[#allocation2 + $0x58c] ss:$16 sps:$4 sm:$0xff]   ;;  %v7708_v11 = vld [vmem:[#allocation2 + $0x580] ss:$16 sps:$4 sm:$0xff]  }
  0xa0   :  { %1736 = vmatpush1.bf16.msra.mxu0 %v7624_v12  ;;  %1900 = vmatpush1.bf16.msra.mxu1 %v7627_v13  ;;  %v7711_v12 = vld [vmem:[#allocation2 + $0x588] ss:$16 sps:$4 sm:$0xff]   ;;  %v7716_v13 = vld [vmem:[#allocation2 + $0x5a4] ss:$16 sps:$4 sm:$0xff]  }
  0xa1   :  { %1737 = vmatprep.subr.bf16.mxu0 %v7632_v14  ;;  %1901 = vmatprep.subr.bf16.mxu1 %v7635_v15  ;;  %v7719_v14 = vld [vmem:[#allocation2 + $0x5ac] ss:$16 sps:$4 sm:$0xff]   ;;  %v7714_v15 = vld [vmem:[#allocation2 + $0x5a0] ss:$16 sps:$4 sm:$0xff]  }
  0xa4   :  { %1738 = vmatpush1.bf16.msra.mxu0 %v7630_v16  ;;  %1902 = vmatpush1.bf16.msra.mxu1 %v7633_v17  ;;  %v7717_v16 = vld [vmem:[#allocation2 + $0x5a8] ss:$16 sps:$4 sm:$0xff]   ;;  %v7722_v17 = vld [vmem:[#allocation2 + $0x5c4] ss:$16 sps:$4 sm:$0xff]  }
  0xa5   :  { %1748 = vmatprep.subr.bf16.mxu0 %v7638_v18  ;;  %1912 = vmatprep.subr.bf16.mxu1 %v7641_v19  ;;  %v7725_v18 = vld [vmem:[#allocation2 + $0x5cc] ss:$16 sps:$4 sm:$0xff]   ;;  %v331_v19 = vcombine.high %v8064_v23, %v8064_v23  ;;  %v7732_v23 = vld [vmem:[#allocation2 + $0x600] ss:$16 sps:$4 sm:$0xff]  }
  0xa7   :  { %1740 = vmatmul.mubr.bf16.vlgmr.msra.gmra.mrb[0].mxu0 %v358_v21  ;;  %1904 = vmatmul.mubr.bf16.vlgmr.msra.gmra.mrb[0].mxu1 %v358_v21  ;;  %v7723_v21 = vld [vmem:[#allocation2 + $0x5c8] ss:$16 sps:$4 sm:$0xff]  }
  0xa8   :  { %1749 = vmatpush1.bf16.msra.mxu0 %v7636_v20  ;;  %1913 = vmatpush1.bf16.msra.mxu1 %v7639_v22  ;;  %v7720_v20 = vld [vmem:[#allocation2 + $0x5c0] ss:$16 sps:$4 sm:$0xff]   ;;  %v7728_v22 = vld [vmem:[#allocation2 + $0x5e4] ss:$16 sps:$4 sm:$0xff]  }
  0xa9   :  { %1750 = vmatprep.subr.bf16.mxu0 %v7644_v24  ;;  %1914 = vmatprep.subr.bf16.mxu1 %v7647_v25  ;;  %v7731_v24 = vld [vmem:[#allocation2 + $0x5ec] ss:$16 sps:$4 sm:$0xff]   ;;  %v8075_v25 = vrot.slane %v331_v19, %v8048_v49  ;;  %v7807_v19 = vld [vmem:[#allocation2 + $0x788] ss:$16 sps:$4 sm:$0xff]  }
  0xaa   :  { %1780 = vmatprep.mubr.bf16.mxu0 %v361_v31  ;;  %1944 = vmatprep.mubr.bf16.mxu1 %v361_v31 }
  0xab   :  { %v347_v31 = vcombine.high %v8075_v25, %v8075_v25 }
  0xac   :  { %1751 = vmatpush1.bf16.msra.mxu0 %v7642_v27  ;;  %1915 = vmatpush1.bf16.msra.mxu1 %v7645_v28  ;;  %v7729_v27 = vld [vmem:[#allocation2 + $0x5e8] ss:$16 sps:$4 sm:$0xff]   ;;  %v7734_v28 = vld [vmem:[#allocation2 + $0x604] ss:$16 sps:$4 sm:$0xff]  }
  0xad   :  { %1752 = vmatprep.subr.bf16.mxu0 %v7650_v29  ;;  %1916 = vmatprep.subr.bf16.mxu1 %v7653_v30  ;;  %v7737_v29 = vld [vmem:[#allocation2 + $0x60c] ss:$16 sps:$4 sm:$0xff]   ;;  %v7735_v30 = vld [vmem:[#allocation2 + $0x608] ss:$16 sps:$4 sm:$0xff]  }
  0xb0   :  { %1753 = vmatpush1.bf16.msra.mxu0 %v7648_v32  ;;  %1917 = vmatpush1.bf16.msra.mxu1 %v7651_v33  ;;  %v360_v32 = vpack.c.bf16 %v8068_v26, %v8068_v26  ;;  %v7740_v33 = vld [vmem:[#allocation2 + $0x624] ss:$16 sps:$4 sm:$0xff]  }
  0xb1   :  { %1754 = vmatprep.subr.bf16.mxu0 %v7656_v34  ;;  %1918 = vmatprep.subr.bf16.mxu1 %v7659_v35  ;;  %v7743_v34 = vld [vmem:[#allocation2 + $0x62c] ss:$16 sps:$4 sm:$0xff]   ;;  %v7738_v35 = vld [vmem:[#allocation2 + $0x620] ss:$16 sps:$4 sm:$0xff]   ;;  %v7752_v26 = vld [vmem:[#allocation2 + $0x664] ss:$16 sps:$4 sm:$0xff]  }
  0xb4   :  { %1755 = vmatpush1.bf16.msra.mxu0 %v7654_v36  ;;  %1919 = vmatpush1.bf16.msra.mxu1 %v7657_v37  ;;  %v7741_v36 = vld [vmem:[#allocation2 + $0x628] ss:$16 sps:$4 sm:$0xff]   ;;  %v363_v37 = vpack.c.bf16 %v347_v31, %v347_v31  ;;  %v7822_v31 = vld [vmem:[#allocation2 + $0x7e0] ss:$16 sps:$4 sm:$0xff]  }
  0xb5   :  { %1756 = vmatprep.subr.bf16.mxu0 %v7662_v38  ;;  %1920 = vmatprep.subr.bf16.mxu1 %v7665_v39  ;;  %v7746_v38 = vld [vmem:[#allocation2 + $0x644] ss:$16 sps:$4 sm:$0xff]   ;;  %v7749_v39 = vld [vmem:[#allocation2 + $0x64c] ss:$16 sps:$4 sm:$0xff]  }
  0xb8   :  { %1757 = vmatpush1.bf16.msra.mxu0 %v7660_v40  ;;  %1921 = vmatpush1.bf16.msra.mxu1 %v7663_v41  ;;  %v7744_v40 = vld [vmem:[#allocation2 + $0x640] ss:$16 sps:$4 sm:$0xff]   ;;  %v7747_v41 = vld [vmem:[#allocation2 + $0x648] ss:$16 sps:$4 sm:$0xff]  }
  0xb9   :  { %1758 = vmatprep.subr.bf16.mxu0 %v7668_v42  ;;  %1922 = vmatprep.subr.bf16.mxu1 %v7671_v44  ;;  %v7755_v42 = vld [vmem:[#allocation2 + $0x66c] ss:$16 sps:$4 sm:$0xff]   ;;  %v7750_v44 = vld [vmem:[#allocation2 + $0x660] ss:$16 sps:$4 sm:$0xff]  }
  0xbc   :  { %1759 = vmatpush1.bf16.msra.mxu0 %v7666_v45  ;;  %1923 = vmatpush1.bf16.msra.mxu1 %v7669_v46  ;;  %v7753_v45 = vld [vmem:[#allocation2 + $0x668] ss:$16 sps:$4 sm:$0xff]   ;;  %v7758_v46 = vld [vmem:[#allocation2 + $0x684] ss:$16 sps:$4 sm:$0xff]  }
  0xbd   :  { %1760 = vmatprep.subr.bf16.mxu0 %v7674_v47  ;;  %1924 = vmatprep.subr.bf16.mxu1 %v7677_v48  ;;  %v7761_v47 = vld [vmem:[#allocation2 + $0x68c] ss:$16 sps:$4 sm:$0xff]   ;;  %v7756_v48 = vld [vmem:[#allocation2 + $0x680] ss:$16 sps:$4 sm:$0xff]  }
  0xc0   :  { %1761 = vmatpush1.bf16.msra.mxu0 %v7672_v50  ;;  %1925 = vmatpush1.bf16.msra.mxu1 %v7675_v51  ;;  %v7759_v50 = vld [vmem:[#allocation2 + $0x688] ss:$16 sps:$4 sm:$0xff]   ;;  %v7764_v51 = vld [vmem:[#allocation2 + $0x6a4] ss:$16 sps:$4 sm:$0xff]  }
  0xc1   :  { %1762 = vmatprep.subr.bf16.mxu0 %v7680_v52  ;;  %1926 = vmatprep.subr.bf16.mxu1 %v7683_v53  ;;  %v7767_v52 = vld [vmem:[#allocation2 + $0x6ac] ss:$16 sps:$4 sm:$0xff]   ;;  %v7762_v53 = vld [vmem:[#allocation2 + $0x6a0] ss:$16 sps:$4 sm:$0xff]  }
  0xc4   :  { %1763 = vmatpush1.bf16.msra.mxu0 %v7678_v54  ;;  %1927 = vmatpush1.bf16.msra.mxu1 %v7681_v55  ;;  %v7765_v54 = vld [vmem:[#allocation2 + $0x6a8] ss:$16 sps:$4 sm:$0xff]   ;;  %v7770_v55 = vld [vmem:[#allocation2 + $0x6c4] ss:$16 sps:$4 sm:$0xff]  }
  0xc5   :  { %1764 = vmatprep.subr.bf16.mxu0 %v7686_v56  ;;  %1928 = vmatprep.subr.bf16.mxu1 %v7689_v57  ;;  %v7773_v56 = vld [vmem:[#allocation2 + $0x6cc] ss:$16 sps:$4 sm:$0xff]   ;;  %v7768_v57 = vld [vmem:[#allocation2 + $0x6c0] ss:$16 sps:$4 sm:$0xff]  }
  0xc8   :  { %1765 = vmatpush1.bf16.msra.mxu0 %v7684_v58  ;;  %1929 = vmatpush1.bf16.msra.mxu1 %v7687_v59  ;;  %v7771_v58 = vld [vmem:[#allocation2 + $0x6c8] ss:$16 sps:$4 sm:$0xff]   ;;  %v7776_v59 = vld [vmem:[#allocation2 + $0x6e4] ss:$16 sps:$4 sm:$0xff]  }
  0xc9   :  { %1766 = vmatprep.subr.bf16.mxu0 %v7692_v60  ;;  %1930 = vmatprep.subr.bf16.mxu1 %v7695_v61  ;;  %v7779_v60 = vld [vmem:[#allocation2 + $0x6ec] ss:$16 sps:$4 sm:$0xff]   ;;  %v7774_v61 = vld [vmem:[#allocation2 + $0x6e0] ss:$16 sps:$4 sm:$0xff]  }
  0xcc   :  { %1767 = vmatpush1.bf16.msra.mxu0 %v7690_v62  ;;  %1931 = vmatpush1.bf16.msra.mxu1 %v7693_v63  ;;  %v7777_v62 = vld [vmem:[#allocation2 + $0x6e8] ss:$16 sps:$4 sm:$0xff]   ;;  %v7782_v63 = vld [vmem:[#allocation2 + $0x704] ss:$16 sps:$4 sm:$0xff]  }
  0xcd   :  { %1768 = vmatprep.subr.bf16.mxu0 %v7698_v0  ;;  %1932 = vmatprep.subr.bf16.mxu1 %v7701_v1  ;;  %v7785_v0 = vld [vmem:[#allocation2 + $0x70c] ss:$16 sps:$4 sm:$0xff]   ;;  %v7780_v1 = vld [vmem:[#allocation2 + $0x700] ss:$16 sps:$4 sm:$0xff]  }
  0xd0   :  { %1769 = vmatpush1.bf16.msra.mxu0 %v7696_v2  ;;  %1933 = vmatpush1.bf16.msra.mxu1 %v7699_v3  ;;  %v7783_v2 = vld [vmem:[#allocation2 + $0x708] ss:$16 sps:$4 sm:$0xff]   ;;  %v7788_v3 = vld [vmem:[#allocation2 + $0x724] ss:$16 sps:$4 sm:$0xff]  }
  0xd1   :  { %1770 = vmatprep.subr.bf16.mxu0 %v7704_v4  ;;  %1934 = vmatprep.subr.bf16.mxu1 %v7707_v5  ;;  %v7791_v4 = vld [vmem:[#allocation2 + $0x72c] ss:$16 sps:$4 sm:$0xff]   ;;  %v7786_v5 = vld [vmem:[#allocation2 + $0x720] ss:$16 sps:$4 sm:$0xff]  }
  0xd4   :  { %1771 = vmatpush1.bf16.msra.mxu0 %v7702_v6  ;;  %1935 = vmatpush1.bf16.msra.mxu1 %v7705_v7  ;;  %v7789_v6 = vld [vmem:[#allocation2 + $0x728] ss:$16 sps:$4 sm:$0xff]   ;;  %v7794_v7 = vld [vmem:[#allocation2 + $0x744] ss:$16 sps:$4 sm:$0xff]  }
  0xd5   :  { %1772 = vmatprep.subr.bf16.mxu0 %v7710_v8  ;;  %1936 = vmatprep.subr.bf16.mxu1 %v7713_v10  ;;  %v7797_v8 = vld [vmem:[#allocation2 + $0x74c] ss:$16 sps:$4 sm:$0xff]   ;;  %v7792_v10 = vld [vmem:[#allocation2 + $0x740] ss:$16 sps:$4 sm:$0xff]  }
  0xd8   :  { %1773 = vmatpush1.bf16.msra.mxu0 %v7708_v11  ;;  %1937 = vmatpush1.bf16.msra.mxu1 %v7711_v12  ;;  %v7795_v11 = vld [vmem:[#allocation2 + $0x748] ss:$16 sps:$4 sm:$0xff]   ;;  %v7800_v12 = vld [vmem:[#allocation2 + $0x764] ss:$16 sps:$4 sm:$0xff]  }
  0xd9   :  { %1774 = vmatprep.subr.bf16.mxu0 %v7716_v13  ;;  %1938 = vmatprep.subr.bf16.mxu1 %v7719_v14  ;;  %v7803_v13 = vld [vmem:[#allocation2 + $0x76c] ss:$16 sps:$4 sm:$0xff]   ;;  %v7798_v14 = vld [vmem:[#allocation2 + $0x760] ss:$16 sps:$4 sm:$0xff]  }
  0xdc   :  { %1775 = vmatpush1.bf16.msra.mxu0 %v7714_v15  ;;  %1939 = vmatpush1.bf16.msra.mxu1 %v7717_v16  ;;  %v7801_v15 = vld [vmem:[#allocation2 + $0x768] ss:$16 sps:$4 sm:$0xff]   ;;  %v7806_v16 = vld [vmem:[#allocation2 + $0x784] ss:$16 sps:$4 sm:$0xff]  }
  0xdd   :  { %1776 = vmatprep.subr.bf16.mxu0 %v7722_v17  ;;  %1940 = vmatprep.subr.bf16.mxu1 %v7725_v18  ;;  %v7809_v17 = vld [vmem:[#allocation2 + $0x78c] ss:$16 sps:$4 sm:$0xff]   ;;  %v7804_v18 = vld [vmem:[#allocation2 + $0x780] ss:$16 sps:$4 sm:$0xff]  }
  0xe0   :  { %1777 = vmatpush1.bf16.msra.mxu0 %v7720_v20  ;;  %1941 = vmatpush1.bf16.msra.mxu1 %v7723_v21  ;;  %v7812_v20 = vld [vmem:[#allocation2 + $0x7a4] ss:$16 sps:$4 sm:$0xff]   ;;  %v7815_v21 = vld [vmem:[#allocation2 + $0x7ac] ss:$16 sps:$4 sm:$0xff]  }
  0xe1   :  { %1778 = vmatprep.subr.bf16.mxu0 %v7728_v22  ;;  %1942 = vmatprep.subr.bf16.mxu1 %v7731_v24  ;;  %v7810_v22 = vld [vmem:[#allocation2 + $0x7a0] ss:$16 sps:$4 sm:$0xff]   ;;  %v7813_v24 = vld [vmem:[#allocation2 + $0x7a8] ss:$16 sps:$4 sm:$0xff]  }
  0xe4   :  { %1779 = vmatpush1.bf16.msra.mxu0 %v7726_v9  ;;  %1943 = vmatpush1.bf16.msra.mxu1 %v7729_v27  ;;  %v7818_v9 = vld [vmem:[#allocation2 + $0x7c4] ss:$16 sps:$4 sm:$0xff]   ;;  %v7821_v27 = vld [vmem:[#allocation2 + $0x7cc] ss:$16 sps:$4 sm:$0xff]  }
  0xe5   :  { %1789 = vmatprep.subr.bf16.mxu0 %v7734_v28  ;;  %1953 = vmatprep.subr.bf16.mxu1 %v7737_v29  ;;  %v7816_v28 = vld [vmem:[#allocation2 + $0x7c0] ss:$16 sps:$4 sm:$0xff]   ;;  %v7819_v29 = vld [vmem:[#allocation2 + $0x7c8] ss:$16 sps:$4 sm:$0xff]  }
  0xe7   :  { %1781 = vmatmul.mubr.bf16.vlgmr.msra.gmra.mrb[0].mxu0 %v360_v32  ;;  %1945 = vmatmul.mubr.bf16.vlgmr.msra.gmra.mrb[0].mxu1 %v360_v32  ;;  %v7825_v32 = vld [vmem:[#allocation2 + $0x7e8] ss:$16 sps:$4 sm:$0xff]  }
  0xe8   :  { %1790 = vmatpush1.bf16.msra.mxu0 %v7732_v23  ;;  %1954 = vmatpush1.bf16.msra.mxu1 %v7735_v30  ;;  %v7824_v23 = vld [vmem:[#allocation2 + $0x7e4] ss:$16 sps:$4 sm:$0xff]   ;;  %v7827_v30 = vld [vmem:[#allocation2 + $0x7ec] ss:$16 sps:$4 sm:$0xff]  }
  0xe9   :  { %1791 = vmatprep.subr.bf16.mxu0 %v7740_v33  ;;  %1955 = vmatprep.subr.bf16.mxu1 %v7743_v34  ;;  %v7831_v33 = vld [vmem:[#allocation4 + $0x4] ss:$8 sps:$4 sm:$0xff]   ;;  %v362_v34 = vpack.c.bf16 %v8075_v25, %v8075_v25  ;;  %v7841_v25 = vld [vmem:[#allocation4 + $0x40] ss:$8 sps:$4 sm:$0xff]  }
  0xea   :  { %1821 = vmatprep.mubr.bf16.mxu0 %v363_v37  ;;  %1985 = vmatprep.mubr.bf16.mxu1 %v363_v37  ;;  %v7832_v37 = vld [vmem:[#allocation4 + $0x10] ss:$8 sps:$4 sm:$0xff]  }
  0xec   :  { %1792 = vmatpush1.bf16.msra.mxu0 %v7738_v35  ;;  %1956 = vmatpush1.bf16.msra.mxu1 %v7741_v36  ;;  %v7829_v35 = vld [vmem:[#allocation4] ss:$8 sps:$4 sm:$0xff]   ;;  %v7834_v36 = vld [vmem:[#allocation4 + $0x14] ss:$8 sps:$4 sm:$0xff]  }
  0xed   :  { %1793 = vmatprep.subr.bf16.mxu0 %v7746_v38  ;;  %1957 = vmatprep.subr.bf16.mxu1 %v7749_v39  ;;  %v7837_v38 = vld [vmem:[#allocation4 + $0x24] ss:$8 sps:$4 sm:$0xff]   ;;  %v7835_v39 = vld [vmem:[#allocation4 + $0x20] ss:$8 sps:$4 sm:$0xff]  }
  0xf0   :  { %1794 = vmatpush1.bf16.msra.mxu0 %v7744_v40  ;;  %1958 = vmatpush1.bf16.msra.mxu1 %v7747_v41  ;;  %v7840_v40 = vld [vmem:[#allocation4 + $0x34] ss:$8 sps:$4 sm:$0xff]   ;;  %v7838_v41 = vld [vmem:[#allocation4 + $0x30] ss:$8 sps:$4 sm:$0xff]  }
  0xf1   :  { %1795 = vmatprep.subr.bf16.mxu0 %v7752_v26  ;;  %1959 = vmatprep.subr.bf16.mxu1 %v7755_v42  ;;  %v7843_v26 = vld [vmem:[#allocation4 + $0x44] ss:$8 sps:$4 sm:$0xff]   ;;  %v7846_v42 = vld [vmem:[#allocation4 + $0x54] ss:$8 sps:$4 sm:$0xff]  }
  0xf4   :  { %1796 = vmatpush1.bf16.msra.mxu0 %v7750_v44  ;;  %1960 = vmatpush1.bf16.msra.mxu1 %v7753_v45  ;;  %v7844_v44 = vld [vmem:[#allocation4 + $0x50] ss:$8 sps:$4 sm:$0xff]   ;;  %v7849_v45 = vld [vmem:[#allocation4 + $0x64] ss:$8 sps:$4 sm:$0xff]  }
  0xf5   :  { %1797 = vmatprep.subr.bf16.mxu0 %v7758_v46  ;;  %1961 = vmatprep.subr.bf16.mxu1 %v7761_v47  ;;  %v7847_v46 = vld [vmem:[#allocation4 + $0x60] ss:$8 sps:$4 sm:$0xff]   ;;  %v7852_v47 = vld [vmem:[#allocation4 + $0x74] ss:$8 sps:$4 sm:$0xff]  }
  0xf8   :  { %1798 = vmatpush1.bf16.msra.mxu0 %v7756_v48  ;;  %1962 = vmatpush1.bf16.msra.mxu1 %v7759_v50  ;;  %v7850_v48 = vld [vmem:[#allocation4 + $0x70] ss:$8 sps:$4 sm:$0xff]   ;;  %v7855_v50 = vld [vmem:[#allocation4 + $0x84] ss:$8 sps:$4 sm:$0xff]  }
  0xf9   :  { %1799 = vmatprep.subr.bf16.mxu0 %v7764_v51  ;;  %1963 = vmatprep.subr.bf16.mxu1 %v7767_v52  ;;  %v7853_v51 = vld [vmem:[#allocation4 + $0x80] ss:$8 sps:$4 sm:$0xff]   ;;  %v7858_v52 = vld [vmem:[#allocation4 + $0x94] ss:$8 sps:$4 sm:$0xff]  }
  0xfc   :  { %1800 = vmatpush1.bf16.msra.mxu0 %v7762_v53  ;;  %1964 = vmatpush1.bf16.msra.mxu1 %v7765_v54  ;;  %v7856_v53 = vld [vmem:[#allocation4 + $0x90] ss:$8 sps:$4 sm:$0xff]   ;;  %v7861_v54 = vld [vmem:[#allocation4 + $0xa4] ss:$8 sps:$4 sm:$0xff]  }
  0xfd   :  { %1801 = vmatprep.subr.bf16.mxu0 %v7770_v55  ;;  %1965 = vmatprep.subr.bf16.mxu1 %v7773_v56  ;;  %v7859_v55 = vld [vmem:[#allocation4 + $0xa0] ss:$8 sps:$4 sm:$0xff]   ;;  %v7864_v56 = vld [vmem:[#allocation4 + $0xb4] ss:$8 sps:$4 sm:$0xff]  }
 0x100   :  { %1802 = vmatpush1.bf16.msra.mxu0 %v7768_v57  ;;  %1966 = vmatpush1.bf16.msra.mxu1 %v7771_v58  ;;  %v7862_v57 = vld [vmem:[#allocation4 + $0xb0] ss:$8 sps:$4 sm:$0xff]   ;;  %v7867_v58 = vld [vmem:[#allocation4 + $0xc4] ss:$8 sps:$4 sm:$0xff]  }
 0x101   :  { %1803 = vmatprep.subr.bf16.mxu0 %v7776_v59  ;;  %1967 = vmatprep.subr.bf16.mxu1 %v7779_v60  ;;  %v7865_v59 = vld [vmem:[#allocation4 + $0xc0] ss:$8 sps:$4 sm:$0xff]   ;;  %v7870_v60 = vld [vmem:[#allocation4 + $0xd4] ss:$8 sps:$4 sm:$0xff]  }
 0x104   :  { %1804 = vmatpush1.bf16.msra.mxu0 %v7774_v61  ;;  %1968 = vmatpush1.bf16.msra.mxu1 %v7777_v62  ;;  %v7868_v61 = vld [vmem:[#allocation4 + $0xd0] ss:$8 sps:$4 sm:$0xff]   ;;  %v7873_v62 = vld [vmem:[#allocation4 + $0xe4] ss:$8 sps:$4 sm:$0xff]  }
 0x105   :  { %1805 = vmatprep.subr.bf16.mxu0 %v7782_v63  ;;  %1969 = vmatprep.subr.bf16.mxu1 %v7785_v0  ;;  %v7871_v63 = vld [vmem:[#allocation4 + $0xe0] ss:$8 sps:$4 sm:$0xff]   ;;  %v7876_v0 = vld [vmem:[#allocation4 + $0xf4] ss:$8 sps:$4 sm:$0xff]  }
 0x108   :  { %1806 = vmatpush1.bf16.msra.mxu0 %v7780_v1  ;;  %1970 = vmatpush1.bf16.msra.mxu1 %v7783_v2  ;;  %v7874_v1 = vld [vmem:[#allocation4 + $0xf0] ss:$8 sps:$4 sm:$0xff]   ;;  %v7879_v2 = vld [vmem:[#allocation4 + $0x104] ss:$8 sps:$4 sm:$0xff]  }
 0x109   :  { %1807 = vmatprep.subr.bf16.mxu0 %v7788_v3  ;;  %1971 = vmatprep.subr.bf16.mxu1 %v7791_v4  ;;  %v2482_v3 = vld [vmem:[%s9884_s5] sm:$0xff] }
 0x10a   :  { %v2498_v4 = vld [vmem:[%s9884_s5 + $0x80] sm:$0xff] }
 0x10c   :  { %1808 = vmatpush1.bf16.msra.mxu0 %v7786_v5  ;;  %1972 = vmatpush1.bf16.msra.mxu1 %v7789_v6  ;;  %v6890_v5 = vcombine.low %v2482_v3, %v2498_v4  ;;  %v6891_v6 = vcombine.high %v2482_v3, %v2498_v4 }
 0x10d   :  { %1809 = vmatprep.subr.bf16.mxu0 %v7794_v7  ;;  %1973 = vmatprep.subr.bf16.mxu1 %v7797_v8  ;;  %v2514_v7 = vld [vmem:[%s9884_s5 + $0x100] sm:$0xff] }
 0x10e   :  { %v2530_v8 = vld [vmem:[%s9884_s5 + $0x180] sm:$0xff] }
 0x110   :  { %1810 = vmatpush1.bf16.msra.mxu0 %v7792_v10  ;;  %1974 = vmatpush1.bf16.msra.mxu1 %v7795_v11  ;;  %v6923_v10 = vcombine.high %v2514_v7, %v2530_v8  ;;  %v6922_v11 = vcombine.low %v2514_v7, %v2530_v8 }
 0x111   :  { %1811 = vmatprep.subr.bf16.mxu0 %v7800_v12  ;;  %1975 = vmatprep.subr.bf16.mxu1 %v7803_v13  ;;  %v2546_v12 = vld [vmem:[%s9884_s5 + $0x200] sm:$0xff] }
 0x112   :  { %v2562_v13 = vld [vmem:[%s9884_s5 + $0x280] sm:$0xff] }
 0x114   :  { %1812 = vmatpush1.bf16.msra.mxu0 %v7798_v14  ;;  %1976 = vmatpush1.bf16.msra.mxu1 %v7801_v15  ;;  %v6955_v14 = vcombine.high %v2546_v12, %v2562_v13  ;;  %v6954_v15 = vcombine.low %v2546_v12, %v2562_v13 }
 0x115   :  { %1813 = vmatprep.subr.bf16.mxu0 %v7806_v16  ;;  %1977 = vmatprep.subr.bf16.mxu1 %v7809_v17  ;;  %v2578_v16 = vld [vmem:[%s9884_s5 + $0x300] sm:$0xff] }
 0x116   :  { %v2594_v17 = vld [vmem:[%s9884_s5 + $0x380] sm:$0xff] }
 0x118   :  { %1814 = vmatpush1.bf16.msra.mxu0 %v7804_v18  ;;  %1978 = vmatpush1.bf16.msra.mxu1 %v7807_v19  ;;  %v6987_v18 = vcombine.high %v2578_v16, %v2594_v17  ;;  %v6986_v19 = vcombine.low %v2578_v16, %v2594_v17 }
 0x119   :  { %1815 = vmatprep.subr.bf16.mxu0 %v7812_v20  ;;  %1979 = vmatprep.subr.bf16.mxu1 %v7815_v21  ;;  %v2610_v20 = vld [vmem:[%s9884_s5 + $0x400] sm:$0xff] }
 0x11a   :  { %v2626_v21 = vld [vmem:[%s9884_s5 + $0x480] sm:$0xff] }
 0x11c   :  { %1816 = vmatpush1.bf16.msra.mxu0 %v7810_v22  ;;  %1980 = vmatpush1.bf16.msra.mxu1 %v7813_v24  ;;  %v7019_v22 = vcombine.high %v2610_v20, %v2626_v21  ;;  %v7018_v24 = vcombine.low %v2610_v20, %v2626_v21  ;;  %v7877_v20 = vld [vmem:[#allocation4 + $0x100] ss:$8 sps:$4 sm:$0xff]  }
 0x11d   :  { %1817 = vmatprep.subr.bf16.mxu0 %v7818_v9  ;;  %1981 = vmatprep.subr.bf16.mxu1 %v7821_v27  ;;  %v2642_v9 = vld [vmem:[%s9884_s5 + $0x500] sm:$0xff] }
 0x11e   :  { %v2658_v27 = vld [vmem:[%s9884_s5 + $0x580] sm:$0xff] }
 0x120   :  { %1818 = vmatpush1.bf16.msra.mxu0 %v7816_v28  ;;  %1982 = vmatpush1.bf16.msra.mxu1 %v7819_v29  ;;  %v7051_v28 = vcombine.high %v2642_v9, %v2658_v27  ;;  %v7050_v29 = vcombine.low %v2642_v9, %v2658_v27  ;;  %v7880_v9 = vld [vmem:[#allocation4 + $0x110] ss:$8 sps:$4 sm:$0xff]   ;;  %v7885_v27 = vld [vmem:[#allocation4 + $0x124] ss:$8 sps:$4 sm:$0xff]  }
 0x121   :  { %1819 = vmatprep.subr.bf16.mxu0 %v7824_v23  ;;  %1983 = vmatprep.subr.bf16.mxu1 %v7827_v30  ;;  %v2674_v23 = vld [vmem:[%s9884_s5 + $0x600] sm:$0xff] }
 0x122   :  { %v2690_v30 = vld [vmem:[%s9884_s5 + $0x680] sm:$0xff] }
 0x124   :  { %1820 = vmatpush1.bf16.msra.mxu0 %v7822_v31  ;;  %1984 = vmatpush1.bf16.msra.mxu1 %v7825_v32  ;;  %v7083_v31 = vcombine.high %v2674_v23, %v2690_v30  ;;  %v7082_v32 = vcombine.low %v2674_v23, %v2690_v30  ;;  %v7886_v23 = vld [vmem:[#allocation4 + $0x130] ss:$8 sps:$4 sm:$0xff]   ;;  %v7891_v30 = vld [vmem:[#allocation4 + $0x144] ss:$8 sps:$4 sm:$0xff]  }
 0x125   :  { %2398 = vmatprep.subr.bf16.mxu0 %v7831_v33  ;;  %5724 = vmatprep.subr.bf16.mxu1 %v6891_v6  ;;  %v2706_v33 = vld [vmem:[%s9884_s5 + $0x700] sm:$0xff] }
 0x127   :  { %1822 = vmatmul.mubr.bf16.vlgmr.msra.gmra.mrb[0].mxu0 %v362_v34  ;;  %1986 = vmatmul.mubr.bf16.vlgmr.msra.gmra.mrb[0].mxu1 %v362_v34  ;;  %v2722_v34 = vld [vmem:[%s9884_s5 + $0x780] sm:$0xff] }
 0x128   :  { %2399 = vmatpush1.bf16.msra.mxu0 %v7829_v35  ;;  %5725 = vmatpush1.bf16.msra.mxu1 %v6890_v5  ;;  %v7115_v35 = vcombine.high %v2706_v33, %v2722_v34 }
 0x129   :  { %2400 = vmatprep.subr.bf16.mxu0 %v7834_v36  ;;  %5726 = vmatprep.subr.bf16.mxu1 %v6923_v10  ;;  %v7114_v36 = vcombine.low %v2706_v33, %v2722_v34  ;;  %v7892_v33 = vld [vmem:[#allocation4 + $0x150] ss:$8 sps:$4 sm:$0xff]   ;;  %v7897_v34 = vld [vmem:[#allocation4 + $0x164] ss:$8 sps:$4 sm:$0xff]  }
 0x12c   :  { %2401 = vmatpush1.bf16.msra.mxu0 %v7832_v37  ;;  %5727 = vmatpush1.bf16.msra.mxu1 %v6922_v11  ;;  %v2738_v37 = vld [vmem:[%s9884_s5 + $0x800] sm:$0xff] }
 0x12d   :  { %2402 = vmatprep.subr.bf16.mxu0 %v7837_v38  ;;  %5728 = vmatprep.subr.bf16.mxu1 %v6955_v14  ;;  %v2754_v38 = vld [vmem:[%s9884_s5 + $0x880] sm:$0xff] }
 0x130   :  { %2403 = vmatpush1.bf16.msra.mxu0 %v7835_v39  ;;  %5729 = vmatpush1.bf16.msra.mxu1 %v6954_v15  ;;  %v7147_v39 = vcombine.high %v2738_v37, %v2754_v38 }
 0x131   :  { %2404 = vmatprep.subr.bf16.mxu0 %v7840_v40  ;;  %5730 = vmatprep.subr.bf16.mxu1 %v6987_v18  ;;  %v7146_v40 = vcombine.low %v2738_v37, %v2754_v38  ;;  %v7898_v37 = vld [vmem:[#allocation4 + $0x170] ss:$8 sps:$4 sm:$0xff]   ;;  %v7903_v38 = vld [vmem:[#allocation4 + $0x184] ss:$8 sps:$4 sm:$0xff]  }
 0x134   :  { %2405 = vmatpush1.bf16.msra.mxu0 %v7838_v41  ;;  %5731 = vmatpush1.bf16.msra.mxu1 %v6986_v19  ;;  %v2770_v41 = vld [vmem:[%s9884_s5 + $0x900] sm:$0xff] }
 0x135   :  { %2406 = vmatprep.subr.bf16.mxu0 %v7843_v26  ;;  %5732 = vmatprep.subr.bf16.mxu1 %v7019_v22  ;;  %v2786_v26 = vld [vmem:[%s9884_s5 + $0x980] sm:$0xff]  ;;  %v7882_v22 = vld [vmem:[#allocation4 + $0x114] ss:$8 sps:$4 sm:$0xff]  }
 0x138   :  { %2407 = vmatpush1.bf16.msra.mxu0 %v7841_v25  ;;  %5733 = vmatpush1.bf16.msra.mxu1 %v7018_v24  ;;  %v7179_v25 = vcombine.high %v2770_v41, %v2786_v26 }
 0x139   :  { %2408 = vmatprep.subr.bf16.mxu0 %v7846_v42  ;;  %5734 = vmatprep.subr.bf16.mxu1 %v7051_v28  ;;  %v7178_v42 = vcombine.low %v2770_v41, %v2786_v26  ;;  %v7883_v28 = vld [vmem:[#allocation4 + $0x120] ss:$8 sps:$4 sm:$0xff]   ;;  %v7904_v41 = vld [vmem:[#allocation4 + $0x190] ss:$8 sps:$4 sm:$0xff]   ;;  %v7909_v26 = vld [vmem:[#allocation4 + $0x1a4] ss:$8 sps:$4 sm:$0xff]  }
 0x13c   :  { %2409 = vmatpush1.bf16.msra.mxu0 %v7844_v44  ;;  %5735 = vmatpush1.bf16.msra.mxu1 %v7050_v29  ;;  %v2802_v44 = vld [vmem:[%s9884_s5 + $0xa00] sm:$0xff]  ;;  %v7888_v29 = vld [vmem:[#allocation4 + $0x134] ss:$8 sps:$4 sm:$0xff]  }
 0x13d   :  { %2410 = vmatprep.subr.bf16.mxu0 %v7849_v45  ;;  %5736 = vmatprep.subr.bf16.mxu1 %v7083_v31  ;;  %v2818_v45 = vld [vmem:[%s9884_s5 + $0xa80] sm:$0xff] }
 0x13e   :  { %v7889_v31 = vld [vmem:[#allocation4 + $0x140] ss:$8 sps:$4 sm:$0xff]  }
 0x140   :  { %2411 = vmatpush1.bf16.msra.mxu0 %v7847_v46  ;;  %5737 = vmatpush1.bf16.msra.mxu1 %v7082_v32  ;;  %v7211_v46 = vcombine.high %v2802_v44, %v2818_v45  ;;  %v7894_v32 = vld [vmem:[#allocation4 + $0x154] ss:$8 sps:$4 sm:$0xff]  }
 0x141   :  { %2412 = vmatprep.subr.bf16.mxu0 %v7852_v47  ;;  %5738 = vmatprep.subr.bf16.mxu1 %v7115_v35  ;;  %v7210_v47 = vcombine.low %v2802_v44, %v2818_v45  ;;  %v7895_v35 = vld [vmem:[#allocation4 + $0x160] ss:$8 sps:$4 sm:$0xff]   ;;  %v7910_v44 = vld [vmem:[#allocation4 + $0x1b0] ss:$8 sps:$4 sm:$0xff]   ;;  %v7915_v45 = vld [vmem:[#allocation4 + $0x1c4] ss:$8 sps:$4 sm:$0xff]  }
 0x144   :  { %2413 = vmatpush1.bf16.msra.mxu0 %v7850_v48  ;;  %5739 = vmatpush1.bf16.msra.mxu1 %v7114_v36  ;;  %v2834_v48 = vld [vmem:[%s9884_s5 + $0xb00] sm:$0xff]  ;;  %v7900_v36 = vld [vmem:[#allocation4 + $0x174] ss:$8 sps:$4 sm:$0xff]  }
 0x145   :  { %2414 = vmatprep.subr.bf16.mxu0 %v7855_v50  ;;  %5740 = vmatprep.subr.bf16.mxu1 %v7147_v39  ;;  %v2850_v50 = vld [vmem:[%s9884_s5 + $0xb80] sm:$0xff] }
 0x146   :  { %v7901_v39 = vld [vmem:[#allocation4 + $0x180] ss:$8 sps:$4 sm:$0xff]  }
 0x148   :  { %2415 = vmatpush1.bf16.msra.mxu0 %v7853_v51  ;;  %5741 = vmatpush1.bf16.msra.mxu1 %v7146_v40  ;;  %v7243_v51 = vcombine.high %v2834_v48, %v2850_v50  ;;  %v7906_v40 = vld [vmem:[#allocation4 + $0x194] ss:$8 sps:$4 sm:$0xff]  }
 0x149   :  { %2416 = vmatprep.subr.bf16.mxu0 %v7858_v52  ;;  %5742 = vmatprep.subr.bf16.mxu1 %v7179_v25  ;;  %v7242_v52 = vcombine.low %v2834_v48, %v2850_v50  ;;  %v7907_v25 = vld [vmem:[#allocation4 + $0x1a0] ss:$8 sps:$4 sm:$0xff]   ;;  %v7918_v48 = vld [vmem:[#allocation4 + $0x1d4] ss:$8 sps:$4 sm:$0xff]   ;;  %v7916_v50 = vld [vmem:[#allocation4 + $0x1d0] ss:$8 sps:$4 sm:$0xff]  }
 0x14c   :  { %2417 = vmatpush1.bf16.msra.mxu0 %v7856_v53  ;;  %5743 = vmatpush1.bf16.msra.mxu1 %v7178_v42  ;;  %v2866_v53 = vld [vmem:[%s9884_s5 + $0xc00] sm:$0xff]  ;;  %v7912_v42 = vld [vmem:[#allocation4 + $0x1b4] ss:$8 sps:$4 sm:$0xff]  }
 0x14d   :  { %2418 = vmatprep.subr.bf16.mxu0 %v7861_v54  ;;  %5744 = vmatprep.subr.bf16.mxu1 %v7211_v46  ;;  %v2882_v54 = vld [vmem:[%s9884_s5 + $0xc80] sm:$0xff] }
 0x14e   :  { %v7913_v46 = vld [vmem:[#allocation4 + $0x1c0] ss:$8 sps:$4 sm:$0xff]  }
 0x150   :  { %2419 = vmatpush1.bf16.msra.mxu0 %v7859_v55  ;;  %5745 = vmatpush1.bf16.msra.mxu1 %v7210_v47  ;;  %v7275_v55 = vcombine.high %v2866_v53, %v2882_v54  ;;  %v8190_v47 = vsub.s32 2, %v8045_v43 }
 0x151   :  { %2420 = vmatprep.subr.bf16.mxu0 %v7864_v56  ;;  %5746 = vmatprep.subr.bf16.mxu1 %v7243_v51  ;;  %v8162_v56 = vsub.s32 0, %v8045_v43 }
 0x154   :  { %2421 = vmatpush1.bf16.msra.mxu0 %v7862_v57  ;;  %5747 = vmatpush1.bf16.msra.mxu1 %v7242_v52  ;;  %v7274_v57 = vcombine.low %v2866_v53, %v2882_v54  ;;  %v7921_v52 = vld [vmem:[#allocation4 + $0x1e4] ss:$8 sps:$4 sm:$0xff]   ;;  %v7919_v53 = vld [vmem:[#allocation4 + $0x1e0] ss:$8 sps:$4 sm:$0xff]  }
 0x155   :  { %2422 = vmatprep.subr.bf16.mxu0 %v7867_v58  ;;  %v8167_v58 = vld [vmem:[%s9881_s2] sm:$0xf]  ;;  %5748 = vmatprep.subr.bf16.mxu1 %v7275_v55  ;;  %v7924_v55 = vld [vmem:[#allocation4 + $0x1f4] ss:$8 sps:$4 sm:$0xff]  }
 0x156   :  { %v377_v51 = vrot.slane %v8167_v58, %v8190_v47 }
 0x158   :  { %2423 = vmatpush1.bf16.msra.mxu0 %v7865_v59  ;;  %v8170_v59 = vsub.s32 1, %v8045_v43  ;;  %5749 = vmatpush1.bf16.msra.mxu1 %v7274_v57  ;;  %v2484_v57 = vld [vmem:[%s9884_s5 + $0x10] sm:$0xff] }
 0x159   :  { %2424 = vmatprep.subr.bf16.mxu0 %v7870_v60  ;;  %v8173_v60 = vsub.s32 3, %v8045_v43 }
 0x15b   :  { %v381_v3 = vrot.slane %v8167_v58, %v8173_v60 }
 0x15c   :  { %2425 = vmatpush1.bf16.msra.mxu0 %v7868_v61  ;;  %v2898_v61 = vld [vmem:[%s9884_s5 + $0xd00] sm:$0xff] }
 0x15d   :  { %2426 = vmatprep.subr.bf16.mxu0 %v7873_v62  ;;  %v2914_v62 = vld [vmem:[%s9884_s5 + $0xd80] sm:$0xff] }
 0x160   :  { %2427 = vmatpush1.bf16.msra.mxu0 %v7871_v63  ;;  %v7307_v63 = vcombine.high %v2898_v61, %v2914_v62 }
 0x161   :  { %2428 = vmatprep.subr.bf16.mxu0 %v7876_v0  ;;  %v369_v0 = vrot.slane %v8167_v58, %v8162_v56 }
 0x162   :  { %5750 = vmatprep.subr.bf16.mxu1 %v7307_v63 }
 0x164   :  { %2429 = vmatpush1.bf16.msra.mxu0 %v7874_v1  ;;  %v7306_v1 = vcombine.low %v2898_v61, %v2914_v62  ;;  %v2500_v61 = vld [vmem:[%s9884_s5 + $0x90] sm:$0xff] }
 0x165   :  { %2439 = vmatprep.subr.bf16.mxu0 %v7879_v2  ;;  %v373_v2 = vrot.slane %v8167_v58, %v8170_v59  ;;  %v7922_v62 = vld [vmem:[#allocation4 + $0x1f0] ss:$8 sps:$4 sm:$0xff]   ;;  %v6895_v58 = vcombine.high %v2484_v57, %v2500_v61 }
 0x166   :  { %5751 = vmatpush1.bf16.msra.mxu1 %v7306_v1  ;;  %v2532_v1 = vld [vmem:[%s9884_s5 + $0x190] sm:$0xff] }
 0x1fa   :  { %v1823_v4 = vpop.f32.mrb[0].mxu0  ;;  %v8187_v5 = vpop.f32.mrb[0].mxu1 }
 0x1fb   :  { %v7402_v6 = vadd.f32 %v1823_v4, %v369_v0  ;;  %v1825_v7 = vpop.f32.mrb[1].mxu0  ;;  %v1989_v8 = vpop.f32.mrb[1].mxu1  ;;  %v7404_v54 = vadd.f32 %v8187_v5, %v377_v51  ;;  %v2516_v0 = vld [vmem:[%s9884_s5 + $0x110] sm:$0xff] }
 0x1fc   :  { %v7403_v10 = vadd.f32 %v1825_v7, %v373_v2  ;;  %v7405_v11 = vadd.f32 %v1989_v8, %v381_v3  ;;  %v1827_v12 = vpop.f32.mrb[2].mxu0  ;;  %v1991_v13 = vpop.f32.mrb[2].mxu1  ;;  %v6894_v2 = vcombine.low %v2484_v57, %v2500_v61  ;;  %v6927_v4 = vcombine.high %v2516_v0, %v2532_v1  ;;  %v2548_v5 = vld [vmem:[%s9884_s5 + $0x210] sm:$0xff]  ;;  %v2930_v61 = vld [vmem:[%s9884_s5 + $0xe00] sm:$0xff] }
 0x1fd   :  { %v1994_v14 = vmax.f32 %v7402_v6, 0.0  ;;  %v1828_v15 = vpop.f32.mrb[3].mxu0  ;;  %v1992_v16 = vpop.f32.mrb[3].mxu1  ;;  %v1996_v63 = vmax.f32 %v7404_v54, 0.0  ;;  %v2564_v6 = vld [vmem:[%s9884_s5 + $0x290] sm:$0xff]  ;;  %v6926_v7 = vcombine.low %v2516_v0, %v2532_v1 }
 0x1fe   :  { %v1995_v17 = vmax.f32 %v7403_v10, 0.0  ;;  %v1997_v18 = vmax.f32 %v7405_v11, 0.0  ;;  %v6959_v8 = vcombine.high %v2548_v5, %v2564_v6  ;;  %v2580_v10 = vld [vmem:[%s9884_s5 + $0x310] sm:$0xff]  ;;  %v6958_v12 = vcombine.low %v2548_v5, %v2564_v6  ;;  %v2978_v5 = vld [vmem:[%s9884_s5 + $0xf80] sm:$0xff] }
 0x1ff   :  { %v2062_v21 = vpack.c.bf16 %v1994_v14, %v1994_v14  ;;  %v2064_v3 = vpack.c.bf16 %v1996_v63, %v1996_v63  ;;  %v2596_v11 = vld [vmem:[%s9884_s5 + $0x390] sm:$0xff] }
 0x200   :  { %v2063_v19 = vpack.c.bf16 %v1995_v17, %v1995_v17  ;;  %v2065_v24 = vpack.c.bf16 %v1997_v18, %v1997_v18  ;;  %v6991_v13 = vcombine.high %v2580_v10, %v2596_v11  ;;  %v2612_v14 = vld [vmem:[%s9884_s5 + $0x410] sm:$0xff]  ;;  %v6990_v16 = vcombine.low %v2580_v10, %v2596_v11 }
 0x201   :  { %v2628_v15 = vld [vmem:[%s9884_s5 + $0x490] sm:$0xff] }
 0x202   :  { %2430 = vmatprep.mubr.bf16.mxu0 %v2063_v19  ;;  %v7023_v17 = vcombine.high %v2612_v14, %v2628_v15  ;;  %v2644_v18 = vld [vmem:[%s9884_s5 + $0x510] sm:$0xff] }
 0x203   :  { %2431 = vmatmul.mubr.bf16.vlgmr.msra.gmra.mrb[4].mxu0 %v2062_v21  ;;  %v2660_v19 = vld [vmem:[%s9884_s5 + $0x590] sm:$0xff] }
 0x204   :  { %2440 = vmatpush1.bf16.msra.mxu0 %v7877_v20  ;;  %2471 = vmatprep.mubr.bf16.mxu0 %v2065_v24  ;;  %v7022_v20 = vcombine.low %v2612_v14, %v2628_v15  ;;  %v7055_v21 = vcombine.high %v2644_v18, %v2660_v19  ;;  %v2692_v24 = vld [vmem:[%s9884_s5 + $0x690] sm:$0xff]  ;;  %v2499_v14 = vld [vmem:[%s9884_s5 + $0x88] sm:$0xff]  ;;  %v2486_v15 = vld [vmem:[%s9884_s5 + $0x20] sm:$0xff] }
 0x205   :  { %2441 = vmatprep.subr.bf16.mxu0 %v7882_v22  ;;  %v2676_v22 = vld [vmem:[%s9884_s5 + $0x610] sm:$0xff] }
 0x206   :  { %v2932_v63 = vld [vmem:[%s9884_s5 + $0xe10] sm:$0xff] }
 0x207   :  { %v2948_v0 = vld [vmem:[%s9884_s5 + $0xe90] sm:$0xff] }
 0x208   :  { %2442 = vmatpush1.bf16.msra.mxu0 %v7880_v9  ;;  %v7054_v9 = vcombine.low %v2644_v18, %v2660_v19  ;;  %v2964_v6 = vld [vmem:[%s9884_s5 + $0xf10] sm:$0xff] }
 0x209   :  { %2443 = vmatprep.subr.bf16.mxu0 %v7885_v27  ;;  %v7087_v27 = vcombine.high %v2676_v22, %v2692_v24 }
 0x20c   :  { %2444 = vmatpush1.bf16.msra.mxu0 %v7883_v28  ;;  %v2708_v28 = vld [vmem:[%s9884_s5 + $0x710] sm:$0xff] }
 0x20d   :  { %2445 = vmatprep.subr.bf16.mxu0 %v7888_v29  ;;  %v2724_v29 = vld [vmem:[%s9884_s5 + $0x790] sm:$0xff] }
 0x210   :  { %2446 = vmatpush1.bf16.msra.mxu0 %v7886_v23  ;;  %v7086_v23 = vcombine.low %v2676_v22, %v2692_v24 }
 0x211   :  { %2447 = vmatprep.subr.bf16.mxu0 %v7891_v30  ;;  %v7119_v30 = vcombine.high %v2708_v28, %v2724_v29 }
 0x214   :  { %2448 = vmatpush1.bf16.msra.mxu0 %v7889_v31  ;;  %v2740_v31 = vld [vmem:[%s9884_s5 + $0x810] sm:$0xff] }
 0x215   :  { %2449 = vmatprep.subr.bf16.mxu0 %v7894_v32  ;;  %v2756_v32 = vld [vmem:[%s9884_s5 + $0x890] sm:$0xff] }
 0x218   :  { %2450 = vmatpush1.bf16.msra.mxu0 %v7892_v33  ;;  %v7118_v33 = vcombine.low %v2708_v28, %v2724_v29 }
 0x219   :  { %2451 = vmatprep.subr.bf16.mxu0 %v7897_v34  ;;  %v7151_v34 = vcombine.high %v2740_v31, %v2756_v32 }
 0x21c   :  { %2452 = vmatpush1.bf16.msra.mxu0 %v7895_v35  ;;  %v2772_v35 = vld [vmem:[%s9884_s5 + $0x910] sm:$0xff] }
 0x21d   :  { %2453 = vmatprep.subr.bf16.mxu0 %v7900_v36  ;;  %v2788_v36 = vld [vmem:[%s9884_s5 + $0x990] sm:$0xff] }
 0x220   :  { %2454 = vmatpush1.bf16.msra.mxu0 %v7898_v37  ;;  %v7150_v37 = vcombine.low %v2740_v31, %v2756_v32 }
 0x221   :  { %2455 = vmatprep.subr.bf16.mxu0 %v7903_v38  ;;  %v7183_v38 = vcombine.high %v2772_v35, %v2788_v36 }
 0x224   :  { %2456 = vmatpush1.bf16.msra.mxu0 %v7901_v39  ;;  %v2804_v39 = vld [vmem:[%s9884_s5 + $0xa10] sm:$0xff] }
 0x225   :  { %2457 = vmatprep.subr.bf16.mxu0 %v7906_v40  ;;  %v2820_v40 = vld [vmem:[%s9884_s5 + $0xa90] sm:$0xff] }
 0x228   :  { %2458 = vmatpush1.bf16.msra.mxu0 %v7904_v41  ;;  %v7182_v41 = vcombine.low %v2772_v35, %v2788_v36  ;;  %v2518_v35 = vld [vmem:[%s9884_s5 + $0x120] sm:$0xff] }
 0x229   :  { %2459 = vmatprep.subr.bf16.mxu0 %v7909_v26  ;;  %v7215_v26 = vcombine.high %v2804_v39, %v2820_v40  ;;  %v2534_v36 = vld [vmem:[%s9884_s5 + $0x1a0] sm:$0xff] }
 0x22c   :  { %2460 = vmatpush1.bf16.msra.mxu0 %v7907_v25  ;;  %v2836_v25 = vld [vmem:[%s9884_s5 + $0xb10] sm:$0xff] }
 0x22d   :  { %2461 = vmatprep.subr.bf16.mxu0 %v7912_v42  ;;  %v2852_v42 = vld [vmem:[%s9884_s5 + $0xb90] sm:$0xff] }
 0x230   :  { %2462 = vmatpush1.bf16.msra.mxu0 %v7910_v44  ;;  %v7214_v44 = vcombine.low %v2804_v39, %v2820_v40  ;;  %v2547_v39 = vld [vmem:[%s9884_s5 + $0x208] sm:$0xff] }
 0x231   :  { %2463 = vmatprep.subr.bf16.mxu0 %v7915_v45  ;;  %v7247_v45 = vcombine.high %v2836_v25, %v2852_v42 }
 0x234   :  { %2464 = vmatpush1.bf16.msra.mxu0 %v7913_v46  ;;  %v2868_v46 = vld [vmem:[%s9884_s5 + $0xc10] sm:$0xff] }
 0x235   :  { %2465 = vmatprep.subr.bf16.mxu0 %v7918_v48  ;;  %v2884_v48 = vld [vmem:[%s9884_s5 + $0xc90] sm:$0xff] }
 0x236   :  { %v7279_v51 = vcombine.high %v2868_v46, %v2884_v48  ;;  %v7278_v54 = vcombine.low %v2868_v46, %v2884_v48 }
 0x238   :  { %2466 = vmatpush1.bf16.msra.mxu0 %v7916_v50  ;;  %v7246_v50 = vcombine.low %v2836_v25, %v2852_v42  ;;  %v2550_v25 = vld [vmem:[%s9884_s5 + $0x220] sm:$0xff] }
 0x239   :  { %2467 = vmatprep.subr.bf16.mxu0 %v7921_v52  ;;  %v2900_v52 = vld [vmem:[%s9884_s5 + $0xd10] sm:$0xff]  ;;  %v2566_v42 = vld [vmem:[%s9884_s5 + $0x2a0] sm:$0xff] }
 0x23a   :  { %v6963_v48 = vcombine.high %v2550_v25, %v2566_v42 }
 0x23c   :  { %2468 = vmatpush1.bf16.msra.mxu0 %v7919_v53  ;;  %v2916_v53 = vld [vmem:[%s9884_s5 + $0xd90] sm:$0xff] }
 0x23d   :  { %2469 = vmatprep.subr.bf16.mxu0 %v7924_v55  ;;  %v7311_v55 = vcombine.high %v2900_v52, %v2916_v53  ;;  %v7310_v57 = vcombine.low %v2900_v52, %v2916_v53  ;;  %v2582_v52 = vld [vmem:[%s9884_s5 + $0x320] sm:$0xff] }
 0x23e   :  { %v2598_v53 = vld [vmem:[%s9884_s5 + $0x3a0] sm:$0xff] }
 0x240   :  { %2470 = vmatpush1.bf16.msra.mxu0 %v7922_v62  ;;  %v2946_v62 = vld [vmem:[%s9884_s5 + $0xe80] sm:$0xff] }
 0x241   :  { %5806 = vmatprep.subr.bf16.mxu0 %v6895_v58  ;;  %v7339_v58 = vcombine.high %v2930_v61, %v2946_v62  ;;  %v7338_v1 = vcombine.low %v2930_v61, %v2946_v62  ;;  %v6995_v61 = vcombine.high %v2582_v52, %v2598_v53  ;;  %v2611_v62 = vld [vmem:[%s9884_s5 + $0x408] sm:$0xff] }
 0x243   :  { %2472 = vmatmul.mubr.bf16.vlgmr.msra.gmra.mrb[4].mxu0 %v2064_v3  ;;  %v7343_v3 = vcombine.high %v2932_v63, %v2948_v0  ;;  %5752 = vmatprep.subr.bf16.mxu1 %v7339_v58  ;;  %v2614_v58 = vld [vmem:[%s9884_s5 + $0x420] sm:$0xff] }
 0x244   :  { %5807 = vmatpush1.bf16.msra.mxu0 %v6894_v2  ;;  %v7342_v2 = vcombine.low %v2932_v63, %v2948_v0  ;;  %5753 = vmatpush1.bf16.msra.mxu1 %v7338_v1  ;;  %v2627_v63 = vld [vmem:[%s9884_s5 + $0x488] sm:$0xff]  ;;  %v2630_v0 = vld [vmem:[%s9884_s5 + $0x4a0] sm:$0xff] }
 0x245   :  { %5808 = vmatprep.subr.bf16.mxu0 %v6927_v4  ;;  %v2962_v4 = vld [vmem:[%s9884_s5 + $0xf00] sm:$0xff] }
 0x246   :  { %v7370_v10 = vcombine.low %v2962_v4, %v2978_v5 }
 0x248   :  { %5809 = vmatpush1.bf16.msra.mxu0 %v6926_v7  ;;  %v7371_v7 = vcombine.high %v2962_v4, %v2978_v5  ;;  %v7027_v4 = vcombine.high %v2614_v58, %v2630_v0  ;;  %v2643_v5 = vld [vmem:[%s9884_s5 + $0x508] sm:$0xff] }
 0x249   :  { %5810 = vmatprep.subr.bf16.mxu0 %v6959_v8  ;;  %v2980_v8 = vld [vmem:[%s9884_s5 + $0xf90] sm:$0xff] }
 0x24a   :  { %v7374_v11 = vcombine.low %v2964_v6, %v2980_v8  ;;  %5754 = vmatprep.subr.bf16.mxu1 %v7371_v7  ;;  %v2646_v7 = vld [vmem:[%s9884_s5 + $0x520] sm:$0xff] }
 0x24b   :  { %5755 = vmatpush1.bf16.msra.mxu1 %v7370_v10  ;;  %v7020_v10 = vcombine.low %v2611_v62, %v2627_v63 }
 0x24c   :  { %5811 = vmatpush1.bf16.msra.mxu0 %v6958_v12  ;;  %v7375_v12 = vcombine.high %v2964_v6, %v2980_v8  ;;  %v2659_v6 = vld [vmem:[%s9884_s5 + $0x588] sm:$0xff]  ;;  %v2662_v8 = vld [vmem:[%s9884_s5 + $0x5a0] sm:$0xff] }
 0x24d   :  { %5812 = vmatprep.subr.bf16.mxu0 %v6991_v13  ;;  %v2483_v13 = vld [vmem:[%s9884_s5 + $0x8] sm:$0xff] }
 0x24e   :  { %v6892_v18 = vcombine.low %v2483_v13, %v2499_v14 }
 0x250   :  { %5813 = vmatpush1.bf16.msra.mxu0 %v6990_v16  ;;  %v6893_v16 = vcombine.high %v2483_v13, %v2499_v14  ;;  %v7059_v13 = vcombine.high %v2646_v7, %v2662_v8  ;;  %v2675_v14 = vld [vmem:[%s9884_s5 + $0x608] sm:$0xff] }
 0x251   :  { %5814 = vmatprep.subr.bf16.mxu0 %v7023_v17  ;;  %v2502_v17 = vld [vmem:[%s9884_s5 + $0xa0] sm:$0xff] }
 0x252   :  { %v6898_v19 = vcombine.low %v2486_v15, %v2502_v17  ;;  %5765 = vmatprep.subr.bf16.mxu1 %v6893_v16  ;;  %v2678_v16 = vld [vmem:[%s9884_s5 + $0x620] sm:$0xff] }
 0x254   :  { %5815 = vmatpush1.bf16.msra.mxu0 %v7022_v20  ;;  %v6899_v20 = vcombine.high %v2486_v15, %v2502_v17  ;;  %v2691_v15 = vld [vmem:[%s9884_s5 + $0x688] sm:$0xff]  ;;  %v2694_v17 = vld [vmem:[%s9884_s5 + $0x6a0] sm:$0xff] }
 0x255   :  { %5816 = vmatprep.subr.bf16.mxu0 %v7055_v21  ;;  %v2066_v21 = vld [vmem:[%s9883_s4] sm:$0x3] }
 0x256   :  { %v2071_v22 = vrot.slane %v2066_v21, %v8162_v56  ;;  %v2075_v24 = vrot.slane %v2066_v21, %v8170_v59  ;;  %v7091_v21 = vcombine.high %v2678_v16, %v2694_v17 }
 0x258   :  { %5817 = vmatpush1.bf16.msra.mxu0 %v7054_v9 }
 0x259   :  { %5818 = vmatprep.subr.bf16.mxu0 %v7087_v27 }
 0x25c   :  { %5819 = vmatpush1.bf16.msra.mxu0 %v7086_v23 }
 0x25d   :  { %5820 = vmatprep.subr.bf16.mxu0 %v7119_v30 }
 0x260   :  { %5821 = vmatpush1.bf16.msra.mxu0 %v7118_v33  ;;  %v2515_v33 = vld [vmem:[%s9884_s5 + $0x108] sm:$0xff] }
 0x261   :  { %5822 = vmatprep.subr.bf16.mxu0 %v7151_v34  ;;  %v2531_v34 = vld [vmem:[%s9884_s5 + $0x188] sm:$0xff] }
 0x262   :  { %v6925_v40 = vcombine.high %v2515_v33, %v2531_v34 }
 0x264   :  { %5823 = vmatpush1.bf16.msra.mxu0 %v7150_v37 }
 0x265   :  { %5824 = vmatprep.subr.bf16.mxu0 %v7183_v38 }
 0x268   :  { %5825 = vmatpush1.bf16.msra.mxu0 %v7182_v41  ;;  %v6931_v41 = vcombine.high %v2518_v35, %v2534_v36 }
 0x269   :  { %5826 = vmatprep.subr.bf16.mxu0 %v7215_v26  ;;  %v2563_v26 = vld [vmem:[%s9884_s5 + $0x288] sm:$0xff] }
 0x26a   :  { %v6957_v46 = vcombine.high %v2547_v39, %v2563_v26 }
 0x26c   :  { %5827 = vmatpush1.bf16.msra.mxu0 %v7214_v44  ;;  %v6924_v44 = vcombine.low %v2515_v33, %v2531_v34  ;;  %v2742_v33 = vld [vmem:[%s9884_s5 + $0x820] sm:$0xff] }
 0x26d   :  { %5828 = vmatprep.subr.bf16.mxu0 %v7247_v45  ;;  %v6930_v45 = vcombine.low %v2518_v35, %v2534_v36  ;;  %v2758_v34 = vld [vmem:[%s9884_s5 + $0x8a0] sm:$0xff] }
 0x270   :  { %5829 = vmatpush1.bf16.msra.mxu0 %v7246_v50  ;;  %v2579_v50 = vld [vmem:[%s9884_s5 + $0x308] sm:$0xff] }
 0x271   :  { %5830 = vmatprep.subr.bf16.mxu0 %v7279_v51  ;;  %v2595_v51 = vld [vmem:[%s9884_s5 + $0x388] sm:$0xff] }
 0x272   :  { %v6988_v1 = vcombine.low %v2579_v50, %v2595_v51 }
 0x274   :  { %5831 = vmatpush1.bf16.msra.mxu0 %v7278_v54  ;;  %v6956_v54 = vcombine.low %v2547_v39, %v2563_v26  ;;  %v2787_v26 = vld [vmem:[%s9884_s5 + $0x988] sm:$0xff] }
 0x275   :  { %5832 = vmatprep.subr.bf16.mxu0 %v7311_v55  ;;  %v6962_v55 = vcombine.low %v2550_v25, %v2566_v42  ;;  %v2774_v25 = vld [vmem:[%s9884_s5 + $0x920] sm:$0xff] }
 0x276   :  { %v2790_v42 = vld [vmem:[%s9884_s5 + $0x9a0] sm:$0xff] }
 0x278   :  { %5833 = vmatpush1.bf16.msra.mxu0 %v7310_v57  ;;  %v6989_v57 = vcombine.high %v2579_v50, %v2595_v51  ;;  %v2803_v50 = vld [vmem:[%s9884_s5 + $0xa08] sm:$0xff] }
 0x279   :  { %5834 = vmatprep.subr.bf16.mxu0 %v7343_v3  ;;  %v7021_v3 = vcombine.high %v2611_v62, %v2627_v63  ;;  %v2819_v51 = vld [vmem:[%s9884_s5 + $0xa88] sm:$0xff] }
 0x27a   :  { %v2835_v62 = vld [vmem:[%s9884_s5 + $0xb08] sm:$0xff] }
 0x27b   :  { %v2851_v63 = vld [vmem:[%s9884_s5 + $0xb88] sm:$0xff] }
 0x27c   :  { %5835 = vmatpush1.bf16.msra.mxu0 %v7342_v2  ;;  %v6994_v2 = vcombine.low %v2582_v52, %v2598_v53  ;;  %v2806_v52 = vld [vmem:[%s9884_s5 + $0xa20] sm:$0xff] }
 0x27d   :  { %5836 = vmatprep.subr.bf16.mxu0 %v7375_v12  ;;  %v7053_v12 = vcombine.high %v2643_v5, %v2659_v6  ;;  %v2822_v53 = vld [vmem:[%s9884_s5 + $0xaa0] sm:$0xff] }
 0x280   :  { %5837 = vmatpush1.bf16.msra.mxu0 %v7374_v11  ;;  %v7026_v11 = vcombine.low %v2614_v58, %v2630_v0  ;;  %v2838_v58 = vld [vmem:[%s9884_s5 + $0xb20] sm:$0xff] }
 0x281   :  { %5888 = vmatprep.subr.bf16.mxu0 %v6899_v20  ;;  %v7085_v20 = vcombine.high %v2675_v14, %v2691_v15  ;;  %v2854_v0 = vld [vmem:[%s9884_s5 + $0xba0] sm:$0xff] }
 0x316   :  { %v2473_v9 = vpop.f32.mrb[4].mxu0 }
 0x317   :  { %v7406_v27 = vadd.f32 %v2473_v9, %v2071_v22  ;;  %v2475_v28 = vpop.f32.mrb[5].mxu0  ;;  %v2707_v22 = vld [vmem:[%s9884_s5 + $0x708] sm:$0xff]  ;;  %v2710_v9 = vld [vmem:[%s9884_s5 + $0x720] sm:$0xff] }
 0x318   :  { %v7407_v29 = vadd.f32 %v2475_v28, %v2075_v24  ;;  %v2477_v23 = vpop.f32.mrb[6].mxu0  ;;  %v2723_v24 = vld [vmem:[%s9884_s5 + $0x788] sm:$0xff]  ;;  %v7084_v28 = vcombine.low %v2675_v14, %v2691_v15 }
 0x319   :  { %v2480_v30 = vmax.f32 %v7406_v27, 0.0  ;;  %v2478_v31 = vpop.f32.mrb[7].mxu0  ;;  %v2726_v27 = vld [vmem:[%s9884_s5 + $0x7a0] sm:$0xff]  ;;  %v7117_v23 = vcombine.high %v2707_v22, %v2723_v24  ;;  %v7116_v35 = vcombine.low %v2707_v22, %v2723_v24  ;;  %v2899_v14 = vld [vmem:[%s9884_s5 + $0xd08] sm:$0xff] }
 0x31a   :  { %v2481_v32 = vmax.f32 %v7407_v29, 0.0  ;;  %v7090_v29 = vcombine.low %v2678_v16, %v2694_v17  ;;  %v2739_v31 = vld [vmem:[%s9884_s5 + $0x808] sm:$0xff]  ;;  %v7122_v36 = vcombine.low %v2710_v9, %v2726_v27  ;;  %v2902_v16 = vld [vmem:[%s9884_s5 + $0xd20] sm:$0xff] }
 0x31b   :  { %v8334_v38 = vpack.c.bf16 %v2480_v30, %v2480_v30  ;;  %v7123_v30 = vcombine.high %v2710_v9, %v2726_v27  ;;  %v2915_v15 = vld [vmem:[%s9884_s5 + $0xd88] sm:$0xff]  ;;  %v2918_v17 = vld [vmem:[%s9884_s5 + $0xda0] sm:$0xff] }
 0x31c   :  { %v8332_v37 = vpack.c.bf16 %v2481_v32, %v2481_v32  ;;  %v2755_v32 = vld [vmem:[%s9884_s5 + $0x888] sm:$0xff]  ;;  %v2934_v9 = vld [vmem:[%s9884_s5 + $0xe20] sm:$0xff] }
 0x31d   :  { %v7149_v39 = vcombine.high %v2739_v31, %v2755_v32  ;;  %v2931_v22 = vld [vmem:[%s9884_s5 + $0xe08] sm:$0xff]  ;;  %v2950_v27 = vld [vmem:[%s9884_s5 + $0xea0] sm:$0xff] }
 0x31e   :  { %5756 = vmatprep.mubr.bf16.mxu1 %v8332_v37  ;;  %5838 = vmatprep.mubr.bf16.mxu0 %v8332_v37  ;;  %v2947_v24 = vld [vmem:[%s9884_s5 + $0xe88] sm:$0xff] }
 0x31f   :  { %5757 = vmatmul.mubr.bf16.vlgmr.msra.gmra.mrb[4].mxu1 %v8334_v38  ;;  %5839 = vmatmul.mubr.bf16.vlgmr.msra.gmra.mrb[8].mxu0 %v8334_v38 }
 0x320   :  { %5766 = vmatpush1.bf16.msra.mxu1 %v6892_v18  ;;  %5889 = vmatpush1.bf16.msra.mxu0 %v6898_v19  ;;  %v7052_v18 = vcombine.low %v2643_v5, %v2659_v6  ;;  %v7058_v19 = vcombine.low %v2646_v7, %v2662_v8  ;;  %v2867_v5 = vld [vmem:[%s9884_s5 + $0xc08] sm:$0xff]  ;;  %v2870_v7 = vld [vmem:[%s9884_s5 + $0xc20] sm:$0xff] }
 0x321   :  { %5797 = vmatprep.mubr.bf16.mxu1 %v8332_v37  ;;  %5920 = vmatprep.mubr.bf16.mxu0 %v8332_v37  ;;  %v2883_v6 = vld [vmem:[%s9884_s5 + $0xc88] sm:$0xff]  ;;  %v2886_v8 = vld [vmem:[%s9884_s5 + $0xca0] sm:$0xff] }
 0x322   :  { %5767 = vmatprep.subr.bf16.mxu1 %v6925_v40  ;;  %5890 = vmatprep.subr.bf16.mxu0 %v6931_v41  ;;  %v7155_v40 = vcombine.high %v2742_v33, %v2758_v34  ;;  %v2771_v41 = vld [vmem:[%s9884_s5 + $0x908] sm:$0xff] }
 0x324   :  { %5768 = vmatpush1.bf16.msra.mxu1 %v6924_v44  ;;  %5891 = vmatpush1.bf16.msra.mxu0 %v6930_v45  ;;  %v7148_v44 = vcombine.low %v2739_v31, %v2755_v32  ;;  %v7154_v45 = vcombine.low %v2742_v33, %v2758_v34  ;;  %v2963_v31 = vld [vmem:[%s9884_s5 + $0xf08] sm:$0xff]  ;;  %v2966_v33 = vld [vmem:[%s9884_s5 + $0xf20] sm:$0xff] }
 0x325   :  { %5769 = vmatprep.subr.bf16.mxu1 %v6957_v46  ;;  %5892 = vmatprep.subr.bf16.mxu0 %v6963_v48  ;;  %v7181_v46 = vcombine.high %v2771_v41, %v2787_v26  ;;  %v7187_v48 = vcombine.high %v2774_v25, %v2790_v42  ;;  %v2979_v32 = vld [vmem:[%s9884_s5 + $0xf88] sm:$0xff]  ;;  %v2982_v34 = vld [vmem:[%s9884_s5 + $0xfa0] sm:$0xff] }
 0x328   :  { %5770 = vmatpush1.bf16.msra.mxu1 %v6956_v54  ;;  %5893 = vmatpush1.bf16.msra.mxu0 %v6962_v55  ;;  %v7180_v54 = vcombine.low %v2771_v41, %v2787_v26  ;;  %v7186_v55 = vcombine.low %v2774_v25, %v2790_v42  ;;  %v2485_v41 = vld [vmem:[%s9884_s5 + $0x18] sm:$0xff]  ;;  %v2488_v25 = vld [vmem:[%s9884_s5 + $0x30] sm:$0xff] }
 0x329   :  { %5771 = vmatprep.subr.bf16.mxu1 %v6989_v57  ;;  %5894 = vmatprep.subr.bf16.mxu0 %v6995_v61  ;;  %v7213_v57 = vcombine.high %v2803_v50, %v2819_v51  ;;  %v7219_v61 = vcombine.high %v2806_v52, %v2822_v53  ;;  %v2501_v26 = vld [vmem:[%s9884_s5 + $0x98] sm:$0xff]  ;;  %v2504_v42 = vld [vmem:[%s9884_s5 + $0xb0] sm:$0xff] }
 0x32c   :  { %5772 = vmatpush1.bf16.msra.mxu1 %v6988_v1  ;;  %5895 = vmatpush1.bf16.msra.mxu0 %v6994_v2  ;;  %v7212_v1 = vcombine.low %v2803_v50, %v2819_v51  ;;  %v7218_v2 = vcombine.low %v2806_v52, %v2822_v53  ;;  %v2517_v50 = vld [vmem:[%s9884_s5 + $0x118] sm:$0xff]  ;;  %v2520_v52 = vld [vmem:[%s9884_s5 + $0x130] sm:$0xff] }
 0x32d   :  { %5773 = vmatprep.subr.bf16.mxu1 %v7021_v3  ;;  %5896 = vmatprep.subr.bf16.mxu0 %v7027_v4  ;;  %v7245_v3 = vcombine.high %v2835_v62, %v2851_v63  ;;  %v7251_v4 = vcombine.high %v2838_v58, %v2854_v0  ;;  %v2533_v51 = vld [vmem:[%s9884_s5 + $0x198] sm:$0xff]  ;;  %v2536_v53 = vld [vmem:[%s9884_s5 + $0x1b0] sm:$0xff] }
 0x330   :  { %5774 = vmatpush1.bf16.msra.mxu1 %v7020_v10  ;;  %5897 = vmatpush1.bf16.msra.mxu0 %v7026_v11  ;;  %v7244_v10 = vcombine.low %v2835_v62, %v2851_v63  ;;  %v7250_v11 = vcombine.low %v2838_v58, %v2854_v0  ;;  %v2549_v62 = vld [vmem:[%s9884_s5 + $0x218] sm:$0xff]  ;;  %v2552_v58 = vld [vmem:[%s9884_s5 + $0x230] sm:$0xff] }
 0x331   :  { %5775 = vmatprep.subr.bf16.mxu1 %v7053_v12  ;;  %5898 = vmatprep.subr.bf16.mxu0 %v7059_v13  ;;  %v7277_v12 = vcombine.high %v2867_v5, %v2883_v6  ;;  %v7283_v13 = vcombine.high %v2870_v7, %v2886_v8  ;;  %v2565_v63 = vld [vmem:[%s9884_s5 + $0x298] sm:$0xff]  ;;  %v2568_v0 = vld [vmem:[%s9884_s5 + $0x2b0] sm:$0xff] }
 0x334   :  { %5776 = vmatpush1.bf16.msra.mxu1 %v7052_v18  ;;  %5899 = vmatpush1.bf16.msra.mxu0 %v7058_v19  ;;  %v7276_v18 = vcombine.low %v2867_v5, %v2883_v6  ;;  %v7282_v19 = vcombine.low %v2870_v7, %v2886_v8  ;;  %v2581_v5 = vld [vmem:[%s9884_s5 + $0x318] sm:$0xff]  ;;  %v2584_v7 = vld [vmem:[%s9884_s5 + $0x330] sm:$0xff] }
 0x335   :  { %5777 = vmatprep.subr.bf16.mxu1 %v7085_v20  ;;  %5900 = vmatprep.subr.bf16.mxu0 %v7091_v21  ;;  %v7309_v20 = vcombine.high %v2899_v14, %v2915_v15  ;;  %v7315_v21 = vcombine.high %v2902_v16, %v2918_v17  ;;  %v2597_v6 = vld [vmem:[%s9884_s5 + $0x398] sm:$0xff]  ;;  %v2600_v8 = vld [vmem:[%s9884_s5 + $0x3b0] sm:$0xff] }
 0x338   :  { %5778 = vmatpush1.bf16.msra.mxu1 %v7084_v28  ;;  %5901 = vmatpush1.bf16.msra.mxu0 %v7090_v29  ;;  %v7308_v28 = vcombine.low %v2899_v14, %v2915_v15  ;;  %v7314_v29 = vcombine.low %v2902_v16, %v2918_v17  ;;  %v2613_v14 = vld [vmem:[%s9884_s5 + $0x418] sm:$0xff]  ;;  %v2616_v16 = vld [vmem:[%s9884_s5 + $0x430] sm:$0xff] }
 0x339   :  { %5779 = vmatprep.subr.bf16.mxu1 %v7117_v23  ;;  %5902 = vmatprep.subr.bf16.mxu0 %v7123_v30  ;;  %v7341_v23 = vcombine.high %v2931_v22, %v2947_v24  ;;  %v7347_v30 = vcombine.high %v2934_v9, %v2950_v27  ;;  %v2629_v15 = vld [vmem:[%s9884_s5 + $0x498] sm:$0xff]  ;;  %v2632_v17 = vld [vmem:[%s9884_s5 + $0x4b0] sm:$0xff] }
 0x33c   :  { %5780 = vmatpush1.bf16.msra.mxu1 %v7116_v35  ;;  %5903 = vmatpush1.bf16.msra.mxu0 %v7122_v36  ;;  %v7340_v35 = vcombine.low %v2931_v22, %v2947_v24  ;;  %v7346_v36 = vcombine.low %v2934_v9, %v2950_v27  ;;  %v2645_v22 = vld [vmem:[%s9884_s5 + $0x518] sm:$0xff]  ;;  %v2648_v9 = vld [vmem:[%s9884_s5 + $0x530] sm:$0xff] }
 0x33d   :  { %5781 = vmatprep.subr.bf16.mxu1 %v7149_v39  ;;  %5904 = vmatprep.subr.bf16.mxu0 %v7155_v40  ;;  %v7373_v39 = vcombine.high %v2963_v31, %v2979_v32  ;;  %v7379_v40 = vcombine.high %v2966_v33, %v2982_v34  ;;  %v2661_v24 = vld [vmem:[%s9884_s5 + $0x598] sm:$0xff]  ;;  %v2664_v27 = vld [vmem:[%s9884_s5 + $0x5b0] sm:$0xff] }
 0x340   :  { %5782 = vmatpush1.bf16.msra.mxu1 %v7148_v44  ;;  %5905 = vmatpush1.bf16.msra.mxu0 %v7154_v45  ;;  %v7372_v44 = vcombine.low %v2963_v31, %v2979_v32  ;;  %v7378_v45 = vcombine.low %v2966_v33, %v2982_v34  ;;  %v2677_v31 = vld [vmem:[%s9884_s5 + $0x618] sm:$0xff]  ;;  %v2680_v33 = vld [vmem:[%s9884_s5 + $0x630] sm:$0xff] }
 0x341   :  { %5783 = vmatprep.subr.bf16.mxu1 %v7181_v46  ;;  %5906 = vmatprep.subr.bf16.mxu0 %v7187_v48  ;;  %v6897_v46 = vcombine.high %v2485_v41, %v2501_v26  ;;  %v6903_v48 = vcombine.high %v2488_v25, %v2504_v42  ;;  %v2693_v32 = vld [vmem:[%s9884_s5 + $0x698] sm:$0xff]  ;;  %v2696_v34 = vld [vmem:[%s9884_s5 + $0x6b0] sm:$0xff] }
 0x344   :  { %5784 = vmatpush1.bf16.msra.mxu1 %v7180_v54  ;;  %5907 = vmatpush1.bf16.msra.mxu0 %v7186_v55  ;;  %v6896_v54 = vcombine.low %v2485_v41, %v2501_v26  ;;  %v6902_v55 = vcombine.low %v2488_v25, %v2504_v42  ;;  %v2709_v41 = vld [vmem:[%s9884_s5 + $0x718] sm:$0xff]  ;;  %v2712_v25 = vld [vmem:[%s9884_s5 + $0x730] sm:$0xff] }
 0x345   :  { %5785 = vmatprep.subr.bf16.mxu1 %v7213_v57  ;;  %5908 = vmatprep.subr.bf16.mxu0 %v7219_v61  ;;  %v6929_v57 = vcombine.high %v2517_v50, %v2533_v51  ;;  %v6935_v61 = vcombine.high %v2520_v52, %v2536_v53  ;;  %v2725_v26 = vld [vmem:[%s9884_s5 + $0x798] sm:$0xff]  ;;  %v2728_v42 = vld [vmem:[%s9884_s5 + $0x7b0] sm:$0xff] }
 0x348   :  { %5786 = vmatpush1.bf16.msra.mxu1 %v7212_v1  ;;  %5909 = vmatpush1.bf16.msra.mxu0 %v7218_v2  ;;  %v6928_v1 = vcombine.low %v2517_v50, %v2533_v51  ;;  %v6934_v2 = vcombine.low %v2520_v52, %v2536_v53  ;;  %v2741_v50 = vld [vmem:[%s9884_s5 + $0x818] sm:$0xff]  ;;  %v2744_v52 = vld [vmem:[%s9884_s5 + $0x830] sm:$0xff] }
 0x349   :  { %5787 = vmatprep.subr.bf16.mxu1 %v7245_v3  ;;  %5910 = vmatprep.subr.bf16.mxu0 %v7251_v4  ;;  %v6961_v3 = vcombine.high %v2549_v62, %v2565_v63  ;;  %v6967_v4 = vcombine.high %v2552_v58, %v2568_v0  ;;  %v2757_v51 = vld [vmem:[%s9884_s5 + $0x898] sm:$0xff]  ;;  %v2760_v53 = vld [vmem:[%s9884_s5 + $0x8b0] sm:$0xff] }
 0x34c   :  { %5788 = vmatpush1.bf16.msra.mxu1 %v7244_v10  ;;  %5911 = vmatpush1.bf16.msra.mxu0 %v7250_v11  ;;  %v6960_v10 = vcombine.low %v2549_v62, %v2565_v63  ;;  %v6966_v11 = vcombine.low %v2552_v58, %v2568_v0  ;;  %v2773_v62 = vld [vmem:[%s9884_s5 + $0x918] sm:$0xff]  ;;  %v2776_v58 = vld [vmem:[%s9884_s5 + $0x930] sm:$0xff] }
 0x34d   :  { %5789 = vmatprep.subr.bf16.mxu1 %v7277_v12  ;;  %5912 = vmatprep.subr.bf16.mxu0 %v7283_v13  ;;  %v6993_v12 = vcombine.high %v2581_v5, %v2597_v6  ;;  %v6999_v13 = vcombine.high %v2584_v7, %v2600_v8  ;;  %v2789_v63 = vld [vmem:[%s9884_s5 + $0x998] sm:$0xff]  ;;  %v2792_v0 = vld [vmem:[%s9884_s5 + $0x9b0] sm:$0xff] }
 0x350   :  { %5790 = vmatpush1.bf16.msra.mxu1 %v7276_v18  ;;  %5913 = vmatpush1.bf16.msra.mxu0 %v7282_v19  ;;  %v6992_v18 = vcombine.low %v2581_v5, %v2597_v6  ;;  %v6998_v19 = vcombine.low %v2584_v7, %v2600_v8  ;;  %v2805_v5 = vld [vmem:[%s9884_s5 + $0xa18] sm:$0xff]  ;;  %v2808_v7 = vld [vmem:[%s9884_s5 + $0xa30] sm:$0xff] }
 0x351   :  { %5791 = vmatprep.subr.bf16.mxu1 %v7309_v20  ;;  %5914 = vmatprep.subr.bf16.mxu0 %v7315_v21  ;;  %v7025_v20 = vcombine.high %v2613_v14, %v2629_v15  ;;  %v7031_v21 = vcombine.high %v2616_v16, %v2632_v17  ;;  %v2821_v6 = vld [vmem:[%s9884_s5 + $0xa98] sm:$0xff]  ;;  %v2824_v8 = vld [vmem:[%s9884_s5 + $0xab0] sm:$0xff] }
 0x354   :  { %5792 = vmatpush1.bf16.msra.mxu1 %v7308_v28  ;;  %5915 = vmatpush1.bf16.msra.mxu0 %v7314_v29  ;;  %v7024_v28 = vcombine.low %v2613_v14, %v2629_v15  ;;  %v7030_v29 = vcombine.low %v2616_v16, %v2632_v17  ;;  %v2837_v14 = vld [vmem:[%s9884_s5 + $0xb18] sm:$0xff]  ;;  %v2840_v16 = vld [vmem:[%s9884_s5 + $0xb30] sm:$0xff] }
 0x355   :  { %5793 = vmatprep.subr.bf16.mxu1 %v7341_v23  ;;  %5916 = vmatprep.subr.bf16.mxu0 %v7347_v30  ;;  %v7057_v23 = vcombine.high %v2645_v22, %v2661_v24  ;;  %v7063_v30 = vcombine.high %v2648_v9, %v2664_v27  ;;  %v2853_v15 = vld [vmem:[%s9884_s5 + $0xb98] sm:$0xff]  ;;  %v2856_v17 = vld [vmem:[%s9884_s5 + $0xbb0] sm:$0xff] }
 0x358   :  { %5794 = vmatpush1.bf16.msra.mxu1 %v7340_v35  ;;  %5917 = vmatpush1.bf16.msra.mxu0 %v7346_v36  ;;  %v7056_v35 = vcombine.low %v2645_v22, %v2661_v24  ;;  %v7062_v36 = vcombine.low %v2648_v9, %v2664_v27  ;;  %v2869_v22 = vld [vmem:[%s9884_s5 + $0xc18] sm:$0xff]  ;;  %v2872_v9 = vld [vmem:[%s9884_s5 + $0xc30] sm:$0xff] }
 0x359   :  { %5795 = vmatprep.subr.bf16.mxu1 %v7373_v39  ;;  %5918 = vmatprep.subr.bf16.mxu0 %v7379_v40  ;;  %v7089_v39 = vcombine.high %v2677_v31, %v2693_v32  ;;  %v7095_v40 = vcombine.high %v2680_v33, %v2696_v34  ;;  %v2885_v24 = vld [vmem:[%s9884_s5 + $0xc98] sm:$0xff]  ;;  %v2888_v27 = vld [vmem:[%s9884_s5 + $0xcb0] sm:$0xff] }
 0x35c   :  { %5796 = vmatpush1.bf16.msra.mxu1 %v7372_v44  ;;  %5919 = vmatpush1.bf16.msra.mxu0 %v7378_v45  ;;  %v7088_v44 = vcombine.low %v2677_v31, %v2693_v32  ;;  %v7094_v45 = vcombine.low %v2680_v33, %v2696_v34  ;;  %v2901_v31 = vld [vmem:[%s9884_s5 + $0xd18] sm:$0xff]  ;;  %v2904_v33 = vld [vmem:[%s9884_s5 + $0xd30] sm:$0xff] }
 0x35d   :  { %5847 = vmatprep.subr.bf16.mxu1 %v6897_v46  ;;  %5970 = vmatprep.subr.bf16.mxu0 %v6903_v48  ;;  %v7121_v46 = vcombine.high %v2709_v41, %v2725_v26  ;;  %v7127_v48 = vcombine.high %v2712_v25, %v2728_v42  ;;  %v2917_v32 = vld [vmem:[%s9884_s5 + $0xd98] sm:$0xff]  ;;  %v2920_v34 = vld [vmem:[%s9884_s5 + $0xdb0] sm:$0xff] }
 0x35f   :  { %5798 = vmatmul.mubr.bf16.vlgmr.msra.gmra.mrb[8].mxu1 %v8334_v38  ;;  %5921 = vmatmul.mubr.bf16.vlgmr.msra.gmra.mrb[12].mxu0 %v8334_v38 }
 0x360   :  { %5848 = vmatpush1.bf16.msra.mxu1 %v6896_v54  ;;  %5879 = vmatprep.mubr.bf16.mxu1 %v8332_v37  ;;  %v7120_v54 = vcombine.low %v2709_v41, %v2725_v26  ;;  %v2933_v41 = vld [vmem:[%s9884_s5 + $0xe18] sm:$0xff] }
 0x361   :  { %5971 = vmatpush1.bf16.msra.mxu0 %v6902_v55  ;;  %6002 = vmatprep.mubr.bf16.mxu0 %v8332_v37  ;;  %v7126_v55 = vcombine.low %v2712_v25, %v2728_v42  ;;  %v2949_v26 = vld [vmem:[%s9884_s5 + $0xe98] sm:$0xff]  ;;  %v2936_v25 = vld [vmem:[%s9884_s5 + $0xe30] sm:$0xff] }
 0x362   :  { %5849 = vmatprep.subr.bf16.mxu1 %v6929_v57  ;;  %5972 = vmatprep.subr.bf16.mxu0 %v6935_v61  ;;  %v7153_v57 = vcombine.high %v2741_v50, %v2757_v51  ;;  %v7159_v61 = vcombine.high %v2744_v52, %v2760_v53  ;;  %v2952_v42 = vld [vmem:[%s9884_s5 + $0xeb0] sm:$0xff] }
 0x364   :  { %5850 = vmatpush1.bf16.msra.mxu1 %v6928_v1  ;;  %v7152_v1 = vcombine.low %v2741_v50, %v2757_v51  ;;  %v2965_v50 = vld [vmem:[%s9884_s5 + $0xf18] sm:$0xff] }
 0x365   :  { %5973 = vmatpush1.bf16.msra.mxu0 %v6934_v2  ;;  %5851 = vmatprep.subr.bf16.mxu1 %v6961_v3  ;;  %v7158_v2 = vcombine.low %v2744_v52, %v2760_v53  ;;  %v7185_v3 = vcombine.high %v2773_v62, %v2789_v63  ;;  %v2981_v51 = vld [vmem:[%s9884_s5 + $0xf98] sm:$0xff]  ;;  %v2968_v52 = vld [vmem:[%s9884_s5 + $0xf30] sm:$0xff] }
 0x366   :  { %5974 = vmatprep.subr.bf16.mxu0 %v6967_v4  ;;  %v7191_v4 = vcombine.high %v2776_v58, %v2792_v0  ;;  %v2984_v53 = vld [vmem:[%s9884_s5 + $0xfb0] sm:$0xff] }
 0x368   :  { %5852 = vmatpush1.bf16.msra.mxu1 %v6960_v10  ;;  %v7184_v10 = vcombine.low %v2773_v62, %v2789_v63  ;;  %v2487_v62 = vld [vmem:[%s9884_s5 + $0x28] sm:$0xff] }
 0x369   :  { %5975 = vmatpush1.bf16.msra.mxu0 %v6966_v11  ;;  %5853 = vmatprep.subr.bf16.mxu1 %v6993_v12  ;;  %v7190_v11 = vcombine.low %v2776_v58, %v2792_v0  ;;  %v7217_v12 = vcombine.high %v2805_v5, %v2821_v6  ;;  %v2503_v63 = vld [vmem:[%s9884_s5 + $0xa8] sm:$0xff]  ;;  %v2490_v58 = vld [vmem:[%s9884_s5 + $0x40] sm:$0xff] }
 0x36a   :  { %5976 = vmatprep.subr.bf16.mxu0 %v6999_v13  ;;  %v7223_v13 = vcombine.high %v2808_v7, %v2824_v8  ;;  %v2506_v0 = vld [vmem:[%s9884_s5 + $0xc0] sm:$0xff] }
 0x36c   :  { %5854 = vmatpush1.bf16.msra.mxu1 %v6992_v18  ;;  %v7216_v18 = vcombine.low %v2805_v5, %v2821_v6  ;;  %v2519_v5 = vld [vmem:[%s9884_s5 + $0x128] sm:$0xff] }
 0x36d   :  { %5977 = vmatpush1.bf16.msra.mxu0 %v6998_v19  ;;  %5855 = vmatprep.subr.bf16.mxu1 %v7025_v20  ;;  %v7222_v19 = vcombine.low %v2808_v7, %v2824_v8  ;;  %v7249_v20 = vcombine.high %v2837_v14, %v2853_v15  ;;  %v2535_v6 = vld [vmem:[%s9884_s5 + $0x1a8] sm:$0xff]  ;;  %v6900_v7 = vcombine.low %v2487_v62, %v2503_v63  ;;  %v2522_v8 = vld [vmem:[%s9884_s5 + $0x140] sm:$0xff] }
 0x36e   :  { %5978 = vmatprep.subr.bf16.mxu0 %v7031_v21  ;;  %v7255_v21 = vcombine.high %v2840_v16, %v2856_v17 }
 0x370   :  { %5856 = vmatpush1.bf16.msra.mxu1 %v7024_v28  ;;  %v7248_v28 = vcombine.low %v2837_v14, %v2853_v15  ;;  %v2567_v14 = vld [vmem:[%s9884_s5 + $0x2a8] sm:$0xff] }
 0x371   :  { %5979 = vmatpush1.bf16.msra.mxu0 %v7030_v29  ;;  %5857 = vmatprep.subr.bf16.mxu1 %v7057_v23  ;;  %v7254_v29 = vcombine.low %v2840_v16, %v2856_v17  ;;  %v7281_v23 = vcombine.high %v2869_v22, %v2885_v24  ;;  %v2554_v16 = vld [vmem:[%s9884_s5 + $0x240] sm:$0xff] }
 0x372   :  { %5980 = vmatprep.subr.bf16.mxu0 %v7063_v30  ;;  %v7287_v30 = vcombine.high %v2872_v9, %v2888_v27  ;;  %v2570_v17 = vld [vmem:[%s9884_s5 + $0x2c0] sm:$0xff] }
 0x374   :  { %5858 = vmatpush1.bf16.msra.mxu1 %v7056_v35  ;;  %v7280_v35 = vcombine.low %v2869_v22, %v2885_v24  ;;  %v2583_v22 = vld [vmem:[%s9884_s5 + $0x328] sm:$0xff] }
 0x375   :  { %5981 = vmatpush1.bf16.msra.mxu0 %v7062_v36  ;;  %5859 = vmatprep.subr.bf16.mxu1 %v7089_v39  ;;  %v7286_v36 = vcombine.low %v2872_v9, %v2888_v27  ;;  %v7313_v39 = vcombine.high %v2901_v31, %v2917_v32  ;;  %v2599_v24 = vld [vmem:[%s9884_s5 + $0x3a8] sm:$0xff]  ;;  %v2586_v9 = vld [vmem:[%s9884_s5 + $0x340] sm:$0xff] }
 0x376   :  { %5982 = vmatprep.subr.bf16.mxu0 %v7095_v40  ;;  %v7319_v40 = vcombine.high %v2904_v33, %v2920_v34  ;;  %v2602_v27 = vld [vmem:[%s9884_s5 + $0x3c0] sm:$0xff] }
 0x378   :  { %5860 = vmatpush1.bf16.msra.mxu1 %v7088_v44  ;;  %v7312_v44 = vcombine.low %v2901_v31, %v2917_v32  ;;  %v2615_v31 = vld [vmem:[%s9884_s5 + $0x428] sm:$0xff] }
 0x379   :  { %5983 = vmatpush1.bf16.msra.mxu0 %v7094_v45  ;;  %5861 = vmatprep.subr.bf16.mxu1 %v7121_v46  ;;  %v7318_v45 = vcombine.low %v2904_v33, %v2920_v34  ;;  %v7345_v46 = vcombine.high %v2933_v41, %v2949_v26  ;;  %v2631_v32 = vld [vmem:[%s9884_s5 + $0x4a8] sm:$0xff]  ;;  %v2618_v33 = vld [vmem:[%s9884_s5 + $0x440] sm:$0xff] }
 0x37a   :  { %5984 = vmatprep.subr.bf16.mxu0 %v7127_v48  ;;  %v7351_v48 = vcombine.high %v2936_v25, %v2952_v42  ;;  %v2634_v34 = vld [vmem:[%s9884_s5 + $0x4c0] sm:$0xff] }
 0x37c   :  { %5862 = vmatpush1.bf16.msra.mxu1 %v7120_v54  ;;  %v7344_v54 = vcombine.low %v2933_v41, %v2949_v26  ;;  %v2647_v41 = vld [vmem:[%s9884_s5 + $0x528] sm:$0xff] }
 0x37d   :  { %5985 = vmatpush1.bf16.msra.mxu0 %v7126_v55  ;;  %5863 = vmatprep.subr.bf16.mxu1 %v7153_v57  ;;  %v7350_v55 = vcombine.low %v2936_v25, %v2952_v42  ;;  %v7377_v57 = vcombine.high %v2965_v50, %v2981_v51  ;;  %v2663_v26 = vld [vmem:[%s9884_s5 + $0x5a8] sm:$0xff]  ;;  %v2650_v25 = vld [vmem:[%s9884_s5 + $0x540] sm:$0xff] }
 0x37e   :  { %5986 = vmatprep.subr.bf16.mxu0 %v7159_v61  ;;  %v7383_v61 = vcombine.high %v2968_v52, %v2984_v53  ;;  %v2666_v42 = vld [vmem:[%s9884_s5 + $0x5c0] sm:$0xff] }
 0x380   :  { %5864 = vmatpush1.bf16.msra.mxu1 %v7152_v1  ;;  %v7376_v1 = vcombine.low %v2965_v50, %v2981_v51  ;;  %v2679_v50 = vld [vmem:[%s9884_s5 + $0x628] sm:$0xff] }
 0x381   :  { %5987 = vmatpush1.bf16.msra.mxu0 %v7158_v2  ;;  %5865 = vmatprep.subr.bf16.mxu1 %v7185_v3  ;;  %v7382_v2 = vcombine.low %v2968_v52, %v2984_v53  ;;  %v6901_v3 = vcombine.high %v2487_v62, %v2503_v63  ;;  %v2695_v51 = vld [vmem:[%s9884_s5 + $0x6a8] sm:$0xff]  ;;  %v2682_v52 = vld [vmem:[%s9884_s5 + $0x640] sm:$0xff] }
 0x382   :  { %5988 = vmatprep.subr.bf16.mxu0 %v7191_v4  ;;  %v6907_v4 = vcombine.high %v2490_v58, %v2506_v0  ;;  %v2698_v53 = vld [vmem:[%s9884_s5 + $0x6c0] sm:$0xff]  ;;  %v2711_v62 = vld [vmem:[%s9884_s5 + $0x728] sm:$0xff] }
 0x383   :  { %v2727_v63 = vld [vmem:[%s9884_s5 + $0x7a8] sm:$0xff] }
 0x384   :  { %5866 = vmatpush1.bf16.msra.mxu1 %v7184_v10  ;;  %v2538_v10 = vld [vmem:[%s9884_s5 + $0x1c0] sm:$0xff] }
 0x385   :  { %5989 = vmatpush1.bf16.msra.mxu0 %v7190_v11  ;;  %5867 = vmatprep.subr.bf16.mxu1 %v7217_v12  ;;  %v6906_v11 = vcombine.low %v2490_v58, %v2506_v0  ;;  %v6933_v12 = vcombine.high %v2519_v5, %v2535_v6  ;;  %v6939_v15 = vcombine.high %v2522_v8, %v2538_v10  ;;  %v2714_v58 = vld [vmem:[%s9884_s5 + $0x740] sm:$0xff] }
 0x386   :  { %5990 = vmatprep.subr.bf16.mxu0 %v7223_v13  ;;  %v2551_v13 = vld [vmem:[%s9884_s5 + $0x228] sm:$0xff]  ;;  %v2730_v0 = vld [vmem:[%s9884_s5 + $0x7c0] sm:$0xff] }
 0x388   :  { %5868 = vmatpush1.bf16.msra.mxu1 %v7216_v18  ;;  %v6932_v18 = vcombine.low %v2519_v5, %v2535_v6  ;;  %v2743_v5 = vld [vmem:[%s9884_s5 + $0x828] sm:$0xff] }
 0x389   :  { %5991 = vmatpush1.bf16.msra.mxu0 %v7222_v19  ;;  %5869 = vmatprep.subr.bf16.mxu1 %v7249_v20  ;;  %v6938_v19 = vcombine.low %v2522_v8, %v2538_v10  ;;  %v6965_v20 = vcombine.high %v2551_v13, %v2567_v14  ;;  %v2759_v6 = vld [vmem:[%s9884_s5 + $0x8a8] sm:$0xff]  ;;  %v2762_v8 = vld [vmem:[%s9884_s5 + $0x8c0] sm:$0xff]  ;;  %v7124_v10 = vcombine.low %v2711_v62, %v2727_v63 }
 0x38a   :  { %5992 = vmatprep.subr.bf16.mxu0 %v7255_v21  ;;  %v6971_v21 = vcombine.high %v2554_v16, %v2570_v17 }
 0x38c   :  { %5870 = vmatpush1.bf16.msra.mxu1 %v7248_v28  ;;  %v6964_v28 = vcombine.low %v2551_v13, %v2567_v14  ;;  %v2775_v14 = vld [vmem:[%s9884_s5 + $0x928] sm:$0xff] }
 0x38d   :  { %5993 = vmatpush1.bf16.msra.mxu0 %v7254_v29  ;;  %5871 = vmatprep.subr.bf16.mxu1 %v7281_v23  ;;  %v6970_v29 = vcombine.low %v2554_v16, %v2570_v17  ;;  %v6997_v23 = vcombine.high %v2583_v22, %v2599_v24  ;;  %v2778_v16 = vld [vmem:[%s9884_s5 + $0x940] sm:$0xff] }
 0x38e   :  { %5994 = vmatprep.subr.bf16.mxu0 %v7287_v30  ;;  %v7003_v30 = vcombine.high %v2586_v9, %v2602_v27  ;;  %v2794_v17 = vld [vmem:[%s9884_s5 + $0x9c0] sm:$0xff] }
 0x390   :  { %5872 = vmatpush1.bf16.msra.mxu1 %v7280_v35  ;;  %v6996_v35 = vcombine.low %v2583_v22, %v2599_v24  ;;  %v2807_v22 = vld [vmem:[%s9884_s5 + $0xa28] sm:$0xff] }
 0x391   :  { %5995 = vmatpush1.bf16.msra.mxu0 %v7286_v36  ;;  %5873 = vmatprep.subr.bf16.mxu1 %v7313_v39  ;;  %v7002_v36 = vcombine.low %v2586_v9, %v2602_v27  ;;  %v7029_v39 = vcombine.high %v2615_v31, %v2631_v32  ;;  %v2823_v24 = vld [vmem:[%s9884_s5 + $0xaa8] sm:$0xff]  ;;  %v2810_v9 = vld [vmem:[%s9884_s5 + $0xa40] sm:$0xff] }
 0x392   :  { %5996 = vmatprep.subr.bf16.mxu0 %v7319_v40  ;;  %v7035_v40 = vcombine.high %v2618_v33, %v2634_v34  ;;  %v2826_v27 = vld [vmem:[%s9884_s5 + $0xac0] sm:$0xff] }
 0x394   :  { %5874 = vmatpush1.bf16.msra.mxu1 %v7312_v44  ;;  %v7028_v44 = vcombine.low %v2615_v31, %v2631_v32  ;;  %v2839_v31 = vld [vmem:[%s9884_s5 + $0xb28] sm:$0xff] }
 0x395   :  { %5997 = vmatpush1.bf16.msra.mxu0 %v7318_v45  ;;  %5875 = vmatprep.subr.bf16.mxu1 %v7345_v46  ;;  %v7034_v45 = vcombine.low %v2618_v33, %v2634_v34  ;;  %v7061_v46 = vcombine.high %v2647_v41, %v2663_v26  ;;  %v2855_v32 = vld [vmem:[%s9884_s5 + $0xba8] sm:$0xff]  ;;  %v2842_v33 = vld [vmem:[%s9884_s5 + $0xb40] sm:$0xff] }
 0x396   :  { %5998 = vmatprep.subr.bf16.mxu0 %v7351_v48  ;;  %v7067_v48 = vcombine.high %v2650_v25, %v2666_v42  ;;  %v2858_v34 = vld [vmem:[%s9884_s5 + $0xbc0] sm:$0xff] }
 0x398   :  { %5876 = vmatpush1.bf16.msra.mxu1 %v7344_v54  ;;  %v7060_v54 = vcombine.low %v2647_v41, %v2663_v26  ;;  %v2871_v41 = vld [vmem:[%s9884_s5 + $0xc28] sm:$0xff] }
 0x399   :  { %5999 = vmatpush1.bf16.msra.mxu0 %v7350_v55  ;;  %5877 = vmatprep.subr.bf16.mxu1 %v7377_v57  ;;  %v7066_v55 = vcombine.low %v2650_v25, %v2666_v42  ;;  %v7093_v57 = vcombine.high %v2679_v50, %v2695_v51  ;;  %v2887_v26 = vld [vmem:[%s9884_s5 + $0xca8] sm:$0xff]  ;;  %v2874_v25 = vld [vmem:[%s9884_s5 + $0xc40] sm:$0xff] }
 0x39a   :  { %6000 = vmatprep.subr.bf16.mxu0 %v7383_v61  ;;  %v7099_v61 = vcombine.high %v2682_v52, %v2698_v53  ;;  %v2890_v42 = vld [vmem:[%s9884_s5 + $0xcc0] sm:$0xff] }
 0x39c   :  { %5878 = vmatpush1.bf16.msra.mxu1 %v7376_v1  ;;  %v7092_v1 = vcombine.low %v2679_v50, %v2695_v51  ;;  %v2903_v50 = vld [vmem:[%s9884_s5 + $0xd28] sm:$0xff] }
 0x39d   :  { %6001 = vmatpush1.bf16.msra.mxu0 %v7382_v2  ;;  %5929 = vmatprep.subr.bf16.mxu1 %v6901_v3  ;;  %v7098_v2 = vcombine.low %v2682_v52, %v2698_v53  ;;  %v7125_v3 = vcombine.high %v2711_v62, %v2727_v63  ;;  %v2919_v51 = vld [vmem:[%s9884_s5 + $0xda8] sm:$0xff]  ;;  %v2906_v52 = vld [vmem:[%s9884_s5 + $0xd40] sm:$0xff] }
 0x39e   :  { %6052 = vmatprep.subr.bf16.mxu0 %v6907_v4  ;;  %v7131_v4 = vcombine.high %v2714_v58, %v2730_v0  ;;  %v2922_v53 = vld [vmem:[%s9884_s5 + $0xdc0] sm:$0xff]  ;;  %v2935_v62 = vld [vmem:[%s9884_s5 + $0xe28] sm:$0xff] }
 0x39f   :  { %5880 = vmatmul.mubr.bf16.vlgmr.msra.gmra.mrb[12].mxu1 %v8334_v38  ;;  %v2951_v63 = vld [vmem:[%s9884_s5 + $0xea8] sm:$0xff] }
 0x3a0   :  { %6003 = vmatmul.mubr.bf16.vlgmr.msra.gmra.mrb[16].mxu0 %v8334_v38  ;;  %5930 = vmatpush1.bf16.msra.mxu1 %v6900_v7  ;;  %v2746_v7 = vld [vmem:[%s9884_s5 + $0x840] sm:$0xff] }
 0x3a1   :  { %5961 = vmatprep.mubr.bf16.mxu1 %v8332_v37  ;;  %6053 = vmatpush1.bf16.msra.mxu0 %v6906_v11  ;;  %v7130_v11 = vcombine.low %v2714_v58, %v2730_v0  ;;  %v7163_v13 = vcombine.high %v2746_v7, %v2762_v8  ;;  %v2938_v58 = vld [vmem:[%s9884_s5 + $0xe40] sm:$0xff] }
 0x3a2   :  { %6084 = vmatprep.mubr.bf16.mxu0 %v8332_v37  ;;  %5931 = vmatprep.subr.bf16.mxu1 %v6933_v12  ;;  %v7157_v12 = vcombine.high %v2743_v5, %v2759_v6  ;;  %v2954_v0 = vld [vmem:[%s9884_s5 + $0xec0] sm:$0xff] }
 0x3a3   :  { %6054 = vmatprep.subr.bf16.mxu0 %v6939_v15  ;;  %v2791_v15 = vld [vmem:[%s9884_s5 + $0x9a8] sm:$0xff] }
 0x3a4   :  { %5932 = vmatpush1.bf16.msra.mxu1 %v6932_v18  ;;  %v7156_v18 = vcombine.low %v2743_v5, %v2759_v6  ;;  %v2967_v5 = vld [vmem:[%s9884_s5 + $0xf28] sm:$0xff] }
 0x3a5   :  { %6055 = vmatpush1.bf16.msra.mxu0 %v6938_v19  ;;  %5933 = vmatprep.subr.bf16.mxu1 %v6965_v20  ;;  %v7162_v19 = vcombine.low %v2746_v7, %v2762_v8  ;;  %v7189_v20 = vcombine.high %v2775_v14, %v2791_v15  ;;  %v2983_v6 = vld [vmem:[%s9884_s5 + $0xfa8] sm:$0xff]  ;;  %v2970_v7 = vld [vmem:[%s9884_s5 + $0xf40] sm:$0xff] }
 0x3a6   :  { %6056 = vmatprep.subr.bf16.mxu0 %v6971_v21  ;;  %v7195_v21 = vcombine.high %v2778_v16, %v2794_v17  ;;  %v2986_v8 = vld [vmem:[%s9884_s5 + $0xfc0] sm:$0xff] }
 0x3a8   :  { %5934 = vmatpush1.bf16.msra.mxu1 %v6964_v28  ;;  %v7188_v28 = vcombine.low %v2775_v14, %v2791_v15  ;;  %v2489_v14 = vld [vmem:[%s9884_s5 + $0x38] sm:$0xff] }
 0x3a9   :  { %6057 = vmatpush1.bf16.msra.mxu0 %v6970_v29  ;;  %5935 = vmatprep.subr.bf16.mxu1 %v6997_v23  ;;  %v7194_v29 = vcombine.low %v2778_v16, %v2794_v17  ;;  %v7221_v23 = vcombine.high %v2807_v22, %v2823_v24  ;;  %v2505_v15 = vld [vmem:[%s9884_s5 + $0xb8] sm:$0xff]  ;;  %v2492_v16 = vld [vmem:[%s9884_s5 + $0x50] sm:$0xff] }
 0x3aa   :  { %6058 = vmatprep.subr.bf16.mxu0 %v7003_v30  ;;  %v7227_v30 = vcombine.high %v2810_v9, %v2826_v27  ;;  %v2508_v17 = vld [vmem:[%s9884_s5 + $0xd0] sm:$0xff] }
 0x3ac   :  { %5936 = vmatpush1.bf16.msra.mxu1 %v6996_v35  ;;  %v7220_v35 = vcombine.low %v2807_v22, %v2823_v24  ;;  %v2521_v22 = vld [vmem:[%s9884_s5 + $0x138] sm:$0xff] }
 0x3ad   :  { %6059 = vmatpush1.bf16.msra.mxu0 %v7002_v36  ;;  %5937 = vmatprep.subr.bf16.mxu1 %v7029_v39  ;;  %v7226_v36 = vcombine.low %v2810_v9, %v2826_v27  ;;  %v7253_v39 = vcombine.high %v2839_v31, %v2855_v32  ;;  %v2537_v24 = vld [vmem:[%s9884_s5 + $0x1b8] sm:$0xff]  ;;  %v6904_v9 = vcombine.low %v2489_v14, %v2505_v15  ;;  %v2524_v27 = vld [vmem:[%s9884_s5 + $0x150] sm:$0xff] }
 0x3ae   :  { %6060 = vmatprep.subr.bf16.mxu0 %v7035_v40  ;;  %v7259_v40 = vcombine.high %v2842_v33, %v2858_v34 }
 0x3b0   :  { %5938 = vmatpush1.bf16.msra.mxu1 %v7028_v44  ;;  %v7252_v44 = vcombine.low %v2839_v31, %v2855_v32  ;;  %v2569_v31 = vld [vmem:[%s9884_s5 + $0x2b8] sm:$0xff] }
 0x3b1   :  { %6061 = vmatpush1.bf16.msra.mxu0 %v7034_v45  ;;  %5939 = vmatprep.subr.bf16.mxu1 %v7061_v46  ;;  %v7258_v45 = vcombine.low %v2842_v33, %v2858_v34  ;;  %v7285_v46 = vcombine.high %v2871_v41, %v2887_v26  ;;  %v2556_v33 = vld [vmem:[%s9884_s5 + $0x250] sm:$0xff] }
 0x3b2   :  { %6062 = vmatprep.subr.bf16.mxu0 %v7067_v48  ;;  %v7291_v48 = vcombine.high %v2874_v25, %v2890_v42  ;;  %v2572_v34 = vld [vmem:[%s9884_s5 + $0x2d0] sm:$0xff] }
 0x3b4   :  { %5940 = vmatpush1.bf16.msra.mxu1 %v7060_v54  ;;  %v7284_v54 = vcombine.low %v2871_v41, %v2887_v26  ;;  %v2585_v41 = vld [vmem:[%s9884_s5 + $0x338] sm:$0xff] }
 0x3b5   :  { %6063 = vmatpush1.bf16.msra.mxu0 %v7066_v55  ;;  %5941 = vmatprep.subr.bf16.mxu1 %v7093_v57  ;;  %v7290_v55 = vcombine.low %v2874_v25, %v2890_v42  ;;  %v7317_v57 = vcombine.high %v2903_v50, %v2919_v51  ;;  %v2601_v26 = vld [vmem:[%s9884_s5 + $0x3b8] sm:$0xff]  ;;  %v2588_v25 = vld [vmem:[%s9884_s5 + $0x350] sm:$0xff] }
 0x3b6   :  { %6064 = vmatprep.subr.bf16.mxu0 %v7099_v61  ;;  %v7323_v61 = vcombine.high %v2906_v52, %v2922_v53  ;;  %v2604_v42 = vld [vmem:[%s9884_s5 + $0x3d0] sm:$0xff] }
 0x3b8   :  { %5942 = vmatpush1.bf16.msra.mxu1 %v7092_v1  ;;  %v7316_v1 = vcombine.low %v2903_v50, %v2919_v51  ;;  %v2617_v50 = vld [vmem:[%s9884_s5 + $0x438] sm:$0xff] }
 0x3b9   :  { %6065 = vmatpush1.bf16.msra.mxu0 %v7098_v2  ;;  %5943 = vmatprep.subr.bf16.mxu1 %v7125_v3  ;;  %v7322_v2 = vcombine.low %v2906_v52, %v2922_v53  ;;  %v7349_v3 = vcombine.high %v2935_v62, %v2951_v63  ;;  %v2633_v51 = vld [vmem:[%s9884_s5 + $0x4b8] sm:$0xff]  ;;  %v2620_v52 = vld [vmem:[%s9884_s5 + $0x450] sm:$0xff] }
 0x3ba   :  { %6066 = vmatprep.subr.bf16.mxu0 %v7131_v4  ;;  %v7355_v4 = vcombine.high %v2938_v58, %v2954_v0  ;;  %v2636_v53 = vld [vmem:[%s9884_s5 + $0x4d0] sm:$0xff] }
 0x3bc   :  { %5944 = vmatpush1.bf16.msra.mxu1 %v7124_v10  ;;  %v7348_v10 = vcombine.low %v2935_v62, %v2951_v63  ;;  %v2649_v62 = vld [vmem:[%s9884_s5 + $0x538] sm:$0xff] }
 0x3bd   :  { %6067 = vmatpush1.bf16.msra.mxu0 %v7130_v11  ;;  %5945 = vmatprep.subr.bf16.mxu1 %v7157_v12  ;;  %v7354_v11 = vcombine.low %v2938_v58, %v2954_v0  ;;  %v7381_v12 = vcombine.high %v2967_v5, %v2983_v6  ;;  %v2665_v63 = vld [vmem:[%s9884_s5 + $0x5b8] sm:$0xff]  ;;  %v8973_v58 = vsub.s32 4, %v8045_v43  ;;  %v2652_v0 = vld [vmem:[%s9884_s5 + $0x550] sm:$0xff] }
 0x3be   :  { %6068 = vmatprep.subr.bf16.mxu0 %v7163_v13  ;;  %v7387_v13 = vcombine.high %v2970_v7, %v2986_v8 }
 0x3c0   :  { %5946 = vmatpush1.bf16.msra.mxu1 %v7156_v18  ;;  %v7380_v18 = vcombine.low %v2967_v5, %v2983_v6  ;;  %v7038_v5 = vcombine.low %v2620_v52, %v2636_v53  ;;  %v7065_v6 = vcombine.high %v2649_v62, %v2665_v63 }
 0x3c1   :  { %6069 = vmatpush1.bf16.msra.mxu0 %v7162_v19  ;;  %5947 = vmatprep.subr.bf16.mxu1 %v7189_v20  ;;  %v7386_v19 = vcombine.low %v2970_v7, %v2986_v8  ;;  %v6905_v20 = vcombine.high %v2489_v14, %v2505_v15  ;;  %v2681_v8 = vld [vmem:[%s9884_s5 + $0x638] sm:$0xff]  ;;  %v2700_v14 = vld [vmem:[%s9884_s5 + $0x6d0] sm:$0xff]  ;;  %v7064_v15 = vcombine.low %v2649_v62, %v2665_v63 }
 0x3c2   :  { %6070 = vmatprep.subr.bf16.mxu0 %v7195_v21  ;;  %v6911_v21 = vcombine.high %v2492_v16, %v2508_v17  ;;  %v2796_v62 = vld [vmem:[%s9884_s5 + $0x9d0] sm:$0xff] }
 0x3c4   :  { %5948 = vmatpush1.bf16.msra.mxu1 %v7188_v28  ;;  %v2540_v28 = vld [vmem:[%s9884_s5 + $0x1d0] sm:$0xff] }
 0x3c5   :  { %6071 = vmatpush1.bf16.msra.mxu0 %v7194_v29  ;;  %5949 = vmatprep.subr.bf16.mxu1 %v7221_v23  ;;  %v6910_v29 = vcombine.low %v2492_v16, %v2508_v17  ;;  %v6937_v23 = vcombine.high %v2521_v22, %v2537_v24  ;;  %v6943_v32 = vcombine.high %v2524_v27, %v2540_v28 }
 0x3c6   :  { %6072 = vmatprep.subr.bf16.mxu0 %v7227_v30  ;;  %v2553_v30 = vld [vmem:[%s9884_s5 + $0x238] sm:$0xff] }
 0x3c8   :  { %5950 = vmatpush1.bf16.msra.mxu1 %v7220_v35  ;;  %v6936_v35 = vcombine.low %v2521_v22, %v2537_v24  ;;  %v2713_v24 = vld [vmem:[%s9884_s5 + $0x738] sm:$0xff] }
 0x3c9   :  { %6073 = vmatpush1.bf16.msra.mxu0 %v7226_v36  ;;  %5951 = vmatprep.subr.bf16.mxu1 %v7253_v39  ;;  %v6942_v36 = vcombine.low %v2524_v27, %v2540_v28  ;;  %v6969_v39 = vcombine.high %v2553_v30, %v2569_v31 }
 0x3ca   :  { %6074 = vmatprep.subr.bf16.mxu0 %v7259_v40  ;;  %v6975_v40 = vcombine.high %v2556_v33, %v2572_v34 }
 0x3cc   :  { %5952 = vmatpush1.bf16.msra.mxu1 %v7252_v44  ;;  %v6968_v44 = vcombine.low %v2553_v30, %v2569_v31  ;;  %v2716_v30 = vld [vmem:[%s9884_s5 + $0x750] sm:$0xff] }
 0x3cd   :  { %6075 = vmatpush1.bf16.msra.mxu0 %v7258_v45  ;;  %5953 = vmatprep.subr.bf16.mxu1 %v7285_v46  ;;  %v6974_v45 = vcombine.low %v2556_v33, %v2572_v34  ;;  %v7001_v46 = vcombine.high %v2585_v41, %v2601_v26  ;;  %v2732_v31 = vld [vmem:[%s9884_s5 + $0x7d0] sm:$0xff] }
 0x3ce   :  { %6076 = vmatprep.subr.bf16.mxu0 %v7291_v48  ;;  %v7007_v48 = vcombine.high %v2588_v25, %v2604_v42 }
 0x3d0   :  { %5954 = vmatpush1.bf16.msra.mxu1 %v7284_v54  ;;  %v7000_v54 = vcombine.low %v2585_v41, %v2601_v26 }
 0x3d1   :  { %6077 = vmatpush1.bf16.msra.mxu0 %v7290_v55  ;;  %5955 = vmatprep.subr.bf16.mxu1 %v7317_v57  ;;  %v7006_v55 = vcombine.low %v2588_v25, %v2604_v42  ;;  %v7033_v57 = vcombine.high %v2617_v50, %v2633_v51 }
 0x3d2   :  { %6078 = vmatprep.subr.bf16.mxu0 %v7323_v61  ;;  %v7039_v61 = vcombine.high %v2620_v52, %v2636_v53  ;;  %v7134_v52 = vcombine.low %v2716_v30, %v2732_v31 }
 0x3d4   :  { %5956 = vmatpush1.bf16.msra.mxu1 %v7316_v1  ;;  %v2668_v1 = vld [vmem:[%s9884_s5 + $0x5d0] sm:$0xff] }
 0x3d5   :  { %6079 = vmatpush1.bf16.msra.mxu0 %v7322_v2  ;;  %5957 = vmatprep.subr.bf16.mxu1 %v7349_v3  ;;  %v7032_v2 = vcombine.low %v2617_v50, %v2633_v51  ;;  %v8984_v3 = vld [vmem:[%s9885_s6] sm:$0xff]  ;;  %v7071_v7 = vcombine.high %v2652_v0, %v2668_v1  ;;  %v2764_v50 = vld [vmem:[%s9884_s5 + $0x8d0] sm:$0xff] }
 0x3d6   :  { %6080 = vmatprep.subr.bf16.mxu0 %v7355_v4  ;;  %v8987_v4 = vsub.s32 5, %v8045_v43  ;;  %v3011_v16 = vrot.slane %v8984_v3, %v8170_v59 }
 0x3d8   :  { %5958 = vmatpush1.bf16.msra.mxu1 %v7348_v10  ;;  %v2697_v10 = vld [vmem:[%s9884_s5 + $0x6b8] sm:$0xff]  ;;  %v3027_v17 = vrot.slane %v8984_v3, %v8987_v4 }
 0x3d9   :  { %6081 = vmatpush1.bf16.msra.mxu0 %v7354_v11  ;;  %5959 = vmatprep.subr.bf16.mxu1 %v7381_v12  ;;  %v3007_v11 = vrot.slane %v8984_v3, %v8162_v56  ;;  %v3023_v12 = vrot.slane %v8984_v3, %v8973_v58 }
 0x3da   :  { %6082 = vmatprep.subr.bf16.mxu0 %v7387_v13  ;;  %v2684_v13 = vld [vmem:[%s9884_s5 + $0x650] sm:$0xff] }
 0x3db   :  { %v7103_v22 = vcombine.high %v2684_v13, %v2700_v14  ;;  %v7102_v41 = vcombine.low %v2684_v13, %v2700_v14  ;;  %v2841_v14 = vld [vmem:[%s9884_s5 + $0xb38] sm:$0xff] }
 0x3dc   :  { %5960 = vmatpush1.bf16.msra.mxu1 %v7380_v18  ;;  %v7070_v18 = vcombine.low %v2652_v0, %v2668_v1 }
 0x3dd   :  { %6083 = vmatpush1.bf16.msra.mxu0 %v7386_v19  ;;  %6011 = vmatprep.subr.bf16.mxu1 %v6905_v20  ;;  %v7097_v19 = vcombine.high %v2681_v8, %v2697_v10 }
 0x3de   :  { %6134 = vmatprep.subr.bf16.mxu0 %v6911_v21 }
 0x3df   :  { %5962 = vmatmul.mubr.bf16.vlgmr.msra.gmra.mrb[16].mxu1 %v8334_v38 }
 0x3e0   :  { %6085 = vmatmul.mubr.bf16.vlgmr.msra.gmra.mrb[20].mxu0 %v8334_v38  ;;  %6012 = vmatpush1.bf16.msra.mxu1 %v6904_v9  ;;  %v2729_v9 = vld [vmem:[%s9884_s5 + $0x7b8] sm:$0xff] }
 0x3e1   :  { %6043 = vmatprep.mubr.bf16.mxu1 %v8332_v37  ;;  %6135 = vmatpush1.bf16.msra.mxu0 %v6910_v29  ;;  %v7129_v26 = vcombine.high %v2713_v24, %v2729_v9  ;;  %v7128_v51 = vcombine.low %v2713_v24, %v2729_v9  ;;  %v2889_v24 = vld [vmem:[%s9884_s5 + $0xcb8] sm:$0xff]  ;;  %v2876_v9 = vld [vmem:[%s9884_s5 + $0xc50] sm:$0xff] }
 0x3e2   :  { %6166 = vmatprep.mubr.bf16.mxu0 %v8332_v37  ;;  %6013 = vmatprep.subr.bf16.mxu1 %v6937_v23 }
 0x3e3   :  { %6136 = vmatprep.subr.bf16.mxu0 %v6943_v32 }
 0x3e4   :  { %6014 = vmatpush1.bf16.msra.mxu1 %v6936_v35 }
 0x3e5   :  { %6137 = vmatpush1.bf16.msra.mxu0 %v6942_v36  ;;  %6015 = vmatprep.subr.bf16.mxu1 %v6969_v39  ;;  %v7096_v36 = vcombine.low %v2681_v8, %v2697_v10  ;;  %v2828_v8 = vld [vmem:[%s9884_s5 + $0xad0] sm:$0xff] }
 0x3e6   :  { %6138 = vmatprep.subr.bf16.mxu0 %v6975_v40 }
 0x3e8   :  { %6016 = vmatpush1.bf16.msra.mxu1 %v6968_v44  ;;  %v7135_v44 = vcombine.high %v2716_v30, %v2732_v31 }
 0x3e9   :  { %6139 = vmatpush1.bf16.msra.mxu0 %v6974_v45  ;;  %6017 = vmatprep.subr.bf16.mxu1 %v7001_v46  ;;  %v2745_v45 = vld [vmem:[%s9884_s5 + $0x838] sm:$0xff] }
 0x3ea   :  { %6140 = vmatprep.subr.bf16.mxu0 %v7007_v48  ;;  %v2761_v46 = vld [vmem:[%s9884_s5 + $0x8b8] sm:$0xff]  ;;  %v2748_v48 = vld [vmem:[%s9884_s5 + $0x850] sm:$0xff] }
 0x3eb   :  { %v7161_v53 = vcombine.high %v2745_v45, %v2761_v46  ;;  %v7160_v63 = vcombine.low %v2745_v45, %v2761_v46  ;;  %v7166_v0 = vcombine.low %v2748_v48, %v2764_v50  ;;  %v2937_v46 = vld [vmem:[%s9884_s5 + $0xe38] sm:$0xff] }
 0x3ec   :  { %6018 = vmatpush1.bf16.msra.mxu1 %v7000_v54  ;;  %v7167_v54 = vcombine.high %v2748_v48, %v2764_v50  ;;  %v2953_v48 = vld [vmem:[%s9884_s5 + $0xeb8] sm:$0xff]  ;;  %v2940_v50 = vld [vmem:[%s9884_s5 + $0xe50] sm:$0xff] }
 0x3ed   :  { %6141 = vmatpush1.bf16.msra.mxu0 %v7006_v55  ;;  %6019 = vmatprep.subr.bf16.mxu1 %v7033_v57  ;;  %v2777_v55 = vld [vmem:[%s9884_s5 + $0x938] sm:$0xff] }
 0x3ee   :  { %6142 = vmatprep.subr.bf16.mxu0 %v7039_v61  ;;  %v2793_v57 = vld [vmem:[%s9884_s5 + $0x9b8] sm:$0xff]  ;;  %v2780_v61 = vld [vmem:[%s9884_s5 + $0x950] sm:$0xff] }
 0x3ef   :  { %v7193_v1 = vcombine.high %v2777_v55, %v2793_v57  ;;  %v7192_v10 = vcombine.low %v2777_v55, %v2793_v57  ;;  %v2969_v57 = vld [vmem:[%s9884_s5 + $0xf38] sm:$0xff] }
 0x3f0   :  { %6020 = vmatpush1.bf16.msra.mxu1 %v7032_v2  ;;  %v7199_v2 = vcombine.high %v2780_v61, %v2796_v62 }
 0x3f1   :  { %6143 = vmatpush1.bf16.msra.mxu0 %v7038_v5  ;;  %6021 = vmatprep.subr.bf16.mxu1 %v7065_v6  ;;  %v2809_v5 = vld [vmem:[%s9884_s5 + $0xa38] sm:$0xff] }
 0x3f2   :  { %v5758_v20 = vpop.f32.mrb[4].mxu1  ;;  %v5840_v21 = vpop.f32.mrb[8].mxu0  ;;  %6144 = vmatprep.subr.bf16.mxu0 %v7071_v7  ;;  %v2825_v6 = vld [vmem:[%s9884_s5 + $0xab8] sm:$0xff]  ;;  %v2812_v7 = vld [vmem:[%s9884_s5 + $0xa50] sm:$0xff] }
 0x3f3   :  { %v9015_v27 = vadd.f32 %v5758_v20, %v3007_v11  ;;  %v9017_v28 = vadd.f32 %v5840_v21, %v3023_v12  ;;  %v5760_v29 = vpop.f32.mrb[5].mxu1  ;;  %v5842_v23 = vpop.f32.mrb[9].mxu0  ;;  %v7198_v11 = vcombine.low %v2780_v61, %v2796_v62  ;;  %v7225_v12 = vcombine.high %v2809_v5, %v2825_v6  ;;  %v2985_v61 = vld [vmem:[%s9884_s5 + $0xfb8] sm:$0xff]  ;;  %v2972_v62 = vld [vmem:[%s9884_s5 + $0xf50] sm:$0xff] }
 0x3f4   :  { %v9025_v32 = vadd.f32 %v5760_v29, %v3011_v16  ;;  %v9027_v33 = vadd.f32 %v5842_v23, %v3027_v17  ;;  %6022 = vmatpush1.bf16.msra.mxu1 %v7064_v15  ;;  %v5762_v34 = vpop.f32.mrb[6].mxu1  ;;  %v5844_v35 = vpop.f32.mrb[10].mxu0  ;;  %v7231_v13 = vcombine.high %v2812_v7, %v2828_v8  ;;  %v2857_v15 = vld [vmem:[%s9884_s5 + $0xbb8] sm:$0xff]  ;;  %v2844_v16 = vld [vmem:[%s9884_s5 + $0xb50] sm:$0xff] }
 0x3f5   :  { %6145 = vmatpush1.bf16.msra.mxu0 %v7070_v18  ;;  %v5763_v39 = vpop.f32.mrb[7].mxu1  ;;  %v5845_v40 = vpop.f32.mrb[11].mxu0  ;;  %6023 = vmatprep.subr.bf16.mxu1 %v7097_v19  ;;  %v2860_v17 = vld [vmem:[%s9884_s5 + $0xbd0] sm:$0xff]  ;;  %v7224_v18 = vcombine.low %v2809_v5, %v2825_v6  ;;  %v7230_v19 = vcombine.low %v2812_v7, %v2828_v8  ;;  %v7257_v20 = vcombine.high %v2841_v14, %v2857_v15  ;;  %v2905_v35 = vld [vmem:[%s9884_s5 + $0xd38] sm:$0xff]  ;;  %v2491_v6 = vld [vmem:[%s9884_s5 + $0x48] sm:$0xff] }
 0x3f6   :  { %v6412_v25 = vcombine.low %v9015_v27, %v9025_v32  ;;  %v6429_v42 = vcombine.low %v9017_v28, %v9027_v33  ;;  %6146 = vmatprep.subr.bf16.mxu0 %v7103_v22  ;;  %v7263_v21 = vcombine.high %v2844_v16, %v2860_v17  ;;  %v2873_v22 = vld [vmem:[%s9884_s5 + $0xc38] sm:$0xff]  ;;  %v2892_v29 = vld [vmem:[%s9884_s5 + $0xcd0] sm:$0xff]  ;;  %v7256_v23 = vcombine.low %v2841_v14, %v2857_v15  ;;  %v2507_v7 = vld [vmem:[%s9884_s5 + $0xc8] sm:$0xff] }
 0x3f7   :  { %v7262_v30 = vcombine.low %v2844_v16, %v2860_v17  ;;  %v7289_v31 = vcombine.high %v2873_v22, %v2889_v24  ;;  %v7295_v34 = vcombine.high %v2876_v9, %v2892_v29  ;;  %v2908_v39 = vld [vmem:[%s9884_s5 + $0xd50] sm:$0xff]  ;;  %v2494_v8 = vld [vmem:[%s9884_s5 + $0x60] sm:$0xff]  ;;  %v2523_v15 = vld [vmem:[%s9884_s5 + $0x148] sm:$0xff]  ;;  %v6908_v17 = vcombine.low %v2491_v6, %v2507_v7 }
 0x3f8   :  { %6024 = vmatpush1.bf16.msra.mxu1 %v7096_v36  ;;  %v2921_v36 = vld [vmem:[%s9884_s5 + $0xdb8] sm:$0xff]  ;;  %v2924_v40 = vld [vmem:[%s9884_s5 + $0xdd0] sm:$0xff]  ;;  %v2539_v16 = vld [vmem:[%s9884_s5 + $0x1c8] sm:$0xff] }
 0x3f9   :  { %6147 = vmatpush1.bf16.msra.mxu0 %v7102_v41  ;;  %6025 = vmatprep.subr.bf16.mxu1 %v7129_v26  ;;  %v7288_v41 = vcombine.low %v2873_v22, %v2889_v24  ;;  %v7294_v26 = vcombine.low %v2876_v9, %v2892_v29  ;;  %v7327_v45 = vcombine.high %v2908_v39, %v2924_v40  ;;  %v2555_v22 = vld [vmem:[%s9884_s5 + $0x248] sm:$0xff]  ;;  %v2558_v29 = vld [vmem:[%s9884_s5 + $0x260] sm:$0xff]  ;;  %v2797_v28 = vld [vmem:[%s9884_s5 + $0x9d8] sm:$0xff] }
 0x3fa   :  { %6148 = vmatprep.subr.bf16.mxu0 %v7135_v44  ;;  %v7321_v44 = vcombine.high %v2905_v35, %v2921_v36  ;;  %v2571_v24 = vld [vmem:[%s9884_s5 + $0x2c8] sm:$0xff]  ;;  %v2782_v32 = vld [vmem:[%s9884_s5 + $0x960] sm:$0xff]  ;;  %v2784_v33 = vld [vmem:[%s9884_s5 + $0x970] sm:$0xff] }
 0x3fb   :  { %v2795_v27 = vld [vmem:[%s9884_s5 + $0x9c8] sm:$0xff] }
 0x3fc   :  { %6026 = vmatpush1.bf16.msra.mxu1 %v7128_v51  ;;  %v2956_v51 = vld [vmem:[%s9884_s5 + $0xed0] sm:$0xff] }
 0x3fd   :  { %6149 = vmatpush1.bf16.msra.mxu0 %v7134_v52  ;;  %6027 = vmatprep.subr.bf16.mxu1 %v7161_v53  ;;  %v7320_v52 = vcombine.low %v2905_v35, %v2921_v36  ;;  %v7326_v53 = vcombine.low %v2908_v39, %v2924_v40  ;;  %v7359_v55 = vcombine.high %v2940_v50, %v2956_v51  ;;  %v2587_v36 = vld [vmem:[%s9884_s5 + $0x348] sm:$0xff]  ;;  %v2590_v40 = vld [vmem:[%s9884_s5 + $0x360] sm:$0xff] }
 0x3fe   :  { %6150 = vmatprep.subr.bf16.mxu0 %v7167_v54  ;;  %v7353_v54 = vcombine.high %v2937_v46, %v2953_v48  ;;  %v2603_v39 = vld [vmem:[%s9884_s5 + $0x3c8] sm:$0xff] }
 0x400   :  { %6028 = vmatpush1.bf16.msra.mxu1 %v7160_v63  ;;  %v2988_v63 = vld [vmem:[%s9884_s5 + $0xfd0] sm:$0xff] }
 0x401   :  { %6151 = vmatpush1.bf16.msra.mxu0 %v7166_v0  ;;  %6029 = vmatprep.subr.bf16.mxu1 %v7193_v1  ;;  %v7352_v0 = vcombine.low %v2937_v46, %v2953_v48  ;;  %v7358_v1 = vcombine.low %v2940_v50, %v2956_v51  ;;  %v7391_v5 = vcombine.high %v2972_v62, %v2988_v63  ;;  %v2619_v48 = vld [vmem:[%s9884_s5 + $0x448] sm:$0xff]  ;;  %v2622_v51 = vld [vmem:[%s9884_s5 + $0x460] sm:$0xff] }
 0x402   :  { %6152 = vmatprep.subr.bf16.mxu0 %v7199_v2  ;;  %v7385_v2 = vcombine.high %v2969_v57, %v2985_v61  ;;  %v2635_v50 = vld [vmem:[%s9884_s5 + $0x4c8] sm:$0xff] }
 0x404   :  { %6030 = vmatpush1.bf16.msra.mxu1 %v7192_v10  ;;  %v2510_v10 = vld [vmem:[%s9884_s5 + $0xe0] sm:$0xff] }
 0x405   :  { %6153 = vmatpush1.bf16.msra.mxu0 %v7198_v11  ;;  %6031 = vmatprep.subr.bf16.mxu1 %v7225_v12  ;;  %v7384_v11 = vcombine.low %v2969_v57, %v2985_v61  ;;  %v7390_v12 = vcombine.low %v2972_v62, %v2988_v63  ;;  %v6915_v14 = vcombine.high %v2494_v8, %v2510_v10  ;;  %v2651_v61 = vld [vmem:[%s9884_s5 + $0x548] sm:$0xff]  ;;  %v2654_v63 = vld [vmem:[%s9884_s5 + $0x560] sm:$0xff] }
 0x406   :  { %6154 = vmatprep.subr.bf16.mxu0 %v7231_v13  ;;  %v6909_v13 = vcombine.high %v2491_v6, %v2507_v7  ;;  %v2667_v62 = vld [vmem:[%s9884_s5 + $0x5c8] sm:$0xff] }
 0x407   :  { %v7069_v6 = vcombine.high %v2651_v61, %v2667_v62 }
 0x408   :  { %6032 = vmatpush1.bf16.msra.mxu1 %v7224_v18  ;;  %v2526_v18 = vld [vmem:[%s9884_s5 + $0x160] sm:$0xff] }
 0x409   :  { %6155 = vmatpush1.bf16.msra.mxu0 %v7230_v19  ;;  %6033 = vmatprep.subr.bf16.mxu1 %v7257_v20  ;;  %v2542_v19 = vld [vmem:[%s9884_s5 + $0x1e0] sm:$0xff]  ;;  %v6914_v20 = vcombine.low %v2494_v8, %v2510_v10  ;;  %v2683_v8 = vld [vmem:[%s9884_s5 + $0x648] sm:$0xff] }
 0x40a   :  { %6156 = vmatprep.subr.bf16.mxu0 %v7263_v21  ;;  %v6941_v21 = vcombine.high %v2523_v15, %v2539_v16  ;;  %v6947_v9 = vcombine.high %v2526_v18, %v2542_v19  ;;  %v2699_v10 = vld [vmem:[%s9884_s5 + $0x6c8] sm:$0xff] }
 0x40c   :  { %6034 = vmatpush1.bf16.msra.mxu1 %v7256_v23  ;;  %v2574_v23 = vld [vmem:[%s9884_s5 + $0x2e0] sm:$0xff] }
 0x40d   :  { %6157 = vmatpush1.bf16.msra.mxu0 %v7262_v30  ;;  %6035 = vmatprep.subr.bf16.mxu1 %v7289_v31  ;;  %v6940_v30 = vcombine.low %v2523_v15, %v2539_v16  ;;  %v6946_v31 = vcombine.low %v2526_v18, %v2542_v19  ;;  %v6979_v35 = vcombine.high %v2558_v29, %v2574_v23 }
 0x40e   :  { %6158 = vmatprep.subr.bf16.mxu0 %v7295_v34  ;;  %v6973_v34 = vcombine.high %v2555_v22, %v2571_v24  ;;  %v3019_v15 = vrot.slane %v8984_v3, %v8173_v60  ;;  %v7101_v19 = vcombine.high %v2683_v8, %v2699_v10 }
 0x410   :  { %6036 = vmatpush1.bf16.msra.mxu1 %v7288_v41  ;;  %v2606_v41 = vld [vmem:[%s9884_s5 + $0x3e0] sm:$0xff] }
 0x411   :  { %6159 = vmatpush1.bf16.msra.mxu0 %v7294_v26  ;;  %6037 = vmatprep.subr.bf16.mxu1 %v7321_v44  ;;  %v6972_v26 = vcombine.low %v2555_v22, %v2571_v24  ;;  %v6978_v44 = vcombine.low %v2558_v29, %v2574_v23  ;;  %v7011_v46 = vcombine.high %v2590_v40, %v2606_v41  ;;  %v2715_v24 = vld [vmem:[%s9884_s5 + $0x748] sm:$0xff] }
 0x412   :  { %6160 = vmatprep.subr.bf16.mxu0 %v7327_v45  ;;  %v7005_v45 = vcombine.high %v2587_v36, %v2603_v39 }
 0x414   :  { %6038 = vmatpush1.bf16.msra.mxu1 %v7320_v52  ;;  %v2638_v52 = vld [vmem:[%s9884_s5 + $0x4e0] sm:$0xff] }
 0x415   :  { %6161 = vmatpush1.bf16.msra.mxu0 %v7326_v53  ;;  %6039 = vmatprep.subr.bf16.mxu1 %v7353_v54  ;;  %v7004_v53 = vcombine.low %v2587_v36, %v2603_v39  ;;  %v7010_v54 = vcombine.low %v2590_v40, %v2606_v41  ;;  %v7043_v57 = vcombine.high %v2622_v51, %v2638_v52 }
 0x416   :  { %6162 = vmatprep.subr.bf16.mxu0 %v7359_v55  ;;  %v7037_v55 = vcombine.high %v2619_v48, %v2635_v50 }
 0x418   :  { %6040 = vmatpush1.bf16.msra.mxu1 %v7352_v0  ;;  %v2670_v0 = vld [vmem:[%s9884_s5 + $0x5e0] sm:$0xff] }
 0x419   :  { %6163 = vmatpush1.bf16.msra.mxu0 %v7358_v1  ;;  %6041 = vmatprep.subr.bf16.mxu1 %v7385_v2  ;;  %v7036_v1 = vcombine.low %v2619_v48, %v2635_v50  ;;  %v9208_v2 = vld [vmem:[%s9885_s6 + $0x8] sm:$0xff]  ;;  %v7075_v7 = vcombine.high %v2654_v63, %v2670_v0  ;;  %v7074_v18 = vcombine.low %v2654_v63, %v2670_v0 }
 0x41a   :  { %6164 = vmatprep.subr.bf16.mxu0 %v7391_v5  ;;  %v7042_v5 = vcombine.low %v2622_v51, %v2638_v52  ;;  %v3043_v16 = vrot.slane %v9208_v2, %v8170_v59 }
 0x41c   :  { %6042 = vmatpush1.bf16.msra.mxu1 %v7384_v11  ;;  %v3015_v11 = vrot.slane %v8984_v3, %v8190_v47 }
 0x41d   :  { %6165 = vmatpush1.bf16.msra.mxu0 %v7390_v12  ;;  %6093 = vmatprep.subr.bf16.mxu1 %v6909_v13  ;;  %v3039_v12 = vrot.slane %v9208_v2, %v8162_v56  ;;  %v2686_v13 = vld [vmem:[%s9884_s5 + $0x660] sm:$0xff] }
 0x41e   :  { %6216 = vmatprep.subr.bf16.mxu0 %v6915_v14  ;;  %v2702_v14 = vld [vmem:[%s9884_s5 + $0x6e0] sm:$0xff] }
 0x41f   :  { %6044 = vmatmul.mubr.bf16.vlgmr.msra.gmra.mrb[20].mxu1 %v8334_v38  ;;  %v7107_v22 = vcombine.high %v2686_v13, %v2702_v14 }
 0x420   :  { %6167 = vmatmul.mubr.bf16.vlgmr.msra.gmra.mrb[24].mxu0 %v8334_v38  ;;  %6094 = vmatpush1.bf16.msra.mxu1 %v6908_v17  ;;  %v7068_v17 = vcombine.low %v2651_v61, %v2667_v62  ;;  %v6420_v61 = vrot.slane %v6412_v25, %v8048_v49  ;;  %v2798_v25 = vld [vmem:[%s9884_s5 + $0x9e0] sm:$0xff] }
 0x421   :  { %6125 = vmatprep.mubr.bf16.mxu1 %v8332_v37  ;;  %6217 = vmatpush1.bf16.msra.mxu0 %v6914_v20 }
 0x422   :  { %6248 = vmatprep.mubr.bf16.mxu0 %v8332_v37  ;;  %6095 = vmatprep.subr.bf16.mxu1 %v6941_v21 }
 0x423   :  { %6218 = vmatprep.subr.bf16.mxu0 %v6947_v9  ;;  %v2731_v9 = vld [vmem:[%s9884_s5 + $0x7c8] sm:$0xff] }
 0x424   :  { %6096 = vmatpush1.bf16.msra.mxu1 %v6940_v30  ;;  %v7133_v48 = vcombine.high %v2715_v24, %v2731_v9  ;;  %v7132_v63 = vcombine.low %v2715_v24, %v2731_v9  ;;  %v2846_v24 = vld [vmem:[%s9884_s5 + $0xb60] sm:$0xff] }
 0x425   :  { %6219 = vmatpush1.bf16.msra.mxu0 %v6946_v31  ;;  %6097 = vmatprep.subr.bf16.mxu1 %v6973_v34  ;;  %v2718_v34 = vld [vmem:[%s9884_s5 + $0x760] sm:$0xff] }
 0x426   :  { %6220 = vmatprep.subr.bf16.mxu0 %v6979_v35  ;;  %v2734_v35 = vld [vmem:[%s9884_s5 + $0x7e0] sm:$0xff] }
 0x427   :  { %v7139_v52 = vcombine.high %v2718_v34, %v2734_v35  ;;  %v7138_v0 = vcombine.low %v2718_v34, %v2734_v35  ;;  %v2862_v9 = vld [vmem:[%s9884_s5 + $0xbe0] sm:$0xff]  ;;  %v2875_v35 = vld [vmem:[%s9884_s5 + $0xc48] sm:$0xff] }
 0x428   :  { %6098 = vmatpush1.bf16.msra.mxu1 %v6972_v26  ;;  %v7100_v26 = vcombine.low %v2683_v8, %v2699_v10  ;;  %v7267_v34 = vcombine.high %v2846_v24, %v2862_v9 }
 0x429   :  { %6221 = vmatpush1.bf16.msra.mxu0 %v6978_v44  ;;  %6099 = vmatprep.subr.bf16.mxu1 %v7005_v45 }
 0x42a   :  { %6222 = vmatprep.subr.bf16.mxu0 %v7011_v46  ;;  %v7106_v46 = vcombine.low %v2686_v13, %v2702_v14  ;;  %v2811_v13 = vld [vmem:[%s9884_s5 + $0xa48] sm:$0xff] }
 0x42b   :  { %v2827_v14 = vld [vmem:[%s9884_s5 + $0xac8] sm:$0xff] }
 0x42c   :  { %6100 = vmatpush1.bf16.msra.mxu1 %v7004_v53  ;;  %v2747_v53 = vld [vmem:[%s9884_s5 + $0x848] sm:$0xff] }
 0x42d   :  { %6223 = vmatpush1.bf16.msra.mxu0 %v7010_v54  ;;  %6101 = vmatprep.subr.bf16.mxu1 %v7037_v55  ;;  %v2763_v54 = vld [vmem:[%s9884_s5 + $0x8c8] sm:$0xff]  ;;  %v2750_v55 = vld [vmem:[%s9884_s5 + $0x860] sm:$0xff] }
 0x42e   :  { %6224 = vmatprep.subr.bf16.mxu0 %v7043_v57  ;;  %v2766_v57 = vld [vmem:[%s9884_s5 + $0x8e0] sm:$0xff]  ;;  %v7164_v8 = vcombine.low %v2747_v53, %v2763_v54 }
 0x42f   :  { %v7170_v10 = vcombine.low %v2750_v55, %v2766_v57 }
 0x430   :  { %6102 = vmatpush1.bf16.msra.mxu1 %v7036_v1  ;;  %v7165_v1 = vcombine.high %v2747_v53, %v2763_v54  ;;  %v2926_v53 = vld [vmem:[%s9884_s5 + $0xde0] sm:$0xff] }
 0x431   :  { %6225 = vmatpush1.bf16.msra.mxu0 %v7042_v5  ;;  %6103 = vmatprep.subr.bf16.mxu1 %v7069_v6  ;;  %v7171_v6 = vcombine.high %v2750_v55, %v2766_v57 }
 0x432   :  { %v5799_v20 = vpop.f32.mrb[8].mxu1  ;;  %v5922_v21 = vpop.f32.mrb[12].mxu0  ;;  %6226 = vmatprep.subr.bf16.mxu0 %v7075_v7  ;;  %v2779_v7 = vld [vmem:[%s9884_s5 + $0x948] sm:$0xff] }
 0x433   :  { %v5800_v29 = vadd.f32 %v5799_v20, %v3015_v11  ;;  %v9236_v23 = vadd.f32 %v5922_v21, %v3039_v12  ;;  %v5801_v30 = vpop.f32.mrb[9].mxu1  ;;  %v5924_v31 = vpop.f32.mrb[13].mxu0  ;;  %v7197_v11 = vcombine.high %v2779_v7, %v2795_v27  ;;  %v7203_v12 = vcombine.high %v2782_v32, %v2798_v25  ;;  %v2843_v21 = vld [vmem:[%s9884_s5 + $0xb48] sm:$0xff] }
 0x434   :  { %v5802_v36 = vadd.f32 %v5801_v30, %v3019_v15  ;;  %v9244_v39 = vadd.f32 %v5924_v31, %v3043_v16  ;;  %v5803_v40 = vpop.f32.mrb[10].mxu1  ;;  %v5926_v41 = vpop.f32.mrb[14].mxu0  ;;  %6104 = vmatpush1.bf16.msra.mxu1 %v7068_v17  ;;  %v2814_v15 = vld [vmem:[%s9884_s5 + $0xa60] sm:$0xff]  ;;  %v7196_v17 = vcombine.low %v2779_v7, %v2795_v27 }
 0x435   :  { %6227 = vmatpush1.bf16.msra.mxu0 %v7074_v18  ;;  %v5804_v44 = vpop.f32.mrb[11].mxu1  ;;  %v5927_v45 = vpop.f32.mrb[15].mxu0  ;;  %6105 = vmatprep.subr.bf16.mxu1 %v7101_v19  ;;  %v2830_v16 = vld [vmem:[%s9884_s5 + $0xae0] sm:$0xff]  ;;  %v7202_v18 = vcombine.low %v2782_v32, %v2798_v25  ;;  %v7229_v19 = vcombine.high %v2811_v13, %v2827_v14  ;;  %v2971_v32 = vld [vmem:[%s9884_s5 + $0xf48] sm:$0xff] }
 0x436   :  { %v6413_v50 = vcombine.low %v5800_v29, %v5802_v36  ;;  %v6446_v51 = vcombine.low %v9236_v23, %v9244_v39  ;;  %6228 = vmatprep.subr.bf16.mxu0 %v7107_v22  ;;  %v7235_v20 = vcombine.high %v2814_v15, %v2830_v16  ;;  %v2859_v22 = vld [vmem:[%s9884_s5 + $0xbc8] sm:$0xff]  ;;  %v7228_v29 = vcombine.low %v2811_v13, %v2827_v14  ;;  %v2878_v40 = vld [vmem:[%s9884_s5 + $0xc60] sm:$0xff] }
 0x437   :  { %v7234_v30 = vcombine.low %v2814_v15, %v2830_v16  ;;  %v7261_v31 = vcombine.high %v2843_v21, %v2859_v22  ;;  %v2891_v36 = vld [vmem:[%s9884_s5 + $0xcc8] sm:$0xff]  ;;  %v2894_v41 = vld [vmem:[%s9884_s5 + $0xce0] sm:$0xff]  ;;  %v7266_v44 = vcombine.low %v2846_v24, %v2862_v9  ;;  %v2493_v15 = vld [vmem:[%s9884_s5 + $0x58] sm:$0xff] }
 0x438   :  { %v6427_v62 = vrot.slane %v6413_v50, %v8048_v49  ;;  %6106 = vmatpush1.bf16.msra.mxu1 %v7100_v26  ;;  %v7260_v26 = vcombine.low %v2843_v21, %v2859_v22  ;;  %v7293_v45 = vcombine.high %v2875_v35, %v2891_v36  ;;  %v2923_v50 = vld [vmem:[%s9884_s5 + $0xdc8] sm:$0xff]  ;;  %v7292_v54 = vcombine.low %v2875_v35, %v2891_v36  ;;  %v2509_v16 = vld [vmem:[%s9884_s5 + $0xd8] sm:$0xff] }
 0x439   :  { %6229 = vmatpush1.bf16.msra.mxu0 %v7106_v46  ;;  %6107 = vmatprep.subr.bf16.mxu1 %v7133_v48  ;;  %v7299_v46 = vcombine.high %v2878_v40, %v2894_v41  ;;  %v2907_v48 = vld [vmem:[%s9884_s5 + $0xd48] sm:$0xff]  ;;  %v7298_v55 = vcombine.low %v2878_v40, %v2894_v41  ;;  %v6913_v21 = vcombine.high %v2493_v15, %v2509_v16  ;;  %v2525_v24 = vld [vmem:[%s9884_s5 + $0x158] sm:$0xff] }
 0x43a   :  { %v6428_v5 = vcombine.low %v6420_v61, %v6427_v62  ;;  %6230 = vmatprep.subr.bf16.mxu0 %v7139_v52  ;;  %v2910_v52 = vld [vmem:[%s9884_s5 + $0xd60] sm:$0xff]  ;;  %v7325_v57 = vcombine.high %v2907_v48, %v2923_v50  ;;  %v2939_v62 = vld [vmem:[%s9884_s5 + $0xe48] sm:$0xff]  ;;  %v2541_v9 = vld [vmem:[%s9884_s5 + $0x1d8] sm:$0xff] }
 0x43b   :  { %v7331_v61 = vcombine.high %v2910_v52, %v2926_v53  ;;  %v2987_v25 = vld [vmem:[%s9884_s5 + $0xfc8] sm:$0xff]  ;;  %v6945_v35 = vcombine.high %v2525_v24, %v2541_v9  ;;  %v2557_v36 = vld [vmem:[%s9884_s5 + $0x258] sm:$0xff] }
 0x43c   :  { %6556 = vst [vmem:[%s9886_s7] sm:$0xff] %v6428_v5  ;;  %6108 = vmatpush1.bf16.msra.mxu1 %v7132_v63  ;;  %v2955_v63 = vld [vmem:[%s9884_s5 + $0xec8] sm:$0xff]  ;;  %v7324_v5 = vcombine.low %v2907_v48, %v2923_v50  ;;  %v7389_v13 = vcombine.high %v2971_v32, %v2987_v25  ;;  %v2573_v40 = vld [vmem:[%s9884_s5 + $0x2d8] sm:$0xff] }
 0x43d   :  { %6231 = vmatpush1.bf16.msra.mxu0 %v7138_v0  ;;  %6109 = vmatprep.subr.bf16.mxu1 %v7165_v1  ;;  %v2942_v0 = vld [vmem:[%s9884_s5 + $0xe60] sm:$0xff]  ;;  %v7357_v7 = vcombine.high %v2939_v62, %v2955_v63  ;;  %v6977_v48 = vcombine.high %v2557_v36, %v2573_v40 }
 0x43e   :  { %6232 = vmatprep.subr.bf16.mxu0 %v7171_v6  ;;  %v2958_v1 = vld [vmem:[%s9884_s5 + $0xee0] sm:$0xff]  ;;  %v7330_v6 = vcombine.low %v2910_v52, %v2926_v53  ;;  %v2589_v52 = vld [vmem:[%s9884_s5 + $0x358] sm:$0xff] }
 0x43f   :  { %v7363_v27 = vcombine.high %v2942_v0, %v2958_v1  ;;  %v2605_v53 = vld [vmem:[%s9884_s5 + $0x3d8] sm:$0xff] }
 0x440   :  { %6110 = vmatpush1.bf16.msra.mxu1 %v7164_v8  ;;  %v2974_v8 = vld [vmem:[%s9884_s5 + $0xf60] sm:$0xff] }
 0x441   :  { %6233 = vmatpush1.bf16.msra.mxu0 %v7170_v10  ;;  %6111 = vmatprep.subr.bf16.mxu1 %v7197_v11  ;;  %v2990_v10 = vld [vmem:[%s9884_s5 + $0xfe0] sm:$0xff]  ;;  %v7356_v11 = vcombine.low %v2939_v62, %v2955_v63  ;;  %v7009_v62 = vcombine.high %v2589_v52, %v2605_v53 }
 0x442   :  { %6234 = vmatprep.subr.bf16.mxu0 %v7203_v12  ;;  %v7362_v12 = vcombine.low %v2942_v0, %v2958_v1  ;;  %v7395_v14 = vcombine.high %v2974_v8, %v2990_v10  ;;  %v2621_v0 = vld [vmem:[%s9884_s5 + $0x458] sm:$0xff] }
 0x443   :  { %v2637_v1 = vld [vmem:[%s9884_s5 + $0x4d8] sm:$0xff] }
 0x444   :  { %6112 = vmatpush1.bf16.msra.mxu1 %v7196_v17  ;;  %v2496_v17 = vld [vmem:[%s9884_s5 + $0x70] sm:$0xff] }
 0x445   :  { %6235 = vmatpush1.bf16.msra.mxu0 %v7202_v18  ;;  %6113 = vmatprep.subr.bf16.mxu1 %v7229_v19  ;;  %v2512_v18 = vld [vmem:[%s9884_s5 + $0xf0] sm:$0xff]  ;;  %v7388_v19 = vcombine.low %v2971_v32, %v2987_v25  ;;  %v7041_v32 = vcombine.high %v2621_v0, %v2637_v1 }
 0x446   :  { %6236 = vmatprep.subr.bf16.mxu0 %v7235_v20  ;;  %v7394_v20 = vcombine.low %v2974_v8, %v2990_v10  ;;  %v6919_v22 = vcombine.high %v2496_v17, %v2512_v18  ;;  %v2653_v8 = vld [vmem:[%s9884_s5 + $0x558] sm:$0xff] }
 0x447   :  { %v2669_v10 = vld [vmem:[%s9884_s5 + $0x5d8] sm:$0xff] }
 0x448   :  { %6114 = vmatpush1.bf16.msra.mxu1 %v7228_v29  ;;  %v6912_v29 = vcombine.low %v2493_v15, %v2509_v16  ;;  %v9432_v15 = vsub.s32 7, %v8045_v43 }
 0x449   :  { %6237 = vmatpush1.bf16.msra.mxu0 %v7234_v30  ;;  %6115 = vmatprep.subr.bf16.mxu1 %v7261_v31  ;;  %v2528_v30 = vld [vmem:[%s9884_s5 + $0x170] sm:$0xff] }
 0x44a   :  { %6238 = vmatprep.subr.bf16.mxu0 %v7267_v34  ;;  %v2544_v31 = vld [vmem:[%s9884_s5 + $0x1f0] sm:$0xff]  ;;  %v6918_v34 = vcombine.low %v2496_v17, %v2512_v18  ;;  %v7073_v17 = vcombine.high %v2653_v8, %v2669_v10 }
 0x44b   :  { %v6951_v41 = vcombine.high %v2528_v30, %v2544_v31 }
 0x44c   :  { %6116 = vmatpush1.bf16.msra.mxu1 %v7260_v26  ;;  %v2560_v26 = vld [vmem:[%s9884_s5 + $0x270] sm:$0xff] }
 0x44d   :  { %6239 = vmatpush1.bf16.msra.mxu0 %v7266_v44  ;;  %6117 = vmatprep.subr.bf16.mxu1 %v7293_v45  ;;  %v2576_v44 = vld [vmem:[%s9884_s5 + $0x2f0] sm:$0xff]  ;;  %v6944_v45 = vcombine.low %v2525_v24, %v2541_v9  ;;  %v3055_v24 = vrot.slane %v9208_v2, %v8973_v58  ;;  %v3035_v9 = vrot.slane %v8984_v3, %v9432_v15 }
 0x44e   :  { %6240 = vmatprep.subr.bf16.mxu0 %v7299_v46  ;;  %v6950_v46 = vcombine.low %v2528_v30, %v2544_v31  ;;  %v6983_v50 = vcombine.high %v2560_v26, %v2576_v44  ;;  %v3059_v30 = vrot.slane %v9208_v2, %v8987_v4 }
 0x450   :  { %6118 = vmatpush1.bf16.msra.mxu1 %v7292_v54  ;;  %v2592_v54 = vld [vmem:[%s9884_s5 + $0x370] sm:$0xff] }
 0x451   :  { %6241 = vmatpush1.bf16.msra.mxu0 %v7298_v55  ;;  %6119 = vmatprep.subr.bf16.mxu1 %v7325_v57  ;;  %v2608_v55 = vld [vmem:[%s9884_s5 + $0x3f0] sm:$0xff]  ;;  %v6976_v57 = vcombine.low %v2557_v36, %v2573_v40  ;;  %v2717_v40 = vld [vmem:[%s9884_s5 + $0x758] sm:$0xff] }
 0x452   :  { %6242 = vmatprep.subr.bf16.mxu0 %v7331_v61  ;;  %v6982_v61 = vcombine.low %v2560_v26, %v2576_v44  ;;  %v7015_v63 = vcombine.high %v2592_v54, %v2608_v55 }
 0x454   :  { %6120 = vmatpush1.bf16.msra.mxu1 %v7324_v5  ;;  %v2624_v5 = vld [vmem:[%s9884_s5 + $0x470] sm:$0xff] }
 0x455   :  { %6243 = vmatpush1.bf16.msra.mxu0 %v7330_v6  ;;  %6121 = vmatprep.subr.bf16.mxu1 %v7357_v7  ;;  %v2640_v6 = vld [vmem:[%s9884_s5 + $0x4f0] sm:$0xff]  ;;  %v7008_v7 = vcombine.low %v2589_v52, %v2605_v53 }
 0x456   :  { %6244 = vmatprep.subr.bf16.mxu0 %v7363_v27  ;;  %v7014_v27 = vcombine.low %v2592_v54, %v2608_v55  ;;  %v7047_v25 = vcombine.high %v2624_v5, %v2640_v6  ;;  %v7046_v16 = vcombine.low %v2624_v5, %v2640_v6  ;;  %v2749_v6 = vld [vmem:[%s9884_s5 + $0x858] sm:$0xff] }
 0x458   :  { %6122 = vmatpush1.bf16.msra.mxu1 %v7356_v11  ;;  %v9423_v11 = vsub.s32 6, %v8045_v43  ;;  %v2688_v43 = vld [vmem:[%s9884_s5 + $0x670] sm:$0xff] }
 0x459   :  { %6245 = vmatpush1.bf16.msra.mxu0 %v7362_v12  ;;  %6123 = vmatprep.subr.bf16.mxu1 %v7389_v13  ;;  %v2656_v12 = vld [vmem:[%s9884_s5 + $0x570] sm:$0xff] }
 0x45a   :  { %6246 = vmatprep.subr.bf16.mxu0 %v7395_v14  ;;  %v2672_v13 = vld [vmem:[%s9884_s5 + $0x5f0] sm:$0xff]  ;;  %v7040_v14 = vcombine.low %v2621_v0, %v2637_v1 }
 0x45b   :  { %v7079_v18 = vcombine.high %v2656_v12, %v2672_v13  ;;  %v7078_v31 = vcombine.low %v2656_v12, %v2672_v13 }
 0x45c   :  { %6124 = vmatpush1.bf16.msra.mxu1 %v7388_v19  ;;  %v2685_v19 = vld [vmem:[%s9884_s5 + $0x658] sm:$0xff] }
 0x45d   :  { %6247 = vmatpush1.bf16.msra.mxu0 %v7394_v20  ;;  %6175 = vmatprep.subr.bf16.mxu1 %v6913_v21  ;;  %v2701_v20 = vld [vmem:[%s9884_s5 + $0x6d8] sm:$0xff]  ;;  %v3031_v21 = vrot.slane %v8984_v3, %v9423_v11 }
 0x45e   :  { %6298 = vmatprep.subr.bf16.mxu0 %v6919_v22  ;;  %v2704_v22 = vld [vmem:[%s9884_s5 + $0x6f0] sm:$0xff]  ;;  %v7104_v54 = vcombine.low %v2685_v19, %v2701_v20 }
 0x45f   :  { %6126 = vmatmul.mubr.bf16.vlgmr.msra.gmra.mrb[24].mxu1 %v8334_v38  ;;  %v7111_v36 = vcombine.high %v2688_v43, %v2704_v22 }
 0x460   :  { %6249 = vmatmul.mubr.bf16.vlgmr.msra.gmra.mrb[28].mxu0 %v8334_v38  ;;  %6176 = vmatpush1.bf16.msra.mxu1 %v6912_v29  ;;  %v7072_v29 = vcombine.low %v2653_v8, %v2669_v10  ;;  %v6437_v8 = vrot.slane %v6429_v42, %v8048_v49  ;;  %v2800_v42 = vld [vmem:[%s9884_s5 + $0x9f0] sm:$0xff] }
 0x461   :  { %6207 = vmatprep.mubr.bf16.mxu1 %v8332_v37  ;;  %6299 = vmatpush1.bf16.msra.mxu0 %v6918_v34  ;;  %v7105_v34 = vcombine.high %v2685_v19, %v2701_v20 }
 0x462   :  { %6330 = vmatprep.mubr.bf16.mxu0 %v8332_v37  ;;  %6177 = vmatprep.subr.bf16.mxu1 %v6945_v35 }
 0x463   :  { %6300 = vmatprep.subr.bf16.mxu0 %v6951_v41  ;;  %v2733_v41 = vld [vmem:[%s9884_s5 + $0x7d8] sm:$0xff] }
 0x464   :  { %6178 = vmatpush1.bf16.msra.mxu1 %v6944_v45  ;;  %v2720_v45 = vld [vmem:[%s9884_s5 + $0x770] sm:$0xff]  ;;  %v7136_v12 = vcombine.low %v2717_v40, %v2733_v41 }
 0x465   :  { %6301 = vmatpush1.bf16.msra.mxu0 %v6950_v46  ;;  %6179 = vmatprep.subr.bf16.mxu1 %v6977_v48  ;;  %v2736_v46 = vld [vmem:[%s9884_s5 + $0x7f0] sm:$0xff] }
 0x466   :  { %6302 = vmatprep.subr.bf16.mxu0 %v6983_v50  ;;  %v7143_v5 = vcombine.high %v2720_v45, %v2736_v46  ;;  %v7142_v13 = vcombine.low %v2720_v45, %v2736_v46 }
 0x468   :  { %6180 = vmatpush1.bf16.msra.mxu1 %v6976_v57 }
 0x469   :  { %6303 = vmatpush1.bf16.msra.mxu0 %v6982_v61  ;;  %6181 = vmatprep.subr.bf16.mxu1 %v7009_v62  ;;  %v7110_v62 = vcombine.low %v2688_v43, %v2704_v22  ;;  %v7207_v43 = vcombine.high %v2784_v33, %v2800_v42  ;;  %v2813_v22 = vld [vmem:[%s9884_s5 + $0xa58] sm:$0xff] }
 0x46a   :  { %6304 = vmatprep.subr.bf16.mxu0 %v7015_v63  ;;  %v7137_v63 = vcombine.high %v2717_v40, %v2733_v41  ;;  %v2861_v40 = vld [vmem:[%s9884_s5 + $0xbd8] sm:$0xff]  ;;  %v2848_v41 = vld [vmem:[%s9884_s5 + $0xb70] sm:$0xff] }
 0x46c   :  { %6182 = vmatpush1.bf16.msra.mxu1 %v7008_v7  ;;  %v2765_v7 = vld [vmem:[%s9884_s5 + $0x8d8] sm:$0xff] }
 0x46d   :  { %6305 = vmatpush1.bf16.msra.mxu0 %v7014_v27  ;;  %6183 = vmatprep.subr.bf16.mxu1 %v7041_v32  ;;  %v2752_v32 = vld [vmem:[%s9884_s5 + $0x870] sm:$0xff]  ;;  %v7168_v19 = vcombine.low %v2749_v6, %v2765_v7 }
 0x46e   :  { %6306 = vmatprep.subr.bf16.mxu0 %v7047_v25  ;;  %v2768_v25 = vld [vmem:[%s9884_s5 + $0x8f0] sm:$0xff] }
 0x46f   :  { %v7174_v20 = vcombine.low %v2752_v32, %v2768_v25 }
 0x470   :  { %6184 = vmatpush1.bf16.msra.mxu1 %v7040_v14  ;;  %v7169_v14 = vcombine.high %v2749_v6, %v2765_v7  ;;  %v2928_v6 = vld [vmem:[%s9884_s5 + $0xdf0] sm:$0xff] }
 0x471   :  { %6307 = vmatpush1.bf16.msra.mxu0 %v7046_v16  ;;  %6185 = vmatprep.subr.bf16.mxu1 %v7073_v17  ;;  %v7175_v17 = vcombine.high %v2752_v32, %v2768_v25 }
 0x472   :  { %v5881_v35 = vpop.f32.mrb[12].mxu1  ;;  %6308 = vmatprep.subr.bf16.mxu0 %v7079_v18  ;;  %v2781_v18 = vld [vmem:[%s9884_s5 + $0x958] sm:$0xff] }
 0x473   :  { %v5882_v3 = vadd.f32 %v5881_v35, %v3031_v21  ;;  %v6004_v26 = vpop.f32.mrb[16].mxu0  ;;  %v5883_v44 = vpop.f32.mrb[13].mxu1  ;;  %v7201_v21 = vcombine.high %v2781_v18, %v2797_v28 }
 0x474   :  { %v9466_v48 = vadd.f32 %v6004_v26, %v3055_v24  ;;  %v5884_v50 = vadd.f32 %v5883_v44, %v3035_v9  ;;  %v6006_v52 = vpop.f32.mrb[17].mxu0  ;;  %v5885_v53 = vpop.f32.mrb[14].mxu1  ;;  %6186 = vmatpush1.bf16.msra.mxu1 %v7072_v29  ;;  %v2829_v24 = vld [vmem:[%s9884_s5 + $0xad8] sm:$0xff]  ;;  %v2816_v9 = vld [vmem:[%s9884_s5 + $0xa70] sm:$0xff] }
 0x475   :  { %v9468_v55 = vadd.f32 %v6006_v52, %v3059_v30  ;;  %v6008_v57 = vpop.f32.mrb[18].mxu0  ;;  %6309 = vmatpush1.bf16.msra.mxu0 %v7078_v31  ;;  %v5886_v61 = vpop.f32.mrb[15].mxu1  ;;  %6187 = vmatprep.subr.bf16.mxu1 %v7105_v34  ;;  %v2832_v29 = vld [vmem:[%s9884_s5 + $0xaf0] sm:$0xff]  ;;  %v7200_v30 = vcombine.low %v2781_v18, %v2797_v28  ;;  %v7206_v31 = vcombine.low %v2784_v33, %v2800_v42  ;;  %v2893_v52 = vld [vmem:[%s9884_s5 + $0xcd8] sm:$0xff] }
 0x476   :  { %v6430_v0 = vcombine.low %v5882_v3, %v5884_v50  ;;  %v6009_v1 = vpop.f32.mrb[19].mxu0  ;;  %6310 = vmatprep.subr.bf16.mxu0 %v7111_v36  ;;  %v7233_v34 = vcombine.high %v2813_v22, %v2829_v24  ;;  %v7239_v35 = vcombine.high %v2816_v9, %v2832_v29  ;;  %v2845_v36 = vld [vmem:[%s9884_s5 + $0xb58] sm:$0xff]  ;;  %v2864_v3 = vld [vmem:[%s9884_s5 + $0xbf0] sm:$0xff]  ;;  %v7232_v26 = vcombine.low %v2813_v22, %v2829_v24 }
 0x477   :  { %v6463_v27 = vcombine.low %v9466_v48, %v9468_v55  ;;  %v7238_v44 = vcombine.low %v2816_v9, %v2832_v29  ;;  %v7265_v45 = vcombine.high %v2845_v36, %v2861_v40  ;;  %v7271_v46 = vcombine.high %v2848_v41, %v2864_v3  ;;  %v2877_v50 = vld [vmem:[%s9884_s5 + $0xc58] sm:$0xff]  ;;  %v2880_v53 = vld [vmem:[%s9884_s5 + $0xc70] sm:$0xff]  ;;  %v2495_v9 = vld [vmem:[%s9884_s5 + $0x68] sm:$0xff] }
 0x478   :  { %v6444_v10 = vrot.slane %v6430_v0, %v8048_v49  ;;  %6188 = vmatpush1.bf16.msra.mxu1 %v7104_v54  ;;  %v2896_v54 = vld [vmem:[%s9884_s5 + $0xcf0] sm:$0xff]  ;;  %v7264_v57 = vcombine.low %v2845_v36, %v2861_v40  ;;  %v7270_v61 = vcombine.low %v2848_v41, %v2864_v3  ;;  %v2909_v0 = vld [vmem:[%s9884_s5 + $0xd58] sm:$0xff]  ;;  %v7296_v7 = vcombine.low %v2877_v50, %v2893_v52  ;;  %v2511_v29 = vld [vmem:[%s9884_s5 + $0xe8] sm:$0xff] }
 0x479   :  { %6311 = vmatpush1.bf16.msra.mxu0 %v7110_v62  ;;  %6189 = vmatprep.subr.bf16.mxu1 %v7137_v63  ;;  %v7297_v62 = vcombine.high %v2877_v50, %v2893_v52  ;;  %v7303_v63 = vcombine.high %v2880_v53, %v2896_v54  ;;  %v2925_v1 = vld [vmem:[%s9884_s5 + $0xdd8] sm:$0xff]  ;;  %v7302_v32 = vcombine.low %v2880_v53, %v2896_v54  ;;  %v2543_v36 = vld [vmem:[%s9884_s5 + $0x1e8] sm:$0xff] }
 0x47a   :  { %v6445_v16 = vcombine.low %v6437_v8, %v6444_v10  ;;  %6312 = vmatprep.subr.bf16.mxu0 %v7143_v5  ;;  %v2912_v5 = vld [vmem:[%s9884_s5 + $0xd70] sm:$0xff]  ;;  %v7329_v25 = vcombine.high %v2909_v0, %v2925_v1  ;;  %v2941_v10 = vld [vmem:[%s9884_s5 + $0xe58] sm:$0xff]  ;;  %v6916_v40 = vcombine.low %v2495_v9, %v2511_v29  ;;  %v2559_v3 = vld [vmem:[%s9884_s5 + $0x268] sm:$0xff] }
 0x47b   :  { %v7335_v8 = vcombine.high %v2912_v5, %v2928_v6  ;;  %v2973_v33 = vld [vmem:[%s9884_s5 + $0xf58] sm:$0xff]  ;;  %v2607_v50 = vld [vmem:[%s9884_s5 + $0x3e8] sm:$0xff] }
 0x47c   :  { %6557 = vst [vmem:[%s9886_s7 + $0x8] sm:$0xff] %v6445_v16  ;;  %6190 = vmatpush1.bf16.msra.mxu1 %v7136_v12  ;;  %v2957_v12 = vld [vmem:[%s9884_s5 + $0xed8] sm:$0xff]  ;;  %v7328_v16 = vcombine.low %v2909_v0, %v2925_v1  ;;  %v2623_v54 = vld [vmem:[%s9884_s5 + $0x468] sm:$0xff] }
 0x47d   :  { %6313 = vmatpush1.bf16.msra.mxu0 %v7142_v13  ;;  %6191 = vmatprep.subr.bf16.mxu1 %v7169_v14  ;;  %v2944_v13 = vld [vmem:[%s9884_s5 + $0xe70] sm:$0xff]  ;;  %v7361_v18 = vcombine.high %v2941_v10, %v2957_v12  ;;  %v2989_v42 = vld [vmem:[%s9884_s5 + $0xfd8] sm:$0xff]  ;;  %v2671_v0 = vld [vmem:[%s9884_s5 + $0x5e8] sm:$0xff] }
 0x47e   :  { %6314 = vmatprep.subr.bf16.mxu0 %v7175_v17  ;;  %v2960_v14 = vld [vmem:[%s9884_s5 + $0xef0] sm:$0xff]  ;;  %v7334_v17 = vcombine.low %v2912_v5, %v2928_v6  ;;  %v7393_v22 = vcombine.high %v2973_v33, %v2989_v42 }
 0x47f   :  { %v7367_v28 = vcombine.high %v2944_v13, %v2960_v14  ;;  %v9618_v5 = vld [vmem:[%s9885_s6 + $0x10] sm:$0xff] }
 0x480   :  { %6192 = vmatpush1.bf16.msra.mxu1 %v7168_v19  ;;  %v2976_v19 = vld [vmem:[%s9884_s5 + $0xf70] sm:$0xff] }
 0x481   :  { %6315 = vmatpush1.bf16.msra.mxu0 %v7174_v20  ;;  %6193 = vmatprep.subr.bf16.mxu1 %v7201_v21  ;;  %v2992_v20 = vld [vmem:[%s9884_s5 + $0xff0] sm:$0xff]  ;;  %v7360_v21 = vcombine.low %v2941_v10, %v2957_v12  ;;  %v3051_v10 = vrot.slane %v9208_v2, %v8173_v60 }
 0x482   :  { %6316 = vmatprep.subr.bf16.mxu0 %v7207_v43  ;;  %v7366_v43 = vcombine.low %v2944_v13, %v2960_v14  ;;  %v7399_v24 = vcombine.high %v2976_v19, %v2992_v20  ;;  %v3075_v13 = vrot.slane %v9618_v5, %v8170_v59 }
 0x484   :  { %6194 = vmatpush1.bf16.msra.mxu1 %v7200_v30  ;;  %v7392_v30 = vcombine.low %v2973_v33, %v2989_v42 }
 0x485   :  { %6317 = vmatpush1.bf16.msra.mxu0 %v7206_v31  ;;  %6195 = vmatprep.subr.bf16.mxu1 %v7233_v34  ;;  %v7398_v31 = vcombine.low %v2976_v19, %v2992_v20  ;;  %v6917_v34 = vcombine.high %v2495_v9, %v2511_v29 }
 0x486   :  { %6318 = vmatprep.subr.bf16.mxu0 %v7239_v35  ;;  %v2527_v35 = vld [vmem:[%s9884_s5 + $0x168] sm:$0xff] }
 0x487   :  { %v6949_v41 = vcombine.high %v2527_v35, %v2543_v36 }
 0x488   :  { %6196 = vmatpush1.bf16.msra.mxu1 %v7232_v26  ;;  %v2575_v26 = vld [vmem:[%s9884_s5 + $0x2e8] sm:$0xff] }
 0x489   :  { %6319 = vmatpush1.bf16.msra.mxu0 %v7238_v44  ;;  %6197 = vmatprep.subr.bf16.mxu1 %v7265_v45  ;;  %v6948_v44 = vcombine.low %v2527_v35, %v2543_v36  ;;  %v6981_v45 = vcombine.high %v2559_v3, %v2575_v26  ;;  %v6980_v52 = vcombine.low %v2559_v3, %v2575_v26  ;;  %v2767_v35 = vld [vmem:[%s9884_s5 + $0x8e8] sm:$0xff] }
 0x48a   :  { %6320 = vmatprep.subr.bf16.mxu0 %v7271_v46  ;;  %v2591_v46 = vld [vmem:[%s9884_s5 + $0x368] sm:$0xff] }
 0x48b   :  { %v7013_v53 = vcombine.high %v2591_v46, %v2607_v50 }
 0x48c   :  { %6198 = vmatpush1.bf16.msra.mxu1 %v7264_v57  ;;  %v2639_v57 = vld [vmem:[%s9884_s5 + $0x4e8] sm:$0xff] }
 0x48d   :  { %6321 = vmatpush1.bf16.msra.mxu0 %v7270_v61  ;;  %6199 = vmatprep.subr.bf16.mxu1 %v7297_v62  ;;  %v7012_v61 = vcombine.low %v2591_v46, %v2607_v50  ;;  %v7045_v62 = vcombine.high %v2623_v54, %v2639_v57  ;;  %v7044_v1 = vcombine.low %v2623_v54, %v2639_v57  ;;  %v2799_v46 = vld [vmem:[%s9884_s5 + $0x9e8] sm:$0xff] }
 0x48e   :  { %6322 = vmatprep.subr.bf16.mxu0 %v7303_v63  ;;  %v2655_v63 = vld [vmem:[%s9884_s5 + $0x568] sm:$0xff] }
 0x48f   :  { %v7077_v6 = vcombine.high %v2655_v63, %v2671_v0  ;;  %v7076_v12 = vcombine.low %v2655_v63, %v2671_v0  ;;  %v2831_v50 = vld [vmem:[%s9884_s5 + $0xae8] sm:$0xff] }
 0x490   :  { %6200 = vmatpush1.bf16.msra.mxu1 %v7296_v7  ;;  %v2687_v7 = vld [vmem:[%s9884_s5 + $0x668] sm:$0xff] }
 0x491   :  { %6323 = vmatpush1.bf16.msra.mxu0 %v7302_v32  ;;  %6201 = vmatprep.subr.bf16.mxu1 %v7329_v25  ;;  %v2703_v32 = vld [vmem:[%s9884_s5 + $0x6e8] sm:$0xff]  ;;  %v3047_v25 = vrot.slane %v9208_v2, %v8190_v47 }
 0x492   :  { %6324 = vmatprep.subr.bf16.mxu0 %v7335_v8  ;;  %v3071_v8 = vrot.slane %v9618_v5, %v8162_v56  ;;  %v7109_v14 = vcombine.high %v2687_v7, %v2703_v32  ;;  %v2847_v54 = vld [vmem:[%s9884_s5 + $0xb68] sm:$0xff] }
 0x493   :  { %v2863_v57 = vld [vmem:[%s9884_s5 + $0xbe8] sm:$0xff] }
 0x494   :  { %6202 = vmatpush1.bf16.msra.mxu1 %v7328_v16  ;;  %v2879_v63 = vld [vmem:[%s9884_s5 + $0xc68] sm:$0xff] }
 0x495   :  { %6325 = vmatpush1.bf16.msra.mxu0 %v7334_v17  ;;  %6203 = vmatprep.subr.bf16.mxu1 %v7361_v18  ;;  %v2719_v17 = vld [vmem:[%s9884_s5 + $0x768] sm:$0xff] }
 0x496   :  { %6326 = vmatprep.subr.bf16.mxu0 %v7367_v28  ;;  %v2735_v18 = vld [vmem:[%s9884_s5 + $0x7e8] sm:$0xff] }
 0x497   :  { %v7141_v29 = vcombine.high %v2719_v17, %v2735_v18  ;;  %v7140_v3 = vcombine.low %v2719_v17, %v2735_v18  ;;  %v2895_v0 = vld [vmem:[%s9884_s5 + $0xce8] sm:$0xff] }
 0x498   :  { %6204 = vmatpush1.bf16.msra.mxu1 %v7360_v21  ;;  %v2991_v17 = vld [vmem:[%s9884_s5 + $0xfe8] sm:$0xff] }
 0x499   :  { %6327 = vmatpush1.bf16.msra.mxu0 %v7366_v43  ;;  %6205 = vmatprep.subr.bf16.mxu1 %v7393_v22  ;;  %v7108_v43 = vcombine.low %v2687_v7, %v2703_v32  ;;  %v2911_v7 = vld [vmem:[%s9884_s5 + $0xd68] sm:$0xff] }
 0x49a   :  { %6328 = vmatprep.subr.bf16.mxu0 %v7399_v24  ;;  %v2927_v32 = vld [vmem:[%s9884_s5 + $0xde8] sm:$0xff] }
 0x49c   :  { %6206 = vmatpush1.bf16.msra.mxu1 %v7392_v30 }
 0x49d   :  { %6329 = vmatpush1.bf16.msra.mxu0 %v7398_v31  ;;  %6257 = vmatprep.subr.bf16.mxu1 %v6917_v34  ;;  %v2751_v34 = vld [vmem:[%s9884_s5 + $0x868] sm:$0xff] }
 0x49e   :  { %v7173_v26 = vcombine.high %v2751_v34, %v2767_v35  ;;  %v7172_v23 = vcombine.low %v2751_v34, %v2767_v35  ;;  %v2593_v35 = vld [vmem:[%s9884_s5 + $0x378] sm:$0xff] }
 0x49f   :  { %6208 = vmatmul.mubr.bf16.vlgmr.msra.gmra.mrb[28].mxu1 %v8334_v38 }
 0x4a0   :  { %6331 = vmatmul.mubr.bf16.vlgmr.msra.gmra.mrb[32].mxu0 %v8334_v38  ;;  %6258 = vmatpush1.bf16.msra.mxu1 %v6916_v40  ;;  %v6454_v40 = vrot.slane %v6446_v51, %v8048_v49  ;;  %v2815_v51 = vld [vmem:[%s9884_s5 + $0xa68] sm:$0xff] }
 0x4a1   :  { %6289 = vmatprep.mubr.bf16.mxu1 %v8332_v37  ;;  %6259 = vmatprep.subr.bf16.mxu1 %v6949_v41 }
 0x4a4   :  { %6260 = vmatpush1.bf16.msra.mxu1 %v6948_v44 }
 0x4a5   :  { %6261 = vmatprep.subr.bf16.mxu1 %v6981_v45  ;;  %v2783_v45 = vld [vmem:[%s9884_s5 + $0x968] sm:$0xff] }
 0x4a6   :  { %v7205_v39 = vcombine.high %v2783_v45, %v2799_v46 }
 0x4a8   :  { %6262 = vmatpush1.bf16.msra.mxu1 %v6980_v52  ;;  %v7204_v52 = vcombine.low %v2783_v45, %v2799_v46  ;;  %v2657_v46 = vld [vmem:[%s9884_s5 + $0x578] sm:$0xff] }
 0x4a9   :  { %6263 = vmatprep.subr.bf16.mxu1 %v7013_v53  ;;  %v7237_v53 = vcombine.high %v2815_v51, %v2831_v50 }
 0x4ac   :  { %6264 = vmatpush1.bf16.msra.mxu1 %v7012_v61  ;;  %v7236_v61 = vcombine.low %v2815_v51, %v2831_v50  ;;  %v2689_v50 = vld [vmem:[%s9884_s5 + $0x678] sm:$0xff] }
 0x4ad   :  { %6265 = vmatprep.subr.bf16.mxu1 %v7045_v62  ;;  %v7269_v62 = vcombine.high %v2847_v54, %v2863_v57 }
 0x4b0   :  { %6266 = vmatpush1.bf16.msra.mxu1 %v7044_v1  ;;  %v7268_v1 = vcombine.low %v2847_v54, %v2863_v57  ;;  %v3087_v57 = vrot.slane %v9618_v5, %v8973_v58 }
 0x4b1   :  { %6267 = vmatprep.subr.bf16.mxu1 %v7077_v6  ;;  %v7301_v6 = vcombine.high %v2879_v63, %v2895_v0 }
 0x4b2   :  { %v5963_v16 = vpop.f32.mrb[16].mxu1 }
 0x4b3   :  { %v5964_v28 = vadd.f32 %v5963_v16, %v3047_v25  ;;  %v6086_v33 = vpop.f32.mrb[20].mxu0  ;;  %v5965_v42 = vpop.f32.mrb[17].mxu1  ;;  %v7300_v25 = vcombine.low %v2879_v63, %v2895_v0  ;;  %v2975_v16 = vld [vmem:[%s9884_s5 + $0xf68] sm:$0xff]  ;;  %v3091_v63 = vrot.slane %v9618_v5, %v8987_v4 }
 0x4b4   :  { %v9640_v19 = vadd.f32 %v6086_v33, %v3071_v8  ;;  %v5966_v2 = vadd.f32 %v5965_v42, %v3051_v10  ;;  %v6088_v20 = vpop.f32.mrb[21].mxu0  ;;  %v5967_v21 = vpop.f32.mrb[18].mxu1  ;;  %6268 = vmatpush1.bf16.msra.mxu1 %v7076_v12  ;;  %v7333_v8 = vcombine.high %v2911_v7, %v2927_v32  ;;  %v2943_v10 = vld [vmem:[%s9884_s5 + $0xe68] sm:$0xff]  ;;  %v2497_v33 = vld [vmem:[%s9884_s5 + $0x78] sm:$0xff] }
 0x4b5   :  { %v9642_v22 = vadd.f32 %v6088_v20, %v3075_v13  ;;  %v6090_v24 = vpop.f32.mrb[22].mxu0  ;;  %v5968_v9 = vpop.f32.mrb[19].mxu1  ;;  %6269 = vmatprep.subr.bf16.mxu1 %v7109_v14  ;;  %v2959_v12 = vld [vmem:[%s9884_s5 + $0xee8] sm:$0xff]  ;;  %v7332_v13 = vcombine.low %v2911_v7, %v2927_v32  ;;  %v2513_v42 = vld [vmem:[%s9884_s5 + $0xf8] sm:$0xff] }
 0x4b6   :  { %v6447_v30 = vcombine.low %v5964_v28, %v5966_v2  ;;  %v6091_v31 = vpop.f32.mrb[23].mxu0  ;;  %v7365_v14 = vcombine.high %v2943_v10, %v2959_v12  ;;  %v7364_v18 = vcombine.low %v2943_v10, %v2959_v12  ;;  %v7397_v28 = vcombine.high %v2975_v16, %v2991_v17  ;;  %v2529_v21 = vld [vmem:[%s9884_s5 + $0x178] sm:$0xff] }
 0x4b7   :  { %v6480_v36 = vcombine.low %v9640_v19, %v9642_v22  ;;  %v7396_v2 = vcombine.low %v2975_v16, %v2991_v17  ;;  %v6921_v20 = vcombine.high %v2497_v33, %v2513_v42  ;;  %v6920_v24 = vcombine.low %v2497_v33, %v2513_v42  ;;  %v2737_v7 = vld [vmem:[%s9884_s5 + $0x7f8] sm:$0xff] }
 0x4b8   :  { %v6461_v41 = vrot.slane %v6447_v30, %v8048_v49  ;;  %6270 = vmatpush1.bf16.msra.mxu1 %v7108_v43  ;;  %v2545_v43 = vld [vmem:[%s9884_s5 + $0x1f8] sm:$0xff] }
 0x4b9   :  { %6271 = vmatprep.subr.bf16.mxu1 %v7141_v29  ;;  %v6953_v9 = vcombine.high %v2529_v21, %v2545_v43  ;;  %v2561_v29 = vld [vmem:[%s9884_s5 + $0x278] sm:$0xff]  ;;  %v6952_v31 = vcombine.low %v2529_v21, %v2545_v43 }
 0x4ba   :  { %v6462_v44 = vcombine.low %v6454_v40, %v6461_v41  ;;  %v2577_v30 = vld [vmem:[%s9884_s5 + $0x2f8] sm:$0xff] }
 0x4bb   :  { %v6985_v34 = vcombine.high %v2561_v29, %v2577_v30  ;;  %v2609_v40 = vld [vmem:[%s9884_s5 + $0x3f8] sm:$0xff]  ;;  %v6984_v41 = vcombine.low %v2561_v29, %v2577_v30 }
 0x4bc   :  { %6558 = vst [vmem:[%s9886_s7 + $0x10] sm:$0xff] %v6462_v44  ;;  %6272 = vmatpush1.bf16.msra.mxu1 %v7140_v3  ;;  %v7017_v3 = vcombine.high %v2593_v35, %v2609_v40  ;;  %v7016_v44 = vcombine.low %v2593_v35, %v2609_v40  ;;  %v2769_v21 = vld [vmem:[%s9884_s5 + $0x8f8] sm:$0xff] }
 0x4bd   :  { %6273 = vmatprep.subr.bf16.mxu1 %v7173_v26  ;;  %v2625_v26 = vld [vmem:[%s9884_s5 + $0x478] sm:$0xff] }
 0x4be   :  { %v2801_v35 = vld [vmem:[%s9884_s5 + $0x9f8] sm:$0xff] }
 0x4bf   :  { %v2833_v40 = vld [vmem:[%s9884_s5 + $0xaf8] sm:$0xff] }
 0x4c0   :  { %6274 = vmatpush1.bf16.msra.mxu1 %v7172_v23  ;;  %v2673_v23 = vld [vmem:[%s9884_s5 + $0x5f8] sm:$0xff] }
 0x4c1   :  { %6275 = vmatprep.subr.bf16.mxu1 %v7205_v39  ;;  %v7081_v51 = vcombine.high %v2657_v46, %v2673_v23 }
 0x4c4   :  { %6276 = vmatpush1.bf16.msra.mxu1 %v7204_v52  ;;  %v2705_v52 = vld [vmem:[%s9884_s5 + $0x6f8] sm:$0xff] }
 0x4c5   :  { %6277 = vmatprep.subr.bf16.mxu1 %v7237_v53  ;;  %v7925_v53 = vld [vmem:[%s9885_s6 + $0x8] sm:$0xff]  ;;  %v7113_v0 = vcombine.high %v2689_v50, %v2705_v52  ;;  %v7112_v16 = vcombine.low %v2689_v50, %v2705_v52  ;;  %v2913_v50 = vld [vmem:[%s9884_s5 + $0xd78] sm:$0xff] }
 0x4c6   :  { %v3063_v54 = vrot.slane %v7925_v53, %v9423_v11  ;;  %v2929_v52 = vld [vmem:[%s9884_s5 + $0xdf8] sm:$0xff] }
 0x4c8   :  { %6278 = vmatpush1.bf16.msra.mxu1 %v7236_v61  ;;  %v3067_v61 = vrot.slane %v7925_v53, %v9432_v15 }
 0x4c9   :  { %6279 = vmatprep.subr.bf16.mxu1 %v7269_v62  ;;  %v7080_v62 = vcombine.low %v2657_v46, %v2673_v23  ;;  %v2881_v46 = vld [vmem:[%s9884_s5 + $0xc78] sm:$0xff] }
 0x4ca   :  { %v2897_v23 = vld [vmem:[%s9884_s5 + $0xcf8] sm:$0xff] }
 0x4cb   :  { %v7304_v53 = vcombine.low %v2881_v46, %v2897_v23 }
 0x4cc   :  { %6280 = vmatpush1.bf16.msra.mxu1 %v7268_v1 }
 0x4cd   :  { %6281 = vmatprep.subr.bf16.mxu1 %v7301_v6  ;;  %v2721_v6 = vld [vmem:[%s9884_s5 + $0x778] sm:$0xff] }
 0x4ce   :  { %v7145_v33 = vcombine.high %v2721_v6, %v2737_v7  ;;  %v7144_v29 = vcombine.low %v2721_v6, %v2737_v7 }
 0x4d0   :  { %6282 = vmatpush1.bf16.msra.mxu1 %v7300_v25 }
 0x4d1   :  { %6283 = vmatprep.subr.bf16.mxu1 %v7333_v8 }
 0x4d4   :  { %6284 = vmatpush1.bf16.msra.mxu1 %v7332_v13 }
 0x4d5   :  { %6285 = vmatprep.subr.bf16.mxu1 %v7365_v14 }
 0x4d8   :  { %6286 = vmatpush1.bf16.msra.mxu1 %v7364_v18 }
 0x4d9   :  { %6287 = vmatprep.subr.bf16.mxu1 %v7397_v28 }
 0x4dc   :  { %6288 = vmatpush1.bf16.msra.mxu1 %v7396_v2 }
 0x4dd   :  { %6339 = vmatprep.subr.bf16.mxu1 %v6921_v20  ;;  %v2753_v20 = vld [vmem:[%s9884_s5 + $0x878] sm:$0xff] }
 0x4de   :  { %v7177_v30 = vcombine.high %v2753_v20, %v2769_v21  ;;  %v7176_v48 = vcombine.low %v2753_v20, %v2769_v21 }
 0x4df   :  { %6290 = vmatmul.mubr.bf16.vlgmr.msra.gmra.mrb[32].mxu1 %v8334_v38 }
 0x4e0   :  { %6340 = vmatpush1.bf16.msra.mxu1 %v6920_v24  ;;  %6371 = vmatprep.mubr.bf16.mxu1 %v8332_v37  ;;  %v2641_v37 = vld [vmem:[%s9884_s5 + $0x4f8] sm:$0xff]  ;;  %v6471_v24 = vrot.slane %v6463_v27, %v8048_v49 }
 0x4e1   :  { %6341 = vmatprep.subr.bf16.mxu1 %v6953_v9  ;;  %v7049_v45 = vcombine.high %v2625_v26, %v2641_v37  ;;  %v7048_v39 = vcombine.low %v2625_v26, %v2641_v37  ;;  %v2817_v27 = vld [vmem:[%s9884_s5 + $0xa78] sm:$0xff] }
 0x4e2   :  { %v2849_v26 = vld [vmem:[%s9884_s5 + $0xb78] sm:$0xff] }
 0x4e3   :  { %v2865_v37 = vld [vmem:[%s9884_s5 + $0xbf8] sm:$0xff] }
 0x4e4   :  { %6342 = vmatpush1.bf16.msra.mxu1 %v6952_v31 }
 0x4e5   :  { %6343 = vmatprep.subr.bf16.mxu1 %v6985_v34  ;;  %v2785_v34 = vld [vmem:[%s9884_s5 + $0x978] sm:$0xff] }
 0x4e6   :  { %v7209_v55 = vcombine.high %v2785_v34, %v2801_v35 }
 0x4e8   :  { %6344 = vmatpush1.bf16.msra.mxu1 %v6984_v41  ;;  %v7208_v41 = vcombine.low %v2785_v34, %v2801_v35  ;;  %v3095_v35 = vrot.slane %v9618_v5, %v9423_v11 }
 0x4e9   :  { %6345 = vmatprep.subr.bf16.mxu1 %v7017_v3  ;;  %v7241_v3 = vcombine.high %v2817_v27, %v2833_v40 }
 0x4ec   :  { %6346 = vmatpush1.bf16.msra.mxu1 %v7016_v44  ;;  %v7240_v44 = vcombine.low %v2817_v27, %v2833_v40 }
 0x4ed   :  { %6347 = vmatprep.subr.bf16.mxu1 %v7049_v45  ;;  %v7273_v45 = vcombine.high %v2849_v26, %v2865_v37 }
 0x4f0   :  { %6348 = vmatpush1.bf16.msra.mxu1 %v7048_v39  ;;  %v7272_v39 = vcombine.low %v2849_v26, %v2865_v37 }
 0x4f1   :  { %6349 = vmatprep.subr.bf16.mxu1 %v7081_v51  ;;  %v7305_v51 = vcombine.high %v2881_v46, %v2897_v23 }
 0x4f2   :  { %v6045_v1 = vpop.f32.mrb[20].mxu1 }
 0x4f3   :  { %v6046_v32 = vadd.f32 %v6045_v1, %v3063_v54  ;;  %v6168_v25 = vpop.f32.mrb[24].mxu0  ;;  %v6047_v8 = vpop.f32.mrb[21].mxu1  ;;  %v7337_v54 = vcombine.high %v2913_v50, %v2929_v52  ;;  %v2993_v1 = vld [vmem:[%s9884_s5 + $0xff8] sm:$0xff] }
 0x4f4   :  { %v9761_v10 = vadd.f32 %v6168_v25, %v3087_v57  ;;  %v6048_v12 = vadd.f32 %v6047_v8, %v3067_v61  ;;  %v6170_v13 = vpop.f32.mrb[25].mxu0  ;;  %v6049_v14 = vpop.f32.mrb[22].mxu1  ;;  %6350 = vmatpush1.bf16.msra.mxu1 %v7080_v62  ;;  %v2945_v57 = vld [vmem:[%s9884_s5 + $0xe78] sm:$0xff]  ;;  %v7336_v62 = vcombine.low %v2913_v50, %v2929_v52  ;;  %v3079_v8 = vrot.slane %v9618_v5, %v8190_v47 }
 0x4f5   :  { %v9763_v17 = vadd.f32 %v6170_v13, %v3091_v63  ;;  %v6172_v18 = vpop.f32.mrb[26].mxu0  ;;  %v6050_v28 = vpop.f32.mrb[23].mxu1  ;;  %6351 = vmatprep.subr.bf16.mxu1 %v7113_v0  ;;  %v2961_v61 = vld [vmem:[%s9884_s5 + $0xef8] sm:$0xff]  ;;  %v3083_v13 = vrot.slane %v9618_v5, %v8173_v60 }
 0x4f6   :  { %v6464_v42 = vcombine.low %v6046_v32, %v6048_v12  ;;  %v6173_v2 = vpop.f32.mrb[27].mxu0  ;;  %v7369_v63 = vcombine.high %v2945_v57, %v2961_v61  ;;  %v2977_v0 = vld [vmem:[%s9884_s5 + $0xf78] sm:$0xff]  ;;  %v7368_v6 = vcombine.low %v2945_v57, %v2961_v61 }
 0x4f7   :  { %v6497_v43 = vcombine.low %v9761_v10, %v9763_v17  ;;  %v7401_v7 = vcombine.high %v2977_v0, %v2993_v1  ;;  %v7400_v32 = vcombine.low %v2977_v0, %v2993_v1  ;;  %v9827_v25 = vld [vmem:[%s9885_s6 + $0x18] sm:$0xff] }
 0x4f8   :  { %v6478_v9 = vrot.slane %v6464_v42, %v8048_v49  ;;  %6352 = vmatpush1.bf16.msra.mxu1 %v7112_v16  ;;  %v3103_v12 = vrot.slane %v9827_v25, %v8162_v56  ;;  %v3107_v14 = vrot.slane %v9827_v25, %v8170_v59  ;;  %v3123_v19 = vrot.slane %v9827_v25, %v8987_v4 }
 0x4f9   :  { %6353 = vmatprep.subr.bf16.mxu1 %v7145_v33  ;;  %v3111_v50 = vrot.slane %v9827_v25, %v8190_v47  ;;  %v3115_v52 = vrot.slane %v9827_v25, %v8173_v60  ;;  %v3127_v47 = vrot.slane %v9827_v25, %v9423_v11  ;;  %v3131_v60 = vrot.slane %v9827_v25, %v9432_v15 }
 0x4fa   :  { %v6479_v31 = vcombine.low %v6471_v24, %v6478_v9 }
 0x4fc   :  { %6559 = vst [vmem:[%s9886_s7 + $0x18] sm:$0xff] %v6479_v31  ;;  %6354 = vmatpush1.bf16.msra.mxu1 %v7144_v29  ;;  %v6488_v31 = vrot.slane %v6480_v36, %v8048_v49 }
 0x4fd   :  { %6355 = vmatprep.subr.bf16.mxu1 %v7177_v30 }
 0x500   :  { %6356 = vmatpush1.bf16.msra.mxu1 %v7176_v48  ;;  %v3119_v48 = vrot.slane %v9827_v25, %v8973_v58 }
 0x501   :  { %6357 = vmatprep.subr.bf16.mxu1 %v7209_v55  ;;  %v3099_v55 = vrot.slane %v9618_v5, %v9432_v15  ;;  %v6505_v5 = vrot.slane %v6497_v43, %v8048_v49 }
 0x504   :  { %6358 = vmatpush1.bf16.msra.mxu1 %v7208_v41 }
 0x505   :  { %6359 = vmatprep.subr.bf16.mxu1 %v7241_v3 }
 0x508   :  { %6360 = vmatpush1.bf16.msra.mxu1 %v7240_v44 }
 0x509   :  { %6361 = vmatprep.subr.bf16.mxu1 %v7273_v45 }
 0x50c   :  { %6362 = vmatpush1.bf16.msra.mxu1 %v7272_v39 }
 0x50d   :  { %6363 = vmatprep.subr.bf16.mxu1 %v7305_v51 }
 0x510   :  { %6364 = vmatpush1.bf16.msra.mxu1 %v7304_v53 }
 0x511   :  { %6365 = vmatprep.subr.bf16.mxu1 %v7337_v54 }
 0x514   :  { %6366 = vmatpush1.bf16.msra.mxu1 %v7336_v62 }
 0x515   :  { %6367 = vmatprep.subr.bf16.mxu1 %v7369_v63 }
 0x518   :  { %6368 = vmatpush1.bf16.msra.mxu1 %v7368_v6 }
 0x519   :  { %6369 = vmatprep.subr.bf16.mxu1 %v7401_v7 }
 0x51c   :  { %6370 = vmatpush1.bf16.msra.mxu1 %v7400_v32 }
 0x51f   :  { %6372 = vmatmul.mubr.bf16.vlgmr.msra.gmra.mrb[36].mxu1 %v8334_v38 }
 0x532   :  { %v6127_v16 = vpop.f32.mrb[24].mxu1 }
 0x533   :  { %v6128_v18 = vadd.f32 %v6127_v16, %v3079_v8  ;;  %v6250_v38 = vpop.f32.mrb[28].mxu0  ;;  %v6129_v28 = vpop.f32.mrb[25].mxu1 }
 0x534   :  { %v6251_v33 = vadd.f32 %v6250_v38, %v3103_v12  ;;  %v6130_v42 = vadd.f32 %v6129_v28, %v3083_v13  ;;  %v6252_v2 = vpop.f32.mrb[29].mxu0  ;;  %v6131_v20 = vpop.f32.mrb[26].mxu1 }
 0x535   :  { %v6253_v21 = vadd.f32 %v6252_v2, %v3107_v14  ;;  %v6254_v24 = vpop.f32.mrb[30].mxu0  ;;  %v6132_v9 = vpop.f32.mrb[27].mxu1 }
 0x536   :  { %v6481_v29 = vcombine.low %v6128_v18, %v6130_v42  ;;  %v6255_v30 = vpop.f32.mrb[31].mxu0 }
 0x537   :  { %v6514_v56 = vcombine.low %v6251_v33, %v6253_v21 }
 0x538   :  { %v6495_v59 = vrot.slane %v6481_v29, %v8048_v49 }
 0x539   :  { %v6522_v43 = vrot.slane %v6514_v56, %v8048_v49 }
 0x53a   :  { %v6496_v34 = vcombine.low %v6488_v31, %v6495_v59 }
 0x53c   :  { %6560 = vst [vmem:[%s9886_s7 + $0x20] sm:$0xff] %v6496_v34 }
 0x572   :  { %v6209_v22 = vpop.f32.mrb[28].mxu1 }
 0x573   :  { %v6210_v36 = vadd.f32 %v6209_v22, %v3095_v35  ;;  %v6332_v27 = vpop.f32.mrb[32].mxu0  ;;  %v6211_v40 = vpop.f32.mrb[29].mxu1 }
 0x574   :  { %v6333_v41 = vadd.f32 %v6332_v27, %v3119_v48  ;;  %v6212_v3 = vadd.f32 %v6211_v40, %v3099_v55  ;;  %v6334_v26 = vpop.f32.mrb[33].mxu0  ;;  %v6213_v37 = vpop.f32.mrb[30].mxu1 }
 0x575   :  { %v6335_v44 = vadd.f32 %v6334_v26, %v3123_v19  ;;  %v6336_v45 = vpop.f32.mrb[34].mxu0  ;;  %v6214_v46 = vpop.f32.mrb[31].mxu1 }
 0x576   :  { %v6498_v23 = vcombine.low %v6210_v36, %v6212_v3  ;;  %v6337_v39 = vpop.f32.mrb[35].mxu0 }
 0x577   :  { %v6531_v58 = vcombine.low %v6333_v41, %v6335_v44 }
 0x578   :  { %v6512_v4 = vrot.slane %v6498_v23, %v8048_v49 }
 0x579   :  { %v6539_v14 = vrot.slane %v6531_v58, %v8048_v49 }
 0x57a   :  { %v6513_v51 = vcombine.low %v6505_v5, %v6512_v4 }
 0x57c   :  { %6561 = vst [vmem:[%s9886_s7 + $0x28] sm:$0xff] %v6513_v51 }
 0x5b2   :  { %v6291_v53 = vpop.f32.mrb[32].mxu1 }
 0x5b3   :  { %v6292_v54 = vadd.f32 %v6291_v53, %v3111_v50  ;;  %v6293_v57 = vpop.f32.mrb[33].mxu1 }
 0x5b4   :  { %v6294_v61 = vadd.f32 %v6293_v57, %v3115_v52  ;;  %v6295_v62 = vpop.f32.mrb[34].mxu1 }
 0x5b5   :  { %v6296_v10 = vpop.f32.mrb[35].mxu1 }
 0x5b6   :  { %v6515_v17 = vcombine.low %v6292_v54, %v6294_v61 }
 0x5b8   :  { %v6529_v63 = vrot.slane %v6515_v17, %v8048_v49 }
 0x5ba   :  { %v6530_v0 = vcombine.low %v6522_v43, %v6529_v63 }
 0x5bc   :  { %6562 = vst [vmem:[%s9886_s7 + $0x30] sm:$0xff] %v6530_v0 }
 0x5f2   :  { %v6373_v1 = vpop.f32.mrb[36].mxu1 }
 0x5f3   :  { %v6374_v6 = vadd.f32 %v6373_v1, %v3127_v47  ;;  %v6375_v7 = vpop.f32.mrb[37].mxu1 }
 0x5f4   :  { %v6376_v32 = vadd.f32 %v6375_v7, %v3131_v60  ;;  %v6377_v8 = vpop.f32.mrb[38].mxu1 }
 0x5f5   :  { %v6378_v12 = vpop.f32.mrb[39].mxu1 }
 0x5f6   :  { %v6532_v13 = vcombine.low %v6374_v6, %v6376_v32 }
 0x5f8   :  { %v6546_v16 = vrot.slane %v6532_v13, %v8048_v49 }
 0x5fa   :  { %v6547_v18 = vcombine.low %v6539_v14, %v6546_v16 }
 0x5fc   :  { %6563 = vst [vmem:[%s9886_s7 + $0x38] sm:$0xff] %v6547_v18 }
 0x5fd   :  { %6568 = vsyncpa [#allocation3], 1 }
 0x5fe   :  { %6569 = vsyncpa [#allocation5], 1 }

</bundles_post_ra>
